<compile_context>
chip_gen: v7x
topology: tpu7x:2x2x1
jax: 0.10.0
libtpu: 0.0.40
codegen_flags: <defaults>
</compile_context>

<pallas_src>
import jax
import jax.numpy as jnp
from jax.experimental import pallas as pl
from jax.experimental.pallas import tpu as pltpu


def _round_up(x, m):
    return ((x + m - 1) // m) * m


def _device_kind():
    try:
        return jax.devices()[0].device_kind.lower()
    except Exception:
        return ""


_KIND = _device_kind()
_IS_V5 = "v5" in _KIND
# 256x256-MXU generations (v6e/v7x) benefit from 256-wide output tiles when
# the grid still keeps >=2 M steps; v5e MXUs are 128x128 so widening there
# only adds OC-padding waste.
_ALLOW_TN256 = (not _IS_V5) and any(t in _KIND for t in ("v6", "v7", "tpu7", "7x"))


# ----------------------------------------------------------------------------
# Pallas kernel: fused GEMM + bias + ReLU (bf16 operands/output, f32 accumulate)
# ----------------------------------------------------------------------------
def _gemm_bias_relu_kernel(a_ref, b_ref, bias_ref, o_ref):
    # a_ref: (tm, K) bf16   b_ref: (K, tn) bf16
    # bias_ref: (1, tn) f32  o_ref: (tm, tn) bf16
    acc = jnp.dot(a_ref[...], b_ref[...], preferred_element_type=jnp.float32)
    o_ref[...] = jnp.maximum(acc + bias_ref[...], 0.0).astype(o_ref.dtype)


def gemm_bias_relu(a_bf16, b_packed, bias_row, oc):
    """relu(a @ b + bias): bf16 operands, f32 accumulate, bf16 output.

    a_bf16:   (M, K)   bf16 im2col activation (K unpadded)
    b_packed: (K, OCp) bf16 pre-transposed/padded weights (OCp = 128-multiple)
    bias_row: (1, OCp) f32
    returns   (M, oc)  bf16
    """
    M, K = a_bf16.shape
    _, OCp = b_packed.shape

    # Per-layer row tile: full (16-aligned) M when small; 256 (or 512 on
    # v6e/v7x at large M) row tiles otherwise. K is NOT padded — a block dim
    # equal to the full array extent is legal even when not 128-aligned.
    tm_cap = 512 if (M >= 4096 and not _IS_V5) else 256
    tm = min(tm_cap, _round_up(M, 16))
    Mp = _round_up(M, tm)

    # 128-lane output tiles by default (lane-dense stores, >=2 grid steps per
    # layer); widen to 256 only where the MXU is 256-wide and the M axis alone
    # still gives every TensorCore at least one parallel step.
    tn = 256 if (_ALLOW_TN256 and OCp % 256 == 0 and Mp // tm >= 2) else 128

    a_p = jnp.pad(a_bf16, ((0, Mp - M), (0, 0)))  # M pad only; stays bf16

    # Explicit VMEM budget sized from the actual block footprint (with a 4x
    # double-buffer/headroom factor) so tm/tn sweeps behave identically on
    # v5e/v6e/v7x instead of tripping the default scoped limit.
    blk_bytes = 2 * (tm * K + K * tn + tm * tn) + 4 * tn
    vmem_limit = min(128 * 1024 * 1024, max(8 * 1024 * 1024, 4 * blk_bytes))

    out = pl.pallas_call(
        _gemm_bias_relu_kernel,
        out_shape=jax.ShapeDtypeStruct((Mp, OCp), jnp.bfloat16),
        grid_spec=pltpu.PrefetchScalarGridSpec(
            num_scalar_prefetch=0,
            grid=(Mp // tm, OCp // tn),
            in_specs=[
                pl.BlockSpec((tm, K), lambda i, j: (i, 0)),
                pl.BlockSpec((K, tn), lambda i, j: (0, j)),
                pl.BlockSpec((1, tn), lambda i, j: (0, j)),
            ],
            out_specs=pl.BlockSpec((tm, tn), lambda i, j: (i, j)),
        ),
        compiler_params=pltpu.CompilerParams(
            dimension_semantics=("parallel", "parallel"),
            vmem_limit_bytes=vmem_limit),
    )(a_p, b_packed, bias_row)
    return out[:M, :oc]


# ----------------------------------------------------------------------------
# Layer wrappers (NHWC, bf16 activations)
# ----------------------------------------------------------------------------
def conv2d_relu(x_bf16, wmat_bf16, bias_row_f32, cfg):
    """x_bf16: (N,H,W,C) NHWC bf16; wmat_bf16: (KH*KW*C, OCp) bf16 pre-packed."""
    cin, oc, k, stride, padding = cfg
    N, H, W, C = x_bf16.shape
    x_p = jnp.pad(x_bf16, ((0, 0), (padding, padding), (padding, padding), (0, 0)))
    OH = (H + 2 * padding - k) // stride + 1
    OW = (W + 2 * padding - k) // stride + 1

    # TODO(synk): fuse this im2col gather into the Pallas GEMM for the stride-1
    # layers (KHxKW 'arbitrary' reduction grid axis + element-offset shifted
    # windows on x_p + f32 VMEM accumulator) so the KH*KW-fold expanded
    # activation never touches HBM; the shifted-window BlockSpec needs
    # element-indexed blocks that don't satisfy the (8,128) tile rule at these
    # tiny spatial sizes, so it is left as a follow-up.
    cols = []
    for ky in range(k):
        for kx in range(k):
            cols.append(
                x_p[:, ky:ky + stride * OH:stride, kx:kx + stride * OW:stride, :])
    patches = jnp.stack(cols, axis=3)            # (N,OH,OW,KH*KW,C) bf16
    a = patches.reshape(N * OH * OW, k * k * C)  # bf16 im2col, no extra cast

    out = gemm_bias_relu(a, wmat_bf16, bias_row_f32, oc)  # (N*OH*OW, OC) bf16
    return out.reshape(N, OH, OW, oc)


def maxpool2d(x, k=3, stride=2):
    """(N,H,W,C) NHWC bf16. kernel=3, stride=2, no padding (AlexNet).

    Memory-bound: a fused jnp.maximum chain over the 9 strided views reads x
    once and writes the pooled output once (no patch materialization, no extra
    pallas_call overhead). max is exact in bf16.
    """
    N, H, W, C = x.shape
    OH = (H - k) // stride + 1
    OW = (W - k) // stride + 1
    out = None
    for ky in range(k):
        for kx in range(k):
            v = x[:, ky:ky + stride * OH:stride, kx:kx + stride * OW:stride, :]
            out = v if out is None else jnp.maximum(out, v)
    return out


# ----------------------------------------------------------------------------
# AlexNet `features` definition (in_ch, out_ch, kernel, stride, padding)
# ----------------------------------------------------------------------------
_CONV_CFG = [
    (3, 64, 11, 4, 2),
    (64, 192, 5, 1, 2),
    (192, 384, 3, 1, 1),
    (384, 256, 3, 1, 1),
    (256, 256, 3, 1, 1),
]
# AlexNet features layer sequence:
#   conv1-relu-pool, conv2-relu-pool, conv3-relu, conv4-relu, conv5-relu, pool
_POOL_AFTER = {0: True, 1: True, 2: False, 3: False, 4: True}


def init_params(key):
    """Deterministic synthetic weights (NOT a pretrained checkpoint)."""
    params = []
    for (cin, cout, k, _, _) in _CONV_CFG:
        key, wk, bk = jax.random.split(key, 3)
        fan_in = cin * k * k
        w = jax.random.normal(wk, (cout, cin, k, k), jnp.float32) / jnp.sqrt(
            jnp.float32(fan_in))
        b = 0.01 * jax.random.normal(bk, (cout,), jnp.float32)
        params.append((w, b))
    return params


def prep_params(params):
    """One-time weight packing, hoisted out of the per-forward path:
    (OC,C,KH,KW) f32 -> (KH*KW*C, OCp) bf16, bias -> (1, OCp) f32, OCp=128-mult."""
    prepped = []
    for (w, b), (cin, oc, k, _, _) in zip(params, _CONV_CFG):
        ocp = _round_up(oc, 128)
        wmat = jnp.transpose(w, (2, 3, 1, 0)).reshape(k * k * cin, oc)
        wmat = jnp.pad(wmat, ((0, 0), (0, ocp - oc))).astype(jnp.bfloat16)
        bias = jnp.pad(b, (0, ocp - oc)).reshape(1, ocp).astype(jnp.float32)
        prepped.append((wmat, bias))
    return prepped


@jax.jit
def alexnet_fmaps(x_nchw, prepped_flat):
    """Forward pass of AlexNet.features, returning the 5 post-ReLU feature
    maps (NCHW, f32) — same semantics as the PyTorch module. Internally the
    network runs NHWC in bf16; f32/NCHW only at the boundaries."""
    prepped = [(prepped_flat[2 * i], prepped_flat[2 * i + 1]) for i in range(5)]
    x = jnp.transpose(x_nchw, (0, 2, 3, 1)).astype(jnp.bfloat16)  # once
    fmaps = []
    n_layers = len(prepped)
    for i, ((wmat, bias), cfg) in enumerate(zip(prepped, _CONV_CFG)):
        x = conv2d_relu(x, wmat, bias, cfg)
        fmaps.append(jnp.transpose(x, (0, 3, 1, 2)).astype(jnp.float32))
        # Skip the final pool: its output is never observed (feature maps are
        # collected right after each ReLU), so dropping it is free and
        # semantics-preserving.
        if _POOL_AFTER[i] and i < n_layers - 1:
            x = maxpool2d(x, k=3, stride=2)
    return fmaps


if __name__ == "__main__":
    key = jax.random.PRNGKey(0)
    pkey, xkey = jax.random.split(key)
    params = init_params(pkey)
    prepped = prep_params(params)                 # one-time weight packing
    prepped_flat = [t for wb in prepped for t in wb]

    # AlexNet needs 3 input channels; 64x64 is the smallest convenient spatial
    # size that survives both interior maxpools.
    x = jax.random.normal(xkey, (2, 3, 64, 64), jnp.float32)

    fmaps = alexnet_fmaps(x, prepped_flat)
    fmaps = jax.block_until_ready(fmaps)

    expected = [(2, 64, 15, 15), (2, 192, 7, 7), (2, 384, 3, 3),
                (2, 256, 3, 3), (2, 256, 3, 3)]
    assert [tuple(f.shape) for f in fmaps] == expected, \
        [tuple(f.shape) for f in fmaps]
    assert all(f.dtype == jnp.float32 for f in fmaps)
    assert all(bool(jnp.all(f >= 0.0)) for f in fmaps)  # post-ReLU
    print("KERNEL_OK")
</pallas_src>

<mosaic_0001>
module attributes {stable_mosaic.version = 11 : i64} {
  func.func @_gemm_bias_relu_kernel(%arg0: i32, %arg1: i32, %arg2: memref<256x363xbf16, #tpu.memory_space<vmem>>, %arg3: memref<363x128xbf16, #tpu.memory_space<vmem>>, %arg4: memref<1x128xf32, #tpu.memory_space<vmem>>, %arg5: memref<256x128xbf16, #tpu.memory_space<vmem>>) attributes {dimension_semantics = [#tpu.dimension_semantics<parallel>, #tpu.dimension_semantics<parallel>], iteration_bounds = array<i64: 2, 1>, scalar_prefetch = 0 : i64, scratch_operands = 0 : i64, tpu.core_type = #tpu.core_type<tc>, window_params = [{transform_indices = @transform_0, window_bounds = array<i64: 256, 363>}, {transform_indices = @transform_1, window_bounds = array<i64: 363, 128>}, {transform_indices = @transform_2, window_bounds = array<i64: 1, 128>}, {transform_indices = @transform_3, window_bounds = array<i64: 256, 128>}]} {
    %c0 = arith.constant 0 : index
    %c0_0 = arith.constant 0 : index
    %0 = vector.load %arg2[%c0, %c0_0] : memref<256x363xbf16, #tpu.memory_space<vmem>>, vector<256x363xbf16>
    %c0_1 = arith.constant 0 : index
    %c0_2 = arith.constant 0 : index
    %1 = vector.load %arg3[%c0_1, %c0_2] : memref<363x128xbf16, #tpu.memory_space<vmem>>, vector<363x128xbf16>
    %cst = arith.constant dense<0.000000e+00> : vector<256x128xf32>
    %2 = tpu.matmul %0, %1, %cst {dimension_numbers = #tpu.dot_dimension_numbers<[1], [0], [0], [1], [0, 0, 1, 1], [], []>} : vector<256x363xbf16>, vector<363x128xbf16>, vector<256x128xf32> -> vector<256x128xf32>
    %c0_3 = arith.constant 0 : index
    %c0_4 = arith.constant 0 : index
    %3 = vector.load %arg4[%c0_3, %c0_4] : memref<1x128xf32, #tpu.memory_space<vmem>>, vector<1x128xf32>
    %4 = vector.broadcast %3 : vector<1x128xf32> to vector<256x128xf32>
    %5 = arith.addf %2, %4 : vector<256x128xf32>
    %cst_5 = arith.constant 0.000000e+00 : f32
    %6 = vector.broadcast %cst_5 : f32 to vector<256x128xf32>
    %7 = arith.maximumf %5, %6 : vector<256x128xf32>
    %8 = arith.truncf %7 : vector<256x128xf32> to vector<256x128xbf16>
    %c0_6 = arith.constant 0 : index
    %c0_7 = arith.constant 0 : index
    %9 = vector.load %arg5[%c0_6, %c0_7] : memref<256x128xbf16, #tpu.memory_space<vmem>>, vector<256x128xbf16>
    tpu.vector_store %arg5[%c0_6, %c0_7], %8 {strides = array<i32>} : memref<256x128xbf16, #tpu.memory_space<vmem>>, vector<256x128xbf16>,
    return
  }
  func.func @transform_0(%arg0: i32, %arg1: i32) -> (i32, i32) {
    %c0_i32 = arith.constant 0 : i32
    %c0_i32_0 = arith.constant 0 : i32
    return %arg0, %c0_i32 : i32, i32
  }
  func.func @transform_1(%arg0: i32, %arg1: i32) -> (i32, i32) {
    %c0_i32 = arith.constant 0 : i32
    %c0_i32_0 = arith.constant 0 : i32
    return %c0_i32, %arg1 : i32, i32
  }
  func.func @transform_2(%arg0: i32, %arg1: i32) -> (i32, i32) {
    %c0_i32 = arith.constant 0 : i32
    %c0_i32_0 = arith.constant 0 : i32
    return %c0_i32, %arg1 : i32, i32
  }
  func.func @transform_3(%arg0: i32, %arg1: i32) -> (i32, i32) {
    %c0_i32 = arith.constant 0 : i32
    return %arg0, %arg1 : i32, i32
  }
}

module attributes {stable_mosaic.version = 11 : i64} {
  func.func @_gemm_bias_relu_kernel(%arg0: i32, %arg1: i32, %arg2: memref<112x1600xbf16, #tpu.memory_space<vmem>>, %arg3: memref<1600x128xbf16, #tpu.memory_space<vmem>>, %arg4: memref<1x128xf32, #tpu.memory_space<vmem>>, %arg5: memref<112x128xbf16, #tpu.memory_space<vmem>>) attributes {dimension_semantics = [#tpu.dimension_semantics<parallel>, #tpu.dimension_semantics<parallel>], iteration_bounds = array<i64: 1, 2>, scalar_prefetch = 0 : i64, scratch_operands = 0 : i64, tpu.core_type = #tpu.core_type<tc>, window_params = [{transform_indices = @transform_0, window_bounds = array<i64: 112, 1600>}, {transform_indices = @transform_1, window_bounds = array<i64: 1600, 128>}, {transform_indices = @transform_2, window_bounds = array<i64: 1, 128>}, {transform_indices = @transform_3, window_bounds = array<i64: 112, 128>}]} {
    %c0 = arith.constant 0 : index
    %c0_0 = arith.constant 0 : index
    %0 = vector.load %arg2[%c0, %c0_0] : memref<112x1600xbf16, #tpu.memory_space<vmem>>, vector<112x1600xbf16>
    %c0_1 = arith.constant 0 : index
    %c0_2 = arith.constant 0 : index
    %1 = vector.load %arg3[%c0_1, %c0_2] : memref<1600x128xbf16, #tpu.memory_space<vmem>>, vector<1600x128xbf16>
    %cst = arith.constant dense<0.000000e+00> : vector<112x128xf32>
    %2 = tpu.matmul %0, %1, %cst {dimension_numbers = #tpu.dot_dimension_numbers<[1], [0], [0], [1], [0, 0, 1, 1], [], []>} : vector<112x1600xbf16>, vector<1600x128xbf16>, vector<112x128xf32> -> vector<112x128xf32>
    %c0_3 = arith.constant 0 : index
    %c0_4 = arith.constant 0 : index
    %3 = vector.load %arg4[%c0_3, %c0_4] : memref<1x128xf32, #tpu.memory_space<vmem>>, vector<1x128xf32>
    %4 = vector.broadcast %3 : vector<1x128xf32> to vector<112x128xf32>
    %5 = arith.addf %2, %4 : vector<112x128xf32>
    %cst_5 = arith.constant 0.000000e+00 : f32
    %6 = vector.broadcast %cst_5 : f32 to vector<112x128xf32>
    %7 = arith.maximumf %5, %6 : vector<112x128xf32>
    %8 = arith.truncf %7 : vector<112x128xf32> to vector<112x128xbf16>
    %c0_6 = arith.constant 0 : index
    %c0_7 = arith.constant 0 : index
    %9 = vector.load %arg5[%c0_6, %c0_7] : memref<112x128xbf16, #tpu.memory_space<vmem>>, vector<112x128xbf16>
    tpu.vector_store %arg5[%c0_6, %c0_7], %8 {strides = array<i32>} : memref<112x128xbf16, #tpu.memory_space<vmem>>, vector<112x128xbf16>,
    return
  }
  func.func @transform_0(%arg0: i32, %arg1: i32) -> (i32, i32) {
    %c0_i32 = arith.constant 0 : i32
    %c0_i32_0 = arith.constant 0 : i32
    return %arg0, %c0_i32 : i32, i32
  }
  func.func @transform_1(%arg0: i32, %arg1: i32) -> (i32, i32) {
    %c0_i32 = arith.constant 0 : i32
    %c0_i32_0 = arith.constant 0 : i32
    return %c0_i32, %arg1 : i32, i32
  }
  func.func @transform_2(%arg0: i32, %arg1: i32) -> (i32, i32) {
    %c0_i32 = arith.constant 0 : i32
    %c0_i32_0 = arith.constant 0 : i32
    return %c0_i32, %arg1 : i32, i32
  }
  func.func @transform_3(%arg0: i32, %arg1: i32) -> (i32, i32) {
    %c0_i32 = arith.constant 0 : i32
    return %arg0, %arg1 : i32, i32
  }
}

module attributes {stable_mosaic.version = 11 : i64} {
  func.func @_gemm_bias_relu_kernel(%arg0: i32, %arg1: i32, %arg2: memref<32x1728xbf16, #tpu.memory_space<vmem>>, %arg3: memref<1728x128xbf16, #tpu.memory_space<vmem>>, %arg4: memref<1x128xf32, #tpu.memory_space<vmem>>, %arg5: memref<32x128xbf16, #tpu.memory_space<vmem>>) attributes {dimension_semantics = [#tpu.dimension_semantics<parallel>, #tpu.dimension_semantics<parallel>], iteration_bounds = array<i64: 1, 3>, scalar_prefetch = 0 : i64, scratch_operands = 0 : i64, tpu.core_type = #tpu.core_type<tc>, window_params = [{transform_indices = @transform_0, window_bounds = array<i64: 32, 1728>}, {transform_indices = @transform_1, window_bounds = array<i64: 1728, 128>}, {transform_indices = @transform_2, window_bounds = array<i64: 1, 128>}, {transform_indices = @transform_3, window_bounds = array<i64: 32, 128>}]} {
    %c0 = arith.constant 0 : index
    %c0_0 = arith.constant 0 : index
    %0 = vector.load %arg2[%c0, %c0_0] : memref<32x1728xbf16, #tpu.memory_space<vmem>>, vector<32x1728xbf16>
    %c0_1 = arith.constant 0 : index
    %c0_2 = arith.constant 0 : index
    %1 = vector.load %arg3[%c0_1, %c0_2] : memref<1728x128xbf16, #tpu.memory_space<vmem>>, vector<1728x128xbf16>
    %cst = arith.constant dense<0.000000e+00> : vector<32x128xf32>
    %2 = tpu.matmul %0, %1, %cst {dimension_numbers = #tpu.dot_dimension_numbers<[1], [0], [0], [1], [0, 0, 1, 1], [], []>} : vector<32x1728xbf16>, vector<1728x128xbf16>, vector<32x128xf32> -> vector<32x128xf32>
    %c0_3 = arith.constant 0 : index
    %c0_4 = arith.constant 0 : index
    %3 = vector.load %arg4[%c0_3, %c0_4] : memref<1x128xf32, #tpu.memory_space<vmem>>, vector<1x128xf32>
    %4 = vector.broadcast %3 : vector<1x128xf32> to vector<32x128xf32>
    %5 = arith.addf %2, %4 : vector<32x128xf32>
    %cst_5 = arith.constant 0.000000e+00 : f32
    %6 = vector.broadcast %cst_5 : f32 to vector<32x128xf32>
    %7 = arith.maximumf %5, %6 : vector<32x128xf32>
    %8 = arith.truncf %7 : vector<32x128xf32> to vector<32x128xbf16>
    %c0_6 = arith.constant 0 : index
    %c0_7 = arith.constant 0 : index
    %9 = vector.load %arg5[%c0_6, %c0_7] : memref<32x128xbf16, #tpu.memory_space<vmem>>, vector<32x128xbf16>
    tpu.vector_store %arg5[%c0_6, %c0_7], %8 {strides = array<i32>} : memref<32x128xbf16, #tpu.memory_space<vmem>>, vector<32x128xbf16>,
    return
  }
  func.func @transform_0(%arg0: i32, %arg1: i32) -> (i32, i32) {
    %c0_i32 = arith.constant 0 : i32
    %c0_i32_0 = arith.constant 0 : i32
    return %arg0, %c0_i32 : i32, i32
  }
  func.func @transform_1(%arg0: i32, %arg1: i32) -> (i32, i32) {
    %c0_i32 = arith.constant 0 : i32
    %c0_i32_0 = arith.constant 0 : i32
    return %c0_i32, %arg1 : i32, i32
  }
  func.func @transform_2(%arg0: i32, %arg1: i32) -> (i32, i32) {
    %c0_i32 = arith.constant 0 : i32
    %c0_i32_0 = arith.constant 0 : i32
    return %c0_i32, %arg1 : i32, i32
  }
  func.func @transform_3(%arg0: i32, %arg1: i32) -> (i32, i32) {
    %c0_i32 = arith.constant 0 : i32
    return %arg0, %arg1 : i32, i32
  }
}

module attributes {stable_mosaic.version = 11 : i64} {
  func.func @_gemm_bias_relu_kernel(%arg0: i32, %arg1: i32, %arg2: memref<32x3456xbf16, #tpu.memory_space<vmem>>, %arg3: memref<3456x128xbf16, #tpu.memory_space<vmem>>, %arg4: memref<1x128xf32, #tpu.memory_space<vmem>>, %arg5: memref<32x128xbf16, #tpu.memory_space<vmem>>) attributes {dimension_semantics = [#tpu.dimension_semantics<parallel>, #tpu.dimension_semantics<parallel>], iteration_bounds = array<i64: 1, 2>, scalar_prefetch = 0 : i64, scratch_operands = 0 : i64, tpu.core_type = #tpu.core_type<tc>, window_params = [{transform_indices = @transform_0, window_bounds = array<i64: 32, 3456>}, {transform_indices = @transform_1, window_bounds = array<i64: 3456, 128>}, {transform_indices = @transform_2, window_bounds = array<i64: 1, 128>}, {transform_indices = @transform_3, window_bounds = array<i64: 32, 128>}]} {
    %c0 = arith.constant 0 : index
    %c0_0 = arith.constant 0 : index
    %0 = vector.load %arg2[%c0, %c0_0] : memref<32x3456xbf16, #tpu.memory_space<vmem>>, vector<32x3456xbf16>
    %c0_1 = arith.constant 0 : index
    %c0_2 = arith.constant 0 : index
    %1 = vector.load %arg3[%c0_1, %c0_2] : memref<3456x128xbf16, #tpu.memory_space<vmem>>, vector<3456x128xbf16>
    %cst = arith.constant dense<0.000000e+00> : vector<32x128xf32>
    %2 = tpu.matmul %0, %1, %cst {dimension_numbers = #tpu.dot_dimension_numbers<[1], [0], [0], [1], [0, 0, 1, 1], [], []>} : vector<32x3456xbf16>, vector<3456x128xbf16>, vector<32x128xf32> -> vector<32x128xf32>
    %c0_3 = arith.constant 0 : index
    %c0_4 = arith.constant 0 : index
    %3 = vector.load %arg4[%c0_3, %c0_4] : memref<1x128xf32, #tpu.memory_space<vmem>>, vector<1x128xf32>
    %4 = vector.broadcast %3 : vector<1x128xf32> to vector<32x128xf32>
    %5 = arith.addf %2, %4 : vector<32x128xf32>
    %cst_5 = arith.constant 0.000000e+00 : f32
    %6 = vector.broadcast %cst_5 : f32 to vector<32x128xf32>
    %7 = arith.maximumf %5, %6 : vector<32x128xf32>
    %8 = arith.truncf %7 : vector<32x128xf32> to vector<32x128xbf16>
    %c0_6 = arith.constant 0 : index
    %c0_7 = arith.constant 0 : index
    %9 = vector.load %arg5[%c0_6, %c0_7] : memref<32x128xbf16, #tpu.memory_space<vmem>>, vector<32x128xbf16>
    tpu.vector_store %arg5[%c0_6, %c0_7], %8 {strides = array<i32>} : memref<32x128xbf16, #tpu.memory_space<vmem>>, vector<32x128xbf16>,
    return
  }
  func.func @transform_0(%arg0: i32, %arg1: i32) -> (i32, i32) {
    %c0_i32 = arith.constant 0 : i32
    %c0_i32_0 = arith.constant 0 : i32
    return %arg0, %c0_i32 : i32, i32
  }
  func.func @transform_1(%arg0: i32, %arg1: i32) -> (i32, i32) {
    %c0_i32 = arith.constant 0 : i32
    %c0_i32_0 = arith.constant 0 : i32
    return %c0_i32, %arg1 : i32, i32
  }
  func.func @transform_2(%arg0: i32, %arg1: i32) -> (i32, i32) {
    %c0_i32 = arith.constant 0 : i32
    %c0_i32_0 = arith.constant 0 : i32
    return %c0_i32, %arg1 : i32, i32
  }
  func.func @transform_3(%arg0: i32, %arg1: i32) -> (i32, i32) {
    %c0_i32 = arith.constant 0 : i32
    return %arg0, %arg1 : i32, i32
  }
}

module attributes {stable_mosaic.version = 11 : i64} {
  func.func @_gemm_bias_relu_kernel(%arg0: i32, %arg1: i32, %arg2: memref<32x2304xbf16, #tpu.memory_space<vmem>>, %arg3: memref<2304x128xbf16, #tpu.memory_space<vmem>>, %arg4: memref<1x128xf32, #tpu.memory_space<vmem>>, %arg5: memref<32x128xbf16, #tpu.memory_space<vmem>>) attributes {dimension_semantics = [#tpu.dimension_semantics<parallel>, #tpu.dimension_semantics<parallel>], iteration_bounds = array<i64: 1, 2>, scalar_prefetch = 0 : i64, scratch_operands = 0 : i64, tpu.core_type = #tpu.core_type<tc>, window_params = [{transform_indices = @transform_0, window_bounds = array<i64: 32, 2304>}, {transform_indices = @transform_1, window_bounds = array<i64: 2304, 128>}, {transform_indices = @transform_2, window_bounds = array<i64: 1, 128>}, {transform_indices = @transform_3, window_bounds = array<i64: 32, 128>}]} {
    %c0 = arith.constant 0 : index
    %c0_0 = arith.constant 0 : index
    %0 = vector.load %arg2[%c0, %c0_0] : memref<32x2304xbf16, #tpu.memory_space<vmem>>, vector<32x2304xbf16>
    %c0_1 = arith.constant 0 : index
    %c0_2 = arith.constant 0 : index
    %1 = vector.load %arg3[%c0_1, %c0_2] : memref<2304x128xbf16, #tpu.memory_space<vmem>>, vector<2304x128xbf16>
    %cst = arith.constant dense<0.000000e+00> : vector<32x128xf32>
    %2 = tpu.matmul %0, %1, %cst {dimension_numbers = #tpu.dot_dimension_numbers<[1], [0], [0], [1], [0, 0, 1, 1], [], []>} : vector<32x2304xbf16>, vector<2304x128xbf16>, vector<32x128xf32> -> vector<32x128xf32>
    %c0_3 = arith.constant 0 : index
    %c0_4 = arith.constant 0 : index
    %3 = vector.load %arg4[%c0_3, %c0_4] : memref<1x128xf32, #tpu.memory_space<vmem>>, vector<1x128xf32>
    %4 = vector.broadcast %3 : vector<1x128xf32> to vector<32x128xf32>
    %5 = arith.addf %2, %4 : vector<32x128xf32>
    %cst_5 = arith.constant 0.000000e+00 : f32
    %6 = vector.broadcast %cst_5 : f32 to vector<32x128xf32>
    %7 = arith.maximumf %5, %6 : vector<32x128xf32>
    %8 = arith.truncf %7 : vector<32x128xf32> to vector<32x128xbf16>
    %c0_6 = arith.constant 0 : index
    %c0_7 = arith.constant 0 : index
    %9 = vector.load %arg5[%c0_6, %c0_7] : memref<32x128xbf16, #tpu.memory_space<vmem>>, vector<32x128xbf16>
    tpu.vector_store %arg5[%c0_6, %c0_7], %8 {strides = array<i32>} : memref<32x128xbf16, #tpu.memory_space<vmem>>, vector<32x128xbf16>,
    return
  }
  func.func @transform_0(%arg0: i32, %arg1: i32) -> (i32, i32) {
    %c0_i32 = arith.constant 0 : i32
    %c0_i32_0 = arith.constant 0 : i32
    return %arg0, %c0_i32 : i32, i32
  }
  func.func @transform_1(%arg0: i32, %arg1: i32) -> (i32, i32) {
    %c0_i32 = arith.constant 0 : i32
    %c0_i32_0 = arith.constant 0 : i32
    return %c0_i32, %arg1 : i32, i32
  }
  func.func @transform_2(%arg0: i32, %arg1: i32) -> (i32, i32) {
    %c0_i32 = arith.constant 0 : i32
    %c0_i32_0 = arith.constant 0 : i32
    return %c0_i32, %arg1 : i32, i32
  }
  func.func @transform_3(%arg0: i32, %arg1: i32) -> (i32, i32) {
    %c0_i32 = arith.constant 0 : i32
    return %arg0, %arg1 : i32, i32
  }
}

</mosaic_0001>

<bundles_post_ra>
// kernel: alexnet_fmaps.5
= control target key start
LH: loop header
LB: loop body
LE: loop exit
PB: predicated region body
PF: predicated region fallthrough
CT: control target
= control target key end

     0   :  { %s2010_s12 = smov 0   ;;  %s2012_s13 = smov 0   ;;  %s2267_s0 = inlined_call_operand.vmem [shape: bf16[512,363], index: 0, kind: input, shape index: {}]   ;;  %s2268_s1 = inlined_call_operand.vmem [shape: bf16[363,128], index: 1, kind: input, shape index: {}]   ;;  %s2269_s2 = inlined_call_operand.vmem [shape: f32[1,128], index: 2, kind: input, shape index: {}]   ;;  %s2270_s3 = inlined_call_operand.vmem [shape: bf16[512,128], index: 3, kind: output, shape index: {}]  }
   0x1   :  { %s2014_s14 = smov 0  }
   0x2 LB: > { %s25_s15 = sadd.s32 1, %s1983_s13  ;;  %p1401_p0 = scmp.ge.s32.totalorder %s1987_s14, 1  ;;  %s1987_s14 = sphi %s2014_s14, %s13_s14   ;;  %s1983_s13 = sphi %s2012_s13, %s2272_s13   ;;  %s1979_s12 = sphi %s2010_s12, %s2271_s12  }
   0x3   : > { %p27_p1 = scmp.ge.s32.totalorder %s25_s15, 2  ;;  %p170_p2 = scmp.lt.s32.totalorder %s1987_s14, 3 }
   0x5   : > { %s2274_s15 = smov (%p27_p1, %s25_s15), 0  ;;  %p171_p3 = pnand %p1401_p0, %p170_p2 }
   0x6   : > { %v1878_v0 = vld [vmem:[%s2268_s1 + $0x40] sm:$0xff] (!%p171_p3)   ;;  %s1402_s18 = sshll.u32 (!%p171_p3), %s1979_s12, 5  ;;  %v1880_v2 = vld [vmem:[%s2268_s1 + $0x48] sm:$0xff] (!%p171_p3)   ;;  %v1882_v4 = vld [vmem:[%s2268_s1 + $0x50] sm:$0xff] (!%p171_p3)   ;;  %vm772_vm0 = vcmask (!%p171_p3), 1044480   ;;  %vm773_vm1 = vcmask (!%p171_p3), 1045504  }
   0x7   : > { %174 = sbr.rel (%p171_p3) target bundleno = 353 (0x161), region = 32  ;;  %v1879_v1 = vld [vmem:[%s2268_s1] sm:$0xff] (!%p171_p3)   ;;  %1655 = vmatprep.subr.bf16.mxu0 (!%p171_p3), %v1878_v0  ;;  %1836 = vmatprep.subr.bf16.mxu1 (!%p171_p3), %v1878_v0  ;;  %p206_p4 = scmp.lt.s32.totalorder (!%p171_p3), %s1402_s18, 63  ;;  %v1881_v3 = vld [vmem:[%s2268_s1 + $0x8] sm:$0xff] (!%p171_p3)   ;;  %v1883_v5 = vld [vmem:[%s2268_s1 + $0x10] sm:$0xff] (!%p171_p3)   ;;  %v1989_v32 = vmov (!%p171_p3), 65535  }
   0x8   : > { %1656 = vmatpush3.bf16.msra.mxu0 (!%p171_p3), %v1879_v1  ;;  %1844 = vmatpush3.bf16.msra.mxu1 (!%p171_p3), %v1879_v1  ;;  %v1884_v6 = vld [vmem:[%s2268_s1 + $0x58] sm:$0xff] (!%p171_p3)   ;;  %v1886_v8 = vld [vmem:[%s2268_s1 + $0x60] sm:$0xff] (!%p171_p3)   ;;  %v1888_v10 = vld [vmem:[%s2268_s1 + $0x68] sm:$0xff] (!%p171_p3)   ;;  %v774_v33 = vsel (!%p171_p3), %vm772_vm0, 4294967295, %v1989_v32  ;;  %vm723_vm2 = vcmask (!%p171_p3), 875520  }
   0x9   : > { %1657 = vmatprep.subr.bf16.mxu0 (!%p171_p3), %v1880_v2  ;;  %1837 = vmatprep.subr.bf16.mxu1 (!%p171_p3), %v1880_v2  ;;  %v1885_v7 = vld [vmem:[%s2268_s1 + $0x18] sm:$0xff] (!%p171_p3)   ;;  %v1887_v9 = vld [vmem:[%s2268_s1 + $0x20] sm:$0xff] (!%p171_p3)   ;;  %v1889_v13 = vld [vmem:[%s2268_s1 + $0x28] sm:$0xff] (!%p171_p3)   ;;  %v775_v39 = vsel (!%p171_p3), %vm773_vm1, %v774_v33, 0 }
   0xa   : > { %v1890_v14 = vld [vmem:[%s2268_s1 + $0x70] sm:$0xff] (!%p171_p3)   ;;  %v1892_v16 = vld [vmem:[%s2268_s1 + $0x78] sm:$0xff] (!%p171_p3)   ;;  %v1900_v18 = vld [vmem:[%s2268_s1 + $0x80] sm:$0xff] (!%p171_p3)  }
   0xb   : > { %v1891_v15 = vld [vmem:[%s2268_s1 + $0x30] sm:$0xff] (!%p171_p3)   ;;  %v1893_v17 = vld [vmem:[%s2268_s1 + $0x38] sm:$0xff] (!%p171_p3)   ;;  %v1907_v23 = vld [vmem:[%s2268_s1 + $0x88] sm:$0xff] (!%p171_p3)  }
   0xc   : > { %1658 = vmatpush3.bf16.msra.mxu0 (!%p171_p3), %v1881_v3  ;;  %1845 = vmatpush3.bf16.msra.mxu1 (!%p171_p3), %v1881_v3  ;;  %v1908_v25 = vld [vmem:[%s2268_s1 + $0x90] sm:$0xff] (!%p171_p3)   ;;  %v1915_v29 = vld [vmem:[%s2268_s1 + $0x98] sm:$0xff] (!%p171_p3)   ;;  %v1916_v31 = vld [vmem:[%s2268_s1 + $0xa0] sm:$0xff] (!%p171_p3)  }
   0xd   : > { %1659 = vmatprep.subr.bf16.mxu0 (!%p171_p3), %v1882_v4  ;;  %1838 = vmatprep.subr.bf16.mxu1 (!%p171_p3), %v1882_v4  ;;  %v1923_v37 = vld [vmem:[%s2268_s1 + $0xa8] sm:$0xff] (!%p171_p3)   ;;  %v1924_v38 = vld [vmem:[%s2268_s1 + $0xb0] sm:$0x3f] (!%p171_p3)  }
   0xe   : > { %s2276_s18 = smov (!%p206_p4, %s1402_s18), 63  ;;  %v777_v40 = vand.u32 %v1924_v38, %v775_v39 }
   0xf   : > { %s1852_s4 = smul.u32 12, %s2276_s18  ;;  %s1405_s23 = sshll.u32 %s2276_s18, 2 }
  0x10   : > { %1660 = vmatpush3.bf16.msra.mxu0 %v1883_v5  ;;  %1846 = vmatpush3.bf16.msra.mxu1 %v1883_v5  ;;  %s2198_s26 = scalar_lea.vmem %s2270_s3, %s1405_s23 }
  0x11   : > { %1661 = vmatprep.subr.bf16.mxu0 %v1884_v6  ;;  %1839 = vmatprep.subr.bf16.mxu1 %v1884_v6  ;;  %s2061_s11 = scalar_lea.vmem %s2267_s0, %s1852_s4 }
  0x12   : > { %v1896_v11 = vld [vmem:[%s2061_s11 + $0x4] ss:$12 sps:$4 sm:$0xff]   ;;  %v1894_v19 = vld [vmem:[%s2061_s11] ss:$12 sps:$4 sm:$0xff]   ;;  %v1901_v21 = vld [vmem:[%s2061_s11 + $0x1c] ss:$12 sps:$4 sm:$0xff]  }
  0x13   : > { %v1899_v12 = vld [vmem:[%s2061_s11 + $0x124] ss:$12 sps:$4 sm:$0xff]   ;;  %811 = vmatprep.mubr.bf16.mxu0 %v1896_v11  ;;  %v1897_v20 = vld [vmem:[%s2061_s11 + $0x120] ss:$12 sps:$4 sm:$0xff]   ;;  %v1903_v22 = vld [vmem:[%s2061_s11 + $0x13c] ss:$12 sps:$4 sm:$0xff]  }
  0x14   : > { %1662 = vmatpush3.bf16.msra.mxu0 %v1885_v7  ;;  %1847 = vmatpush3.bf16.msra.mxu1 %v1885_v7  ;;  %v1905_v24 = vld [vmem:[%s2061_s11 + $0x18] ss:$12 sps:$4 sm:$0xff]   ;;  %v1909_v27 = vld [vmem:[%s2061_s11 + $0x34] ss:$12 sps:$4 sm:$0xff]   ;;  %v1913_v30 = vld [vmem:[%s2061_s11 + $0x30] ss:$12 sps:$4 sm:$0xff]  }
  0x15   : > { %1663 = vmatprep.subr.bf16.mxu0 %v1886_v8  ;;  %1840 = vmatprep.subr.bf16.mxu1 %v1886_v8  ;;  %v1906_v26 = vld [vmem:[%s2061_s11 + $0x138] ss:$12 sps:$4 sm:$0xff]   ;;  %v1911_v28 = vld [vmem:[%s2061_s11 + $0x154] ss:$12 sps:$4 sm:$0xff]   ;;  %v1914_v34 = vld [vmem:[%s2061_s11 + $0x150] ss:$12 sps:$4 sm:$0xff]  }
  0x16   : > { %907 = vmatprep.mubr.bf16.mxu1 %v1899_v12  ;;  %v1917_v35 = vld [vmem:[%s2061_s11 + $0x4c] ss:$12 sps:$4 sm:$0xff]   ;;  %v1921_v41 = vld [vmem:[%s2061_s11 + $0x48] ss:$12 sps:$4 sm:$0xff]   ;;  %v1925_v43 = vld [vmem:[%s2061_s11 + $0x64] ss:$12 sps:$4 sm:$0xff]  }
  0x17   : > { %v1919_v36 = vld [vmem:[%s2061_s11 + $0x16c] ss:$12 sps:$4 sm:$0xff]   ;;  %v1922_v42 = vld [vmem:[%s2061_s11 + $0x168] ss:$12 sps:$4 sm:$0xff]   ;;  %v1934_v50 = vld [vmem:[%s2061_s11 + $0x50] ss:$12 sps:$4 sm:$0xff]  }
  0x18   : > { %1664 = vmatpush3.bf16.msra.mxu0 %v1887_v9  ;;  %1848 = vmatpush3.bf16.msra.mxu1 %v1887_v9  ;;  %v1927_v44 = vld [vmem:[%s2061_s11 + $0x8] ss:$12 sps:$4 sm:$0xff]   ;;  %v1928_v45 = vld [vmem:[%s2061_s11 + $0x60] ss:$12 sps:$4 sm:$0xff]   ;;  %v1932_v48 = vld [vmem:[%s2061_s11 + $0x38] ss:$12 sps:$4 sm:$0xff]  }
  0x19   : > { %1665 = vmatprep.subr.bf16.mxu0 %v1888_v10  ;;  %1841 = vmatprep.subr.bf16.mxu1 %v1888_v10  ;;  %v1929_v46 = vld [vmem:[%s2061_s11 + $0x20] ss:$12 sps:$4 sm:$0xff]   ;;  %v1930_v47 = vld [vmem:[%s2061_s11 + $0x7c] ss:$12 sps:$4 sm:$0xff]   ;;  %v1933_v49 = vld [vmem:[%s2061_s11 + $0x78] ss:$12 sps:$4 sm:$0xff]  }
  0x1a   : > { %v1935_v51 = vld [vmem:[%s2061_s11 + $0x94] ss:$12 sps:$4 sm:$0xff]   ;;  %v1938_v53 = vld [vmem:[%s2061_s11 + $0x90] ss:$12 sps:$4 sm:$0xff]   ;;  %v1940_v55 = vld [vmem:[%s2061_s11 + $0xac] ss:$12 sps:$4 sm:$0xff]  }
  0x1b   : > { %v1937_v52 = vld [vmem:[%s2061_s11 + $0x68] ss:$12 sps:$4 sm:$0xff]   ;;  %v1939_v54 = vld [vmem:[%s2061_s11 + $0x80] ss:$12 sps:$4 sm:$0xff]   ;;  %v1942_v56 = vld [vmem:[%s2061_s11 + $0x98] ss:$12 sps:$4 sm:$0xff]  }
  0x1c   : > { %1666 = vmatpush3.bf16.msra.mxu0 %v1889_v13  ;;  %1849 = vmatpush3.bf16.msra.mxu1 %v1889_v13  ;;  %v1943_v57 = vld [vmem:[%s2061_s11 + $0xa8] ss:$12 sps:$4 sm:$0xff]   ;;  %v1944_v58 = vld [vmem:[%s2061_s11 + $0xb0] ss:$12 sps:$4 sm:$0xff]   ;;  %v1948_v61 = vld [vmem:[%s2061_s11 + $0xc0] ss:$12 sps:$4 sm:$0xff]  }
  0x1d   : > { %1667 = vmatprep.subr.bf16.mxu0 %v1890_v14  ;;  %1842 = vmatprep.subr.bf16.mxu1 %v1890_v14  ;;  %v1945_v59 = vld [vmem:[%s2061_s11 + $0xc4] ss:$12 sps:$4 sm:$0xff]   ;;  %v1947_v60 = vld [vmem:[%s2061_s11 + $0xc8] ss:$12 sps:$4 sm:$0xff]   ;;  %v1949_v62 = vld [vmem:[%s2061_s11 + $0xe0] ss:$12 sps:$4 sm:$0xff]  }
  0x1e   : > { %v1950_v63 = vld [vmem:[%s2061_s11 + $0xdc] ss:$12 sps:$4 sm:$0xff]   ;;  %v1952_v0 = vld [vmem:[%s2061_s11 + $0xf8] ss:$12 sps:$4 sm:$0xff]   ;;  %v1955_v3 = vld [vmem:[%s2061_s11 + $0xf4] ss:$12 sps:$4 sm:$0xff]  }
  0x1f   : > { %v1953_v1 = vld [vmem:[%s2061_s11 + $0xd8] ss:$12 sps:$4 sm:$0xff]   ;;  %v1954_v2 = vld [vmem:[%s2061_s11 + $0x110] ss:$12 sps:$4 sm:$0xff]   ;;  %v1957_v4 = vld [vmem:[%s2061_s11 + $0x128] ss:$12 sps:$4 sm:$0xff]  }
  0x20   : > { %1668 = vmatpush3.bf16.msra.mxu0 %v1891_v15  ;;  %1850 = vmatpush3.bf16.msra.mxu1 %v1891_v15  ;;  %v1958_v5 = vld [vmem:[%s2061_s11 + $0xf0] ss:$12 sps:$4 sm:$0xff]   ;;  %v1959_v6 = vld [vmem:[%s2061_s11 + $0x140] ss:$12 sps:$4 sm:$0xff]   ;;  %v1962_v8 = vld [vmem:[%s2061_s11 + $0x158] ss:$12 sps:$4 sm:$0xff]  }
  0x21   : > { %1669 = vmatprep.subr.bf16.mxu0 %v1892_v16  ;;  %1843 = vmatprep.subr.bf16.mxu1 %v1892_v16  ;;  %v1960_v7 = vld [vmem:[%s2061_s11 + $0x10c] ss:$12 sps:$4 sm:$0xff]   ;;  %v1963_v9 = vld [vmem:[%s2061_s11 + $0x108] ss:$12 sps:$4 sm:$0xff]   ;;  %v1964_v10 = vld [vmem:[%s2061_s11 + $0x170] ss:$12 sps:$4 sm:$0xff]  }
  0x24   : > { %1670 = vmatpush3.bf16.msra.mxu0 %v1893_v17  ;;  %1851 = vmatpush3.bf16.msra.mxu1 %v1893_v17 }
  0x25   : > { %1790 = vmatprep.subr.bf16.mxu1 %v1900_v18 }
  0x27   : > { %812 = vmatmul.mubr.bf16.vlgmr.msra.gmra.mrb[0].mxu0 %v1894_v19  ;;  %908 = vmatmul.mubr.bf16.vlgmr.msra.gmra.mrb[0].mxu1 %v1897_v20 }
  0x28   : > { %1791 = vmatpush3.bf16.msra.mxu1 %v1900_v18  ;;  %819 = vmatprep.mubr.bf16.mxu0 %v1901_v21 }
  0x29   : > { %915 = vmatprep.mubr.bf16.mxu1 %v1903_v22  ;;  %1792 = vmatprep.subr.bf16.mxu1 %v1907_v23 }
  0x2c   : > { %1793 = vmatpush3.bf16.msra.mxu1 %v1907_v23 }
  0x2d   : > { %1794 = vmatprep.subr.bf16.mxu1 %v1908_v25 }
  0x2f   : > { %820 = vmatmul.mubr.bf16.gmra.mrb[4].mxu0 %v1905_v24  ;;  %916 = vmatmul.mubr.bf16.gmra.mrb[4].mxu1 %v1906_v26 }
  0x30   : > { %1795 = vmatpush3.bf16.msra.mxu1 %v1908_v25  ;;  %827 = vmatprep.mubr.bf16.mxu0 %v1909_v27 }
  0x31   : > { %923 = vmatprep.mubr.bf16.mxu1 %v1911_v28  ;;  %1796 = vmatprep.subr.bf16.mxu1 %v1915_v29 }
  0x34   : > { %1797 = vmatpush3.bf16.msra.mxu1 %v1915_v29 }
  0x35   : > { %1798 = vmatprep.subr.bf16.mxu1 %v1916_v31 }
  0x37   : > { %828 = vmatmul.mubr.bf16.gmra.mrb[8].mxu0 %v1913_v30  ;;  %924 = vmatmul.mubr.bf16.gmra.mrb[8].mxu1 %v1914_v34 }
  0x38   : > { %1799 = vmatpush3.bf16.msra.mxu1 %v1916_v31  ;;  %835 = vmatprep.mubr.bf16.mxu0 %v1917_v35 }
  0x39   : > { %931 = vmatprep.mubr.bf16.mxu1 %v1919_v36  ;;  %1800 = vmatprep.subr.bf16.mxu1 %v1923_v37 }
  0x3c   : > { %1801 = vmatpush3.bf16.msra.mxu1 %v1923_v37 }
  0x3d   : > { %1802 = vmatprep.subr.bf16.mxu1 %v777_v40 }
  0x3f   : > { %836 = vmatmul.mubr.bf16.gmra.mrb[12].mxu0 %v1921_v41  ;;  %932 = vmatmul.mubr.bf16.gmra.mrb[12].mxu1 %v1922_v42 }
  0x40   : > { %1803 = vmatpush3.bf16.msra.mxu1 %v777_v40  ;;  %843 = vmatprep.mubr.bf16.mxu0 %v1925_v43 }
  0x41   : > { %1804 = vmatprep.mubr.msk.bf16.mxu1 %vm723_vm2, %v1927_v44 }
  0x47   : > { %844 = vmatmul.mubr.bf16.gmra.mrb[16].mxu0 %v1928_v45  ;;  %1805 = vmatmul.mubr.msk.bf16.vlgmr.msra.gmra.mrb[16].mxu1 %vm723_vm2, %v1929_v46 }
  0x48   : > { %851 = vmatprep.mubr.bf16.mxu0 %v1930_v47  ;;  %1808 = vmatprep.mubr.msk.bf16.mxu1 %vm723_vm2, %v1932_v48 }
  0x4f   : > { %852 = vmatmul.mubr.bf16.gmra.mrb[20].mxu0 %v1933_v49  ;;  %1809 = vmatmul.mubr.msk.bf16.gmra.mrb[20].mxu1 %vm723_vm2, %v1934_v50 }
  0x50   : > { %859 = vmatprep.mubr.bf16.mxu0 %v1935_v51  ;;  %1812 = vmatprep.mubr.msk.bf16.mxu1 %vm723_vm2, %v1937_v52 }
  0x57   : > { %860 = vmatmul.mubr.bf16.gmra.mrb[24].mxu0 %v1938_v53  ;;  %1813 = vmatmul.mubr.msk.bf16.gmra.mrb[24].mxu1 %vm723_vm2, %v1939_v54 }
  0x58   : > { %867 = vmatprep.mubr.bf16.mxu0 %v1940_v55  ;;  %1816 = vmatprep.mubr.msk.bf16.mxu1 %vm723_vm2, %v1942_v56 }
  0x5f   : > { %868 = vmatmul.mubr.bf16.gmra.mrb[28].mxu0 %v1943_v57  ;;  %1817 = vmatmul.mubr.msk.bf16.gmra.mrb[28].mxu1 %vm723_vm2, %v1944_v58 }
  0x60   : > { %875 = vmatprep.mubr.bf16.mxu0 %v1945_v59  ;;  %1820 = vmatprep.mubr.msk.bf16.mxu1 %vm723_vm2, %v1947_v60  ;;  %v2188_v59 = vld [vmem:[%s2269_s2] ss:$0 sm:$0xff] }
  0x67   : > { %876 = vmatmul.mubr.bf16.gmra.mrb[32].mxu0 %v1948_v61  ;;  %1821 = vmatmul.mubr.msk.bf16.gmra.mrb[32].mxu1 %vm723_vm2, %v1949_v62 }
  0x68   : > { %883 = vmatprep.mubr.bf16.mxu0 %v1950_v63  ;;  %1824 = vmatprep.mubr.msk.bf16.mxu1 %vm723_vm2, %v1952_v0 }
  0x6f   : > { %884 = vmatmul.mubr.bf16.gmra.mrb[36].mxu0 %v1953_v1  ;;  %1825 = vmatmul.mubr.msk.bf16.gmra.mrb[36].mxu1 %vm723_vm2, %v1954_v2 }
  0x70   : > { %891 = vmatprep.mubr.bf16.mxu0 %v1955_v3  ;;  %1828 = vmatprep.mubr.msk.bf16.mxu1 %vm723_vm2, %v1957_v4 }
  0x77   : > { %892 = vmatmul.mubr.bf16.gmra.mrb[40].mxu0 %v1958_v5  ;;  %1829 = vmatmul.mubr.msk.bf16.gmra.mrb[40].mxu1 %vm723_vm2, %v1959_v6 }
  0x78   : > { %899 = vmatprep.mubr.bf16.mxu0 %v1960_v7  ;;  %1832 = vmatprep.mubr.msk.bf16.mxu1 %vm723_vm2, %v1962_v8 }
  0x7f   : > { %900 = vmatmul.mubr.bf16.gmra.mrb[44].mxu0 %v1963_v9  ;;  %1833 = vmatmul.mubr.msk.bf16.gmra.mrb[44].mxu1 %vm723_vm2, %v1964_v10 }
  0xfa   : > { %v1671_v11 = vpop.f32.mrb[0].mxu0  ;;  %v1743_v12 = vpop.f32.mrb[0].mxu1 }
  0xfb   : > { %v1672_v13 = vpop.f32.mrb[1].mxu0  ;;  %v1744_v14 = vpop.f32.mrb[1].mxu1 }
  0xfc   : > { %v1673_v15 = vadd.f32 %v1672_v13, %v1671_v11  ;;  %v1674_v16 = vpop.f32.mrb[2].mxu0  ;;  %v2169_v17 = vadd.f32 %v1744_v14, %v1743_v12  ;;  %v1746_v18 = vpop.f32.mrb[2].mxu1 }
  0xfd   : > { %v1675_v19 = vpop.f32.mrb[3].mxu0  ;;  %v1747_v20 = vpop.f32.mrb[3].mxu1 }
  0xfe   : > { %v1676_v21 = vadd.f32 %v1675_v19, %v1674_v16  ;;  %v2171_v22 = vadd.f32 %v1747_v20, %v1746_v18  ;;  %v814_v63 = vadd.f32 %v1673_v15, %v2188_v59 }
 0x100   : > { %v817_v8 = vadd.f32 %v1676_v21, %v2188_v59 }
 0x102   : > { %v1677_v23 = vpop.f32.mrb[4].mxu0  ;;  %v1749_v24 = vpop.f32.mrb[4].mxu1 }
 0x103   : > { %v1678_v25 = vpop.f32.mrb[5].mxu0  ;;  %v1750_v26 = vpop.f32.mrb[5].mxu1 }
 0x104   : > { %v1679_v27 = vadd.f32 %v1678_v25, %v1677_v23  ;;  %v1680_v28 = vpop.f32.mrb[6].mxu0  ;;  %v2173_v29 = vadd.f32 %v1750_v26, %v1749_v24  ;;  %v1752_v30 = vpop.f32.mrb[6].mxu1 }
 0x105   : > { %v1681_v31 = vpop.f32.mrb[7].mxu0  ;;  %v1753_v32 = vpop.f32.mrb[7].mxu1 }
 0x106   : > { %v1682_v33 = vadd.f32 %v1681_v31, %v1680_v28  ;;  %v2175_v34 = vadd.f32 %v1753_v32, %v1752_v30  ;;  %v822_v60 = vadd.f32 %v1679_v27, %v2188_v59 }
 0x108   : > { %v825_v3 = vadd.f32 %v1682_v33, %v2188_v59 }
 0x10a   : > { %v1683_v35 = vpop.f32.mrb[8].mxu0  ;;  %v1755_v36 = vpop.f32.mrb[8].mxu1 }
 0x10b   : > { %v1684_v37 = vpop.f32.mrb[9].mxu0  ;;  %v1756_v38 = vpop.f32.mrb[9].mxu1 }
 0x10c   : > { %v1685_v39 = vadd.f32 %v1684_v37, %v1683_v35  ;;  %v1686_v40 = vpop.f32.mrb[10].mxu0  ;;  %v2177_v41 = vadd.f32 %v1756_v38, %v1755_v36  ;;  %v1758_v42 = vpop.f32.mrb[10].mxu1 }
 0x10d   : > { %v1687_v43 = vpop.f32.mrb[11].mxu0  ;;  %v1759_v44 = vpop.f32.mrb[11].mxu1 }
 0x10e   : > { %v1688_v45 = vadd.f32 %v1687_v43, %v1686_v40  ;;  %v2179_v46 = vadd.f32 %v1759_v44, %v1758_v42  ;;  %v830_v25 = vadd.f32 %v1685_v39, %v2188_v59 }
 0x110   : > { %v833_v36 = vadd.f32 %v1688_v45, %v2188_v59 }
 0x112   : > { %v1689_v47 = vpop.f32.mrb[12].mxu0  ;;  %v1761_v48 = vpop.f32.mrb[12].mxu1 }
 0x113   : > { %v1690_v49 = vpop.f32.mrb[13].mxu0  ;;  %v1762_v50 = vpop.f32.mrb[13].mxu1 }
 0x114   : > { %v1691_v51 = vadd.f32 %v1690_v49, %v1689_v47  ;;  %v1692_v52 = vpop.f32.mrb[14].mxu0  ;;  %v2181_v53 = vadd.f32 %v1762_v50, %v1761_v48  ;;  %v1764_v54 = vpop.f32.mrb[14].mxu1 }
 0x115   : > { %v1693_v55 = vpop.f32.mrb[15].mxu0  ;;  %v1765_v56 = vpop.f32.mrb[15].mxu1 }
 0x116   : > { %v1694_v57 = vadd.f32 %v1693_v55, %v1692_v52  ;;  %v2183_v58 = vadd.f32 %v1765_v56, %v1764_v54  ;;  %v838_v20 = vadd.f32 %v1691_v51, %v2188_v59 }
 0x118   : > { %v841_v30 = vadd.f32 %v1694_v57, %v2188_v59 }
 0x11a   : > { %v1695_v61 = vpop.f32.mrb[16].mxu0  ;;  %v1806_v62 = vpop.f32.mrb[16].mxu1 }
 0x11b   : > { %v983_v0 = vadd.f32 %v1806_v62, %v822_v60  ;;  %v1696_v1 = vpop.f32.mrb[17].mxu0  ;;  %v974_v2 = vpop.f32.mrb[17].mxu1 }
 0x11c   : > { %v1697_v4 = vadd.f32 %v1696_v1, %v1695_v61  ;;  %v975_v5 = vadd.f32 %v974_v2, %v814_v63  ;;  %v1698_v6 = vpop.f32.mrb[18].mxu0  ;;  %v1807_v7 = vpop.f32.mrb[18].mxu1 }
 0x11d   : > { %v986_v9 = vadd.f32 %v1807_v7, %v825_v3  ;;  %v1699_v10 = vpop.f32.mrb[19].mxu0  ;;  %v977_v11 = vpop.f32.mrb[19].mxu1  ;;  %v1103_v14 = vmax.f32 %v983_v0, 0.0 }
 0x11e   : > { %v1700_v12 = vadd.f32 %v1699_v10, %v1698_v6  ;;  %v978_v13 = vadd.f32 %v977_v11, %v817_v8  ;;  %v1101_v15 = vmax.f32 %v975_v5, 0.0  ;;  %v846_v55 = vadd.f32 %v1697_v4, %v2188_v59 }
 0x11f   : > { %v1104_v16 = vmax.f32 %v986_v9, 0.0 }
 0x120   : > { %v1102_v18 = vmax.f32 %v978_v13, 0.0  ;;  %v849_v1 = vadd.f32 %v1700_v12, %v2188_v59 }
 0x121   : > { %v1568_v19 = vpack.c.bf16 %v1104_v16, %v1103_v14 }
 0x122   : > { %v1563_v21 = vpack.c.bf16 %v1102_v18, %v1101_v15  ;;  %v1701_v23 = vpop.f32.mrb[20].mxu0  ;;  %v1810_v24 = vpop.f32.mrb[20].mxu1 }
 0x123   : > { %1640 = vst [vmem:[%s2198_s26 + $0x8] sm:$0xff] %v1568_v19   ;;  %v999_v26 = vadd.f32 %v1810_v24, %v838_v20  ;;  %v1702_v27 = vpop.f32.mrb[21].mxu0  ;;  %v990_v28 = vpop.f32.mrb[21].mxu1 }
 0x124   : > { %1564 = vst [vmem:[%s2198_s26] sm:$0xff] %v1563_v21   ;;  %v1703_v31 = vadd.f32 %v1702_v27, %v1701_v23  ;;  %v991_v32 = vadd.f32 %v990_v28, %v830_v25  ;;  %v1704_v33 = vpop.f32.mrb[22].mxu0  ;;  %v1811_v35 = vpop.f32.mrb[22].mxu1 }
 0x125   : > { %v1002_v37 = vadd.f32 %v1811_v35, %v841_v30  ;;  %v1705_v38 = vpop.f32.mrb[23].mxu0  ;;  %v993_v40 = vpop.f32.mrb[23].mxu1  ;;  %v1107_v39 = vmax.f32 %v999_v26, 0.0 }
 0x126   : > { %v1706_v42 = vadd.f32 %v1705_v38, %v1704_v33  ;;  %v994_v43 = vadd.f32 %v993_v40, %v833_v36  ;;  %v1105_v47 = vmax.f32 %v991_v32, 0.0  ;;  %v854_v50 = vadd.f32 %v1703_v31, %v2188_v59 }
 0x127   : > { %v1108_v44 = vmax.f32 %v1002_v37, 0.0 }
 0x128   : > { %v1106_v48 = vmax.f32 %v994_v43, 0.0  ;;  %v857_v60 = vadd.f32 %v1706_v42, %v2188_v59 }
 0x129   : > { %v1578_v49 = vpack.c.bf16 %v1108_v44, %v1107_v39 }
 0x12a   : > { %v1573_v51 = vpack.c.bf16 %v1106_v48, %v1105_v47  ;;  %v1707_v52 = vpop.f32.mrb[24].mxu0  ;;  %v1814_v54 = vpop.f32.mrb[24].mxu1 }
 0x12b   : > { %1642 = vst [vmem:[%s2198_s26 + $0x18] sm:$0xff] %v1578_v49   ;;  %v1015_v45 = vadd.f32 %v1814_v54, %v854_v50  ;;  %v1708_v56 = vpop.f32.mrb[25].mxu0  ;;  %v1006_v57 = vpop.f32.mrb[25].mxu1 }
 0x12c   : > { %1641 = vst [vmem:[%s2198_s26 + $0x10] sm:$0xff] %v1573_v51   ;;  %v1709_v61 = vadd.f32 %v1708_v56, %v1707_v52  ;;  %v1007_v62 = vadd.f32 %v1006_v57, %v846_v55  ;;  %v1710_v63 = vpop.f32.mrb[26].mxu0  ;;  %v1815_v0 = vpop.f32.mrb[26].mxu1 }
 0x12d   : > { %v1018_v2 = vadd.f32 %v1815_v0, %v857_v60  ;;  %v1711_v3 = vpop.f32.mrb[27].mxu0  ;;  %v1009_v5 = vpop.f32.mrb[27].mxu1  ;;  %v1111_v7 = vmax.f32 %v1015_v45, 0.0 }
 0x12e   : > { %v1712_v6 = vadd.f32 %v1711_v3, %v1710_v63  ;;  %v1010_v4 = vadd.f32 %v1009_v5, %v849_v1  ;;  %v1109_v9 = vmax.f32 %v1007_v62, 0.0  ;;  %v862_v15 = vadd.f32 %v1709_v61, %v2188_v59 }
 0x12f   : > { %v1112_v8 = vmax.f32 %v1018_v2, 0.0 }
 0x130   : > { %v1110_v10 = vmax.f32 %v1010_v4, 0.0  ;;  %v865_v24 = vadd.f32 %v1712_v6, %v2188_v59 }
 0x131   : > { %v1588_v11 = vpack.c.bf16 %v1112_v8, %v1111_v7 }
 0x132   : > { %v1583_v13 = vpack.c.bf16 %v1110_v10, %v1109_v9  ;;  %v1713_v14 = vpop.f32.mrb[28].mxu0  ;;  %v1818_v16 = vpop.f32.mrb[28].mxu1 }
 0x133   : > { %1644 = vst [vmem:[%s2198_s26 + $0x28] sm:$0xff] %v1588_v11   ;;  %v1714_v18 = vpop.f32.mrb[29].mxu0  ;;  %v1022_v19 = vpop.f32.mrb[29].mxu1 }
 0x134   : > { %1643 = vst [vmem:[%s2198_s26 + $0x20] sm:$0xff] %v1583_v13   ;;  %v1715_v12 = vadd.f32 %v1714_v18, %v1713_v14  ;;  %v1023_v20 = vadd.f32 %v1022_v19, %v862_v15  ;;  %v1716_v21 = vpop.f32.mrb[30].mxu0  ;;  %v1819_v23 = vpop.f32.mrb[30].mxu1  ;;  %v918_v13 = vadd.f32 %v2173_v29, %v2188_v59  ;;  %v910_v18 = vadd.f32 %v2169_v17, %v2188_v59 }
 0x135   : > { %v1717_v25 = vpop.f32.mrb[31].mxu0  ;;  %v1025_v26 = vpop.f32.mrb[31].mxu1 }
 0x136   : > { %v870_v27 = vadd.f32 %v1715_v12, %v2188_v59  ;;  %v1718_v28 = vadd.f32 %v1717_v25, %v1716_v21  ;;  %v1026_v30 = vadd.f32 %v1025_v26, %v865_v24  ;;  %v1113_v32 = vmax.f32 %v1023_v20, 0.0 }
 0x137   : > { %v921_v21 = vadd.f32 %v2175_v34, %v2188_v59 }
 0x138   : > { %v1031_v31 = vadd.f32 %v1818_v16, %v870_v27  ;;  %v873_v33 = vadd.f32 %v1718_v28, %v2188_v59  ;;  %v1114_v35 = vmax.f32 %v1026_v30, 0.0 }
 0x13a   : > { %v1034_v36 = vadd.f32 %v1819_v23, %v873_v33  ;;  %v1593_v37 = vpack.c.bf16 %v1114_v35, %v1113_v32  ;;  %v1719_v38 = vpop.f32.mrb[32].mxu0  ;;  %v1822_v40 = vpop.f32.mrb[32].mxu1  ;;  %v1115_v39 = vmax.f32 %v1031_v31, 0.0  ;;  %v913_v31 = vadd.f32 %v2171_v22, %v2188_v59 }
 0x13b   : > { %v1720_v42 = vpop.f32.mrb[33].mxu0  ;;  %v1038_v43 = vpop.f32.mrb[33].mxu1 }
 0x13c   : > { %v1116_v44 = vmax.f32 %v1034_v36, 0.0  ;;  %1645 = vst [vmem:[%s2198_s26 + $0x30] sm:$0xff] %v1593_v37   ;;  %v1721_v47 = vadd.f32 %v1720_v42, %v1719_v38  ;;  %v1722_v48 = vpop.f32.mrb[34].mxu0  ;;  %v1823_v49 = vpop.f32.mrb[34].mxu1 }
 0x13d   : > { %v1723_v50 = vpop.f32.mrb[35].mxu0  ;;  %v1041_v51 = vpop.f32.mrb[35].mxu1 }
 0x13e   : > { %v1598_v52 = vpack.c.bf16 %v1116_v44, %v1115_v39  ;;  %v878_v54 = vadd.f32 %v1721_v47, %v2188_v59  ;;  %v1724_v55 = vadd.f32 %v1723_v50, %v1722_v48  ;;  %v934_v44 = vadd.f32 %v2181_v53, %v2188_v59 }
 0x140   : > { %1646 = vst [vmem:[%s2198_s26 + $0x38] sm:$0xff] %v1598_v52   ;;  %v1039_v45 = vadd.f32 %v1038_v43, %v878_v54  ;;  %v881_v56 = vadd.f32 %v1724_v55, %v2188_v59  ;;  %v937_v55 = vadd.f32 %v2183_v58, %v2188_v59 }
 0x142   : > { %v1042_v57 = vadd.f32 %v1041_v51, %v881_v56  ;;  %v1725_v60 = vpop.f32.mrb[36].mxu0  ;;  %v2222_v61 = vpop.f32.mrb[36].mxu1  ;;  %v1117_v0 = vmax.f32 %v1039_v45, 0.0 }
 0x143   : > { %v1726_v62 = vpop.f32.mrb[37].mxu0  ;;  %v1054_v63 = vpop.f32.mrb[37].mxu1 }
 0x144   : > { %v1118_v1 = vmax.f32 %v1042_v57, 0.0  ;;  %v1727_v2 = vadd.f32 %v1726_v62, %v1725_v60  ;;  %v1728_v3 = vpop.f32.mrb[38].mxu0  ;;  %v2224_v5 = vpop.f32.mrb[38].mxu1 }
 0x145   : > { %v1729_v6 = vpop.f32.mrb[39].mxu0  ;;  %v1057_v4 = vpop.f32.mrb[39].mxu1 }
 0x146   : > { %v1603_v7 = vpack.c.bf16 %v1118_v1, %v1117_v0  ;;  %v886_v8 = vadd.f32 %v1727_v2, %v2188_v59  ;;  %v1730_v9 = vadd.f32 %v1729_v6, %v1728_v3 }
 0x148   : > { %1647 = vst [vmem:[%s2198_s26 + $0x40] sm:$0xff] %v1603_v7   ;;  %v1047_v10 = vadd.f32 %v1822_v40, %v886_v8  ;;  %v889_v11 = vadd.f32 %v1730_v9, %v2188_v59 }
 0x14a   : > { %v1050_v14 = vadd.f32 %v1823_v49, %v889_v11  ;;  %v1731_v16 = vpop.f32.mrb[40].mxu0  ;;  %v1830_v15 = vpop.f32.mrb[40].mxu1  ;;  %v1119_v23 = vmax.f32 %v1047_v10, 0.0  ;;  %v926_v49 = vadd.f32 %v2177_v41, %v2188_v59  ;;  %v929_v41 = vadd.f32 %v2179_v46, %v2188_v59 }
 0x14b   : > { %v1079_v19 = vadd.f32 %v1830_v15, %v918_v13  ;;  %v1732_v12 = vpop.f32.mrb[41].mxu0  ;;  %v1070_v20 = vpop.f32.mrb[41].mxu1 }
 0x14c   : > { %v1120_v24 = vmax.f32 %v1050_v14, 0.0  ;;  %v1733_v25 = vadd.f32 %v1732_v12, %v1731_v16  ;;  %v1071_v26 = vadd.f32 %v1070_v20, %v910_v18  ;;  %v1734_v27 = vpop.f32.mrb[42].mxu0  ;;  %v1831_v28 = vpop.f32.mrb[42].mxu1 }
 0x14d   : > { %v1082_v29 = vadd.f32 %v1831_v28, %v921_v21  ;;  %v1735_v30 = vpop.f32.mrb[43].mxu0  ;;  %v1073_v32 = vpop.f32.mrb[43].mxu1  ;;  %v1127_v36 = vmax.f32 %v1079_v19, 0.0 }
 0x14e   : > { %v1608_v17 = vpack.c.bf16 %v1120_v24, %v1119_v23  ;;  %v894_v33 = vadd.f32 %v1733_v25, %v2188_v59  ;;  %v1736_v35 = vadd.f32 %v1735_v30, %v1734_v27  ;;  %v1074_v37 = vadd.f32 %v1073_v32, %v913_v31 }
 0x14f   : > { %v1128_v34 = vmax.f32 %v1082_v29, 0.0  ;;  %v1125_v42 = vmax.f32 %v1071_v26, 0.0 }
 0x150   : > { %1648 = vst [vmem:[%s2198_s26 + $0x48] sm:$0xff] %v1608_v17   ;;  %v1055_v38 = vadd.f32 %v1054_v63, %v894_v33  ;;  %v897_v40 = vadd.f32 %v1736_v35, %v2188_v59  ;;  %v1126_v39 = vmax.f32 %v1074_v37, 0.0 }
 0x151   : > { %v1628_v43 = vpack.c.bf16 %v1128_v34, %v1127_v36 }
 0x152   : > { %v1058_v22 = vadd.f32 %v1057_v4, %v897_v40  ;;  %v1737_v47 = vpop.f32.mrb[44].mxu0  ;;  %v1834_v48 = vpop.f32.mrb[44].mxu1  ;;  %v1623_v50 = vpack.c.bf16 %v1126_v39, %v1125_v42  ;;  %v1121_v45 = vmax.f32 %v1055_v38, 0.0 }
 0x153   : > { %1652 = vst [vmem:[%s2198_s26 + $0x68] sm:$0xff] %v1628_v43   ;;  %v1095_v51 = vadd.f32 %v1834_v48, %v934_v44  ;;  %v1738_v52 = vpop.f32.mrb[45].mxu0  ;;  %v1086_v54 = vpop.f32.mrb[45].mxu1 }
 0x154   : > { %v1122_v56 = vmax.f32 %v1058_v22, 0.0  ;;  %v1739_v57 = vadd.f32 %v1738_v52, %v1737_v47  ;;  %v1087_v53 = vadd.f32 %v1086_v54, %v926_v49  ;;  %v1740_v60 = vpop.f32.mrb[46].mxu0  ;;  %v1835_v62 = vpop.f32.mrb[46].mxu1  ;;  %1651 = vst [vmem:[%s2198_s26 + $0x60] sm:$0xff] %v1623_v50  }
 0x155   : > { %v1098_v63 = vadd.f32 %v1835_v62, %v937_v55  ;;  %v1741_v0 = vpop.f32.mrb[47].mxu0  ;;  %v1089_v1 = vpop.f32.mrb[47].mxu1  ;;  %v1131_v6 = vmax.f32 %v1095_v51, 0.0 }
 0x156   : > { %v1613_v2 = vpack.c.bf16 %v1122_v56, %v1121_v45  ;;  %v902_v3 = vadd.f32 %v1739_v57, %v2188_v59  ;;  %v1742_v58 = vadd.f32 %v1741_v0, %v1740_v60  ;;  %v1090_v7 = vadd.f32 %v1089_v1, %v929_v41 }
 0x157   : > { %v1132_v4 = vmax.f32 %v1098_v63, 0.0  ;;  %v1129_v10 = vmax.f32 %v1087_v53, 0.0 }
 0x158   : > { %1649 = vst [vmem:[%s2198_s26 + $0x50] sm:$0xff] %v1613_v2   ;;  %v1063_v8 = vadd.f32 %v2222_v61, %v902_v3  ;;  %v905_v9 = vadd.f32 %v1742_v58, %v2188_v59  ;;  %v1130_v13 = vmax.f32 %v1090_v7, 0.0 }
 0x159   : > { %v1638_v11 = vpack.c.bf16 %v1132_v4, %v1131_v6 }
 0x15a   : > { %v1066_v46 = vadd.f32 %v2224_v5, %v905_v9  ;;  %v1633_v14 = vpack.c.bf16 %v1130_v13, %v1129_v10  ;;  %v1123_v16 = vmax.f32 %v1063_v8, 0.0 }
 0x15b   : > { %1654 = vst [vmem:[%s2198_s26 + $0x78] sm:$0xff] %v1638_v11  }
 0x15c   : > { %v1124_v15 = vmax.f32 %v1066_v46, 0.0  ;;  %1653 = vst [vmem:[%s2198_s26 + $0x70] sm:$0xff] %v1633_v14  }
 0x15e   : > { %v1618_v18 = vpack.c.bf16 %v1124_v15, %v1123_v16 }
 0x160   : > { %1650 = vst [vmem:[%s2198_s26 + $0x58] sm:$0xff] %v1618_v18  }
 0x161 PF: > { %s13_s14 = sadd.s32 1, %s1987_s14   ;;  %s2271_s12 = smov %s1983_s13 }
 0x162   : > { %p10_p5 = scmp.ge.s32.totalorder %s13_s14, 4   ;;  %s2272_s13 = smov %s2274_s15 }
 0x164   :  { %12 = sbr.rel (!%p10_p5) target bundleno = 2 (0x2), region = 68 }

// kernel: alexnet_fmaps.6
= control target key start
LH: loop header
LB: loop body
LE: loop exit
PB: predicated region body
PF: predicated region fallthrough
CT: control target
= control target key end

     0   :  { %s4369_s12 = smov 0   ;;  %s4371_s13 = smov 0   ;;  %s5401_s0 = inlined_call_operand.vmem [shape: bf16[112,1600], index: 0, kind: input, shape index: {}]   ;;  %s5402_s1 = inlined_call_operand.vmem [shape: bf16[1600,256], index: 1, kind: input, shape index: {}]   ;;  %s5403_s2 = inlined_call_operand.vmem [shape: f32[1,256], index: 2, kind: input, shape index: {}]   ;;  %s5404_s3 = inlined_call_operand.vmem [shape: bf16[112,256], index: 3, kind: output, shape index: {}]  }
   0x1   :  { %s4373_s14 = smov 0   ;;  %s4375_s15 = smov 0  }
   0x2   :  { %s4377_s16 = smov 0  }
   0x3 LB: > { %s22_s17 = sadd.s32 1, %s4341_s15  ;;  %s3340_s18 = sadd.s32 4294967295, %s4345_s16   ;;  %s4345_s16 = sphi %s4377_s16, %s13_s16   ;;  %s4341_s15 = sphi %s4375_s15, %s5409_s15   ;;  %s4337_s14 = sphi %s4373_s14, %s5408_s14   ;;  %s4333_s13 = sphi %s4371_s13, %s5407_s13   ;;  %s4329_s12 = sphi %s4369_s12, %s5406_s12  }
   0x4   : > { %p23_p0 = scmp.ge.s32.totalorder %s22_s17, 2  ;;  %p65_p1 = scmp.ne.s32.totalorder %s4333_s13, %s4329_s12 }
   0x5   : > { %p66_p2 = scmp.eq.s32.totalorder %s4345_s16, 0  ;;  %p123_p4 = scmp.eq.s32.totalorder %s3340_s18, 1 }
   0x6   : > { %s5411_s17 = smov (%p23_p0, %s22_s17), 0  ;;  %s58_s20 = sadd.s32 1, %s4333_s13 }
   0x7   : > { %p67_p3 = por %p66_p2, %p65_p1  ;;  %s55_s19 = ssub.s32 %s4341_s15, %s5411_s17 }
   0x8   : > { %p56_p5 = scmp.eq.s32.totalorder %s55_s19, 0  ;;  %p4404_p6 = por %p123_p4, %p65_p1 }
   0x9   : > { %p3344_p7 = scmp.ge.s32.totalorder %s4345_s16, 2 }
   0xa   : > { %s4409_s22 = scalar_select %p56_p5, %s4333_s13, %s58_s20  }
   0xb   : > { %155 = sbr.rel (%p3344_p7) target bundleno = 155 (0x9b), region = 20 }
  0x12   : > { %158 = sbr.rel (!%p67_p3) target bundleno = 155 (0x9b), region = 24  ;;  %s160_s23 = sand.u32 (%p67_p3), 1, %s4333_s13  }
  0x13   : > { %s3345_s24 = sshll.u32 (%p67_p3), %s4341_s15, 2  ;;  %s4029_s25 = smul.u32 (%p67_p3), 800, %s160_s23 }
  0x14   : > { %s4417_s28 = scalar_lea.vmem (%p67_p3), %s5402_s1, %s3345_s24 }
  0x15   : > { %v180_v0 = vld [vmem:[%s4417_s28] sm:$0xf] (%p67_p3)  ;;  %v182_v1 = vld [vmem:[%s4417_s28 + $0x8] sm:$0xf] (%p67_p3)  ;;  %v184_v2 = vld [vmem:[%s4417_s28 + $0x10] sm:$0xf] (%p67_p3) }
  0x16   : > { %v186_v3 = vld [vmem:[%s4417_s28 + $0x18] sm:$0xf] (%p67_p3)  ;;  %v188_v4 = vld [vmem:[%s4417_s28 + $0x20] sm:$0xf] (%p67_p3)  ;;  %s4424_s29 = scalar_lea.vmem (%p67_p3), [#allocation2], %s4029_s25 }
  0x17   : > { %181 = vst [vmem:[%s4424_s29] sm:$0xf] (%p67_p3), %v180_v0  ;;  %183 = vst [vmem:[%s4424_s29 + $0x4] sm:$0xf] (%p67_p3), %v182_v1  ;;  %v190_v5 = vld [vmem:[%s4417_s28 + $0x28] sm:$0xf] (%p67_p3) }
  0x18   : > { %185 = vst [vmem:[%s4424_s29 + $0x8] sm:$0xf] (%p67_p3), %v184_v2  ;;  %187 = vst [vmem:[%s4424_s29 + $0xc] sm:$0xf] (%p67_p3), %v186_v3  ;;  %v192_v6 = vld [vmem:[%s4417_s28 + $0x30] sm:$0xf] (%p67_p3) }
  0x19   : > { %189 = vst [vmem:[%s4424_s29 + $0x10] sm:$0xf] %v188_v4  ;;  %v194_v7 = vld [vmem:[%s4417_s28 + $0x38] sm:$0xf]  ;;  %191 = vst [vmem:[%s4424_s29 + $0x14] sm:$0xf] %v190_v5 }
  0x1a   : > { %193 = vst [vmem:[%s4424_s29 + $0x18] sm:$0xf] %v192_v6  ;;  %195 = vst [vmem:[%s4424_s29 + $0x1c] sm:$0xf] %v194_v7  ;;  %v196_v8 = vld [vmem:[%s4417_s28 + $0x40] sm:$0xf] }
  0x1b   : > { %v198_v9 = vld [vmem:[%s4417_s28 + $0x48] sm:$0xf]  ;;  %v200_v10 = vld [vmem:[%s4417_s28 + $0x50] sm:$0xf]  ;;  %197 = vst [vmem:[%s4424_s29 + $0x20] sm:$0xf] %v196_v8 }
  0x1c   : > { %199 = vst [vmem:[%s4424_s29 + $0x24] sm:$0xf] %v198_v9  ;;  %201 = vst [vmem:[%s4424_s29 + $0x28] sm:$0xf] %v200_v10  ;;  %v202_v11 = vld [vmem:[%s4417_s28 + $0x58] sm:$0xf] }
  0x1d   : > { %v204_v12 = vld [vmem:[%s4417_s28 + $0x60] sm:$0xf]  ;;  %v206_v13 = vld [vmem:[%s4417_s28 + $0x68] sm:$0xf]  ;;  %203 = vst [vmem:[%s4424_s29 + $0x2c] sm:$0xf] %v202_v11 }
  0x1e   : > { %205 = vst [vmem:[%s4424_s29 + $0x30] sm:$0xf] %v204_v12  ;;  %207 = vst [vmem:[%s4424_s29 + $0x34] sm:$0xf] %v206_v13  ;;  %v208_v14 = vld [vmem:[%s4417_s28 + $0x70] sm:$0xf] }
  0x1f   : > { %v210_v15 = vld [vmem:[%s4417_s28 + $0x78] sm:$0xf]  ;;  %v212_v16 = vld [vmem:[%s4417_s28 + $0x80] sm:$0xf]  ;;  %209 = vst [vmem:[%s4424_s29 + $0x38] sm:$0xf] %v208_v14 }
  0x20   : > { %211 = vst [vmem:[%s4424_s29 + $0x3c] sm:$0xf] %v210_v15  ;;  %213 = vst [vmem:[%s4424_s29 + $0x40] sm:$0xf] %v212_v16  ;;  %v214_v17 = vld [vmem:[%s4417_s28 + $0x88] sm:$0xf] }
  0x21   : > { %v216_v18 = vld [vmem:[%s4417_s28 + $0x90] sm:$0xf]  ;;  %v218_v19 = vld [vmem:[%s4417_s28 + $0x98] sm:$0xf]  ;;  %215 = vst [vmem:[%s4424_s29 + $0x44] sm:$0xf] %v214_v17 }
  0x22   : > { %217 = vst [vmem:[%s4424_s29 + $0x48] sm:$0xf] %v216_v18  ;;  %219 = vst [vmem:[%s4424_s29 + $0x4c] sm:$0xf] %v218_v19  ;;  %v220_v20 = vld [vmem:[%s4417_s28 + $0xa0] sm:$0xf] }
  0x23   : > { %v222_v21 = vld [vmem:[%s4417_s28 + $0xa8] sm:$0xf]  ;;  %v224_v22 = vld [vmem:[%s4417_s28 + $0xb0] sm:$0xf]  ;;  %221 = vst [vmem:[%s4424_s29 + $0x50] sm:$0xf] %v220_v20 }
  0x24   : > { %223 = vst [vmem:[%s4424_s29 + $0x54] sm:$0xf] %v222_v21  ;;  %225 = vst [vmem:[%s4424_s29 + $0x58] sm:$0xf] %v224_v22  ;;  %v226_v23 = vld [vmem:[%s4417_s28 + $0xb8] sm:$0xf] }
  0x25   : > { %v228_v24 = vld [vmem:[%s4417_s28 + $0xc0] sm:$0xf]  ;;  %v230_v25 = vld [vmem:[%s4417_s28 + $0xc8] sm:$0xf]  ;;  %227 = vst [vmem:[%s4424_s29 + $0x5c] sm:$0xf] %v226_v23 }
  0x26   : > { %229 = vst [vmem:[%s4424_s29 + $0x60] sm:$0xf] %v228_v24  ;;  %231 = vst [vmem:[%s4424_s29 + $0x64] sm:$0xf] %v230_v25  ;;  %v232_v26 = vld [vmem:[%s4417_s28 + $0xd0] sm:$0xf] }
  0x27   : > { %v234_v27 = vld [vmem:[%s4417_s28 + $0xd8] sm:$0xf]  ;;  %v236_v28 = vld [vmem:[%s4417_s28 + $0xe0] sm:$0xf]  ;;  %233 = vst [vmem:[%s4424_s29 + $0x68] sm:$0xf] %v232_v26 }
  0x28   : > { %235 = vst [vmem:[%s4424_s29 + $0x6c] sm:$0xf] %v234_v27  ;;  %237 = vst [vmem:[%s4424_s29 + $0x70] sm:$0xf] %v236_v28  ;;  %v238_v29 = vld [vmem:[%s4417_s28 + $0xe8] sm:$0xf] }
  0x29   : > { %v240_v30 = vld [vmem:[%s4417_s28 + $0xf0] sm:$0xf]  ;;  %v242_v31 = vld [vmem:[%s4417_s28 + $0xf8] sm:$0xf]  ;;  %239 = vst [vmem:[%s4424_s29 + $0x74] sm:$0xf] %v238_v29 }
  0x2a   : > { %241 = vst [vmem:[%s4424_s29 + $0x78] sm:$0xf] %v240_v30  ;;  %243 = vst [vmem:[%s4424_s29 + $0x7c] sm:$0xf] %v242_v31  ;;  %v244_v32 = vld [vmem:[%s4417_s28 + $0x100] sm:$0xf] }
  0x2b   : > { %v246_v33 = vld [vmem:[%s4417_s28 + $0x108] sm:$0xf]  ;;  %v248_v34 = vld [vmem:[%s4417_s28 + $0x110] sm:$0xf]  ;;  %245 = vst [vmem:[%s4424_s29 + $0x80] sm:$0xf] %v244_v32 }
  0x2c   : > { %247 = vst [vmem:[%s4424_s29 + $0x84] sm:$0xf] %v246_v33  ;;  %249 = vst [vmem:[%s4424_s29 + $0x88] sm:$0xf] %v248_v34  ;;  %v250_v35 = vld [vmem:[%s4417_s28 + $0x118] sm:$0xf] }
  0x2d   : > { %v252_v36 = vld [vmem:[%s4417_s28 + $0x120] sm:$0xf]  ;;  %v254_v37 = vld [vmem:[%s4417_s28 + $0x128] sm:$0xf]  ;;  %251 = vst [vmem:[%s4424_s29 + $0x8c] sm:$0xf] %v250_v35 }
  0x2e   : > { %253 = vst [vmem:[%s4424_s29 + $0x90] sm:$0xf] %v252_v36  ;;  %255 = vst [vmem:[%s4424_s29 + $0x94] sm:$0xf] %v254_v37  ;;  %v256_v38 = vld [vmem:[%s4417_s28 + $0x130] sm:$0xf] }
  0x2f   : > { %v258_v39 = vld [vmem:[%s4417_s28 + $0x138] sm:$0xf]  ;;  %v260_v40 = vld [vmem:[%s4417_s28 + $0x140] sm:$0xf]  ;;  %257 = vst [vmem:[%s4424_s29 + $0x98] sm:$0xf] %v256_v38 }
  0x30   : > { %259 = vst [vmem:[%s4424_s29 + $0x9c] sm:$0xf] %v258_v39  ;;  %261 = vst [vmem:[%s4424_s29 + $0xa0] sm:$0xf] %v260_v40  ;;  %v262_v41 = vld [vmem:[%s4417_s28 + $0x148] sm:$0xf] }
  0x31   : > { %v264_v42 = vld [vmem:[%s4417_s28 + $0x150] sm:$0xf]  ;;  %v266_v43 = vld [vmem:[%s4417_s28 + $0x158] sm:$0xf]  ;;  %263 = vst [vmem:[%s4424_s29 + $0xa4] sm:$0xf] %v262_v41 }
  0x32   : > { %265 = vst [vmem:[%s4424_s29 + $0xa8] sm:$0xf] %v264_v42  ;;  %267 = vst [vmem:[%s4424_s29 + $0xac] sm:$0xf] %v266_v43  ;;  %v268_v44 = vld [vmem:[%s4417_s28 + $0x160] sm:$0xf] }
  0x33   : > { %v270_v45 = vld [vmem:[%s4417_s28 + $0x168] sm:$0xf]  ;;  %v272_v46 = vld [vmem:[%s4417_s28 + $0x170] sm:$0xf]  ;;  %269 = vst [vmem:[%s4424_s29 + $0xb0] sm:$0xf] %v268_v44 }
  0x34   : > { %271 = vst [vmem:[%s4424_s29 + $0xb4] sm:$0xf] %v270_v45  ;;  %273 = vst [vmem:[%s4424_s29 + $0xb8] sm:$0xf] %v272_v46  ;;  %v274_v47 = vld [vmem:[%s4417_s28 + $0x178] sm:$0xf] }
  0x35   : > { %v276_v48 = vld [vmem:[%s4417_s28 + $0x180] sm:$0xf]  ;;  %v278_v49 = vld [vmem:[%s4417_s28 + $0x188] sm:$0xf]  ;;  %275 = vst [vmem:[%s4424_s29 + $0xbc] sm:$0xf] %v274_v47 }
  0x36   : > { %277 = vst [vmem:[%s4424_s29 + $0xc0] sm:$0xf] %v276_v48  ;;  %279 = vst [vmem:[%s4424_s29 + $0xc4] sm:$0xf] %v278_v49  ;;  %v280_v50 = vld [vmem:[%s4417_s28 + $0x190] sm:$0xf] }
  0x37   : > { %v282_v51 = vld [vmem:[%s4417_s28 + $0x198] sm:$0xf]  ;;  %v284_v52 = vld [vmem:[%s4417_s28 + $0x1a0] sm:$0xf]  ;;  %281 = vst [vmem:[%s4424_s29 + $0xc8] sm:$0xf] %v280_v50 }
  0x38   : > { %283 = vst [vmem:[%s4424_s29 + $0xcc] sm:$0xf] %v282_v51  ;;  %285 = vst [vmem:[%s4424_s29 + $0xd0] sm:$0xf] %v284_v52  ;;  %v286_v53 = vld [vmem:[%s4417_s28 + $0x1a8] sm:$0xf] }
  0x39   : > { %v288_v54 = vld [vmem:[%s4417_s28 + $0x1b0] sm:$0xf]  ;;  %v290_v55 = vld [vmem:[%s4417_s28 + $0x1b8] sm:$0xf]  ;;  %287 = vst [vmem:[%s4424_s29 + $0xd4] sm:$0xf] %v286_v53 }
  0x3a   : > { %289 = vst [vmem:[%s4424_s29 + $0xd8] sm:$0xf] %v288_v54  ;;  %291 = vst [vmem:[%s4424_s29 + $0xdc] sm:$0xf] %v290_v55  ;;  %v292_v56 = vld [vmem:[%s4417_s28 + $0x1c0] sm:$0xf] }
  0x3b   : > { %v294_v57 = vld [vmem:[%s4417_s28 + $0x1c8] sm:$0xf]  ;;  %v296_v58 = vld [vmem:[%s4417_s28 + $0x1d0] sm:$0xf]  ;;  %293 = vst [vmem:[%s4424_s29 + $0xe0] sm:$0xf] %v292_v56 }
  0x3c   : > { %295 = vst [vmem:[%s4424_s29 + $0xe4] sm:$0xf] %v294_v57  ;;  %297 = vst [vmem:[%s4424_s29 + $0xe8] sm:$0xf] %v296_v58  ;;  %v298_v59 = vld [vmem:[%s4417_s28 + $0x1d8] sm:$0xf] }
  0x3d   : > { %v300_v60 = vld [vmem:[%s4417_s28 + $0x1e0] sm:$0xf]  ;;  %v302_v61 = vld [vmem:[%s4417_s28 + $0x1e8] sm:$0xf]  ;;  %299 = vst [vmem:[%s4424_s29 + $0xec] sm:$0xf] %v298_v59 }
  0x3e   : > { %301 = vst [vmem:[%s4424_s29 + $0xf0] sm:$0xf] %v300_v60  ;;  %303 = vst [vmem:[%s4424_s29 + $0xf4] sm:$0xf] %v302_v61  ;;  %v304_v62 = vld [vmem:[%s4417_s28 + $0x1f0] sm:$0xf] }
  0x3f   : > { %v306_v63 = vld [vmem:[%s4417_s28 + $0x1f8] sm:$0xf]  ;;  %v308_v0 = vld [vmem:[%s4417_s28 + $0x200] sm:$0xf]  ;;  %305 = vst [vmem:[%s4424_s29 + $0xf8] sm:$0xf] %v304_v62 }
  0x40   : > { %307 = vst [vmem:[%s4424_s29 + $0xfc] sm:$0xf] %v306_v63  ;;  %309 = vst [vmem:[%s4424_s29 + $0x100] sm:$0xf] %v308_v0  ;;  %v310_v1 = vld [vmem:[%s4417_s28 + $0x208] sm:$0xf] }
  0x41   : > { %v312_v2 = vld [vmem:[%s4417_s28 + $0x210] sm:$0xf]  ;;  %v314_v3 = vld [vmem:[%s4417_s28 + $0x218] sm:$0xf]  ;;  %311 = vst [vmem:[%s4424_s29 + $0x104] sm:$0xf] %v310_v1 }
  0x42   : > { %313 = vst [vmem:[%s4424_s29 + $0x108] sm:$0xf] %v312_v2  ;;  %315 = vst [vmem:[%s4424_s29 + $0x10c] sm:$0xf] %v314_v3  ;;  %v316_v4 = vld [vmem:[%s4417_s28 + $0x220] sm:$0xf] }
  0x43   : > { %v318_v5 = vld [vmem:[%s4417_s28 + $0x228] sm:$0xf]  ;;  %v320_v6 = vld [vmem:[%s4417_s28 + $0x230] sm:$0xf]  ;;  %317 = vst [vmem:[%s4424_s29 + $0x110] sm:$0xf] %v316_v4 }
  0x44   : > { %319 = vst [vmem:[%s4424_s29 + $0x114] sm:$0xf] %v318_v5  ;;  %321 = vst [vmem:[%s4424_s29 + $0x118] sm:$0xf] %v320_v6  ;;  %v322_v7 = vld [vmem:[%s4417_s28 + $0x238] sm:$0xf] }
  0x45   : > { %v324_v8 = vld [vmem:[%s4417_s28 + $0x240] sm:$0xf]  ;;  %v326_v9 = vld [vmem:[%s4417_s28 + $0x248] sm:$0xf]  ;;  %323 = vst [vmem:[%s4424_s29 + $0x11c] sm:$0xf] %v322_v7 }
  0x46   : > { %325 = vst [vmem:[%s4424_s29 + $0x120] sm:$0xf] %v324_v8  ;;  %327 = vst [vmem:[%s4424_s29 + $0x124] sm:$0xf] %v326_v9  ;;  %v328_v10 = vld [vmem:[%s4417_s28 + $0x250] sm:$0xf] }
  0x47   : > { %v330_v11 = vld [vmem:[%s4417_s28 + $0x258] sm:$0xf]  ;;  %v332_v12 = vld [vmem:[%s4417_s28 + $0x260] sm:$0xf]  ;;  %329 = vst [vmem:[%s4424_s29 + $0x128] sm:$0xf] %v328_v10 }
  0x48   : > { %331 = vst [vmem:[%s4424_s29 + $0x12c] sm:$0xf] %v330_v11  ;;  %333 = vst [vmem:[%s4424_s29 + $0x130] sm:$0xf] %v332_v12  ;;  %v334_v13 = vld [vmem:[%s4417_s28 + $0x268] sm:$0xf] }
  0x49   : > { %v336_v14 = vld [vmem:[%s4417_s28 + $0x270] sm:$0xf]  ;;  %v338_v15 = vld [vmem:[%s4417_s28 + $0x278] sm:$0xf]  ;;  %335 = vst [vmem:[%s4424_s29 + $0x134] sm:$0xf] %v334_v13 }
  0x4a   : > { %337 = vst [vmem:[%s4424_s29 + $0x138] sm:$0xf] %v336_v14  ;;  %339 = vst [vmem:[%s4424_s29 + $0x13c] sm:$0xf] %v338_v15  ;;  %v340_v16 = vld [vmem:[%s4417_s28 + $0x280] sm:$0xf] }
  0x4b   : > { %v342_v17 = vld [vmem:[%s4417_s28 + $0x288] sm:$0xf]  ;;  %v344_v18 = vld [vmem:[%s4417_s28 + $0x290] sm:$0xf]  ;;  %341 = vst [vmem:[%s4424_s29 + $0x140] sm:$0xf] %v340_v16 }
  0x4c   : > { %343 = vst [vmem:[%s4424_s29 + $0x144] sm:$0xf] %v342_v17  ;;  %345 = vst [vmem:[%s4424_s29 + $0x148] sm:$0xf] %v344_v18  ;;  %v346_v19 = vld [vmem:[%s4417_s28 + $0x298] sm:$0xf] }
  0x4d   : > { %v348_v20 = vld [vmem:[%s4417_s28 + $0x2a0] sm:$0xf]  ;;  %v350_v21 = vld [vmem:[%s4417_s28 + $0x2a8] sm:$0xf]  ;;  %347 = vst [vmem:[%s4424_s29 + $0x14c] sm:$0xf] %v346_v19 }
  0x4e   : > { %349 = vst [vmem:[%s4424_s29 + $0x150] sm:$0xf] %v348_v20  ;;  %351 = vst [vmem:[%s4424_s29 + $0x154] sm:$0xf] %v350_v21  ;;  %v352_v22 = vld [vmem:[%s4417_s28 + $0x2b0] sm:$0xf] }
  0x4f   : > { %v354_v23 = vld [vmem:[%s4417_s28 + $0x2b8] sm:$0xf]  ;;  %v356_v24 = vld [vmem:[%s4417_s28 + $0x2c0] sm:$0xf]  ;;  %353 = vst [vmem:[%s4424_s29 + $0x158] sm:$0xf] %v352_v22 }
  0x50   : > { %355 = vst [vmem:[%s4424_s29 + $0x15c] sm:$0xf] %v354_v23  ;;  %357 = vst [vmem:[%s4424_s29 + $0x160] sm:$0xf] %v356_v24  ;;  %v358_v25 = vld [vmem:[%s4417_s28 + $0x2c8] sm:$0xf] }
  0x51   : > { %v360_v26 = vld [vmem:[%s4417_s28 + $0x2d0] sm:$0xf]  ;;  %v362_v27 = vld [vmem:[%s4417_s28 + $0x2d8] sm:$0xf]  ;;  %359 = vst [vmem:[%s4424_s29 + $0x164] sm:$0xf] %v358_v25 }
  0x52   : > { %361 = vst [vmem:[%s4424_s29 + $0x168] sm:$0xf] %v360_v26  ;;  %363 = vst [vmem:[%s4424_s29 + $0x16c] sm:$0xf] %v362_v27  ;;  %v364_v28 = vld [vmem:[%s4417_s28 + $0x2e0] sm:$0xf] }
  0x53   : > { %v366_v29 = vld [vmem:[%s4417_s28 + $0x2e8] sm:$0xf]  ;;  %v368_v30 = vld [vmem:[%s4417_s28 + $0x2f0] sm:$0xf]  ;;  %365 = vst [vmem:[%s4424_s29 + $0x170] sm:$0xf] %v364_v28 }
  0x54   : > { %367 = vst [vmem:[%s4424_s29 + $0x174] sm:$0xf] %v366_v29  ;;  %369 = vst [vmem:[%s4424_s29 + $0x178] sm:$0xf] %v368_v30  ;;  %v370_v31 = vld [vmem:[%s4417_s28 + $0x2f8] sm:$0xf] }
  0x55   : > { %v372_v32 = vld [vmem:[%s4417_s28 + $0x300] sm:$0xf]  ;;  %v374_v33 = vld [vmem:[%s4417_s28 + $0x308] sm:$0xf]  ;;  %371 = vst [vmem:[%s4424_s29 + $0x17c] sm:$0xf] %v370_v31 }
  0x56   : > { %373 = vst [vmem:[%s4424_s29 + $0x180] sm:$0xf] %v372_v32  ;;  %375 = vst [vmem:[%s4424_s29 + $0x184] sm:$0xf] %v374_v33  ;;  %v376_v34 = vld [vmem:[%s4417_s28 + $0x310] sm:$0xf] }
  0x57   : > { %v378_v35 = vld [vmem:[%s4417_s28 + $0x318] sm:$0xf]  ;;  %v380_v36 = vld [vmem:[%s4417_s28 + $0x320] sm:$0xf]  ;;  %377 = vst [vmem:[%s4424_s29 + $0x188] sm:$0xf] %v376_v34 }
  0x58   : > { %379 = vst [vmem:[%s4424_s29 + $0x18c] sm:$0xf] %v378_v35  ;;  %381 = vst [vmem:[%s4424_s29 + $0x190] sm:$0xf] %v380_v36  ;;  %v382_v37 = vld [vmem:[%s4417_s28 + $0x328] sm:$0xf] }
  0x59   : > { %v384_v38 = vld [vmem:[%s4417_s28 + $0x330] sm:$0xf]  ;;  %v386_v39 = vld [vmem:[%s4417_s28 + $0x338] sm:$0xf]  ;;  %383 = vst [vmem:[%s4424_s29 + $0x194] sm:$0xf] %v382_v37 }
  0x5a   : > { %385 = vst [vmem:[%s4424_s29 + $0x198] sm:$0xf] %v384_v38  ;;  %387 = vst [vmem:[%s4424_s29 + $0x19c] sm:$0xf] %v386_v39  ;;  %v388_v40 = vld [vmem:[%s4417_s28 + $0x340] sm:$0xf] }
  0x5b   : > { %v390_v41 = vld [vmem:[%s4417_s28 + $0x348] sm:$0xf]  ;;  %v392_v42 = vld [vmem:[%s4417_s28 + $0x350] sm:$0xf]  ;;  %389 = vst [vmem:[%s4424_s29 + $0x1a0] sm:$0xf] %v388_v40 }
  0x5c   : > { %391 = vst [vmem:[%s4424_s29 + $0x1a4] sm:$0xf] %v390_v41  ;;  %393 = vst [vmem:[%s4424_s29 + $0x1a8] sm:$0xf] %v392_v42  ;;  %v394_v43 = vld [vmem:[%s4417_s28 + $0x358] sm:$0xf] }
  0x5d   : > { %v396_v44 = vld [vmem:[%s4417_s28 + $0x360] sm:$0xf]  ;;  %v398_v45 = vld [vmem:[%s4417_s28 + $0x368] sm:$0xf]  ;;  %395 = vst [vmem:[%s4424_s29 + $0x1ac] sm:$0xf] %v394_v43 }
  0x5e   : > { %397 = vst [vmem:[%s4424_s29 + $0x1b0] sm:$0xf] %v396_v44  ;;  %399 = vst [vmem:[%s4424_s29 + $0x1b4] sm:$0xf] %v398_v45  ;;  %v400_v46 = vld [vmem:[%s4417_s28 + $0x370] sm:$0xf] }
  0x5f   : > { %v402_v47 = vld [vmem:[%s4417_s28 + $0x378] sm:$0xf]  ;;  %v404_v48 = vld [vmem:[%s4417_s28 + $0x380] sm:$0xf]  ;;  %401 = vst [vmem:[%s4424_s29 + $0x1b8] sm:$0xf] %v400_v46 }
  0x60   : > { %403 = vst [vmem:[%s4424_s29 + $0x1bc] sm:$0xf] %v402_v47  ;;  %405 = vst [vmem:[%s4424_s29 + $0x1c0] sm:$0xf] %v404_v48  ;;  %v406_v49 = vld [vmem:[%s4417_s28 + $0x388] sm:$0xf] }
  0x61   : > { %v408_v50 = vld [vmem:[%s4417_s28 + $0x390] sm:$0xf]  ;;  %v410_v51 = vld [vmem:[%s4417_s28 + $0x398] sm:$0xf]  ;;  %407 = vst [vmem:[%s4424_s29 + $0x1c4] sm:$0xf] %v406_v49 }
  0x62   : > { %409 = vst [vmem:[%s4424_s29 + $0x1c8] sm:$0xf] %v408_v50  ;;  %411 = vst [vmem:[%s4424_s29 + $0x1cc] sm:$0xf] %v410_v51  ;;  %v412_v52 = vld [vmem:[%s4417_s28 + $0x3a0] sm:$0xf] }
  0x63   : > { %v414_v53 = vld [vmem:[%s4417_s28 + $0x3a8] sm:$0xf]  ;;  %v416_v54 = vld [vmem:[%s4417_s28 + $0x3b0] sm:$0xf]  ;;  %413 = vst [vmem:[%s4424_s29 + $0x1d0] sm:$0xf] %v412_v52 }
  0x64   : > { %415 = vst [vmem:[%s4424_s29 + $0x1d4] sm:$0xf] %v414_v53  ;;  %417 = vst [vmem:[%s4424_s29 + $0x1d8] sm:$0xf] %v416_v54  ;;  %v418_v55 = vld [vmem:[%s4417_s28 + $0x3b8] sm:$0xf] }
  0x65   : > { %v420_v56 = vld [vmem:[%s4417_s28 + $0x3c0] sm:$0xf]  ;;  %v422_v57 = vld [vmem:[%s4417_s28 + $0x3c8] sm:$0xf]  ;;  %419 = vst [vmem:[%s4424_s29 + $0x1dc] sm:$0xf] %v418_v55 }
  0x66   : > { %421 = vst [vmem:[%s4424_s29 + $0x1e0] sm:$0xf] %v420_v56  ;;  %423 = vst [vmem:[%s4424_s29 + $0x1e4] sm:$0xf] %v422_v57  ;;  %v424_v58 = vld [vmem:[%s4417_s28 + $0x3d0] sm:$0xf] }
  0x67   : > { %v426_v59 = vld [vmem:[%s4417_s28 + $0x3d8] sm:$0xf]  ;;  %v428_v60 = vld [vmem:[%s4417_s28 + $0x3e0] sm:$0xf]  ;;  %425 = vst [vmem:[%s4424_s29 + $0x1e8] sm:$0xf] %v424_v58 }
  0x68   : > { %427 = vst [vmem:[%s4424_s29 + $0x1ec] sm:$0xf] %v426_v59  ;;  %429 = vst [vmem:[%s4424_s29 + $0x1f0] sm:$0xf] %v428_v60  ;;  %v430_v61 = vld [vmem:[%s4417_s28 + $0x3e8] sm:$0xf] }
  0x69   : > { %v432_v62 = vld [vmem:[%s4417_s28 + $0x3f0] sm:$0xf]  ;;  %v434_v63 = vld [vmem:[%s4417_s28 + $0x3f8] sm:$0xf]  ;;  %431 = vst [vmem:[%s4424_s29 + $0x1f4] sm:$0xf] %v430_v61 }
  0x6a   : > { %433 = vst [vmem:[%s4424_s29 + $0x1f8] sm:$0xf] %v432_v62  ;;  %435 = vst [vmem:[%s4424_s29 + $0x1fc] sm:$0xf] %v434_v63  ;;  %v436_v0 = vld [vmem:[%s4417_s28 + $0x400] sm:$0xf] }
  0x6b   : > { %v438_v1 = vld [vmem:[%s4417_s28 + $0x408] sm:$0xf]  ;;  %v440_v2 = vld [vmem:[%s4417_s28 + $0x410] sm:$0xf]  ;;  %437 = vst [vmem:[%s4424_s29 + $0x200] sm:$0xf] %v436_v0 }
  0x6c   : > { %439 = vst [vmem:[%s4424_s29 + $0x204] sm:$0xf] %v438_v1  ;;  %441 = vst [vmem:[%s4424_s29 + $0x208] sm:$0xf] %v440_v2  ;;  %v442_v3 = vld [vmem:[%s4417_s28 + $0x418] sm:$0xf] }
  0x6d   : > { %v444_v4 = vld [vmem:[%s4417_s28 + $0x420] sm:$0xf]  ;;  %v446_v5 = vld [vmem:[%s4417_s28 + $0x428] sm:$0xf]  ;;  %443 = vst [vmem:[%s4424_s29 + $0x20c] sm:$0xf] %v442_v3 }
  0x6e   : > { %445 = vst [vmem:[%s4424_s29 + $0x210] sm:$0xf] %v444_v4  ;;  %447 = vst [vmem:[%s4424_s29 + $0x214] sm:$0xf] %v446_v5  ;;  %v448_v6 = vld [vmem:[%s4417_s28 + $0x430] sm:$0xf] }
  0x6f   : > { %v450_v7 = vld [vmem:[%s4417_s28 + $0x438] sm:$0xf]  ;;  %v452_v8 = vld [vmem:[%s4417_s28 + $0x440] sm:$0xf]  ;;  %449 = vst [vmem:[%s4424_s29 + $0x218] sm:$0xf] %v448_v6 }
  0x70   : > { %451 = vst [vmem:[%s4424_s29 + $0x21c] sm:$0xf] %v450_v7  ;;  %453 = vst [vmem:[%s4424_s29 + $0x220] sm:$0xf] %v452_v8  ;;  %v454_v9 = vld [vmem:[%s4417_s28 + $0x448] sm:$0xf] }
  0x71   : > { %v456_v10 = vld [vmem:[%s4417_s28 + $0x450] sm:$0xf]  ;;  %v458_v11 = vld [vmem:[%s4417_s28 + $0x458] sm:$0xf]  ;;  %455 = vst [vmem:[%s4424_s29 + $0x224] sm:$0xf] %v454_v9 }
  0x72   : > { %457 = vst [vmem:[%s4424_s29 + $0x228] sm:$0xf] %v456_v10  ;;  %459 = vst [vmem:[%s4424_s29 + $0x22c] sm:$0xf] %v458_v11  ;;  %v460_v12 = vld [vmem:[%s4417_s28 + $0x460] sm:$0xf] }
  0x73   : > { %v462_v13 = vld [vmem:[%s4417_s28 + $0x468] sm:$0xf]  ;;  %v464_v14 = vld [vmem:[%s4417_s28 + $0x470] sm:$0xf]  ;;  %461 = vst [vmem:[%s4424_s29 + $0x230] sm:$0xf] %v460_v12 }
  0x74   : > { %463 = vst [vmem:[%s4424_s29 + $0x234] sm:$0xf] %v462_v13  ;;  %465 = vst [vmem:[%s4424_s29 + $0x238] sm:$0xf] %v464_v14  ;;  %v466_v15 = vld [vmem:[%s4417_s28 + $0x478] sm:$0xf] }
  0x75   : > { %v468_v16 = vld [vmem:[%s4417_s28 + $0x480] sm:$0xf]  ;;  %v470_v17 = vld [vmem:[%s4417_s28 + $0x488] sm:$0xf]  ;;  %467 = vst [vmem:[%s4424_s29 + $0x23c] sm:$0xf] %v466_v15 }
  0x76   : > { %469 = vst [vmem:[%s4424_s29 + $0x240] sm:$0xf] %v468_v16  ;;  %471 = vst [vmem:[%s4424_s29 + $0x244] sm:$0xf] %v470_v17  ;;  %v472_v18 = vld [vmem:[%s4417_s28 + $0x490] sm:$0xf] }
  0x77   : > { %v474_v19 = vld [vmem:[%s4417_s28 + $0x498] sm:$0xf]  ;;  %v476_v20 = vld [vmem:[%s4417_s28 + $0x4a0] sm:$0xf]  ;;  %473 = vst [vmem:[%s4424_s29 + $0x248] sm:$0xf] %v472_v18 }
  0x78   : > { %475 = vst [vmem:[%s4424_s29 + $0x24c] sm:$0xf] %v474_v19  ;;  %477 = vst [vmem:[%s4424_s29 + $0x250] sm:$0xf] %v476_v20  ;;  %v478_v21 = vld [vmem:[%s4417_s28 + $0x4a8] sm:$0xf] }
  0x79   : > { %v480_v22 = vld [vmem:[%s4417_s28 + $0x4b0] sm:$0xf]  ;;  %v482_v23 = vld [vmem:[%s4417_s28 + $0x4b8] sm:$0xf]  ;;  %479 = vst [vmem:[%s4424_s29 + $0x254] sm:$0xf] %v478_v21 }
  0x7a   : > { %481 = vst [vmem:[%s4424_s29 + $0x258] sm:$0xf] %v480_v22  ;;  %483 = vst [vmem:[%s4424_s29 + $0x25c] sm:$0xf] %v482_v23  ;;  %v484_v24 = vld [vmem:[%s4417_s28 + $0x4c0] sm:$0xf] }
  0x7b   : > { %v486_v25 = vld [vmem:[%s4417_s28 + $0x4c8] sm:$0xf]  ;;  %v488_v26 = vld [vmem:[%s4417_s28 + $0x4d0] sm:$0xf]  ;;  %485 = vst [vmem:[%s4424_s29 + $0x260] sm:$0xf] %v484_v24 }
  0x7c   : > { %487 = vst [vmem:[%s4424_s29 + $0x264] sm:$0xf] %v486_v25  ;;  %489 = vst [vmem:[%s4424_s29 + $0x268] sm:$0xf] %v488_v26  ;;  %v490_v27 = vld [vmem:[%s4417_s28 + $0x4d8] sm:$0xf] }
  0x7d   : > { %v492_v28 = vld [vmem:[%s4417_s28 + $0x4e0] sm:$0xf]  ;;  %v494_v29 = vld [vmem:[%s4417_s28 + $0x4e8] sm:$0xf]  ;;  %491 = vst [vmem:[%s4424_s29 + $0x26c] sm:$0xf] %v490_v27 }
  0x7e   : > { %493 = vst [vmem:[%s4424_s29 + $0x270] sm:$0xf] %v492_v28  ;;  %495 = vst [vmem:[%s4424_s29 + $0x274] sm:$0xf] %v494_v29  ;;  %v496_v30 = vld [vmem:[%s4417_s28 + $0x4f0] sm:$0xf] }
  0x7f   : > { %v498_v31 = vld [vmem:[%s4417_s28 + $0x4f8] sm:$0xf]  ;;  %v500_v32 = vld [vmem:[%s4417_s28 + $0x500] sm:$0xf]  ;;  %497 = vst [vmem:[%s4424_s29 + $0x278] sm:$0xf] %v496_v30 }
  0x80   : > { %499 = vst [vmem:[%s4424_s29 + $0x27c] sm:$0xf] %v498_v31  ;;  %501 = vst [vmem:[%s4424_s29 + $0x280] sm:$0xf] %v500_v32  ;;  %v502_v33 = vld [vmem:[%s4417_s28 + $0x508] sm:$0xf] }
  0x81   : > { %v504_v34 = vld [vmem:[%s4417_s28 + $0x510] sm:$0xf]  ;;  %v506_v35 = vld [vmem:[%s4417_s28 + $0x518] sm:$0xf]  ;;  %503 = vst [vmem:[%s4424_s29 + $0x284] sm:$0xf] %v502_v33 }
  0x82   : > { %505 = vst [vmem:[%s4424_s29 + $0x288] sm:$0xf] %v504_v34  ;;  %507 = vst [vmem:[%s4424_s29 + $0x28c] sm:$0xf] %v506_v35  ;;  %v508_v36 = vld [vmem:[%s4417_s28 + $0x520] sm:$0xf] }
  0x83   : > { %v510_v37 = vld [vmem:[%s4417_s28 + $0x528] sm:$0xf]  ;;  %v512_v38 = vld [vmem:[%s4417_s28 + $0x530] sm:$0xf]  ;;  %509 = vst [vmem:[%s4424_s29 + $0x290] sm:$0xf] %v508_v36 }
  0x84   : > { %511 = vst [vmem:[%s4424_s29 + $0x294] sm:$0xf] %v510_v37  ;;  %513 = vst [vmem:[%s4424_s29 + $0x298] sm:$0xf] %v512_v38  ;;  %v514_v39 = vld [vmem:[%s4417_s28 + $0x538] sm:$0xf] }
  0x85   : > { %v516_v40 = vld [vmem:[%s4417_s28 + $0x540] sm:$0xf]  ;;  %v518_v41 = vld [vmem:[%s4417_s28 + $0x548] sm:$0xf]  ;;  %515 = vst [vmem:[%s4424_s29 + $0x29c] sm:$0xf] %v514_v39 }
  0x86   : > { %517 = vst [vmem:[%s4424_s29 + $0x2a0] sm:$0xf] %v516_v40  ;;  %519 = vst [vmem:[%s4424_s29 + $0x2a4] sm:$0xf] %v518_v41  ;;  %v520_v42 = vld [vmem:[%s4417_s28 + $0x550] sm:$0xf] }
  0x87   : > { %v522_v43 = vld [vmem:[%s4417_s28 + $0x558] sm:$0xf]  ;;  %v524_v44 = vld [vmem:[%s4417_s28 + $0x560] sm:$0xf]  ;;  %521 = vst [vmem:[%s4424_s29 + $0x2a8] sm:$0xf] %v520_v42 }
  0x88   : > { %523 = vst [vmem:[%s4424_s29 + $0x2ac] sm:$0xf] %v522_v43  ;;  %525 = vst [vmem:[%s4424_s29 + $0x2b0] sm:$0xf] %v524_v44  ;;  %v526_v45 = vld [vmem:[%s4417_s28 + $0x568] sm:$0xf] }
  0x89   : > { %v528_v46 = vld [vmem:[%s4417_s28 + $0x570] sm:$0xf]  ;;  %v530_v47 = vld [vmem:[%s4417_s28 + $0x578] sm:$0xf]  ;;  %527 = vst [vmem:[%s4424_s29 + $0x2b4] sm:$0xf] %v526_v45 }
  0x8a   : > { %529 = vst [vmem:[%s4424_s29 + $0x2b8] sm:$0xf] %v528_v46  ;;  %531 = vst [vmem:[%s4424_s29 + $0x2bc] sm:$0xf] %v530_v47  ;;  %v532_v48 = vld [vmem:[%s4417_s28 + $0x580] sm:$0xf] }
  0x8b   : > { %v534_v49 = vld [vmem:[%s4417_s28 + $0x588] sm:$0xf]  ;;  %v536_v50 = vld [vmem:[%s4417_s28 + $0x590] sm:$0xf]  ;;  %533 = vst [vmem:[%s4424_s29 + $0x2c0] sm:$0xf] %v532_v48 }
  0x8c   : > { %535 = vst [vmem:[%s4424_s29 + $0x2c4] sm:$0xf] %v534_v49  ;;  %537 = vst [vmem:[%s4424_s29 + $0x2c8] sm:$0xf] %v536_v50  ;;  %v538_v51 = vld [vmem:[%s4417_s28 + $0x598] sm:$0xf] }
  0x8d   : > { %v540_v52 = vld [vmem:[%s4417_s28 + $0x5a0] sm:$0xf]  ;;  %v542_v53 = vld [vmem:[%s4417_s28 + $0x5a8] sm:$0xf]  ;;  %539 = vst [vmem:[%s4424_s29 + $0x2cc] sm:$0xf] %v538_v51 }
  0x8e   : > { %541 = vst [vmem:[%s4424_s29 + $0x2d0] sm:$0xf] %v540_v52  ;;  %543 = vst [vmem:[%s4424_s29 + $0x2d4] sm:$0xf] %v542_v53  ;;  %v544_v54 = vld [vmem:[%s4417_s28 + $0x5b0] sm:$0xf] }
  0x8f   : > { %v546_v55 = vld [vmem:[%s4417_s28 + $0x5b8] sm:$0xf]  ;;  %v548_v56 = vld [vmem:[%s4417_s28 + $0x5c0] sm:$0xf]  ;;  %545 = vst [vmem:[%s4424_s29 + $0x2d8] sm:$0xf] %v544_v54 }
  0x90   : > { %547 = vst [vmem:[%s4424_s29 + $0x2dc] sm:$0xf] %v546_v55  ;;  %549 = vst [vmem:[%s4424_s29 + $0x2e0] sm:$0xf] %v548_v56  ;;  %v550_v57 = vld [vmem:[%s4417_s28 + $0x5c8] sm:$0xf] }
  0x91   : > { %v552_v58 = vld [vmem:[%s4417_s28 + $0x5d0] sm:$0xf]  ;;  %v554_v59 = vld [vmem:[%s4417_s28 + $0x5d8] sm:$0xf]  ;;  %551 = vst [vmem:[%s4424_s29 + $0x2e4] sm:$0xf] %v550_v57 }
  0x92   : > { %553 = vst [vmem:[%s4424_s29 + $0x2e8] sm:$0xf] %v552_v58  ;;  %555 = vst [vmem:[%s4424_s29 + $0x2ec] sm:$0xf] %v554_v59  ;;  %v556_v60 = vld [vmem:[%s4417_s28 + $0x5e0] sm:$0xf] }
  0x93   : > { %v558_v61 = vld [vmem:[%s4417_s28 + $0x5e8] sm:$0xf]  ;;  %v560_v62 = vld [vmem:[%s4417_s28 + $0x5f0] sm:$0xf]  ;;  %557 = vst [vmem:[%s4424_s29 + $0x2f0] sm:$0xf] %v556_v60 }
  0x94   : > { %559 = vst [vmem:[%s4424_s29 + $0x2f4] sm:$0xf] %v558_v61  ;;  %561 = vst [vmem:[%s4424_s29 + $0x2f8] sm:$0xf] %v560_v62  ;;  %v562_v63 = vld [vmem:[%s4417_s28 + $0x5f8] sm:$0xf] }
  0x95   : > { %v564_v0 = vld [vmem:[%s4417_s28 + $0x600] sm:$0xf]  ;;  %v566_v1 = vld [vmem:[%s4417_s28 + $0x608] sm:$0xf]  ;;  %563 = vst [vmem:[%s4424_s29 + $0x2fc] sm:$0xf] %v562_v63 }
  0x96   : > { %565 = vst [vmem:[%s4424_s29 + $0x300] sm:$0xf] %v564_v0  ;;  %567 = vst [vmem:[%s4424_s29 + $0x304] sm:$0xf] %v566_v1  ;;  %v568_v2 = vld [vmem:[%s4417_s28 + $0x610] sm:$0xf] }
  0x97   : > { %v570_v3 = vld [vmem:[%s4417_s28 + $0x618] sm:$0xf]  ;;  %v572_v4 = vld [vmem:[%s4417_s28 + $0x620] sm:$0xf]  ;;  %569 = vst [vmem:[%s4424_s29 + $0x308] sm:$0xf] %v568_v2 }
  0x98   : > { %571 = vst [vmem:[%s4424_s29 + $0x30c] sm:$0xf] %v570_v3  ;;  %573 = vst [vmem:[%s4424_s29 + $0x310] sm:$0xf] %v572_v4  ;;  %v574_v5 = vld [vmem:[%s4417_s28 + $0x628] sm:$0xf] }
  0x99   : > { %v576_v6 = vld [vmem:[%s4417_s28 + $0x630] sm:$0xf]  ;;  %v578_v7 = vld [vmem:[%s4417_s28 + $0x638] sm:$0xf]  ;;  %575 = vst [vmem:[%s4424_s29 + $0x314] sm:$0xf] %v574_v5 }
  0x9a   : > { %577 = vst [vmem:[%s4424_s29 + $0x318] sm:$0xf] %v576_v6  ;;  %579 = vst [vmem:[%s4424_s29 + $0x31c] sm:$0xf] %v578_v7 }
  0x9b PF: > { %p3346_p8 = scmp.ge.s32.totalorder %s4345_s16, 1  ;;  %p1007_p9 = scmp.lt.s32.totalorder %s4345_s16, 3 }
  0x9d   : > { %p1008_p10 = pnand %p3346_p8, %p1007_p9 }
  0x9e   : > { %s1014_s30 = sand.u32 (!%p1008_p10), 1, %s4329_s12   ;;  %v4092_v8 = vld [vmem:[%s5401_s0 + $0x1a4] ss:$52 sps:$4 sm:$0xff] (!%p1008_p10)   ;;  %v4090_v27 = vld [vmem:[%s5401_s0 + $0x1a0] ss:$52 sps:$4 sm:$0xff] (!%p1008_p10)   ;;  %vm4348_vm0 = vmmov (!%p1008_p10), 0  }
  0x9f   : > { %1011 = sbr.rel (%p1008_p10) target bundleno = 622 (0x26e), region = 69  ;;  %v4096_v9 = vld [vmem:[%s5401_s0 + $0x4] ss:$52 sps:$4 sm:$0xff] (!%p1008_p10)   ;;  %2503 = vmatprep.mubr.bf16.mxu1 (!%p1008_p10), %v4092_v8  ;;  %v4094_v28 = vld [vmem:[%s5401_s0] ss:$52 sps:$4 sm:$0xff] (!%p1008_p10)   ;;  %vm2417_vm1 = vcmask (!%p1008_p10), 523264  }
  0xa0   : > { %s4030_s4 = smul.u32 (!%p1008_p10), 800, %s1014_s30  ;;  %2471 = vmatprep.mubr.bf16.mxu0 (!%p1008_p10), %v4096_v9  ;;  %v4105_v33 = vld [vmem:[%s5401_s0 + $0x6c] ss:$52 sps:$4 sm:$0xff] (!%p1008_p10)   ;;  %v4108_v39 = vld [vmem:[%s5401_s0 + $0x68] ss:$52 sps:$4 sm:$0xff] (!%p1008_p10)   ;;  %p1052_p11 = scmp.lt.s32.totalorder (!%p1008_p10), %s4337_s14, 1 }
  0xa1   : > { %v4112_v35 = vld [vmem:[%s5401_s0 + $0x20c] ss:$52 sps:$4 sm:$0xff] (!%p1008_p10)   ;;  %v4115_v43 = vld [vmem:[%s5401_s0 + $0x208] ss:$52 sps:$4 sm:$0xff] (!%p1008_p10)   ;;  %v4122_v51 = vld [vmem:[%s5401_s0 + $0xd0] ss:$52 sps:$4 sm:$0xff] (!%p1008_p10)  }
  0xa2   : > { %s4832_s9 = scalar_lea.vmem (!%p1008_p10), [#allocation2], %s4030_s4  ;;  %v4119_v47 = vld [vmem:[%s5401_s0 + $0xd4] ss:$52 sps:$4 sm:$0xff] (!%p1008_p10)   ;;  %v4129_v55 = vld [vmem:[%s5401_s0 + $0x270] ss:$52 sps:$4 sm:$0xff] (!%p1008_p10)   ;;  %s4031_s26 = smul.u32 (!%p1008_p10), 56, %s1014_s30 }
  0xa3   : > { %v4074_v10 = vld [vmem:[%s4832_s9 + $0x40] sm:$0xff] (!%p1008_p10)   ;;  %v4076_v12 = vld [vmem:[%s4832_s9 + $0x48] sm:$0xff] (!%p1008_p10)   ;;  %v4078_v14 = vld [vmem:[%s4832_s9 + $0x50] sm:$0xff] (!%p1008_p10)  }
  0xa4   : > { %v4075_v11 = vld [vmem:[%s4832_s9] sm:$0xff] (!%p1008_p10)   ;;  %4013 = vmatprep.subr.bf16.mxu1 (!%p1008_p10), %v4074_v10  ;;  %3618 = vmatprep.subr.bf16.mxu0 (!%p1008_p10), %v4074_v10  ;;  %v4077_v13 = vld [vmem:[%s4832_s9 + $0x8] sm:$0xff] (!%p1008_p10)   ;;  %v4079_v15 = vld [vmem:[%s4832_s9 + $0x10] sm:$0xff] (!%p1008_p10)   ;;  %s5346_s27 = scalar_lea.vmem (!%p1008_p10), [#allocation3], %s4031_s26 }
  0xa5   : > { %4021 = vmatpush3.bf16.msra.mxu1 (!%p1008_p10), %v4075_v11  ;;  %3619 = vmatpush3.bf16.msra.mxu0 (!%p1008_p10), %v4075_v11  ;;  %v4080_v16 = vld [vmem:[%s4832_s9 + $0x58] sm:$0xff] (!%p1008_p10)   ;;  %v4082_v18 = vld [vmem:[%s4832_s9 + $0x60] sm:$0xff] (!%p1008_p10)   ;;  %v4084_v20 = vld [vmem:[%s4832_s9 + $0x68] sm:$0xff] (!%p1008_p10)  }
  0xa6   : > { %4014 = vmatprep.subr.bf16.mxu1 %v4076_v12  ;;  %3620 = vmatprep.subr.bf16.mxu0 %v4076_v12  ;;  %v4081_v17 = vld [vmem:[%s4832_s9 + $0x18] sm:$0xff]   ;;  %v4083_v19 = vld [vmem:[%s4832_s9 + $0x20] sm:$0xff]   ;;  %v4085_v21 = vld [vmem:[%s4832_s9 + $0x28] sm:$0xff]   ;;  %s3560_s12 = sshll.u32 (%p4404_p6), %s4337_s14, 2 }
  0xa7   : > { %v4086_v22 = vld [vmem:[%s4832_s9 + $0x70] sm:$0xff]   ;;  %v4088_v24 = vld [vmem:[%s4832_s9 + $0x78] sm:$0xff]   ;;  %v4093_v26 = vld [vmem:[%s4832_s9 + $0xc0] sm:$0xff]   ;;  %s3157_s29 = scalar_lea.vmem (%p4404_p6), %s5404_s3, %s3560_s12 }
  0xa8   : > { %v4087_v23 = vld [vmem:[%s4832_s9 + $0x30] sm:$0xff]   ;;  %v4089_v25 = vld [vmem:[%s4832_s9 + $0x38] sm:$0xff]   ;;  %v4098_v29 = vld [vmem:[%s4832_s9 + $0x140] sm:$0xff]  }
  0xa9   : > { %4022 = vmatpush3.bf16.msra.mxu1 %v4077_v13  ;;  %3621 = vmatpush3.bf16.msra.mxu0 %v4077_v13  ;;  %v4097_v30 = vld [vmem:[%s4832_s9 + $0x80] sm:$0xff]   ;;  %v4100_v32 = vld [vmem:[%s4832_s9 + $0xc8] sm:$0xff]   ;;  %v4104_v38 = vld [vmem:[%s4832_s9 + $0xd0] sm:$0xff]  }
  0xaa   : > { %4015 = vmatprep.subr.bf16.mxu1 %v4078_v14  ;;  %3622 = vmatprep.subr.bf16.mxu0 %v4078_v14  ;;  %v4099_v31 = vld [vmem:[%s4832_s9 + $0x100] sm:$0xff]   ;;  %v4102_v34 = vld [vmem:[%s4832_s9 + $0x148] sm:$0xff]   ;;  %v4109_v40 = vld [vmem:[%s4832_s9 + $0x150] sm:$0xff]  }
  0xab   : > { %v4101_v36 = vld [vmem:[%s4832_s9 + $0x88] sm:$0xff]   ;;  %v4107_v41 = vld [vmem:[%s4832_s9 + $0x90] sm:$0xff]   ;;  %v4111_v44 = vld [vmem:[%s4832_s9 + $0xd8] sm:$0xff]  }
  0xac   : > { %v4103_v37 = vld [vmem:[%s4832_s9 + $0x108] sm:$0xff]   ;;  %v4110_v42 = vld [vmem:[%s4832_s9 + $0x110] sm:$0xff]   ;;  %v4116_v45 = vld [vmem:[%s4832_s9 + $0x158] sm:$0xff]  }
  0xad   : > { %4023 = vmatpush3.bf16.msra.mxu1 %v4079_v15  ;;  %3623 = vmatpush3.bf16.msra.mxu0 %v4079_v15  ;;  %v4114_v46 = vld [vmem:[%s4832_s9 + $0x98] sm:$0xff]   ;;  %v4126_v48 = vld [vmem:[%s5401_s0 + $0x274] ss:$52 sps:$4 sm:$0xff]   ;;  %v4118_v50 = vld [vmem:[%s4832_s9 + $0xe0] sm:$0xff]  }
  0xae   : > { %4016 = vmatprep.subr.bf16.mxu1 %v4080_v16  ;;  %3624 = vmatprep.subr.bf16.mxu0 %v4080_v16  ;;  %v4117_v49 = vld [vmem:[%s4832_s9 + $0x118] sm:$0xff]   ;;  %v4123_v52 = vld [vmem:[%s4832_s9 + $0x160] sm:$0xff]   ;;  %v4125_v56 = vld [vmem:[%s4832_s9 + $0xe8] sm:$0xff]  }
  0xaf   : > { %v4121_v53 = vld [vmem:[%s4832_s9 + $0xa0] sm:$0xff]   ;;  %v4130_v57 = vld [vmem:[%s4832_s9 + $0x168] sm:$0xff]   ;;  %v4133_v59 = vld [vmem:[%s5401_s0 + $0x13c] ss:$52 sps:$4 sm:$0xff]  }
  0xb0   : > { %v4124_v54 = vld [vmem:[%s4832_s9 + $0x120] sm:$0xff]   ;;  %v4128_v58 = vld [vmem:[%s4832_s9 + $0xa8] sm:$0xff]   ;;  %v4132_v61 = vld [vmem:[%s4832_s9 + $0xf0] sm:$0xff]  }
  0xb1   : > { %4024 = vmatpush3.bf16.msra.mxu1 %v4081_v17  ;;  %3625 = vmatpush3.bf16.msra.mxu0 %v4081_v17  ;;  %v4131_v60 = vld [vmem:[%s4832_s9 + $0x128] sm:$0xff]   ;;  %v4137_v62 = vld [vmem:[%s4832_s9 + $0x170] sm:$0xff]   ;;  %v4139_v3 = vld [vmem:[%s4832_s9 + $0xf8] sm:$0xff]  }
  0xb2   : > { %4017 = vmatprep.subr.bf16.mxu1 %v4082_v18  ;;  %3626 = vmatprep.subr.bf16.mxu0 %v4082_v18  ;;  %v4135_v63 = vld [vmem:[%s4832_s9 + $0xb0] sm:$0xff]   ;;  %v4144_v0 = vld [vmem:[%s5401_s0 + $0xc] ss:$52 sps:$4 sm:$0xff]   ;;  %v4141_v4 = vld [vmem:[%s4832_s9 + $0x178] sm:$0xff]  }
  0xb3   : > { %v4136_v1 = vld [vmem:[%s5401_s0 + $0x138] ss:$52 sps:$4 sm:$0xff]   ;;  %v4138_v2 = vld [vmem:[%s4832_s9 + $0x130] sm:$0xff]   ;;  %v4146_v8 = vld [vmem:[%s4832_s9 + $0x1c0] sm:$0xff]  }
  0xb4   : > { %v4140_v5 = vld [vmem:[%s4832_s9 + $0xb8] sm:$0xff]   ;;  %v4149_v6 = vld [vmem:[%s5401_s0 + $0x14] ss:$52 sps:$4 sm:$0xff]   ;;  %v4147_v10 = vld [vmem:[%s5401_s0 + $0x10] ss:$52 sps:$4 sm:$0xff]  }
  0xb5   : > { %4025 = vmatpush3.bf16.msra.mxu1 %v4083_v19  ;;  %3627 = vmatpush3.bf16.msra.mxu0 %v4083_v19  ;;  %v4145_v7 = vld [vmem:[%s4832_s9 + $0x138] sm:$0xff]   ;;  %v4151_v11 = vld [vmem:[%s4832_s9 + $0x240] sm:$0xff]   ;;  %v4153_v14 = vld [vmem:[%s5401_s0 + $0x74] ss:$52 sps:$4 sm:$0xff]  }
  0xb6   : > { %4018 = vmatprep.subr.bf16.mxu1 %v4084_v20  ;;  %3628 = vmatprep.subr.bf16.mxu0 %v4084_v20  ;;  %v4142_v9 = vld [vmem:[%s5401_s0 + $0x8] ss:$52 sps:$4 sm:$0xff]   ;;  %v4150_v12 = vld [vmem:[%s4832_s9 + $0x180] sm:$0xff]  }
  0xb7   : > { %v4152_v13 = vld [vmem:[%s4832_s9 + $0x200] sm:$0xff]   ;;  %v4155_v15 = vld [vmem:[%s4832_s9 + $0x1c8] sm:$0xff]   ;;  %v4158_v16 = vld [vmem:[%s5401_s0 + $0x7c] ss:$52 sps:$4 sm:$0xff]  }
  0xb8   : > { %v4161_v17 = vld [vmem:[%s4832_s9 + $0x248] sm:$0xff]   ;;  %v4156_v20 = vld [vmem:[%s5401_s0 + $0x70] ss:$52 sps:$4 sm:$0xff]  }
  0xb9   : > { %4026 = vmatpush3.bf16.msra.mxu1 %v4085_v21  ;;  %3629 = vmatpush3.bf16.msra.mxu0 %v4085_v21  ;;  %v4157_v18 = vld [vmem:[%s4832_s9 + $0x188] sm:$0xff]   ;;  %v4163_v21 = vld [vmem:[%s4832_s9 + $0x1d0] sm:$0xff]  }
  0xba   : > { %4019 = vmatprep.subr.bf16.mxu1 %v4086_v22  ;;  %3630 = vmatprep.subr.bf16.mxu0 %v4086_v22  ;;  %v4162_v19 = vld [vmem:[%s4832_s9 + $0x208] sm:$0xff]  }
  0xbb   : > { %v4160_v22 = vld [vmem:[%s5401_s0 + $0x78] ss:$52 sps:$4 sm:$0xff]  }
  0xbd   : > { %4027 = vmatpush3.bf16.msra.mxu1 %v4087_v23  ;;  %3631 = vmatpush3.bf16.msra.mxu0 %v4087_v23  ;;  %v4164_v23 = vld [vmem:[%s5401_s0 + $0xdc] ss:$52 sps:$4 sm:$0xff]  }
  0xbe   : > { %4020 = vmatprep.subr.bf16.mxu1 %v4088_v24  ;;  %3632 = vmatprep.subr.bf16.mxu0 %v4088_v24  ;;  %v4166_v24 = vld [vmem:[%s4832_s9 + $0x190] sm:$0xff]  }
  0xc1   : > { %4028 = vmatpush3.bf16.msra.mxu1 %v4089_v25  ;;  %3633 = vmatpush3.bf16.msra.mxu0 %v4089_v25  ;;  %v4168_v25 = vld [vmem:[%s5401_s0 + $0xe4] ss:$52 sps:$4 sm:$0xff]  }
  0xc2   : > { %3676 = vmatprep.subr.bf16.mxu1 %v4093_v26  ;;  %3734 = vmatprep.subr.bf16.mxu0 %v4098_v29  ;;  %v4171_v26 = vld [vmem:[%s4832_s9 + $0x250] sm:$0xff]   ;;  %v4174_v29 = vld [vmem:[%s4832_s9 + $0x198] sm:$0xff]  }
  0xc4   : > { %2504 = vmatmul.mubr.bf16.vlgmr.msra.gmra.mrb[0].mxu1 %v4090_v27  ;;  %2472 = vmatmul.mubr.bf16.vlgmr.msra.gmra.mrb[0].mxu0 %v4094_v28  ;;  %v4172_v27 = vld [vmem:[%s4832_s9 + $0x210] sm:$0xff]   ;;  %v4173_v28 = vld [vmem:[%s4832_s9 + $0x1d8] sm:$0xff]  }
  0xc5   : > { %3677 = vmatpush3.bf16.msra.mxu1 %v4097_v30  ;;  %3735 = vmatpush3.bf16.msra.mxu0 %v4099_v31  ;;  %v4167_v30 = vld [vmem:[%s5401_s0 + $0xd8] ss:$52 sps:$4 sm:$0xff]   ;;  %v4170_v31 = vld [vmem:[%s5401_s0 + $0xe0] ss:$52 sps:$4 sm:$0xff]  }
  0xc6   : > { %3678 = vmatprep.subr.bf16.mxu1 %v4100_v32  ;;  %3736 = vmatprep.subr.bf16.mxu0 %v4102_v34  ;;  %v4175_v32 = vld [vmem:[%s5401_s0 + $0x144] ss:$52 sps:$4 sm:$0xff]  }
  0xc7   : > { %2479 = vmatprep.mubr.bf16.mxu0 %v4105_v33  ;;  %2511 = vmatprep.mubr.bf16.mxu1 %v4112_v35  ;;  %v4178_v33 = vld [vmem:[%s5401_s0 + $0x14c] ss:$52 sps:$4 sm:$0xff]   ;;  %v4181_v34 = vld [vmem:[%s4832_s9 + $0x258] sm:$0xff]  }
  0xc8   : > { %v4182_v35 = vld [vmem:[%s4832_s9 + $0x218] sm:$0xff]  }
  0xc9   : > { %3679 = vmatpush3.bf16.msra.mxu1 %v4101_v36  ;;  %3737 = vmatpush3.bf16.msra.mxu0 %v4103_v37  ;;  %v4183_v36 = vld [vmem:[%s4832_s9 + $0x1e0] sm:$0xff]  }
  0xca   : > { %3680 = vmatprep.subr.bf16.mxu1 %v4104_v38  ;;  %3738 = vmatprep.subr.bf16.mxu0 %v4109_v40  ;;  %v4184_v37 = vld [vmem:[%s4832_s9 + $0x1a0] sm:$0xff]  }
  0xcb   : > { %v4177_v38 = vld [vmem:[%s5401_s0 + $0x140] ss:$52 sps:$4 sm:$0xff]  }
  0xcc   : > { %2480 = vmatmul.mubr.bf16.gmra.mrb[4].mxu0 %v4108_v39  ;;  %2512 = vmatmul.mubr.bf16.gmra.mrb[4].mxu1 %v4115_v43  ;;  %v4180_v39 = vld [vmem:[%s5401_s0 + $0x148] ss:$52 sps:$4 sm:$0xff]   ;;  %v4185_v40 = vld [vmem:[%s5401_s0 + $0x1ac] ss:$52 sps:$4 sm:$0xff]  }
  0xcd   : > { %3681 = vmatpush3.bf16.msra.mxu1 %v4107_v41  ;;  %3739 = vmatpush3.bf16.msra.mxu0 %v4110_v42  ;;  %v4188_v41 = vld [vmem:[%s5401_s0 + $0x1b4] ss:$52 sps:$4 sm:$0xff]   ;;  %v4190_v42 = vld [vmem:[%s4832_s9 + $0x260] sm:$0xff]  }
  0xce   : > { %3682 = vmatprep.subr.bf16.mxu1 %v4111_v44  ;;  %3740 = vmatprep.subr.bf16.mxu0 %v4116_v45  ;;  %v4192_v43 = vld [vmem:[%s4832_s9 + $0x220] sm:$0xff]   ;;  %v4193_v44 = vld [vmem:[%s4832_s9 + $0x1e8] sm:$0xff]  }
  0xcf   : > { %2487 = vmatprep.mubr.bf16.mxu0 %v4119_v47  ;;  %2519 = vmatprep.mubr.bf16.mxu1 %v4126_v48  ;;  %v4194_v45 = vld [vmem:[%s4832_s9 + $0x1a8] sm:$0xff]   ;;  %v4191_v48 = vld [vmem:[%s5401_s0 + $0x1b0] ss:$52 sps:$4 sm:$0xff]  }
  0xd0   : > { %v4187_v47 = vld [vmem:[%s5401_s0 + $0x1a8] ss:$52 sps:$4 sm:$0xff]  }
  0xd1   : > { %3683 = vmatpush3.bf16.msra.mxu1 %v4114_v46  ;;  %3741 = vmatpush3.bf16.msra.mxu0 %v4117_v49  ;;  %v4198_v46 = vld [vmem:[%s4832_s9 + $0x268] sm:$0xff]  }
  0xd2   : > { %3684 = vmatprep.subr.bf16.mxu1 %v4118_v50  ;;  %3742 = vmatprep.subr.bf16.mxu0 %v4123_v52  ;;  %v4201_v49 = vld [vmem:[%s4832_s9 + $0x228] sm:$0xff]   ;;  %v4203_v52 = vld [vmem:[%s4832_s9 + $0x1f0] sm:$0xff]  }
  0xd3   : > { %v4195_v50 = vld [vmem:[%s5401_s0 + $0x214] ss:$52 sps:$4 sm:$0xff]  }
  0xd4   : > { %2488 = vmatmul.mubr.bf16.gmra.mrb[8].mxu0 %v4122_v51  ;;  %2520 = vmatmul.mubr.bf16.gmra.mrb[8].mxu1 %v4129_v55  ;;  %v4199_v51 = vld [vmem:[%s5401_s0 + $0x21c] ss:$52 sps:$4 sm:$0xff]  }
  0xd5   : > { %3685 = vmatpush3.bf16.msra.mxu1 %v4121_v53  ;;  %3743 = vmatpush3.bf16.msra.mxu0 %v4124_v54  ;;  %v4204_v53 = vld [vmem:[%s4832_s9 + $0x1b0] sm:$0xff]  }
  0xd6   : > { %3686 = vmatprep.subr.bf16.mxu1 %v4125_v56  ;;  %3744 = vmatprep.subr.bf16.mxu0 %v4130_v57  ;;  %v4207_v54 = vld [vmem:[%s4832_s9 + $0x270] sm:$0xff]   ;;  %v4202_v57 = vld [vmem:[%s5401_s0 + $0x218] ss:$52 sps:$4 sm:$0xff]  }
  0xd7   : > { %2495 = vmatprep.mubr.bf16.mxu0 %v4133_v59  ;;  %2560 = vmatprep.mubr.bf16.mxu1 %v4144_v0  ;;  %v4209_v55 = vld [vmem:[%s4832_s9 + $0x230] sm:$0xff]   ;;  %v4220_v0 = vld [vmem:[%s4832_s9 + $0x2c0] sm:$0xff]  }
  0xd8   : > { %v4197_v56 = vld [vmem:[%s5401_s0 + $0x210] ss:$52 sps:$4 sm:$0xff]  }
  0xd9   : > { %3687 = vmatpush3.bf16.msra.mxu1 %v4128_v58  ;;  %3745 = vmatpush3.bf16.msra.mxu0 %v4131_v60  ;;  %v4212_v58 = vld [vmem:[%s4832_s9 + $0x1f8] sm:$0xff]  }
  0xda   : > { %3688 = vmatprep.subr.bf16.mxu1 %v4132_v61  ;;  %3746 = vmatprep.subr.bf16.mxu0 %v4137_v62  ;;  %v4205_v59 = vld [vmem:[%s5401_s0 + $0x27c] ss:$52 sps:$4 sm:$0xff]   ;;  %v4210_v62 = vld [vmem:[%s5401_s0 + $0x284] ss:$52 sps:$4 sm:$0xff]  }
  0xdb   : > { %v4214_v60 = vld [vmem:[%s4832_s9 + $0x1b8] sm:$0xff]  }
  0xdc   : > { %2496 = vmatmul.mubr.bf16.gmra.mrb[12].mxu0 %v4136_v1  ;;  %v4215_v61 = vld [vmem:[%s4832_s9 + $0x278] sm:$0xff]  }
  0xdd   : > { %3689 = vmatpush3.bf16.msra.mxu1 %v4135_v63  ;;  %3747 = vmatpush3.bf16.msra.mxu0 %v4138_v2  ;;  %v4219_v63 = vld [vmem:[%s4832_s9 + $0x238] sm:$0xff]   ;;  %v4347_v2 = vmov 0.0  }
  0xde   : > { %3690 = vmatprep.subr.bf16.mxu1 %v4139_v3  ;;  %3748 = vmatprep.subr.bf16.mxu0 %v4141_v4  ;;  %v4208_v1 = vld [vmem:[%s5401_s0 + $0x278] ss:$52 sps:$4 sm:$0xff]   ;;  %v4213_v3 = vld [vmem:[%s5401_s0 + $0x280] ss:$52 sps:$4 sm:$0xff]   ;;  %v4218_v4 = vld [vmem:[%s5401_s0 + $0x1c] ss:$52 sps:$4 sm:$0xff]  }
  0xdf   : > { %2649 = vmatprep.mubr.bf16.mxu0 %v4149_v6  ;;  %v4216_v6 = vld [vmem:[%s5401_s0 + $0x18] ss:$52 sps:$4 sm:$0xff]  }
  0xe1   : > { %3691 = vmatpush3.bf16.msra.mxu1 %v4140_v5  ;;  %3749 = vmatpush3.bf16.msra.mxu0 %v4145_v7  ;;  %v4223_v5 = vld [vmem:[%s5401_s0 + $0x24] ss:$52 sps:$4 sm:$0xff]   ;;  %v4221_v7 = vld [vmem:[%s5401_s0 + $0x20] ss:$52 sps:$4 sm:$0xff]  }
  0xe2   : > { %3792 = vmatprep.subr.bf16.mxu1 %v4146_v8  ;;  %3850 = vmatprep.subr.bf16.mxu0 %v4151_v11  ;;  %v4224_v8 = vld [vmem:[%s4832_s9 + $0x280] sm:$0xff]   ;;  %v4228_v11 = vld [vmem:[%s4832_s9 + $0x2c8] sm:$0xff]  }
  0xe4   : > { %2561 = vmatmul.mubr.bf16.vlgmr.msra.gmra.mrb[12].mxu1 %v4142_v9  ;;  %2650 = vmatmul.mubr.bf16.vlgmr.msra.gmra.mrb[16].mxu0 %v4147_v10  ;;  %v4225_v9 = vld [vmem:[%s4832_s9 + $0x300] sm:$0xff]  }
  0xe5   : > { %3793 = vmatpush3.bf16.msra.mxu1 %v4150_v12  ;;  %3851 = vmatpush3.bf16.msra.mxu0 %v4152_v13  ;;  %v4226_v10 = vld [vmem:[%s5401_s0 + $0x84] ss:$52 sps:$4 sm:$0xff]   ;;  %v4231_v12 = vld [vmem:[%s5401_s0 + $0x8c] ss:$52 sps:$4 sm:$0xff]  }
  0xe6   : > { %2568 = vmatprep.mubr.bf16.mxu1 %v4153_v14  ;;  %3794 = vmatprep.subr.bf16.mxu1 %v4155_v15  ;;  %v4230_v13 = vld [vmem:[%s4832_s9 + $0x288] sm:$0xff]   ;;  %v4229_v15 = vld [vmem:[%s5401_s0 + $0x80] ss:$52 sps:$4 sm:$0xff]  }
  0xe7   : > { %2657 = vmatprep.mubr.bf16.mxu0 %v4158_v16  ;;  %3852 = vmatprep.subr.bf16.mxu0 %v4161_v17  ;;  %v4242_v14 = vld [vmem:[%s4832_s9 + $0x308] sm:$0xff]   ;;  %v4234_v16 = vld [vmem:[%s4832_s9 + $0x2d0] sm:$0xff]  }
  0xe8   : > { %v4233_v17 = vld [vmem:[%s5401_s0 + $0x88] ss:$52 sps:$4 sm:$0xff]  }
  0xe9   : > { %3795 = vmatpush3.bf16.msra.mxu1 %v4157_v18  ;;  %3853 = vmatpush3.bf16.msra.mxu0 %v4162_v19  ;;  %v4235_v18 = vld [vmem:[%s5401_s0 + $0xec] ss:$52 sps:$4 sm:$0xff]   ;;  %v4237_v19 = vld [vmem:[%s4832_s9 + $0x290] sm:$0xff]  }
  0xea   : > { %3796 = vmatprep.subr.bf16.mxu1 %v4163_v21  ;;  %3854 = vmatprep.subr.bf16.mxu0 %v4171_v26  ;;  %v4243_v21 = vld [vmem:[%s4832_s9 + $0x2d8] sm:$0xff]   ;;  %v4241_v26 = vld [vmem:[%s5401_s0 + $0xf0] ss:$52 sps:$4 sm:$0xff]  }
  0xec   : > { %2569 = vmatmul.mubr.bf16.gmra.mrb[16].mxu1 %v4156_v20  ;;  %2658 = vmatmul.mubr.bf16.gmra.mrb[20].mxu0 %v4160_v22  ;;  %v4239_v20 = vld [vmem:[%s5401_s0 + $0xf4] ss:$52 sps:$4 sm:$0xff]  }
  0xed   : > { %2576 = vmatprep.mubr.bf16.mxu1 %v4164_v23  ;;  %3797 = vmatpush3.bf16.msra.mxu1 %v4166_v24  ;;  %v4259_v22 = vld [vmem:[%s4832_s9 + $0x310] sm:$0xff]   ;;  %v4244_v23 = vld [vmem:[%s4832_s9 + $0x298] sm:$0xff]   ;;  %v4251_v24 = vld [vmem:[%s4832_s9 + $0x2e0] sm:$0xff]  }
  0xee   : > { %2665 = vmatprep.mubr.bf16.mxu0 %v4168_v25  ;;  %3855 = vmatpush3.bf16.msra.mxu0 %v4172_v27  ;;  %v4238_v25 = vld [vmem:[%s5401_s0 + $0xe8] ss:$52 sps:$4 sm:$0xff]  }
  0xef   : > { %3798 = vmatprep.subr.bf16.mxu1 %v4173_v28  ;;  %3856 = vmatprep.subr.bf16.mxu0 %v4181_v34  ;;  %v4245_v27 = vld [vmem:[%s5401_s0 + $0x154] ss:$52 sps:$4 sm:$0xff]   ;;  %v4248_v28 = vld [vmem:[%s5401_s0 + $0x15c] ss:$52 sps:$4 sm:$0xff]  }
  0xf0   : > { %v4268_v34 = vld [vmem:[%s4832_s9 + $0x2f0] sm:$0xff]  }
  0xf1   : > { %3799 = vmatpush3.bf16.msra.mxu1 %v4174_v29  ;;  %v4252_v29 = vld [vmem:[%s4832_s9 + $0x2a0] sm:$0xff]  }
  0xf2   : > { %3857 = vmatpush3.bf16.msra.mxu0 %v4182_v35  ;;  %3800 = vmatprep.subr.bf16.mxu1 %v4183_v36  ;;  %v4250_v35 = vld [vmem:[%s5401_s0 + $0x158] ss:$52 sps:$4 sm:$0xff]   ;;  %v4253_v36 = vld [vmem:[%s5401_s0 + $0x1bc] ss:$52 sps:$4 sm:$0xff]  }
  0xf3   : > { %3858 = vmatprep.subr.bf16.mxu0 %v4190_v42  ;;  %v4258_v42 = vld [vmem:[%s5401_s0 + $0x1c0] ss:$52 sps:$4 sm:$0xff]  }
  0xf4   : > { %2577 = vmatmul.mubr.bf16.gmra.mrb[20].mxu1 %v4167_v30  ;;  %2666 = vmatmul.mubr.bf16.gmra.mrb[24].mxu0 %v4170_v31  ;;  %v4260_v30 = vld [vmem:[%s4832_s9 + $0x2e8] sm:$0xff]   ;;  %v4273_v31 = vld [vmem:[%s4832_s9 + $0x318] sm:$0xff]  }
  0xf5   : > { %2584 = vmatprep.mubr.bf16.mxu1 %v4175_v32  ;;  %2673 = vmatprep.mubr.bf16.mxu0 %v4178_v33  ;;  %v4261_v32 = vld [vmem:[%s4832_s9 + $0x2a8] sm:$0xff]   ;;  %v4247_v33 = vld [vmem:[%s5401_s0 + $0x150] ss:$52 sps:$4 sm:$0xff]  }
  0xf6   : > { %3801 = vmatpush3.bf16.msra.mxu1 %v4184_v37  ;;  %3859 = vmatpush3.bf16.msra.mxu0 %v4192_v43  ;;  %v4256_v37 = vld [vmem:[%s5401_s0 + $0x1c4] ss:$52 sps:$4 sm:$0xff]  }
  0xf7   : > { %3802 = vmatprep.subr.bf16.mxu1 %v4193_v44  ;;  %3860 = vmatprep.subr.bf16.mxu0 %v4198_v46  ;;  %v4262_v43 = vld [vmem:[%s5401_s0 + $0x224] ss:$52 sps:$4 sm:$0xff]   ;;  %v4265_v44 = vld [vmem:[%s5401_s0 + $0x22c] ss:$52 sps:$4 sm:$0xff]   ;;  %v4267_v46 = vld [vmem:[%s5401_s0 + $0x228] ss:$52 sps:$4 sm:$0xff]  }
  0xfa   : > { %3803 = vmatpush3.bf16.msra.mxu1 %v4194_v45  ;;  %3861 = vmatpush3.bf16.msra.mxu0 %v4201_v49  ;;  %v4264_v45 = vld [vmem:[%s5401_s0 + $0x220] ss:$52 sps:$4 sm:$0xff]   ;;  %v4272_v49 = vld [vmem:[%s5401_s0 + $0x288] ss:$52 sps:$4 sm:$0xff]  }
  0xfb   : > { %3804 = vmatprep.subr.bf16.mxu1 %v4203_v52  ;;  %3862 = vmatprep.subr.bf16.mxu0 %v4207_v54  ;;  %v4279_v52 = vld [vmem:[%s5401_s0 + $0x28] ss:$52 sps:$4 sm:$0xff]  }
  0xfc   : > { %2585 = vmatmul.mubr.bf16.gmra.mrb[24].mxu1 %v4177_v38  ;;  %2674 = vmatmul.mubr.bf16.gmra.mrb[28].mxu0 %v4180_v39  ;;  %v4269_v38 = vld [vmem:[%s4832_s9 + $0x2b0] sm:$0xff]   ;;  %v4276_v39 = vld [vmem:[%s4832_s9 + $0x2f8] sm:$0xff]  }
  0xfd   : > { %2592 = vmatprep.mubr.bf16.mxu1 %v4185_v40  ;;  %2681 = vmatprep.mubr.bf16.mxu0 %v4188_v41  ;;  %v4278_v40 = vld [vmem:[%s4832_s9 + $0x2b8] sm:$0xff]   ;;  %v4283_v54 = vld [vmem:[%s5401_s0 + $0x94] ss:$52 sps:$4 sm:$0xff]   ;;  %s1053_s9 = scalar_select %p1052_p11, %s4337_s14, 1 }
  0xfe   : > { %3805 = vmatpush3.bf16.msra.mxu1 %v4204_v53  ;;  %3863 = vmatpush3.bf16.msra.mxu0 %v4209_v55  ;;  %v4255_v41 = vld [vmem:[%s5401_s0 + $0x1b8] ss:$52 sps:$4 sm:$0xff]   ;;  %v4282_v53 = vld [vmem:[%s5401_s0 + $0x30] ss:$52 sps:$4 sm:$0xff]  }
  0xff   : > { %3806 = vmatprep.subr.bf16.mxu1 %v4212_v58  ;;  %3864 = vmatprep.subr.bf16.mxu0 %v4215_v61  ;;  %v4285_v55 = vld [vmem:[%s5401_s0 + $0x90] ss:$52 sps:$4 sm:$0xff]   ;;  %v4289_v58 = vld [vmem:[%s5401_s0 + $0xf8] ss:$52 sps:$4 sm:$0xff]   ;;  %v4293_v61 = vld [vmem:[%s5401_s0 + $0x160] ss:$52 sps:$4 sm:$0xff]   ;;  %s1054_s25 = scalar_lea.vmem %s5403_s2, %s1053_s9 }
 0x102   : > { %3807 = vmatpush3.bf16.msra.mxu1 %v4214_v60  ;;  %3865 = vmatpush3.bf16.msra.mxu0 %v4219_v63  ;;  %v4291_v60 = vld [vmem:[%s5401_s0 + $0x164] ss:$52 sps:$4 sm:$0xff]   ;;  %v4295_v63 = vld [vmem:[%s5401_s0 + $0x1cc] ss:$52 sps:$4 sm:$0xff]  }
 0x103   : > { %3908 = vmatprep.subr.bf16.mxu1 %v4220_v0  ;;  %3977 = vmatprep.subr.bf16.mxu0 %v4347_v2  ;;  %v4297_v0 = vld [vmem:[%s5401_s0 + $0x1c8] ss:$52 sps:$4 sm:$0xff]  }
 0x104   : > { %2593 = vmatmul.mubr.bf16.gmra.mrb[28].mxu1 %v4187_v47  ;;  %2682 = vmatmul.mubr.bf16.gmra.mrb[32].mxu0 %v4191_v48  ;;  %v4270_v47 = vld [vmem:[%s5401_s0 + $0x28c] ss:$52 sps:$4 sm:$0xff]   ;;  %v4274_v48 = vld [vmem:[%s5401_s0 + $0x294] ss:$52 sps:$4 sm:$0xff]  }
 0x105   : > { %2600 = vmatprep.mubr.bf16.mxu1 %v4195_v50  ;;  %2689 = vmatprep.mubr.bf16.mxu0 %v4199_v51  ;;  %v4277_v50 = vld [vmem:[%s5401_s0 + $0x290] ss:$52 sps:$4 sm:$0xff]   ;;  %v4281_v51 = vld [vmem:[%s5401_s0 + $0x2c] ss:$52 sps:$4 sm:$0xff]  }
 0x10c   : > { %2601 = vmatmul.mubr.bf16.gmra.mrb[32].mxu1 %v4197_v56  ;;  %2690 = vmatmul.mubr.bf16.gmra.mrb[36].mxu0 %v4202_v57  ;;  %v4286_v56 = vld [vmem:[%s5401_s0 + $0x98] ss:$52 sps:$4 sm:$0xff]   ;;  %v4287_v57 = vld [vmem:[%s5401_s0 + $0xfc] ss:$52 sps:$4 sm:$0xff]  }
 0x10d   : > { %2608 = vmatprep.mubr.bf16.mxu1 %v4205_v59  ;;  %2697 = vmatprep.mubr.bf16.mxu0 %v4210_v62  ;;  %v4290_v59 = vld [vmem:[%s5401_s0 + $0x100] ss:$52 sps:$4 sm:$0xff]   ;;  %v4294_v62 = vld [vmem:[%s5401_s0 + $0x168] ss:$52 sps:$4 sm:$0xff]  }
 0x114   : > { %2609 = vmatmul.mubr.bf16.gmra.mrb[36].mxu1 %v4208_v1  ;;  %2698 = vmatmul.mubr.bf16.gmra.mrb[40].mxu0 %v4213_v3  ;;  %v4298_v1 = vld [vmem:[%s5401_s0 + $0x1d0] ss:$52 sps:$4 sm:$0xff]   ;;  %v4299_v3 = vld [vmem:[%s5401_s0 + $0x234] ss:$52 sps:$4 sm:$0xff]  }
 0x115   : > { %2738 = vmatprep.mubr.bf16.mxu1 %v4218_v4  ;;  %2827 = vmatprep.mubr.bf16.mxu0 %v4223_v5  ;;  %v4301_v4 = vld [vmem:[%s5401_s0 + $0x230] ss:$52 sps:$4 sm:$0xff]   ;;  %v4302_v5 = vld [vmem:[%s5401_s0 + $0x238] ss:$52 sps:$4 sm:$0xff]  }
 0x11c   : > { %2739 = vmatmul.mubr.bf16.vlgmr.msra.gmra.mrb[40].mxu1 %v4216_v6  ;;  %2828 = vmatmul.mubr.bf16.vlgmr.msra.gmra.mrb[44].mxu0 %v4221_v7  ;;  %v4303_v6 = vld [vmem:[%s5401_s0 + $0x29c] ss:$52 sps:$4 sm:$0xff]   ;;  %v4305_v7 = vld [vmem:[%s5401_s0 + $0x298] ss:$52 sps:$4 sm:$0xff]  }
 0x11d   : > { %3909 = vmatpush3.bf16.msra.mxu1 %v4224_v8  ;;  %3978 = vmatpush3.bf16.msra.mxu0 %v4225_v9  ;;  %v4306_v8 = vld [vmem:[%s5401_s0 + $0x2a0] ss:$52 sps:$4 sm:$0xff]  }
 0x11e   : > { %2746 = vmatprep.mubr.bf16.mxu1 %v4226_v10  ;;  %3910 = vmatprep.subr.bf16.mxu1 %v4228_v11 }
 0x11f   : > { %2835 = vmatprep.mubr.bf16.mxu0 %v4231_v12  ;;  %3979 = vmatprep.subr.bf16.mxu0 %v4347_v2 }
 0x121   : > { %3911 = vmatpush3.bf16.msra.mxu1 %v4230_v13  ;;  %3980 = vmatpush3.bf16.msra.mxu0 %v4242_v14 }
 0x122   : > { %3912 = vmatprep.subr.bf16.mxu1 %v4234_v16  ;;  %3981 = vmatprep.subr.bf16.mxu0 %v4347_v2 }
 0x124   : > { %2747 = vmatmul.mubr.bf16.gmra.mrb[44].mxu1 %v4229_v15  ;;  %2836 = vmatmul.mubr.bf16.gmra.mrb[48].mxu0 %v4233_v17 }
 0x125   : > { %2754 = vmatprep.mubr.bf16.mxu1 %v4235_v18  ;;  %3913 = vmatpush3.bf16.msra.mxu1 %v4237_v19 }
 0x126   : > { %2843 = vmatprep.mubr.bf16.mxu0 %v4239_v20  ;;  %3914 = vmatprep.subr.bf16.mxu1 %v4243_v21 }
 0x127   : > { %3982 = vmatpush3.bf16.msra.mxu0 %v4259_v22 }
 0x128   : > { %3983 = vmatprep.subr.bf16.mxu0 %v4347_v2 }
 0x129   : > { %3915 = vmatpush3.bf16.msra.mxu1 %v4244_v23 }
 0x12a   : > { %3916 = vmatprep.subr.bf16.mxu1 %v4251_v24 }
 0x12b   : > { %3984 = vmatpush3.bf16.msra.mxu0 %v4273_v31 }
 0x12c   : > { %2755 = vmatmul.mubr.bf16.gmra.mrb[48].mxu1 %v4238_v25  ;;  %2844 = vmatmul.mubr.bf16.gmra.mrb[52].mxu0 %v4241_v26 }
 0x12d   : > { %2762 = vmatprep.mubr.bf16.mxu1 %v4245_v27  ;;  %2851 = vmatprep.mubr.bf16.mxu0 %v4248_v28 }
 0x12e   : > { %3917 = vmatpush3.bf16.msra.mxu1 %v4252_v29 }
 0x12f   : > { %3918 = vmatprep.subr.bf16.mxu1 %v4260_v30 }
 0x132   : > { %3919 = vmatpush3.bf16.msra.mxu1 %v4261_v32 }
 0x133   : > { %3920 = vmatprep.subr.bf16.mxu1 %v4268_v34 }
 0x134   : > { %2763 = vmatmul.mubr.bf16.gmra.mrb[52].mxu1 %v4247_v33  ;;  %2852 = vmatmul.mubr.bf16.gmra.mrb[56].mxu0 %v4250_v35 }
 0x135   : > { %2770 = vmatprep.mubr.bf16.mxu1 %v4253_v36  ;;  %2859 = vmatprep.mubr.bf16.mxu0 %v4256_v37 }
 0x136   : > { %3921 = vmatpush3.bf16.msra.mxu1 %v4269_v38 }
 0x137   : > { %3922 = vmatprep.subr.bf16.mxu1 %v4276_v39 }
 0x13a   : > { %3923 = vmatpush3.bf16.msra.mxu1 %v4278_v40 }
 0x13c   : > { %2771 = vmatmul.mubr.bf16.gmra.mrb[56].mxu1 %v4255_v41  ;;  %2860 = vmatmul.mubr.bf16.gmra.mrb[60].mxu0 %v4258_v42 }
 0x13d   : > { %2778 = vmatprep.mubr.bf16.mxu1 %v4262_v43  ;;  %2867 = vmatprep.mubr.bf16.mxu0 %v4265_v44 }
 0x144   : > { %2779 = vmatmul.mubr.bf16.gmra.mrb[60].mxu1 %v4264_v45  ;;  %2868 = vmatmul.mubr.bf16.gmra.mrb[64].mxu0 %v4267_v46 }
 0x145   : > { %2786 = vmatprep.mubr.bf16.mxu1 %v4270_v47  ;;  %2875 = vmatprep.mubr.bf16.mxu0 %v4274_v48 }
 0x14c   : > { %2787 = vmatmul.mubr.bf16.gmra.mrb[64].mxu1 %v4272_v49  ;;  %2876 = vmatmul.mubr.bf16.gmra.mrb[68].mxu0 %v4277_v50 }
 0x14d   : > { %2916 = vmatprep.mubr.bf16.mxu1 %v4281_v51  ;;  %3985 = vmatprep.mubr.msk.bf16.mxu0 %vm4348_vm0, %v4347_v2 }
 0x154   : > { %2917 = vmatmul.mubr.bf16.vlgmr.msra.gmra.mrb[68].mxu1 %v4279_v52  ;;  %3986 = vmatmul.mubr.msk.bf16.vlgmr.msra.gmra.mrb[72].mxu0 %vm2417_vm1, %v4282_v53  ;;  %v5247_v52 = vld [vmem:[%s1054_s25] ss:$0 sm:$0xff] }
 0x155   : > { %2924 = vmatprep.mubr.bf16.mxu1 %v4283_v54  ;;  %3989 = vmatprep.mubr.msk.bf16.mxu0 %vm4348_vm0, %v4347_v2 }
 0x15c   : > { %2925 = vmatmul.mubr.bf16.gmra.mrb[72].mxu1 %v4285_v55  ;;  %3990 = vmatmul.mubr.msk.bf16.gmra.mrb[76].mxu0 %vm2417_vm1, %v4286_v56 }
 0x15d   : > { %2932 = vmatprep.mubr.bf16.mxu1 %v4287_v57  ;;  %3993 = vmatprep.mubr.msk.bf16.mxu0 %vm4348_vm0, %v4347_v2 }
 0x164   : > { %2933 = vmatmul.mubr.bf16.gmra.mrb[76].mxu1 %v4289_v58  ;;  %3994 = vmatmul.mubr.msk.bf16.gmra.mrb[80].mxu0 %vm2417_vm1, %v4290_v59 }
 0x165   : > { %2940 = vmatprep.mubr.bf16.mxu1 %v4291_v60  ;;  %3997 = vmatprep.mubr.msk.bf16.mxu0 %vm4348_vm0, %v4347_v2 }
 0x16c   : > { %2941 = vmatmul.mubr.bf16.gmra.mrb[80].mxu1 %v4293_v61  ;;  %3998 = vmatmul.mubr.msk.bf16.gmra.mrb[84].mxu0 %vm2417_vm1, %v4294_v62 }
 0x16d   : > { %2948 = vmatprep.mubr.bf16.mxu1 %v4295_v63  ;;  %4001 = vmatprep.mubr.msk.bf16.mxu0 %vm4348_vm0, %v4347_v2 }
 0x174   : > { %2949 = vmatmul.mubr.bf16.gmra.mrb[84].mxu1 %v4297_v0  ;;  %4002 = vmatmul.mubr.msk.bf16.gmra.mrb[88].mxu0 %vm2417_vm1, %v4298_v1 }
 0x175   : > { %2956 = vmatprep.mubr.bf16.mxu1 %v4299_v3  ;;  %4005 = vmatprep.mubr.msk.bf16.mxu0 %vm4348_vm0, %v4347_v2 }
 0x17c   : > { %2957 = vmatmul.mubr.bf16.gmra.mrb[88].mxu1 %v4301_v4  ;;  %4006 = vmatmul.mubr.msk.bf16.gmra.mrb[92].mxu0 %vm2417_vm1, %v4302_v5 }
 0x17d   : > { %2964 = vmatprep.mubr.bf16.mxu1 %v4303_v6  ;;  %4009 = vmatprep.mubr.msk.bf16.mxu0 %vm4348_vm0, %v4347_v2 }
 0x184   : > { %2965 = vmatmul.mubr.bf16.gmra.mrb[92].mxu1 %v4305_v7  ;;  %4010 = vmatmul.mubr.msk.bf16.gmra.mrb[96].mxu0 %vm2417_vm1, %v4306_v8 }
 0x197   : > { %v3658_v9 = vpop.f32.mrb[0].mxu1  ;;  %v3634_v10 = vpop.f32.mrb[0].mxu0 }
 0x198   : > { %v3659_v11 = vpop.f32.mrb[1].mxu1  ;;  %v3635_v12 = vpop.f32.mrb[1].mxu0 }
 0x199   : > { %v5226_v13 = vadd.f32 %v3659_v11, %v3658_v9  ;;  %v3661_v14 = vpop.f32.mrb[2].mxu1  ;;  %v3636_v15 = vadd.f32 %v3635_v12, %v3634_v10  ;;  %v3637_v2 = vpop.f32.mrb[2].mxu0 }
 0x19a   : > { %v3662_v16 = vpop.f32.mrb[3].mxu1  ;;  %v3638_v17 = vpop.f32.mrb[3].mxu0 }
 0x19b   : > { %v5228_v18 = vadd.f32 %v3662_v16, %v3661_v14  ;;  %v3639_v19 = vadd.f32 %v3638_v17, %v3637_v2  ;;  %v2474_v55 = vadd.f32 %v3636_v15, %v5247_v52 }
 0x19d   : > { %v2477_v62 = vadd.f32 %v3639_v19, %v5247_v52 }
 0x19f   : > { %v3640_v20 = vpop.f32.mrb[4].mxu0  ;;  %v3664_v21 = vpop.f32.mrb[4].mxu1 }
 0x1a0   : > { %v3641_v22 = vpop.f32.mrb[5].mxu0  ;;  %v3665_v23 = vpop.f32.mrb[5].mxu1 }
 0x1a1   : > { %v3642_v24 = vadd.f32 %v3641_v22, %v3640_v20  ;;  %v3643_v25 = vpop.f32.mrb[6].mxu0  ;;  %v5230_v26 = vadd.f32 %v3665_v23, %v3664_v21  ;;  %v3667_v27 = vpop.f32.mrb[6].mxu1 }
 0x1a2   : > { %v3644_v28 = vpop.f32.mrb[7].mxu0  ;;  %v3668_v29 = vpop.f32.mrb[7].mxu1 }
 0x1a3   : > { %v3645_v30 = vadd.f32 %v3644_v28, %v3643_v25  ;;  %v5232_v31 = vadd.f32 %v3668_v29, %v3667_v27  ;;  %v2482_v10 = vadd.f32 %v3642_v24, %v5247_v52 }
 0x1a5   : > { %v2485_v17 = vadd.f32 %v3645_v30, %v5247_v52 }
 0x1a7   : > { %v3646_v32 = vpop.f32.mrb[8].mxu0  ;;  %v3670_v33 = vpop.f32.mrb[8].mxu1 }
 0x1a8   : > { %v3647_v34 = vpop.f32.mrb[9].mxu0  ;;  %v3671_v35 = vpop.f32.mrb[9].mxu1 }
 0x1a9   : > { %v3648_v36 = vadd.f32 %v3647_v34, %v3646_v32  ;;  %v3649_v37 = vpop.f32.mrb[10].mxu0  ;;  %v5234_v38 = vadd.f32 %v3671_v35, %v3670_v33  ;;  %v3673_v39 = vpop.f32.mrb[10].mxu1 }
 0x1aa   : > { %v3650_v40 = vpop.f32.mrb[11].mxu0  ;;  %v3674_v41 = vpop.f32.mrb[11].mxu1 }
 0x1ab   : > { %v3651_v42 = vadd.f32 %v3650_v40, %v3649_v37  ;;  %v5236_v43 = vadd.f32 %v3674_v41, %v3673_v39  ;;  %v2490_v32 = vadd.f32 %v3648_v36, %v5247_v52 }
 0x1ad   : > { %v2493_v40 = vadd.f32 %v3651_v42, %v5247_v52 }
 0x1af   : > { %v3652_v44 = vpop.f32.mrb[12].mxu0 }
 0x1b0   : > { %v3653_v45 = vpop.f32.mrb[13].mxu0 }
 0x1b1   : > { %v5240_v46 = vadd.f32 %v3653_v45, %v3652_v44  ;;  %v3655_v47 = vpop.f32.mrb[14].mxu0 }
 0x1b2   : > { %v3656_v48 = vpop.f32.mrb[15].mxu0 }
 0x1b3   : > { %v5242_v49 = vadd.f32 %v3656_v48, %v3655_v47 }
 0x1b7   : > { %v3692_v50 = vpop.f32.mrb[12].mxu1  ;;  %v3750_v51 = vpop.f32.mrb[16].mxu0 }
 0x1b8   : > { %v3693_v53 = vpop.f32.mrb[13].mxu1  ;;  %v3751_v54 = vpop.f32.mrb[17].mxu0 }
 0x1b9   : > { %v3694_v56 = vadd.f32 %v3693_v53, %v3692_v50  ;;  %v3695_v57 = vpop.f32.mrb[14].mxu1  ;;  %v3752_v58 = vadd.f32 %v3751_v54, %v3750_v51  ;;  %v3753_v59 = vpop.f32.mrb[18].mxu0 }
 0x1ba   : > { %v3696_v60 = vpop.f32.mrb[15].mxu1  ;;  %v3754_v61 = vpop.f32.mrb[19].mxu0 }
 0x1bb   : > { %v2563_v63 = vadd.f32 %v3694_v56, %v2474_v55  ;;  %v3697_v0 = vadd.f32 %v3696_v60, %v3695_v57  ;;  %v3755_v1 = vadd.f32 %v3754_v61, %v3753_v59  ;;  %v2498_v55 = vadd.f32 %v5240_v46, %v5247_v52 }
 0x1bc   : > { %v2501_v61 = vadd.f32 %v5242_v49, %v5247_v52 }
 0x1bd   : > { %v2566_v3 = vadd.f32 %v3697_v0, %v2477_v62  ;;  %v5251_v4 = vadd.f32 %v3752_v58, %v2563_v63 }
 0x1bf   : > { %v5253_v5 = vadd.f32 %v3755_v1, %v2566_v3  ;;  %v3698_v6 = vpop.f32.mrb[16].mxu1  ;;  %v3756_v7 = vpop.f32.mrb[20].mxu0 }
 0x1c0   : > { %v3699_v8 = vpop.f32.mrb[17].mxu1  ;;  %v3757_v9 = vpop.f32.mrb[21].mxu0 }
 0x1c1   : > { %v3700_v11 = vadd.f32 %v3699_v8, %v3698_v6  ;;  %v3701_v12 = vpop.f32.mrb[18].mxu1  ;;  %v3758_v14 = vadd.f32 %v3757_v9, %v3756_v7  ;;  %v3759_v15 = vpop.f32.mrb[22].mxu0 }
 0x1c2   : > { %v3702_v2 = vpop.f32.mrb[19].mxu1  ;;  %v3760_v16 = vpop.f32.mrb[23].mxu0 }
 0x1c3   : > { %v2571_v19 = vadd.f32 %v3700_v11, %v2482_v10  ;;  %v3703_v20 = vadd.f32 %v3702_v2, %v3701_v12  ;;  %v3761_v21 = vadd.f32 %v3760_v16, %v3759_v15  ;;  %v2506_v10 = vadd.f32 %v5226_v13, %v5247_v52 }
 0x1c4   : > { %v2509_v16 = vadd.f32 %v5228_v18, %v5247_v52 }
 0x1c5   : > { %v2574_v22 = vadd.f32 %v3703_v20, %v2485_v17  ;;  %v5257_v23 = vadd.f32 %v3758_v14, %v2571_v19 }
 0x1c7   : > { %v5259_v25 = vadd.f32 %v3761_v21, %v2574_v22  ;;  %v3704_v27 = vpop.f32.mrb[20].mxu1  ;;  %v3762_v28 = vpop.f32.mrb[24].mxu0 }
 0x1c8   : > { %v3705_v29 = vpop.f32.mrb[21].mxu1  ;;  %v3763_v24 = vpop.f32.mrb[25].mxu0 }
 0x1c9   : > { %v3706_v33 = vadd.f32 %v3705_v29, %v3704_v27  ;;  %v3707_v34 = vpop.f32.mrb[22].mxu1  ;;  %v3764_v35 = vadd.f32 %v3763_v24, %v3762_v28  ;;  %v3765_v37 = vpop.f32.mrb[26].mxu0 }
 0x1ca   : > { %v3708_v39 = vpop.f32.mrb[23].mxu1  ;;  %v3766_v30 = vpop.f32.mrb[27].mxu0 }
 0x1cb   : > { %v2579_v41 = vadd.f32 %v3706_v33, %v2490_v32  ;;  %v3709_v44 = vadd.f32 %v3708_v39, %v3707_v34  ;;  %v3767_v45 = vadd.f32 %v3766_v30, %v3765_v37  ;;  %v2514_v32 = vadd.f32 %v5230_v26, %v5247_v52 }
 0x1cc   : > { %v2517_v30 = vadd.f32 %v5232_v31, %v5247_v52 }
 0x1cd   : > { %v2582_v47 = vadd.f32 %v3709_v44, %v2493_v40  ;;  %v5263_v48 = vadd.f32 %v3764_v35, %v2579_v41 }
 0x1cf   : > { %v5265_v50 = vadd.f32 %v3767_v45, %v2582_v47  ;;  %v3710_v51 = vpop.f32.mrb[24].mxu1  ;;  %v3768_v53 = vpop.f32.mrb[28].mxu0 }
 0x1d0   : > { %v3711_v54 = vpop.f32.mrb[25].mxu1  ;;  %v3769_v36 = vpop.f32.mrb[29].mxu0 }
 0x1d1   : > { %v3712_v56 = vadd.f32 %v3711_v54, %v3710_v51  ;;  %v3713_v57 = vpop.f32.mrb[26].mxu1  ;;  %v3770_v58 = vadd.f32 %v3769_v36, %v3768_v53  ;;  %v3771_v59 = vpop.f32.mrb[30].mxu0 }
 0x1d2   : > { %v3714_v42 = vpop.f32.mrb[27].mxu1  ;;  %v3772_v60 = vpop.f32.mrb[31].mxu0 }
 0x1d3   : > { %v2587_v62 = vadd.f32 %v3712_v56, %v2498_v55  ;;  %v3715_v63 = vadd.f32 %v3714_v42, %v3713_v57  ;;  %v3773_v0 = vadd.f32 %v3772_v60, %v3771_v59  ;;  %v2522_v55 = vadd.f32 %v5234_v38, %v5247_v52 }
 0x1d4   : > { %v2525_v60 = vadd.f32 %v5236_v43, %v5247_v52 }
 0x1d5   : > { %v2590_v1 = vadd.f32 %v3715_v63, %v2501_v61  ;;  %v5271_v3 = vadd.f32 %v3770_v58, %v2587_v62 }
 0x1d7   : > { %v5273_v6 = vadd.f32 %v3773_v0, %v2590_v1  ;;  %v3716_v7 = vpop.f32.mrb[28].mxu1  ;;  %v3774_v8 = vpop.f32.mrb[32].mxu0 }
 0x1d8   : > { %v3717_v46 = vpop.f32.mrb[29].mxu1  ;;  %v3775_v9 = vpop.f32.mrb[33].mxu0 }
 0x1d9   : > { %v3718_v11 = vadd.f32 %v3717_v46, %v3716_v7  ;;  %v3719_v12 = vpop.f32.mrb[30].mxu1  ;;  %v3776_v14 = vadd.f32 %v3775_v9, %v3774_v8  ;;  %v3777_v15 = vpop.f32.mrb[34].mxu0 }
 0x1da   : > { %v3720_v49 = vpop.f32.mrb[31].mxu1  ;;  %v3778_v2 = vpop.f32.mrb[35].mxu0 }
 0x1db   : > { %v2595_v17 = vadd.f32 %v3718_v11, %v2506_v10  ;;  %v3721_v19 = vadd.f32 %v3720_v49, %v3719_v12  ;;  %v3779_v20 = vadd.f32 %v3778_v2, %v3777_v15 }
 0x1dd   : > { %v2598_v21 = vadd.f32 %v3721_v19, %v2509_v16  ;;  %v5279_v22 = vadd.f32 %v3776_v14, %v2595_v17 }
 0x1df   : > { %v5281_v27 = vadd.f32 %v3779_v20, %v2598_v21  ;;  %v3722_v28 = vpop.f32.mrb[32].mxu1  ;;  %v3780_v29 = vpop.f32.mrb[36].mxu0 }
 0x1e0   : > { %v3723_v13 = vpop.f32.mrb[33].mxu1  ;;  %v3781_v24 = vpop.f32.mrb[37].mxu0 }
 0x1e1   : > { %v3724_v33 = vadd.f32 %v3723_v13, %v3722_v28  ;;  %v3725_v34 = vpop.f32.mrb[34].mxu1  ;;  %v3782_v35 = vadd.f32 %v3781_v24, %v3780_v29  ;;  %v3783_v37 = vpop.f32.mrb[38].mxu0 }
 0x1e2   : > { %v3726_v18 = vpop.f32.mrb[35].mxu1  ;;  %v3784_v39 = vpop.f32.mrb[39].mxu0 }
 0x1e3   : > { %v2603_v40 = vadd.f32 %v3724_v33, %v2514_v32  ;;  %v3727_v41 = vadd.f32 %v3726_v18, %v3725_v34  ;;  %v3785_v44 = vadd.f32 %v3784_v39, %v3783_v37 }
 0x1e5   : > { %v2606_v45 = vadd.f32 %v3727_v41, %v2517_v30  ;;  %v5287_v47 = vadd.f32 %v3782_v35, %v2603_v40 }
 0x1e7   : > { %v5289_v51 = vadd.f32 %v3785_v44, %v2606_v45  ;;  %v3728_v53 = vpop.f32.mrb[36].mxu1  ;;  %v3786_v54 = vpop.f32.mrb[40].mxu0 }
 0x1e8   : > { %v3729_v26 = vpop.f32.mrb[37].mxu1  ;;  %v3787_v36 = vpop.f32.mrb[41].mxu0 }
 0x1e9   : > { %v3730_v56 = vadd.f32 %v3729_v26, %v3728_v53  ;;  %v3731_v57 = vpop.f32.mrb[38].mxu1  ;;  %v3788_v58 = vadd.f32 %v3787_v36, %v3786_v54  ;;  %v3789_v59 = vpop.f32.mrb[42].mxu0 }
 0x1ea   : > { %v3732_v31 = vpop.f32.mrb[39].mxu1  ;;  %v3790_v42 = vpop.f32.mrb[43].mxu0 }
 0x1eb   : > { %v2611_v61 = vadd.f32 %v3730_v56, %v2522_v55  ;;  %v3733_v62 = vadd.f32 %v3732_v31, %v3731_v57  ;;  %v3791_v63 = vadd.f32 %v3790_v42, %v3789_v59 }
 0x1ed   : > { %v2614_v0 = vadd.f32 %v3733_v62, %v2525_v60  ;;  %v5295_v1 = vadd.f32 %v3788_v58, %v2611_v61 }
 0x1ef   : > { %v5297_v7 = vadd.f32 %v3791_v63, %v2614_v0  ;;  %v3808_v8 = vpop.f32.mrb[40].mxu1  ;;  %v3866_v46 = vpop.f32.mrb[44].mxu0 }
 0x1f0   : > { %v3809_v38 = vpop.f32.mrb[41].mxu1  ;;  %v3867_v9 = vpop.f32.mrb[45].mxu0 }
 0x1f1   : > { %v3810_v10 = vadd.f32 %v3809_v38, %v3808_v8  ;;  %v3811_v11 = vpop.f32.mrb[42].mxu1  ;;  %v3868_v12 = vadd.f32 %v3867_v9, %v3866_v46  ;;  %v3869_v14 = vpop.f32.mrb[46].mxu0 }
 0x1f2   : > { %v3812_v15 = vpop.f32.mrb[43].mxu1  ;;  %v3870_v49 = vpop.f32.mrb[47].mxu0 }
 0x1f3   : > { %v2741_v43 = vadd.f32 %v3810_v10, %v5251_v4  ;;  %v3813_v52 = vadd.f32 %v3812_v15, %v3811_v11  ;;  %v3871_v2 = vadd.f32 %v3870_v49, %v3869_v14 }
 0x1f5   : > { %v2744_v16 = vadd.f32 %v3813_v52, %v5253_v5  ;;  %v5301_v17 = vadd.f32 %v3868_v12, %v2741_v43 }
 0x1f7   : > { %v5303_v19 = vadd.f32 %v3871_v2, %v2744_v16  ;;  %v3814_v20 = vpop.f32.mrb[44].mxu1  ;;  %v3872_v21 = vpop.f32.mrb[48].mxu0 }
 0x1f8   : > { %v3815_v28 = vpop.f32.mrb[45].mxu1  ;;  %v3873_v29 = vpop.f32.mrb[49].mxu0 }
 0x1f9   : > { %v3816_v13 = vadd.f32 %v3815_v28, %v3814_v20  ;;  %v3817_v24 = vpop.f32.mrb[46].mxu1  ;;  %v3874_v32 = vadd.f32 %v3873_v29, %v3872_v21  ;;  %v3875_v33 = vpop.f32.mrb[50].mxu0 }
 0x1fa   : > { %v3818_v34 = vpop.f32.mrb[47].mxu1  ;;  %v3876_v35 = vpop.f32.mrb[51].mxu0 }
 0x1fb   : > { %v2749_v4 = vadd.f32 %v3816_v13, %v5257_v23  ;;  %v3819_v37 = vadd.f32 %v3818_v34, %v3817_v24  ;;  %v3877_v18 = vadd.f32 %v3876_v35, %v3875_v33 }
 0x1fd   : > { %v2752_v5 = vadd.f32 %v3819_v37, %v5259_v25  ;;  %v5307_v39 = vadd.f32 %v3874_v32, %v2749_v4 }
 0x1ff   : > { %v5309_v30 = vadd.f32 %v3877_v18, %v2752_v5  ;;  %v3820_v40 = vpop.f32.mrb[48].mxu1  ;;  %v3878_v41 = vpop.f32.mrb[52].mxu0 }
 0x200   : > { %v3821_v44 = vpop.f32.mrb[49].mxu1  ;;  %v3879_v45 = vpop.f32.mrb[53].mxu0 }
 0x201   : > { %v3822_v53 = vadd.f32 %v3821_v44, %v3820_v40  ;;  %v3823_v54 = vpop.f32.mrb[50].mxu1  ;;  %v3880_v26 = vadd.f32 %v3879_v45, %v3878_v41  ;;  %v3881_v36 = vpop.f32.mrb[54].mxu0 }
 0x202   : > { %v3824_v55 = vpop.f32.mrb[51].mxu1  ;;  %v3882_v56 = vpop.f32.mrb[55].mxu0 }
 0x203   : > { %v2757_v23 = vadd.f32 %v3822_v53, %v5263_v48  ;;  %v3825_v57 = vadd.f32 %v3824_v55, %v3823_v54  ;;  %v3883_v58 = vadd.f32 %v3882_v56, %v3881_v36 }
 0x205   : > { %v2760_v25 = vadd.f32 %v3825_v57, %v5265_v50  ;;  %v5313_v59 = vadd.f32 %v3880_v26, %v2757_v23 }
 0x207   : > { %v5315_v31 = vadd.f32 %v3883_v58, %v2760_v25  ;;  %v3826_v42 = vpop.f32.mrb[52].mxu1  ;;  %v3884_v60 = vpop.f32.mrb[56].mxu0 }
 0x208   : > { %v3827_v61 = vpop.f32.mrb[53].mxu1  ;;  %v3885_v62 = vpop.f32.mrb[57].mxu0 }
 0x209   : > { %v3828_v63 = vadd.f32 %v3827_v61, %v3826_v42  ;;  %v3829_v0 = vpop.f32.mrb[54].mxu1  ;;  %v3886_v8 = vadd.f32 %v3885_v62, %v3884_v60  ;;  %v3887_v46 = vpop.f32.mrb[58].mxu0 }
 0x20a   : > { %v3830_v38 = vpop.f32.mrb[55].mxu1  ;;  %v3888_v9 = vpop.f32.mrb[59].mxu0 }
 0x20b   : > { %v2765_v48 = vadd.f32 %v3828_v63, %v5271_v3  ;;  %v3831_v10 = vadd.f32 %v3830_v38, %v3829_v0  ;;  %v3889_v11 = vadd.f32 %v3888_v9, %v3887_v46 }
 0x20d   : > { %v2768_v50 = vadd.f32 %v3831_v10, %v5273_v6  ;;  %v5319_v12 = vadd.f32 %v3886_v8, %v2765_v48 }
 0x20f   : > { %v5321_v14 = vadd.f32 %v3889_v11, %v2768_v50  ;;  %v3832_v15 = vpop.f32.mrb[56].mxu1  ;;  %v3890_v49 = vpop.f32.mrb[60].mxu0 }
 0x210   : > { %v3833_v43 = vpop.f32.mrb[57].mxu1  ;;  %v3891_v52 = vpop.f32.mrb[61].mxu0 }
 0x211   : > { %v3834_v2 = vadd.f32 %v3833_v43, %v3832_v15  ;;  %v3835_v16 = vpop.f32.mrb[58].mxu1  ;;  %v3892_v20 = vadd.f32 %v3891_v52, %v3890_v49  ;;  %v3893_v21 = vpop.f32.mrb[62].mxu0 }
 0x212   : > { %v3836_v28 = vpop.f32.mrb[59].mxu1  ;;  %v3894_v29 = vpop.f32.mrb[63].mxu0 }
 0x213   : > { %v2773_v3 = vadd.f32 %v3834_v2, %v5279_v22  ;;  %v3837_v13 = vadd.f32 %v3836_v28, %v3835_v16  ;;  %v3895_v24 = vadd.f32 %v3894_v29, %v3893_v21 }
 0x215   : > { %v2776_v6 = vadd.f32 %v3837_v13, %v5281_v27  ;;  %v5325_v32 = vadd.f32 %v3892_v20, %v2773_v3 }
 0x217   : > { %v5327_v33 = vadd.f32 %v3895_v24, %v2776_v6  ;;  %v3838_v34 = vpop.f32.mrb[60].mxu1  ;;  %v3896_v35 = vpop.f32.mrb[64].mxu0 }
 0x218   : > { %v3839_v4 = vpop.f32.mrb[61].mxu1  ;;  %v3897_v37 = vpop.f32.mrb[65].mxu0 }
 0x219   : > { %v3840_v18 = vadd.f32 %v3839_v4, %v3838_v34  ;;  %v3841_v5 = vpop.f32.mrb[62].mxu1  ;;  %v3898_v40 = vadd.f32 %v3897_v37, %v3896_v35  ;;  %v3899_v41 = vpop.f32.mrb[66].mxu0 }
 0x21a   : > { %v3842_v44 = vpop.f32.mrb[63].mxu1  ;;  %v3900_v45 = vpop.f32.mrb[67].mxu0 }
 0x21b   : > { %v2781_v22 = vadd.f32 %v3840_v18, %v5287_v47  ;;  %v3843_v53 = vadd.f32 %v3842_v44, %v3841_v5  ;;  %v3901_v54 = vadd.f32 %v3900_v45, %v3899_v41 }
 0x21d   : > { %v2784_v27 = vadd.f32 %v3843_v53, %v5289_v51  ;;  %v5331_v26 = vadd.f32 %v3898_v40, %v2781_v22 }
 0x21f   : > { %v5333_v36 = vadd.f32 %v3901_v54, %v2784_v27  ;;  %v3844_v55 = vpop.f32.mrb[64].mxu1  ;;  %v3902_v56 = vpop.f32.mrb[68].mxu0 }
 0x220   : > { %v3845_v23 = vpop.f32.mrb[65].mxu1  ;;  %v3903_v57 = vpop.f32.mrb[69].mxu0 }
 0x221   : > { %v3846_v58 = vadd.f32 %v3845_v23, %v3844_v55  ;;  %v3847_v25 = vpop.f32.mrb[66].mxu1  ;;  %v3904_v42 = vadd.f32 %v3903_v57, %v3902_v56  ;;  %v3905_v60 = vpop.f32.mrb[70].mxu0 }
 0x222   : > { %v3848_v61 = vpop.f32.mrb[67].mxu1  ;;  %v3906_v62 = vpop.f32.mrb[71].mxu0 }
 0x223   : > { %v2789_v47 = vadd.f32 %v3846_v58, %v5295_v1  ;;  %v3849_v63 = vadd.f32 %v3848_v61, %v3847_v25  ;;  %v3907_v0 = vadd.f32 %v3906_v62, %v3905_v60 }
 0x225   : > { %v2792_v51 = vadd.f32 %v3849_v63, %v5297_v7  ;;  %v5337_v8 = vadd.f32 %v3904_v42, %v2789_v47 }
 0x227   : > { %v5339_v46 = vadd.f32 %v3907_v0, %v2792_v51  ;;  %v3924_v38 = vpop.f32.mrb[68].mxu1  ;;  %v3007_v9 = vpop.f32.mrb[72].mxu0 }
 0x228   : > { %v3925_v48 = vpop.f32.mrb[69].mxu1  ;;  %v3987_v10 = vpop.f32.mrb[73].mxu0 }
 0x229   : > { %v3926_v11 = vadd.f32 %v3925_v48, %v3924_v38  ;;  %v3927_v50 = vpop.f32.mrb[70].mxu1  ;;  %v3010_v15 = vpop.f32.mrb[74].mxu0 }
 0x22a   : > { %v3928_v49 = vpop.f32.mrb[71].mxu1  ;;  %v3988_v43 = vpop.f32.mrb[75].mxu0 }
 0x22b   : > { %v3929_v52 = vadd.f32 %v3928_v49, %v3927_v50  ;;  %v2919_v1 = vadd.f32 %v3926_v11, %v5301_v17 }
 0x22d   : > { %v3008_v2 = vadd.f32 %v3007_v9, %v2919_v1  ;;  %v2922_v7 = vadd.f32 %v3929_v52, %v5303_v19 }
 0x22f   : > { %v3011_v16 = vadd.f32 %v3010_v15, %v2922_v7  ;;  %v3930_v20 = vpop.f32.mrb[72].mxu1  ;;  %v3015_v21 = vpop.f32.mrb[76].mxu0  ;;  %v3062_v3 = vmax.f32 %v3008_v2, 0.0 }
 0x230   : > { %v3931_v28 = vpop.f32.mrb[73].mxu1  ;;  %v3991_v29 = vpop.f32.mrb[77].mxu0 }
 0x231   : > { %v3063_v13 = vmax.f32 %v3011_v16, 0.0  ;;  %v3932_v24 = vadd.f32 %v3931_v28, %v3930_v20  ;;  %v3933_v6 = vpop.f32.mrb[74].mxu1  ;;  %v3018_v34 = vpop.f32.mrb[78].mxu0 }
 0x232   : > { %v3934_v35 = vpop.f32.mrb[75].mxu1  ;;  %v3992_v4 = vpop.f32.mrb[79].mxu0 }
 0x233   : > { %v3580_v37 = vpack.c.bf16 %v3063_v13, %v3062_v3  ;;  %v3935_v18 = vadd.f32 %v3934_v35, %v3933_v6  ;;  %v2927_v17 = vadd.f32 %v3932_v24, %v5307_v39 }
 0x235   : > { %3581 = vst [vmem:[%s5346_s27] sm:$0xff] %v3580_v37   ;;  %v3016_v19 = vadd.f32 %v3015_v21, %v2927_v17  ;;  %v2930_v5 = vadd.f32 %v3935_v18, %v5309_v30 }
 0x237   : > { %v3019_v40 = vadd.f32 %v3018_v34, %v2930_v5  ;;  %v3936_v41 = vpop.f32.mrb[76].mxu1  ;;  %v3023_v44 = vpop.f32.mrb[80].mxu0  ;;  %v3064_v53 = vmax.f32 %v3016_v19, 0.0 }
 0x238   : > { %v3937_v45 = vpop.f32.mrb[77].mxu1  ;;  %v3995_v22 = vpop.f32.mrb[81].mxu0 }
 0x239   : > { %v3065_v54 = vmax.f32 %v3019_v40, 0.0  ;;  %v3938_v27 = vadd.f32 %v3937_v45, %v3936_v41  ;;  %v3939_v55 = vpop.f32.mrb[78].mxu1  ;;  %v3026_v56 = vpop.f32.mrb[82].mxu0 }
 0x23a   : > { %v3940_v23 = vpop.f32.mrb[79].mxu1  ;;  %v3996_v39 = vpop.f32.mrb[83].mxu0 }
 0x23b   : > { %v3585_v57 = vpack.c.bf16 %v3065_v54, %v3064_v53  ;;  %v3941_v58 = vadd.f32 %v3940_v23, %v3939_v55  ;;  %v2935_v25 = vadd.f32 %v3938_v27, %v5313_v59 }
 0x23d   : > { %3612 = vst [vmem:[%s5346_s27 + $0x8] sm:$0xff] %v3585_v57   ;;  %v3024_v42 = vadd.f32 %v3023_v44, %v2935_v25  ;;  %v2938_v30 = vadd.f32 %v3941_v58, %v5315_v31 }
 0x23f   : > { %v3027_v60 = vadd.f32 %v3026_v56, %v2938_v30  ;;  %v3942_v61 = vpop.f32.mrb[80].mxu1  ;;  %v3031_v62 = vpop.f32.mrb[84].mxu0  ;;  %v3066_v0 = vmax.f32 %v3024_v42, 0.0 }
 0x240   : > { %v3943_v47 = vpop.f32.mrb[81].mxu1  ;;  %v3999_v63 = vpop.f32.mrb[85].mxu0 }
 0x241   : > { %v3067_v51 = vmax.f32 %v3027_v60, 0.0  ;;  %v3944_v38 = vadd.f32 %v3943_v47, %v3942_v61  ;;  %v3945_v9 = vpop.f32.mrb[82].mxu1  ;;  %v3034_v48 = vpop.f32.mrb[86].mxu0 }
 0x242   : > { %v3946_v10 = vpop.f32.mrb[83].mxu1  ;;  %v4000_v11 = vpop.f32.mrb[87].mxu0 }
 0x243   : > { %v3590_v50 = vpack.c.bf16 %v3067_v51, %v3066_v0  ;;  %v3947_v15 = vadd.f32 %v3946_v10, %v3945_v9  ;;  %v2943_v59 = vadd.f32 %v3944_v38, %v5319_v12 }
 0x244   : > { %v3177_v10 = vld [vmem:[%s5346_s27 + $0x8] sm:$0xf] (%p4404_p6)  ;;  %v3179_v11 = vld [vmem:[%s5346_s27 + $0xc] sm:$0xf] (%p4404_p6) }
 0x245   : > { %3613 = vst [vmem:[%s5346_s27 + $0x10] sm:$0xff] %v3590_v50   ;;  %v3032_v49 = vadd.f32 %v3031_v62, %v2943_v59  ;;  %v2946_v31 = vadd.f32 %v3947_v15, %v5321_v14  ;;  %3178 = vst [vmem:[%s3157_s29 + $0x10] sm:$0xf] (%p4404_p6), %v3177_v10 }
 0x246   : > { %3180 = vst [vmem:[%s3157_s29 + $0x18] sm:$0xf] (%p4404_p6), %v3179_v11 }
 0x247   : > { %v3035_v43 = vadd.f32 %v3034_v48, %v2946_v31  ;;  %v3948_v52 = vpop.f32.mrb[84].mxu1  ;;  %v3039_v1 = vpop.f32.mrb[88].mxu0  ;;  %v3068_v16 = vmax.f32 %v3032_v49, 0.0 }
 0x248   : > { %v3949_v2 = vpop.f32.mrb[85].mxu1  ;;  %v4003_v7 = vpop.f32.mrb[89].mxu0 }
 0x249   : > { %v3069_v20 = vmax.f32 %v3035_v43, 0.0  ;;  %v3950_v21 = vadd.f32 %v3949_v2, %v3948_v52  ;;  %v3951_v28 = vpop.f32.mrb[86].mxu1  ;;  %v3042_v29 = vpop.f32.mrb[90].mxu0 }
 0x24a   : > { %v3952_v3 = vpop.f32.mrb[87].mxu1  ;;  %v4004_v13 = vpop.f32.mrb[91].mxu0 }
 0x24b   : > { %v3595_v24 = vpack.c.bf16 %v3069_v20, %v3068_v16  ;;  %v3953_v6 = vadd.f32 %v3952_v3, %v3951_v28  ;;  %v2951_v12 = vadd.f32 %v3950_v21, %v5325_v32 }
 0x24c   : > { %v3181_v50 = vld [vmem:[%s5346_s27 + $0x10] sm:$0xf] (%p4404_p6)  ;;  %v3183_v15 = vld [vmem:[%s5346_s27 + $0x14] sm:$0xf] (%p4404_p6) }
 0x24d   : > { %3614 = vst [vmem:[%s5346_s27 + $0x18] sm:$0xff] %v3595_v24   ;;  %v3040_v34 = vadd.f32 %v3039_v1, %v2951_v12  ;;  %v2954_v14 = vadd.f32 %v3953_v6, %v5327_v33  ;;  %3182 = vst [vmem:[%s3157_s29 + $0x20] sm:$0xf] (%p4404_p6), %v3181_v50 }
 0x24e   : > { %3184 = vst [vmem:[%s3157_s29 + $0x28] sm:$0xf] (%p4404_p6), %v3183_v15 }
 0x24f   : > { %v3043_v35 = vadd.f32 %v3042_v29, %v2954_v14  ;;  %v3954_v4 = vpop.f32.mrb[88].mxu1  ;;  %v3047_v37 = vpop.f32.mrb[92].mxu0  ;;  %v3070_v19 = vmax.f32 %v3040_v34, 0.0 }
 0x250   : > { %v3955_v18 = vpop.f32.mrb[89].mxu1  ;;  %v4007_v17 = vpop.f32.mrb[93].mxu0 }
 0x251   : > { %v3071_v5 = vmax.f32 %v3043_v35, 0.0  ;;  %v3956_v40 = vadd.f32 %v3955_v18, %v3954_v4  ;;  %v3957_v41 = vpop.f32.mrb[90].mxu1  ;;  %v3050_v44 = vpop.f32.mrb[94].mxu0 }
 0x252   : > { %v3958_v45 = vpop.f32.mrb[91].mxu1  ;;  %v4008_v22 = vpop.f32.mrb[95].mxu0 }
 0x253   : > { %v3600_v53 = vpack.c.bf16 %v3071_v5, %v3070_v19  ;;  %v3959_v54 = vadd.f32 %v3958_v45, %v3957_v41  ;;  %v2959_v32 = vadd.f32 %v3956_v40, %v5331_v26 }
 0x254   : > { %v3185_v59 = vld [vmem:[%s5346_s27 + $0x18] sm:$0xf] (%p4404_p6)  ;;  %v3187_v49 = vld [vmem:[%s5346_s27 + $0x1c] sm:$0xf] (%p4404_p6) }
 0x255   : > { %3615 = vst [vmem:[%s5346_s27 + $0x20] sm:$0xff] %v3600_v53   ;;  %v3048_v27 = vadd.f32 %v3047_v37, %v2959_v32  ;;  %v2962_v33 = vadd.f32 %v3959_v54, %v5333_v36  ;;  %3186 = vst [vmem:[%s3157_s29 + $0x30] sm:$0xf] (%p4404_p6), %v3185_v59 }
 0x256   : > { %3188 = vst [vmem:[%s3157_s29 + $0x38] sm:$0xf] (%p4404_p6), %v3187_v49 }
 0x257   : > { %v3051_v55 = vadd.f32 %v3050_v44, %v2962_v33  ;;  %v3960_v56 = vpop.f32.mrb[92].mxu1  ;;  %v3055_v23 = vpop.f32.mrb[96].mxu0  ;;  %v3072_v58 = vmax.f32 %v3048_v27, 0.0 }
 0x258   : > { %v3961_v39 = vpop.f32.mrb[93].mxu1  ;;  %v4011_v57 = vpop.f32.mrb[97].mxu0 }
 0x259   : > { %v3073_v25 = vmax.f32 %v3051_v55, 0.0  ;;  %v3962_v42 = vadd.f32 %v3961_v39, %v3960_v56  ;;  %v3963_v30 = vpop.f32.mrb[94].mxu1  ;;  %v3058_v60 = vpop.f32.mrb[98].mxu0 }
 0x25a   : > { %v3964_v61 = vpop.f32.mrb[95].mxu1  ;;  %v4012_v62 = vpop.f32.mrb[99].mxu0 }
 0x25b   : > { %v3605_v47 = vpack.c.bf16 %v3073_v25, %v3072_v58  ;;  %v3965_v26 = vadd.f32 %v3964_v61, %v3963_v30  ;;  %v2967_v63 = vadd.f32 %v3962_v42, %v5337_v8  ;;  %v3173_v8 = vld [vmem:[%s5346_s27] sm:$0xf] (%p4404_p6) }
 0x25c   : > { %3174 = vst [vmem:[%s3157_s29] sm:$0xf] (%p4404_p6), %v3173_v8  ;;  %v3189_v31 = vld [vmem:[%s5346_s27 + $0x20] sm:$0xf] (%p4404_p6)  ;;  %v3191_v43 = vld [vmem:[%s5346_s27 + $0x24] sm:$0xf] (%p4404_p6) }
 0x25d   : > { %3616 = vst [vmem:[%s5346_s27 + $0x28] sm:$0xff] %v3605_v47   ;;  %v3056_v36 = vadd.f32 %v3055_v23, %v2967_v63  ;;  %v2970_v0 = vadd.f32 %v3965_v26, %v5339_v46  ;;  %v3175_v46 = vld [vmem:[%s5346_s27 + $0x4] sm:$0xf] (%p4404_p6)  ;;  %3190 = vst [vmem:[%s3157_s29 + $0x40] sm:$0xf] (%p4404_p6), %v3189_v31 }
 0x25e   : > { %3176 = vst [vmem:[%s3157_s29 + $0x8] sm:$0xf] (%p4404_p6), %v3175_v46  ;;  %3192 = vst [vmem:[%s3157_s29 + $0x48] sm:$0xf] (%p4404_p6), %v3191_v43 }
 0x25f   : > { %v3059_v51 = vadd.f32 %v3058_v60, %v2970_v0  ;;  %v3074_v38 = vmax.f32 %v3056_v36, 0.0  ;;  %3152 = sbr.rel (!%p4404_p6) target bundleno = 622 (0x26e), region = 77 }
 0x261   : > { %v3075_v9 = vmax.f32 %v3059_v51, 0.0 }
 0x263   : > { %v3610_v48 = vpack.c.bf16 %v3075_v9, %v3074_v38 }
 0x264   : > { %v3193_v52 = vld [vmem:[%s5346_s27 + $0x28] sm:$0xf] (%p4404_p6)  ;;  %v3195_v1 = vld [vmem:[%s5346_s27 + $0x2c] sm:$0xf] (%p4404_p6) }
 0x265   : > { %3617 = vst [vmem:[%s5346_s27 + $0x30] sm:$0xff] %v3610_v48   ;;  %3194 = vst [vmem:[%s3157_s29 + $0x50] sm:$0xf] (%p4404_p6), %v3193_v52 }
 0x266   : > { %3196 = vst [vmem:[%s3157_s29 + $0x58] sm:$0xf] %v3195_v1 }
 0x26c   : > { %v3197_v2 = vld [vmem:[%s5346_s27 + $0x30] sm:$0xf]  ;;  %v3199_v7 = vld [vmem:[%s5346_s27 + $0x34] sm:$0xf] }
 0x26d   : > { %3198 = vst [vmem:[%s3157_s29 + $0x60] sm:$0xf] %v3197_v2  ;;  %3200 = vst [vmem:[%s3157_s29 + $0x68] sm:$0xf] %v3199_v7 }
 0x26e PF: > { %s13_s16 = sadd.s32 1, %s4345_s16   ;;  %s5406_s12 = smov %s4333_s13 }
 0x26f   : > { %p10_p12 = scmp.ge.s32.totalorder %s13_s16, 4   ;;  %s5407_s13 = smov %s4409_s22 }
 0x270   : > { %s5408_s14 = smov %s4341_s15  ;;  %s5409_s15 = smov %s5411_s17 }
 0x271   :  { %12 = sbr.rel (!%p10_p12) target bundleno = 3 (0x3), region = 155 }

// kernel: alexnet_fmaps.7
= control target key start
LH: loop header
LB: loop body
LE: loop exit
PB: predicated region body
PF: predicated region fallthrough
CT: control target
= control target key end

     0   :  { %s3278_s12 = smov 0   ;;  %s3280_s13 = smov 0   ;;  %s4003_s0 = inlined_call_operand.vmem [shape: bf16[32,1728], index: 0, kind: input, shape index: {}]   ;;  %s4004_s1 = inlined_call_operand.vmem [shape: bf16[1728,384], index: 1, kind: input, shape index: {}]   ;;  %s4005_s2 = inlined_call_operand.vmem [shape: f32[1,384], index: 2, kind: input, shape index: {}]   ;;  %s4006_s3 = inlined_call_operand.vmem [shape: bf16[32,384], index: 3, kind: output, shape index: {}]  }
   0x1   :  { %s3282_s14 = smov 0   ;;  %s3284_s15 = smov 0  }
   0x2   :  { %s3286_s16 = smov 0  }
   0x3 LB: > { %s22_s17 = sadd.s32 1, %s3251_s15  ;;  %s2686_s18 = sadd.s32 4294967295, %s3255_s16   ;;  %s3255_s16 = sphi %s3286_s16, %s13_s16   ;;  %s3251_s15 = sphi %s3284_s15, %s4011_s15   ;;  %s3247_s14 = sphi %s3282_s14, %s4010_s14   ;;  %s3243_s13 = sphi %s3280_s13, %s4009_s13   ;;  %s3239_s12 = sphi %s3278_s12, %s4008_s12  }
   0x4   : > { %p23_p0 = scmp.ge.s32.totalorder %s22_s17, 3  ;;  %p65_p1 = scmp.ne.s32.totalorder %s3243_s13, %s3239_s12 }
   0x5   : > { %p66_p2 = scmp.eq.s32.totalorder %s3255_s16, 0  ;;  %p123_p4 = scmp.eq.s32.totalorder %s2686_s18, 2 }
   0x6   : > { %s4013_s17 = smov (%p23_p0, %s22_s17), 0  ;;  %s58_s20 = sadd.s32 1, %s3243_s13 }
   0x7   : > { %p67_p3 = por %p66_p2, %p65_p1  ;;  %s55_s19 = ssub.s32 %s3251_s15, %s4013_s17 }
   0x8   : > { %p56_p5 = scmp.eq.s32.totalorder %s55_s19, 0  ;;  %p3313_p6 = por %p123_p4, %p65_p1 }
   0x9   : > { %p2690_p7 = scmp.ge.s32.totalorder %s3255_s16, 3 }
   0xa   : > { %s3318_s22 = scalar_select %p56_p5, %s3243_s13, %s58_s20  }
   0xb   : > { %155 = sbr.rel (%p2690_p7) target bundleno = 166 (0xa6), region = 20 }
  0x12   : > { %158 = sbr.rel (!%p67_p3) target bundleno = 166 (0xa6), region = 24  ;;  %s160_s23 = sand.u32 (%p67_p3), 1, %s3243_s13  }
  0x13   : > { %s2691_s24 = sshll.u32 (%p67_p3), %s3251_s15, 2  ;;  %s3024_s25 = smul.u32 (%p67_p3), 864, %s160_s23 }
  0x14   : > { %s3326_s28 = scalar_lea.vmem (%p67_p3), %s4004_s1, %s2691_s24 }
  0x15   : > { %v180_v0 = vld [vmem:[%s3326_s28] sm:$0xf] (%p67_p3)  ;;  %v182_v1 = vld [vmem:[%s3326_s28 + $0xc] sm:$0xf] (%p67_p3)  ;;  %v184_v2 = vld [vmem:[%s3326_s28 + $0x18] sm:$0xf] (%p67_p3) }
  0x16   : > { %v186_v3 = vld [vmem:[%s3326_s28 + $0x24] sm:$0xf] (%p67_p3)  ;;  %v188_v4 = vld [vmem:[%s3326_s28 + $0x30] sm:$0xf] (%p67_p3)  ;;  %s3333_s29 = scalar_lea.vmem (%p67_p3), [#allocation2], %s3024_s25 }
  0x17   : > { %181 = vst [vmem:[%s3333_s29] sm:$0xf] (%p67_p3), %v180_v0  ;;  %183 = vst [vmem:[%s3333_s29 + $0x4] sm:$0xf] (%p67_p3), %v182_v1  ;;  %v190_v5 = vld [vmem:[%s3326_s28 + $0x3c] sm:$0xf] (%p67_p3) }
  0x18   : > { %185 = vst [vmem:[%s3333_s29 + $0x8] sm:$0xf] (%p67_p3), %v184_v2  ;;  %187 = vst [vmem:[%s3333_s29 + $0xc] sm:$0xf] (%p67_p3), %v186_v3  ;;  %v192_v6 = vld [vmem:[%s3326_s28 + $0x48] sm:$0xf] (%p67_p3) }
  0x19   : > { %189 = vst [vmem:[%s3333_s29 + $0x10] sm:$0xf] %v188_v4  ;;  %v194_v7 = vld [vmem:[%s3326_s28 + $0x54] sm:$0xf]  ;;  %191 = vst [vmem:[%s3333_s29 + $0x14] sm:$0xf] %v190_v5 }
  0x1a   : > { %193 = vst [vmem:[%s3333_s29 + $0x18] sm:$0xf] %v192_v6  ;;  %195 = vst [vmem:[%s3333_s29 + $0x1c] sm:$0xf] %v194_v7  ;;  %v196_v8 = vld [vmem:[%s3326_s28 + $0x60] sm:$0xf] }
  0x1b   : > { %v198_v9 = vld [vmem:[%s3326_s28 + $0x6c] sm:$0xf]  ;;  %v200_v10 = vld [vmem:[%s3326_s28 + $0x78] sm:$0xf]  ;;  %197 = vst [vmem:[%s3333_s29 + $0x20] sm:$0xf] %v196_v8 }
  0x1c   : > { %199 = vst [vmem:[%s3333_s29 + $0x24] sm:$0xf] %v198_v9  ;;  %201 = vst [vmem:[%s3333_s29 + $0x28] sm:$0xf] %v200_v10  ;;  %v202_v11 = vld [vmem:[%s3326_s28 + $0x84] sm:$0xf] }
  0x1d   : > { %v204_v12 = vld [vmem:[%s3326_s28 + $0x90] sm:$0xf]  ;;  %v206_v13 = vld [vmem:[%s3326_s28 + $0x9c] sm:$0xf]  ;;  %203 = vst [vmem:[%s3333_s29 + $0x2c] sm:$0xf] %v202_v11 }
  0x1e   : > { %205 = vst [vmem:[%s3333_s29 + $0x30] sm:$0xf] %v204_v12  ;;  %207 = vst [vmem:[%s3333_s29 + $0x34] sm:$0xf] %v206_v13  ;;  %v208_v14 = vld [vmem:[%s3326_s28 + $0xa8] sm:$0xf] }
  0x1f   : > { %v210_v15 = vld [vmem:[%s3326_s28 + $0xb4] sm:$0xf]  ;;  %v212_v16 = vld [vmem:[%s3326_s28 + $0xc0] sm:$0xf]  ;;  %209 = vst [vmem:[%s3333_s29 + $0x38] sm:$0xf] %v208_v14 }
  0x20   : > { %211 = vst [vmem:[%s3333_s29 + $0x3c] sm:$0xf] %v210_v15  ;;  %213 = vst [vmem:[%s3333_s29 + $0x40] sm:$0xf] %v212_v16  ;;  %v214_v17 = vld [vmem:[%s3326_s28 + $0xcc] sm:$0xf] }
  0x21   : > { %v216_v18 = vld [vmem:[%s3326_s28 + $0xd8] sm:$0xf]  ;;  %v218_v19 = vld [vmem:[%s3326_s28 + $0xe4] sm:$0xf]  ;;  %215 = vst [vmem:[%s3333_s29 + $0x44] sm:$0xf] %v214_v17 }
  0x22   : > { %217 = vst [vmem:[%s3333_s29 + $0x48] sm:$0xf] %v216_v18  ;;  %219 = vst [vmem:[%s3333_s29 + $0x4c] sm:$0xf] %v218_v19  ;;  %v220_v20 = vld [vmem:[%s3326_s28 + $0xf0] sm:$0xf] }
  0x23   : > { %v222_v21 = vld [vmem:[%s3326_s28 + $0xfc] sm:$0xf]  ;;  %v224_v22 = vld [vmem:[%s3326_s28 + $0x108] sm:$0xf]  ;;  %221 = vst [vmem:[%s3333_s29 + $0x50] sm:$0xf] %v220_v20 }
  0x24   : > { %223 = vst [vmem:[%s3333_s29 + $0x54] sm:$0xf] %v222_v21  ;;  %225 = vst [vmem:[%s3333_s29 + $0x58] sm:$0xf] %v224_v22  ;;  %v226_v23 = vld [vmem:[%s3326_s28 + $0x114] sm:$0xf] }
  0x25   : > { %v228_v24 = vld [vmem:[%s3326_s28 + $0x120] sm:$0xf]  ;;  %v230_v25 = vld [vmem:[%s3326_s28 + $0x12c] sm:$0xf]  ;;  %227 = vst [vmem:[%s3333_s29 + $0x5c] sm:$0xf] %v226_v23 }
  0x26   : > { %229 = vst [vmem:[%s3333_s29 + $0x60] sm:$0xf] %v228_v24  ;;  %231 = vst [vmem:[%s3333_s29 + $0x64] sm:$0xf] %v230_v25  ;;  %v232_v26 = vld [vmem:[%s3326_s28 + $0x138] sm:$0xf] }
  0x27   : > { %v234_v27 = vld [vmem:[%s3326_s28 + $0x144] sm:$0xf]  ;;  %v236_v28 = vld [vmem:[%s3326_s28 + $0x150] sm:$0xf]  ;;  %233 = vst [vmem:[%s3333_s29 + $0x68] sm:$0xf] %v232_v26 }
  0x28   : > { %235 = vst [vmem:[%s3333_s29 + $0x6c] sm:$0xf] %v234_v27  ;;  %237 = vst [vmem:[%s3333_s29 + $0x70] sm:$0xf] %v236_v28  ;;  %v238_v29 = vld [vmem:[%s3326_s28 + $0x15c] sm:$0xf] }
  0x29   : > { %v240_v30 = vld [vmem:[%s3326_s28 + $0x168] sm:$0xf]  ;;  %v242_v31 = vld [vmem:[%s3326_s28 + $0x174] sm:$0xf]  ;;  %239 = vst [vmem:[%s3333_s29 + $0x74] sm:$0xf] %v238_v29 }
  0x2a   : > { %241 = vst [vmem:[%s3333_s29 + $0x78] sm:$0xf] %v240_v30  ;;  %243 = vst [vmem:[%s3333_s29 + $0x7c] sm:$0xf] %v242_v31  ;;  %v244_v32 = vld [vmem:[%s3326_s28 + $0x180] sm:$0xf] }
  0x2b   : > { %v246_v33 = vld [vmem:[%s3326_s28 + $0x18c] sm:$0xf]  ;;  %v248_v34 = vld [vmem:[%s3326_s28 + $0x198] sm:$0xf]  ;;  %245 = vst [vmem:[%s3333_s29 + $0x80] sm:$0xf] %v244_v32 }
  0x2c   : > { %247 = vst [vmem:[%s3333_s29 + $0x84] sm:$0xf] %v246_v33  ;;  %249 = vst [vmem:[%s3333_s29 + $0x88] sm:$0xf] %v248_v34  ;;  %v250_v35 = vld [vmem:[%s3326_s28 + $0x1a4] sm:$0xf] }
  0x2d   : > { %v252_v36 = vld [vmem:[%s3326_s28 + $0x1b0] sm:$0xf]  ;;  %v254_v37 = vld [vmem:[%s3326_s28 + $0x1bc] sm:$0xf]  ;;  %251 = vst [vmem:[%s3333_s29 + $0x8c] sm:$0xf] %v250_v35 }
  0x2e   : > { %253 = vst [vmem:[%s3333_s29 + $0x90] sm:$0xf] %v252_v36  ;;  %255 = vst [vmem:[%s3333_s29 + $0x94] sm:$0xf] %v254_v37  ;;  %v256_v38 = vld [vmem:[%s3326_s28 + $0x1c8] sm:$0xf] }
  0x2f   : > { %v258_v39 = vld [vmem:[%s3326_s28 + $0x1d4] sm:$0xf]  ;;  %v260_v40 = vld [vmem:[%s3326_s28 + $0x1e0] sm:$0xf]  ;;  %257 = vst [vmem:[%s3333_s29 + $0x98] sm:$0xf] %v256_v38 }
  0x30   : > { %259 = vst [vmem:[%s3333_s29 + $0x9c] sm:$0xf] %v258_v39  ;;  %261 = vst [vmem:[%s3333_s29 + $0xa0] sm:$0xf] %v260_v40  ;;  %v262_v41 = vld [vmem:[%s3326_s28 + $0x1ec] sm:$0xf] }
  0x31   : > { %v264_v42 = vld [vmem:[%s3326_s28 + $0x1f8] sm:$0xf]  ;;  %v266_v43 = vld [vmem:[%s3326_s28 + $0x204] sm:$0xf]  ;;  %263 = vst [vmem:[%s3333_s29 + $0xa4] sm:$0xf] %v262_v41 }
  0x32   : > { %265 = vst [vmem:[%s3333_s29 + $0xa8] sm:$0xf] %v264_v42  ;;  %267 = vst [vmem:[%s3333_s29 + $0xac] sm:$0xf] %v266_v43  ;;  %v268_v44 = vld [vmem:[%s3326_s28 + $0x210] sm:$0xf] }
  0x33   : > { %v270_v45 = vld [vmem:[%s3326_s28 + $0x21c] sm:$0xf]  ;;  %v272_v46 = vld [vmem:[%s3326_s28 + $0x228] sm:$0xf]  ;;  %269 = vst [vmem:[%s3333_s29 + $0xb0] sm:$0xf] %v268_v44 }
  0x34   : > { %271 = vst [vmem:[%s3333_s29 + $0xb4] sm:$0xf] %v270_v45  ;;  %273 = vst [vmem:[%s3333_s29 + $0xb8] sm:$0xf] %v272_v46  ;;  %v274_v47 = vld [vmem:[%s3326_s28 + $0x234] sm:$0xf] }
  0x35   : > { %v276_v48 = vld [vmem:[%s3326_s28 + $0x240] sm:$0xf]  ;;  %v278_v49 = vld [vmem:[%s3326_s28 + $0x24c] sm:$0xf]  ;;  %275 = vst [vmem:[%s3333_s29 + $0xbc] sm:$0xf] %v274_v47 }
  0x36   : > { %277 = vst [vmem:[%s3333_s29 + $0xc0] sm:$0xf] %v276_v48  ;;  %279 = vst [vmem:[%s3333_s29 + $0xc4] sm:$0xf] %v278_v49  ;;  %v280_v50 = vld [vmem:[%s3326_s28 + $0x258] sm:$0xf] }
  0x37   : > { %v282_v51 = vld [vmem:[%s3326_s28 + $0x264] sm:$0xf]  ;;  %v284_v52 = vld [vmem:[%s3326_s28 + $0x270] sm:$0xf]  ;;  %281 = vst [vmem:[%s3333_s29 + $0xc8] sm:$0xf] %v280_v50 }
  0x38   : > { %283 = vst [vmem:[%s3333_s29 + $0xcc] sm:$0xf] %v282_v51  ;;  %285 = vst [vmem:[%s3333_s29 + $0xd0] sm:$0xf] %v284_v52  ;;  %v286_v53 = vld [vmem:[%s3326_s28 + $0x27c] sm:$0xf] }
  0x39   : > { %v288_v54 = vld [vmem:[%s3326_s28 + $0x288] sm:$0xf]  ;;  %v290_v55 = vld [vmem:[%s3326_s28 + $0x294] sm:$0xf]  ;;  %287 = vst [vmem:[%s3333_s29 + $0xd4] sm:$0xf] %v286_v53 }
  0x3a   : > { %289 = vst [vmem:[%s3333_s29 + $0xd8] sm:$0xf] %v288_v54  ;;  %291 = vst [vmem:[%s3333_s29 + $0xdc] sm:$0xf] %v290_v55  ;;  %v292_v56 = vld [vmem:[%s3326_s28 + $0x2a0] sm:$0xf] }
  0x3b   : > { %v294_v57 = vld [vmem:[%s3326_s28 + $0x2ac] sm:$0xf]  ;;  %v296_v58 = vld [vmem:[%s3326_s28 + $0x2b8] sm:$0xf]  ;;  %293 = vst [vmem:[%s3333_s29 + $0xe0] sm:$0xf] %v292_v56 }
  0x3c   : > { %295 = vst [vmem:[%s3333_s29 + $0xe4] sm:$0xf] %v294_v57  ;;  %297 = vst [vmem:[%s3333_s29 + $0xe8] sm:$0xf] %v296_v58  ;;  %v298_v59 = vld [vmem:[%s3326_s28 + $0x2c4] sm:$0xf] }
  0x3d   : > { %v300_v60 = vld [vmem:[%s3326_s28 + $0x2d0] sm:$0xf]  ;;  %v302_v61 = vld [vmem:[%s3326_s28 + $0x2dc] sm:$0xf]  ;;  %299 = vst [vmem:[%s3333_s29 + $0xec] sm:$0xf] %v298_v59 }
  0x3e   : > { %301 = vst [vmem:[%s3333_s29 + $0xf0] sm:$0xf] %v300_v60  ;;  %303 = vst [vmem:[%s3333_s29 + $0xf4] sm:$0xf] %v302_v61  ;;  %v304_v62 = vld [vmem:[%s3326_s28 + $0x2e8] sm:$0xf] }
  0x3f   : > { %v306_v63 = vld [vmem:[%s3326_s28 + $0x2f4] sm:$0xf]  ;;  %v308_v0 = vld [vmem:[%s3326_s28 + $0x300] sm:$0xf]  ;;  %305 = vst [vmem:[%s3333_s29 + $0xf8] sm:$0xf] %v304_v62 }
  0x40   : > { %307 = vst [vmem:[%s3333_s29 + $0xfc] sm:$0xf] %v306_v63  ;;  %309 = vst [vmem:[%s3333_s29 + $0x100] sm:$0xf] %v308_v0  ;;  %v310_v1 = vld [vmem:[%s3326_s28 + $0x30c] sm:$0xf] }
  0x41   : > { %v312_v2 = vld [vmem:[%s3326_s28 + $0x318] sm:$0xf]  ;;  %v314_v3 = vld [vmem:[%s3326_s28 + $0x324] sm:$0xf]  ;;  %311 = vst [vmem:[%s3333_s29 + $0x104] sm:$0xf] %v310_v1 }
  0x42   : > { %313 = vst [vmem:[%s3333_s29 + $0x108] sm:$0xf] %v312_v2  ;;  %315 = vst [vmem:[%s3333_s29 + $0x10c] sm:$0xf] %v314_v3  ;;  %v316_v4 = vld [vmem:[%s3326_s28 + $0x330] sm:$0xf] }
  0x43   : > { %v318_v5 = vld [vmem:[%s3326_s28 + $0x33c] sm:$0xf]  ;;  %v320_v6 = vld [vmem:[%s3326_s28 + $0x348] sm:$0xf]  ;;  %317 = vst [vmem:[%s3333_s29 + $0x110] sm:$0xf] %v316_v4 }
  0x44   : > { %319 = vst [vmem:[%s3333_s29 + $0x114] sm:$0xf] %v318_v5  ;;  %321 = vst [vmem:[%s3333_s29 + $0x118] sm:$0xf] %v320_v6  ;;  %v322_v7 = vld [vmem:[%s3326_s28 + $0x354] sm:$0xf] }
  0x45   : > { %v324_v8 = vld [vmem:[%s3326_s28 + $0x360] sm:$0xf]  ;;  %v326_v9 = vld [vmem:[%s3326_s28 + $0x36c] sm:$0xf]  ;;  %323 = vst [vmem:[%s3333_s29 + $0x11c] sm:$0xf] %v322_v7 }
  0x46   : > { %325 = vst [vmem:[%s3333_s29 + $0x120] sm:$0xf] %v324_v8  ;;  %327 = vst [vmem:[%s3333_s29 + $0x124] sm:$0xf] %v326_v9  ;;  %v328_v10 = vld [vmem:[%s3326_s28 + $0x378] sm:$0xf] }
  0x47   : > { %v330_v11 = vld [vmem:[%s3326_s28 + $0x384] sm:$0xf]  ;;  %v332_v12 = vld [vmem:[%s3326_s28 + $0x390] sm:$0xf]  ;;  %329 = vst [vmem:[%s3333_s29 + $0x128] sm:$0xf] %v328_v10 }
  0x48   : > { %331 = vst [vmem:[%s3333_s29 + $0x12c] sm:$0xf] %v330_v11  ;;  %333 = vst [vmem:[%s3333_s29 + $0x130] sm:$0xf] %v332_v12  ;;  %v334_v13 = vld [vmem:[%s3326_s28 + $0x39c] sm:$0xf] }
  0x49   : > { %v336_v14 = vld [vmem:[%s3326_s28 + $0x3a8] sm:$0xf]  ;;  %v338_v15 = vld [vmem:[%s3326_s28 + $0x3b4] sm:$0xf]  ;;  %335 = vst [vmem:[%s3333_s29 + $0x134] sm:$0xf] %v334_v13 }
  0x4a   : > { %337 = vst [vmem:[%s3333_s29 + $0x138] sm:$0xf] %v336_v14  ;;  %339 = vst [vmem:[%s3333_s29 + $0x13c] sm:$0xf] %v338_v15  ;;  %v340_v16 = vld [vmem:[%s3326_s28 + $0x3c0] sm:$0xf] }
  0x4b   : > { %v342_v17 = vld [vmem:[%s3326_s28 + $0x3cc] sm:$0xf]  ;;  %v344_v18 = vld [vmem:[%s3326_s28 + $0x3d8] sm:$0xf]  ;;  %341 = vst [vmem:[%s3333_s29 + $0x140] sm:$0xf] %v340_v16 }
  0x4c   : > { %343 = vst [vmem:[%s3333_s29 + $0x144] sm:$0xf] %v342_v17  ;;  %345 = vst [vmem:[%s3333_s29 + $0x148] sm:$0xf] %v344_v18  ;;  %v346_v19 = vld [vmem:[%s3326_s28 + $0x3e4] sm:$0xf] }
  0x4d   : > { %v348_v20 = vld [vmem:[%s3326_s28 + $0x3f0] sm:$0xf]  ;;  %v350_v21 = vld [vmem:[%s3326_s28 + $0x3fc] sm:$0xf]  ;;  %347 = vst [vmem:[%s3333_s29 + $0x14c] sm:$0xf] %v346_v19 }
  0x4e   : > { %349 = vst [vmem:[%s3333_s29 + $0x150] sm:$0xf] %v348_v20  ;;  %351 = vst [vmem:[%s3333_s29 + $0x154] sm:$0xf] %v350_v21  ;;  %v352_v22 = vld [vmem:[%s3326_s28 + $0x408] sm:$0xf] }
  0x4f   : > { %v354_v23 = vld [vmem:[%s3326_s28 + $0x414] sm:$0xf]  ;;  %v356_v24 = vld [vmem:[%s3326_s28 + $0x420] sm:$0xf]  ;;  %353 = vst [vmem:[%s3333_s29 + $0x158] sm:$0xf] %v352_v22 }
  0x50   : > { %355 = vst [vmem:[%s3333_s29 + $0x15c] sm:$0xf] %v354_v23  ;;  %357 = vst [vmem:[%s3333_s29 + $0x160] sm:$0xf] %v356_v24  ;;  %v358_v25 = vld [vmem:[%s3326_s28 + $0x42c] sm:$0xf] }
  0x51   : > { %v360_v26 = vld [vmem:[%s3326_s28 + $0x438] sm:$0xf]  ;;  %v362_v27 = vld [vmem:[%s3326_s28 + $0x444] sm:$0xf]  ;;  %359 = vst [vmem:[%s3333_s29 + $0x164] sm:$0xf] %v358_v25 }
  0x52   : > { %361 = vst [vmem:[%s3333_s29 + $0x168] sm:$0xf] %v360_v26  ;;  %363 = vst [vmem:[%s3333_s29 + $0x16c] sm:$0xf] %v362_v27  ;;  %v364_v28 = vld [vmem:[%s3326_s28 + $0x450] sm:$0xf] }
  0x53   : > { %v366_v29 = vld [vmem:[%s3326_s28 + $0x45c] sm:$0xf]  ;;  %v368_v30 = vld [vmem:[%s3326_s28 + $0x468] sm:$0xf]  ;;  %365 = vst [vmem:[%s3333_s29 + $0x170] sm:$0xf] %v364_v28 }
  0x54   : > { %367 = vst [vmem:[%s3333_s29 + $0x174] sm:$0xf] %v366_v29  ;;  %369 = vst [vmem:[%s3333_s29 + $0x178] sm:$0xf] %v368_v30  ;;  %v370_v31 = vld [vmem:[%s3326_s28 + $0x474] sm:$0xf] }
  0x55   : > { %v372_v32 = vld [vmem:[%s3326_s28 + $0x480] sm:$0xf]  ;;  %v374_v33 = vld [vmem:[%s3326_s28 + $0x48c] sm:$0xf]  ;;  %371 = vst [vmem:[%s3333_s29 + $0x17c] sm:$0xf] %v370_v31 }
  0x56   : > { %373 = vst [vmem:[%s3333_s29 + $0x180] sm:$0xf] %v372_v32  ;;  %375 = vst [vmem:[%s3333_s29 + $0x184] sm:$0xf] %v374_v33  ;;  %v376_v34 = vld [vmem:[%s3326_s28 + $0x498] sm:$0xf] }
  0x57   : > { %v378_v35 = vld [vmem:[%s3326_s28 + $0x4a4] sm:$0xf]  ;;  %v380_v36 = vld [vmem:[%s3326_s28 + $0x4b0] sm:$0xf]  ;;  %377 = vst [vmem:[%s3333_s29 + $0x188] sm:$0xf] %v376_v34 }
  0x58   : > { %379 = vst [vmem:[%s3333_s29 + $0x18c] sm:$0xf] %v378_v35  ;;  %381 = vst [vmem:[%s3333_s29 + $0x190] sm:$0xf] %v380_v36  ;;  %v382_v37 = vld [vmem:[%s3326_s28 + $0x4bc] sm:$0xf] }
  0x59   : > { %v384_v38 = vld [vmem:[%s3326_s28 + $0x4c8] sm:$0xf]  ;;  %v386_v39 = vld [vmem:[%s3326_s28 + $0x4d4] sm:$0xf]  ;;  %383 = vst [vmem:[%s3333_s29 + $0x194] sm:$0xf] %v382_v37 }
  0x5a   : > { %385 = vst [vmem:[%s3333_s29 + $0x198] sm:$0xf] %v384_v38  ;;  %387 = vst [vmem:[%s3333_s29 + $0x19c] sm:$0xf] %v386_v39  ;;  %v388_v40 = vld [vmem:[%s3326_s28 + $0x4e0] sm:$0xf] }
  0x5b   : > { %v390_v41 = vld [vmem:[%s3326_s28 + $0x4ec] sm:$0xf]  ;;  %v392_v42 = vld [vmem:[%s3326_s28 + $0x4f8] sm:$0xf]  ;;  %389 = vst [vmem:[%s3333_s29 + $0x1a0] sm:$0xf] %v388_v40 }
  0x5c   : > { %391 = vst [vmem:[%s3333_s29 + $0x1a4] sm:$0xf] %v390_v41  ;;  %393 = vst [vmem:[%s3333_s29 + $0x1a8] sm:$0xf] %v392_v42  ;;  %v394_v43 = vld [vmem:[%s3326_s28 + $0x504] sm:$0xf] }
  0x5d   : > { %v396_v44 = vld [vmem:[%s3326_s28 + $0x510] sm:$0xf]  ;;  %v398_v45 = vld [vmem:[%s3326_s28 + $0x51c] sm:$0xf]  ;;  %395 = vst [vmem:[%s3333_s29 + $0x1ac] sm:$0xf] %v394_v43 }
  0x5e   : > { %397 = vst [vmem:[%s3333_s29 + $0x1b0] sm:$0xf] %v396_v44  ;;  %399 = vst [vmem:[%s3333_s29 + $0x1b4] sm:$0xf] %v398_v45  ;;  %v400_v46 = vld [vmem:[%s3326_s28 + $0x528] sm:$0xf] }
  0x5f   : > { %v402_v47 = vld [vmem:[%s3326_s28 + $0x534] sm:$0xf]  ;;  %v404_v48 = vld [vmem:[%s3326_s28 + $0x540] sm:$0xf]  ;;  %401 = vst [vmem:[%s3333_s29 + $0x1b8] sm:$0xf] %v400_v46 }
  0x60   : > { %403 = vst [vmem:[%s3333_s29 + $0x1bc] sm:$0xf] %v402_v47  ;;  %405 = vst [vmem:[%s3333_s29 + $0x1c0] sm:$0xf] %v404_v48  ;;  %v406_v49 = vld [vmem:[%s3326_s28 + $0x54c] sm:$0xf] }
  0x61   : > { %v408_v50 = vld [vmem:[%s3326_s28 + $0x558] sm:$0xf]  ;;  %v410_v51 = vld [vmem:[%s3326_s28 + $0x564] sm:$0xf]  ;;  %407 = vst [vmem:[%s3333_s29 + $0x1c4] sm:$0xf] %v406_v49 }
  0x62   : > { %409 = vst [vmem:[%s3333_s29 + $0x1c8] sm:$0xf] %v408_v50  ;;  %411 = vst [vmem:[%s3333_s29 + $0x1cc] sm:$0xf] %v410_v51  ;;  %v412_v52 = vld [vmem:[%s3326_s28 + $0x570] sm:$0xf] }
  0x63   : > { %v414_v53 = vld [vmem:[%s3326_s28 + $0x57c] sm:$0xf]  ;;  %v416_v54 = vld [vmem:[%s3326_s28 + $0x588] sm:$0xf]  ;;  %413 = vst [vmem:[%s3333_s29 + $0x1d0] sm:$0xf] %v412_v52 }
  0x64   : > { %415 = vst [vmem:[%s3333_s29 + $0x1d4] sm:$0xf] %v414_v53  ;;  %417 = vst [vmem:[%s3333_s29 + $0x1d8] sm:$0xf] %v416_v54  ;;  %v418_v55 = vld [vmem:[%s3326_s28 + $0x594] sm:$0xf] }
  0x65   : > { %v420_v56 = vld [vmem:[%s3326_s28 + $0x5a0] sm:$0xf]  ;;  %v422_v57 = vld [vmem:[%s3326_s28 + $0x5ac] sm:$0xf]  ;;  %419 = vst [vmem:[%s3333_s29 + $0x1dc] sm:$0xf] %v418_v55 }
  0x66   : > { %421 = vst [vmem:[%s3333_s29 + $0x1e0] sm:$0xf] %v420_v56  ;;  %423 = vst [vmem:[%s3333_s29 + $0x1e4] sm:$0xf] %v422_v57  ;;  %v424_v58 = vld [vmem:[%s3326_s28 + $0x5b8] sm:$0xf] }
  0x67   : > { %v426_v59 = vld [vmem:[%s3326_s28 + $0x5c4] sm:$0xf]  ;;  %v428_v60 = vld [vmem:[%s3326_s28 + $0x5d0] sm:$0xf]  ;;  %425 = vst [vmem:[%s3333_s29 + $0x1e8] sm:$0xf] %v424_v58 }
  0x68   : > { %427 = vst [vmem:[%s3333_s29 + $0x1ec] sm:$0xf] %v426_v59  ;;  %429 = vst [vmem:[%s3333_s29 + $0x1f0] sm:$0xf] %v428_v60  ;;  %v430_v61 = vld [vmem:[%s3326_s28 + $0x5dc] sm:$0xf] }
  0x69   : > { %v432_v62 = vld [vmem:[%s3326_s28 + $0x5e8] sm:$0xf]  ;;  %v434_v63 = vld [vmem:[%s3326_s28 + $0x5f4] sm:$0xf]  ;;  %431 = vst [vmem:[%s3333_s29 + $0x1f4] sm:$0xf] %v430_v61 }
  0x6a   : > { %433 = vst [vmem:[%s3333_s29 + $0x1f8] sm:$0xf] %v432_v62  ;;  %435 = vst [vmem:[%s3333_s29 + $0x1fc] sm:$0xf] %v434_v63  ;;  %v436_v0 = vld [vmem:[%s3326_s28 + $0x600] sm:$0xf] }
  0x6b   : > { %v438_v1 = vld [vmem:[%s3326_s28 + $0x60c] sm:$0xf]  ;;  %v440_v2 = vld [vmem:[%s3326_s28 + $0x618] sm:$0xf]  ;;  %437 = vst [vmem:[%s3333_s29 + $0x200] sm:$0xf] %v436_v0 }
  0x6c   : > { %439 = vst [vmem:[%s3333_s29 + $0x204] sm:$0xf] %v438_v1  ;;  %441 = vst [vmem:[%s3333_s29 + $0x208] sm:$0xf] %v440_v2  ;;  %v442_v3 = vld [vmem:[%s3326_s28 + $0x624] sm:$0xf] }
  0x6d   : > { %v444_v4 = vld [vmem:[%s3326_s28 + $0x630] sm:$0xf]  ;;  %v446_v5 = vld [vmem:[%s3326_s28 + $0x63c] sm:$0xf]  ;;  %443 = vst [vmem:[%s3333_s29 + $0x20c] sm:$0xf] %v442_v3 }
  0x6e   : > { %445 = vst [vmem:[%s3333_s29 + $0x210] sm:$0xf] %v444_v4  ;;  %447 = vst [vmem:[%s3333_s29 + $0x214] sm:$0xf] %v446_v5  ;;  %v448_v6 = vld [vmem:[%s3326_s28 + $0x648] sm:$0xf] }
  0x6f   : > { %v450_v7 = vld [vmem:[%s3326_s28 + $0x654] sm:$0xf]  ;;  %v452_v8 = vld [vmem:[%s3326_s28 + $0x660] sm:$0xf]  ;;  %449 = vst [vmem:[%s3333_s29 + $0x218] sm:$0xf] %v448_v6 }
  0x70   : > { %451 = vst [vmem:[%s3333_s29 + $0x21c] sm:$0xf] %v450_v7  ;;  %453 = vst [vmem:[%s3333_s29 + $0x220] sm:$0xf] %v452_v8  ;;  %v454_v9 = vld [vmem:[%s3326_s28 + $0x66c] sm:$0xf] }
  0x71   : > { %v456_v10 = vld [vmem:[%s3326_s28 + $0x678] sm:$0xf]  ;;  %v458_v11 = vld [vmem:[%s3326_s28 + $0x684] sm:$0xf]  ;;  %455 = vst [vmem:[%s3333_s29 + $0x224] sm:$0xf] %v454_v9 }
  0x72   : > { %457 = vst [vmem:[%s3333_s29 + $0x228] sm:$0xf] %v456_v10  ;;  %459 = vst [vmem:[%s3333_s29 + $0x22c] sm:$0xf] %v458_v11  ;;  %v460_v12 = vld [vmem:[%s3326_s28 + $0x690] sm:$0xf] }
  0x73   : > { %v462_v13 = vld [vmem:[%s3326_s28 + $0x69c] sm:$0xf]  ;;  %v464_v14 = vld [vmem:[%s3326_s28 + $0x6a8] sm:$0xf]  ;;  %461 = vst [vmem:[%s3333_s29 + $0x230] sm:$0xf] %v460_v12 }
  0x74   : > { %463 = vst [vmem:[%s3333_s29 + $0x234] sm:$0xf] %v462_v13  ;;  %465 = vst [vmem:[%s3333_s29 + $0x238] sm:$0xf] %v464_v14  ;;  %v466_v15 = vld [vmem:[%s3326_s28 + $0x6b4] sm:$0xf] }
  0x75   : > { %v468_v16 = vld [vmem:[%s3326_s28 + $0x6c0] sm:$0xf]  ;;  %v470_v17 = vld [vmem:[%s3326_s28 + $0x6cc] sm:$0xf]  ;;  %467 = vst [vmem:[%s3333_s29 + $0x23c] sm:$0xf] %v466_v15 }
  0x76   : > { %469 = vst [vmem:[%s3333_s29 + $0x240] sm:$0xf] %v468_v16  ;;  %471 = vst [vmem:[%s3333_s29 + $0x244] sm:$0xf] %v470_v17  ;;  %v472_v18 = vld [vmem:[%s3326_s28 + $0x6d8] sm:$0xf] }
  0x77   : > { %v474_v19 = vld [vmem:[%s3326_s28 + $0x6e4] sm:$0xf]  ;;  %v476_v20 = vld [vmem:[%s3326_s28 + $0x6f0] sm:$0xf]  ;;  %473 = vst [vmem:[%s3333_s29 + $0x248] sm:$0xf] %v472_v18 }
  0x78   : > { %475 = vst [vmem:[%s3333_s29 + $0x24c] sm:$0xf] %v474_v19  ;;  %477 = vst [vmem:[%s3333_s29 + $0x250] sm:$0xf] %v476_v20  ;;  %v478_v21 = vld [vmem:[%s3326_s28 + $0x6fc] sm:$0xf] }
  0x79   : > { %v480_v22 = vld [vmem:[%s3326_s28 + $0x708] sm:$0xf]  ;;  %v482_v23 = vld [vmem:[%s3326_s28 + $0x714] sm:$0xf]  ;;  %479 = vst [vmem:[%s3333_s29 + $0x254] sm:$0xf] %v478_v21 }
  0x7a   : > { %481 = vst [vmem:[%s3333_s29 + $0x258] sm:$0xf] %v480_v22  ;;  %483 = vst [vmem:[%s3333_s29 + $0x25c] sm:$0xf] %v482_v23  ;;  %v484_v24 = vld [vmem:[%s3326_s28 + $0x720] sm:$0xf] }
  0x7b   : > { %v486_v25 = vld [vmem:[%s3326_s28 + $0x72c] sm:$0xf]  ;;  %v488_v26 = vld [vmem:[%s3326_s28 + $0x738] sm:$0xf]  ;;  %485 = vst [vmem:[%s3333_s29 + $0x260] sm:$0xf] %v484_v24 }
  0x7c   : > { %487 = vst [vmem:[%s3333_s29 + $0x264] sm:$0xf] %v486_v25  ;;  %489 = vst [vmem:[%s3333_s29 + $0x268] sm:$0xf] %v488_v26  ;;  %v490_v27 = vld [vmem:[%s3326_s28 + $0x744] sm:$0xf] }
  0x7d   : > { %v492_v28 = vld [vmem:[%s3326_s28 + $0x750] sm:$0xf]  ;;  %v494_v29 = vld [vmem:[%s3326_s28 + $0x75c] sm:$0xf]  ;;  %491 = vst [vmem:[%s3333_s29 + $0x26c] sm:$0xf] %v490_v27 }
  0x7e   : > { %493 = vst [vmem:[%s3333_s29 + $0x270] sm:$0xf] %v492_v28  ;;  %495 = vst [vmem:[%s3333_s29 + $0x274] sm:$0xf] %v494_v29  ;;  %v496_v30 = vld [vmem:[%s3326_s28 + $0x768] sm:$0xf] }
  0x7f   : > { %v498_v31 = vld [vmem:[%s3326_s28 + $0x774] sm:$0xf]  ;;  %v500_v32 = vld [vmem:[%s3326_s28 + $0x780] sm:$0xf]  ;;  %497 = vst [vmem:[%s3333_s29 + $0x278] sm:$0xf] %v496_v30 }
  0x80   : > { %499 = vst [vmem:[%s3333_s29 + $0x27c] sm:$0xf] %v498_v31  ;;  %501 = vst [vmem:[%s3333_s29 + $0x280] sm:$0xf] %v500_v32  ;;  %v502_v33 = vld [vmem:[%s3326_s28 + $0x78c] sm:$0xf] }
  0x81   : > { %v504_v34 = vld [vmem:[%s3326_s28 + $0x798] sm:$0xf]  ;;  %v506_v35 = vld [vmem:[%s3326_s28 + $0x7a4] sm:$0xf]  ;;  %503 = vst [vmem:[%s3333_s29 + $0x284] sm:$0xf] %v502_v33 }
  0x82   : > { %505 = vst [vmem:[%s3333_s29 + $0x288] sm:$0xf] %v504_v34  ;;  %507 = vst [vmem:[%s3333_s29 + $0x28c] sm:$0xf] %v506_v35  ;;  %v508_v36 = vld [vmem:[%s3326_s28 + $0x7b0] sm:$0xf] }
  0x83   : > { %v510_v37 = vld [vmem:[%s3326_s28 + $0x7bc] sm:$0xf]  ;;  %v512_v38 = vld [vmem:[%s3326_s28 + $0x7c8] sm:$0xf]  ;;  %509 = vst [vmem:[%s3333_s29 + $0x290] sm:$0xf] %v508_v36 }
  0x84   : > { %511 = vst [vmem:[%s3333_s29 + $0x294] sm:$0xf] %v510_v37  ;;  %513 = vst [vmem:[%s3333_s29 + $0x298] sm:$0xf] %v512_v38  ;;  %v514_v39 = vld [vmem:[%s3326_s28 + $0x7d4] sm:$0xf] }
  0x85   : > { %v516_v40 = vld [vmem:[%s3326_s28 + $0x7e0] sm:$0xf]  ;;  %v518_v41 = vld [vmem:[%s3326_s28 + $0x7ec] sm:$0xf]  ;;  %515 = vst [vmem:[%s3333_s29 + $0x29c] sm:$0xf] %v514_v39 }
  0x86   : > { %517 = vst [vmem:[%s3333_s29 + $0x2a0] sm:$0xf] %v516_v40  ;;  %519 = vst [vmem:[%s3333_s29 + $0x2a4] sm:$0xf] %v518_v41  ;;  %v520_v42 = vld [vmem:[%s3326_s28 + $0x7f8] sm:$0xf] }
  0x87   : > { %v522_v43 = vld [vmem:[%s3326_s28 + $0x804] sm:$0xf]  ;;  %v524_v44 = vld [vmem:[%s3326_s28 + $0x810] sm:$0xf]  ;;  %521 = vst [vmem:[%s3333_s29 + $0x2a8] sm:$0xf] %v520_v42 }
  0x88   : > { %523 = vst [vmem:[%s3333_s29 + $0x2ac] sm:$0xf] %v522_v43  ;;  %525 = vst [vmem:[%s3333_s29 + $0x2b0] sm:$0xf] %v524_v44  ;;  %v526_v45 = vld [vmem:[%s3326_s28 + $0x81c] sm:$0xf] }
  0x89   : > { %v528_v46 = vld [vmem:[%s3326_s28 + $0x828] sm:$0xf]  ;;  %v530_v47 = vld [vmem:[%s3326_s28 + $0x834] sm:$0xf]  ;;  %527 = vst [vmem:[%s3333_s29 + $0x2b4] sm:$0xf] %v526_v45 }
  0x8a   : > { %529 = vst [vmem:[%s3333_s29 + $0x2b8] sm:$0xf] %v528_v46  ;;  %531 = vst [vmem:[%s3333_s29 + $0x2bc] sm:$0xf] %v530_v47  ;;  %v532_v48 = vld [vmem:[%s3326_s28 + $0x840] sm:$0xf] }
  0x8b   : > { %v534_v49 = vld [vmem:[%s3326_s28 + $0x84c] sm:$0xf]  ;;  %v536_v50 = vld [vmem:[%s3326_s28 + $0x858] sm:$0xf]  ;;  %533 = vst [vmem:[%s3333_s29 + $0x2c0] sm:$0xf] %v532_v48 }
  0x8c   : > { %535 = vst [vmem:[%s3333_s29 + $0x2c4] sm:$0xf] %v534_v49  ;;  %537 = vst [vmem:[%s3333_s29 + $0x2c8] sm:$0xf] %v536_v50  ;;  %v538_v51 = vld [vmem:[%s3326_s28 + $0x864] sm:$0xf] }
  0x8d   : > { %v540_v52 = vld [vmem:[%s3326_s28 + $0x870] sm:$0xf]  ;;  %v542_v53 = vld [vmem:[%s3326_s28 + $0x87c] sm:$0xf]  ;;  %539 = vst [vmem:[%s3333_s29 + $0x2cc] sm:$0xf] %v538_v51 }
  0x8e   : > { %541 = vst [vmem:[%s3333_s29 + $0x2d0] sm:$0xf] %v540_v52  ;;  %543 = vst [vmem:[%s3333_s29 + $0x2d4] sm:$0xf] %v542_v53  ;;  %v544_v54 = vld [vmem:[%s3326_s28 + $0x888] sm:$0xf] }
  0x8f   : > { %v546_v55 = vld [vmem:[%s3326_s28 + $0x894] sm:$0xf]  ;;  %v548_v56 = vld [vmem:[%s3326_s28 + $0x8a0] sm:$0xf]  ;;  %545 = vst [vmem:[%s3333_s29 + $0x2d8] sm:$0xf] %v544_v54 }
  0x90   : > { %547 = vst [vmem:[%s3333_s29 + $0x2dc] sm:$0xf] %v546_v55  ;;  %549 = vst [vmem:[%s3333_s29 + $0x2e0] sm:$0xf] %v548_v56  ;;  %v550_v57 = vld [vmem:[%s3326_s28 + $0x8ac] sm:$0xf] }
  0x91   : > { %v552_v58 = vld [vmem:[%s3326_s28 + $0x8b8] sm:$0xf]  ;;  %v554_v59 = vld [vmem:[%s3326_s28 + $0x8c4] sm:$0xf]  ;;  %551 = vst [vmem:[%s3333_s29 + $0x2e4] sm:$0xf] %v550_v57 }
  0x92   : > { %553 = vst [vmem:[%s3333_s29 + $0x2e8] sm:$0xf] %v552_v58  ;;  %555 = vst [vmem:[%s3333_s29 + $0x2ec] sm:$0xf] %v554_v59  ;;  %v556_v60 = vld [vmem:[%s3326_s28 + $0x8d0] sm:$0xf] }
  0x93   : > { %v558_v61 = vld [vmem:[%s3326_s28 + $0x8dc] sm:$0xf]  ;;  %v560_v62 = vld [vmem:[%s3326_s28 + $0x8e8] sm:$0xf]  ;;  %557 = vst [vmem:[%s3333_s29 + $0x2f0] sm:$0xf] %v556_v60 }
  0x94   : > { %559 = vst [vmem:[%s3333_s29 + $0x2f4] sm:$0xf] %v558_v61  ;;  %561 = vst [vmem:[%s3333_s29 + $0x2f8] sm:$0xf] %v560_v62  ;;  %v562_v63 = vld [vmem:[%s3326_s28 + $0x8f4] sm:$0xf] }
  0x95   : > { %v564_v0 = vld [vmem:[%s3326_s28 + $0x900] sm:$0xf]  ;;  %v566_v1 = vld [vmem:[%s3326_s28 + $0x90c] sm:$0xf]  ;;  %563 = vst [vmem:[%s3333_s29 + $0x2fc] sm:$0xf] %v562_v63 }
  0x96   : > { %565 = vst [vmem:[%s3333_s29 + $0x300] sm:$0xf] %v564_v0  ;;  %567 = vst [vmem:[%s3333_s29 + $0x304] sm:$0xf] %v566_v1  ;;  %v568_v2 = vld [vmem:[%s3326_s28 + $0x918] sm:$0xf] }
  0x97   : > { %v570_v3 = vld [vmem:[%s3326_s28 + $0x924] sm:$0xf]  ;;  %v572_v4 = vld [vmem:[%s3326_s28 + $0x930] sm:$0xf]  ;;  %569 = vst [vmem:[%s3333_s29 + $0x308] sm:$0xf] %v568_v2 }
  0x98   : > { %571 = vst [vmem:[%s3333_s29 + $0x30c] sm:$0xf] %v570_v3  ;;  %573 = vst [vmem:[%s3333_s29 + $0x310] sm:$0xf] %v572_v4  ;;  %v574_v5 = vld [vmem:[%s3326_s28 + $0x93c] sm:$0xf] }
  0x99   : > { %v576_v6 = vld [vmem:[%s3326_s28 + $0x948] sm:$0xf]  ;;  %v578_v7 = vld [vmem:[%s3326_s28 + $0x954] sm:$0xf]  ;;  %575 = vst [vmem:[%s3333_s29 + $0x314] sm:$0xf] %v574_v5 }
  0x9a   : > { %577 = vst [vmem:[%s3333_s29 + $0x318] sm:$0xf] %v576_v6  ;;  %579 = vst [vmem:[%s3333_s29 + $0x31c] sm:$0xf] %v578_v7  ;;  %v580_v8 = vld [vmem:[%s3326_s28 + $0x960] sm:$0xf] }
  0x9b   : > { %v582_v9 = vld [vmem:[%s3326_s28 + $0x96c] sm:$0xf]  ;;  %v584_v10 = vld [vmem:[%s3326_s28 + $0x978] sm:$0xf]  ;;  %581 = vst [vmem:[%s3333_s29 + $0x320] sm:$0xf] %v580_v8 }
  0x9c   : > { %583 = vst [vmem:[%s3333_s29 + $0x324] sm:$0xf] %v582_v9  ;;  %585 = vst [vmem:[%s3333_s29 + $0x328] sm:$0xf] %v584_v10  ;;  %v586_v11 = vld [vmem:[%s3326_s28 + $0x984] sm:$0xf] }
  0x9d   : > { %v588_v12 = vld [vmem:[%s3326_s28 + $0x990] sm:$0xf]  ;;  %v590_v13 = vld [vmem:[%s3326_s28 + $0x99c] sm:$0xf]  ;;  %587 = vst [vmem:[%s3333_s29 + $0x32c] sm:$0xf] %v586_v11 }
  0x9e   : > { %589 = vst [vmem:[%s3333_s29 + $0x330] sm:$0xf] %v588_v12  ;;  %591 = vst [vmem:[%s3333_s29 + $0x334] sm:$0xf] %v590_v13  ;;  %v592_v14 = vld [vmem:[%s3326_s28 + $0x9a8] sm:$0xf] }
  0x9f   : > { %v594_v15 = vld [vmem:[%s3326_s28 + $0x9b4] sm:$0xf]  ;;  %v596_v16 = vld [vmem:[%s3326_s28 + $0x9c0] sm:$0xf]  ;;  %593 = vst [vmem:[%s3333_s29 + $0x338] sm:$0xf] %v592_v14 }
  0xa0   : > { %595 = vst [vmem:[%s3333_s29 + $0x33c] sm:$0xf] %v594_v15  ;;  %597 = vst [vmem:[%s3333_s29 + $0x340] sm:$0xf] %v596_v16  ;;  %v598_v17 = vld [vmem:[%s3326_s28 + $0x9cc] sm:$0xf] }
  0xa1   : > { %v600_v18 = vld [vmem:[%s3326_s28 + $0x9d8] sm:$0xf]  ;;  %v602_v19 = vld [vmem:[%s3326_s28 + $0x9e4] sm:$0xf]  ;;  %599 = vst [vmem:[%s3333_s29 + $0x344] sm:$0xf] %v598_v17 }
  0xa2   : > { %601 = vst [vmem:[%s3333_s29 + $0x348] sm:$0xf] %v600_v18  ;;  %603 = vst [vmem:[%s3333_s29 + $0x34c] sm:$0xf] %v602_v19  ;;  %v604_v20 = vld [vmem:[%s3326_s28 + $0x9f0] sm:$0xf] }
  0xa3   : > { %v606_v21 = vld [vmem:[%s3326_s28 + $0x9fc] sm:$0xf]  ;;  %v608_v22 = vld [vmem:[%s3326_s28 + $0xa08] sm:$0xf]  ;;  %605 = vst [vmem:[%s3333_s29 + $0x350] sm:$0xf] %v604_v20 }
  0xa4   : > { %607 = vst [vmem:[%s3333_s29 + $0x354] sm:$0xf] %v606_v21  ;;  %609 = vst [vmem:[%s3333_s29 + $0x358] sm:$0xf] %v608_v22  ;;  %v610_v23 = vld [vmem:[%s3326_s28 + $0xa14] sm:$0xf] }
  0xa5   : > { %611 = vst [vmem:[%s3333_s29 + $0x35c] sm:$0xf] %v610_v23 }
  0xa6 PF: > { %p2692_p8 = scmp.ge.s32.totalorder %s3255_s16, 1  ;;  %p1071_p9 = scmp.lt.s32.totalorder %s3255_s16, 4 }
  0xa8   : > { %p1072_p10 = pnand %p2692_p8, %p1071_p9 }
  0xa9   : > { %s1078_s30 = sand.u32 (!%p1072_p10), 1, %s3239_s12   ;;  %v3092_v24 = vld [vmem:[%s4003_s0 + $0x4] ss:$56 sps:$4 sm:$0xff] (!%p1072_p10)   ;;  %v3114_v25 = vld [vmem:[%s4003_s0 + $0x14] ss:$56 sps:$4 sm:$0xff] (!%p1072_p10)   ;;  %vm2158_vm0 = vcmask (!%p1072_p10), 523264  }
  0xaa   : > { %1075 = sbr.rel (%p1072_p10) target bundleno = 545 (0x221), region = 69  ;;  %2197 = vmatprep.mubr.bf16.mxu1 (!%p1072_p10), %v3092_v24  ;;  %2295 = vmatprep.mubr.bf16.mxu0 (!%p1072_p10), %v3114_v25  ;;  %v3090_v52 = vld [vmem:[%s4003_s0] ss:$56 sps:$4 sm:$0xff] (!%p1072_p10)   ;;  %v3118_v55 = vld [vmem:[%s4003_s0 + $0x74] ss:$56 sps:$4 sm:$0xff] (!%p1072_p10)   ;;  %p1116_p11 = scmp.lt.s32.totalorder (!%p1072_p10), %s3247_s14, 2 }
  0xab   : > { %s3025_s4 = smul.u32 (!%p1072_p10), 864, %s1078_s30  ;;  %v3121_v63 = vld [vmem:[%s4003_s0 + $0x70] ss:$56 sps:$4 sm:$0xff] (!%p1072_p10)   ;;  %v3133_v20 = vld [vmem:[%s4003_s0 + $0xc] ss:$56 sps:$4 sm:$0xff] (!%p1072_p10)   ;;  %s2693_s20 = sshll.u32 (!%p1072_p10), %s1078_s30, 4 }
  0xac   : > { %v3112_v3 = vld [vmem:[%s4003_s0 + $0x10] ss:$56 sps:$4 sm:$0xff] (!%p1072_p10)   ;;  %s1108_s23 = scalar_lea.vmem (!%p1072_p10), [#allocation3], %s2693_s20 }
  0xad   : > { %s3773_s9 = scalar_lea.vmem (!%p1072_p10), [#allocation2], %s3025_s4  ;;  %v3131_v24 = vld [vmem:[%s4003_s0 + $0x8] ss:$56 sps:$4 sm:$0xff] (!%p1072_p10)  }
  0xae   : > { %v3067_v26 = vld [vmem:[%s3773_s9 + $0x40] sm:$0xff] (!%p1072_p10)   ;;  %v3069_v28 = vld [vmem:[%s3773_s9 + $0x48] sm:$0xff] (!%p1072_p10)   ;;  %v3071_v30 = vld [vmem:[%s3773_s9 + $0x50] sm:$0xff] (!%p1072_p10)  }
  0xaf   : > { %v3068_v27 = vld [vmem:[%s3773_s9] sm:$0xff] (!%p1072_p10)   ;;  %2856 = vmatprep.subr.bf16.mxu1 (!%p1072_p10), %v3067_v26  ;;  %v3070_v29 = vld [vmem:[%s3773_s9 + $0x8] sm:$0xff] (!%p1072_p10)   ;;  %v3072_v31 = vld [vmem:[%s3773_s9 + $0x10] sm:$0xff] (!%p1072_p10)  }
  0xb0   : > { %2857 = vmatpush3.bf16.msra.mxu1 (!%p1072_p10), %v3068_v27  ;;  %v3073_v32 = vld [vmem:[%s3773_s9 + $0x58] sm:$0xff] (!%p1072_p10)   ;;  %v3077_v34 = vld [vmem:[%s3773_s9 + $0x140] sm:$0xff] (!%p1072_p10)   ;;  %v3081_v38 = vld [vmem:[%s3773_s9 + $0x148] sm:$0xff] (!%p1072_p10)  }
  0xb1   : > { %2858 = vmatprep.subr.bf16.mxu1 %v3069_v28  ;;  %v3074_v33 = vld [vmem:[%s3773_s9 + $0x18] sm:$0xff]   ;;  %v3078_v35 = vld [vmem:[%s3773_s9 + $0x100] sm:$0xff]   ;;  %2912 = vmatprep.subr.bf16.mxu0 %v3077_v34  ;;  %v3082_v39 = vld [vmem:[%s3773_s9 + $0x108] sm:$0xff]   ;;  %s1117_s10 = scalar_select %p1116_p11, %s3247_s14, 2 }
  0xb2   : > { %v3075_v36 = vld [vmem:[%s3773_s9 + $0x60] sm:$0xff]   ;;  %2913 = vmatpush3.bf16.msra.mxu0 %v3078_v35  ;;  %v3079_v40 = vld [vmem:[%s3773_s9 + $0x68] sm:$0xff]   ;;  %v3085_v42 = vld [vmem:[%s3773_s9 + $0x150] sm:$0xff]   ;;  %s2838_s12 = sshll.u32 (%p3313_p6), %s3247_s14, 2 }
  0xb3   : > { %v3076_v37 = vld [vmem:[%s3773_s9 + $0x20] sm:$0xff]   ;;  %2914 = vmatprep.subr.bf16.mxu0 %v3081_v38  ;;  %v3080_v41 = vld [vmem:[%s3773_s9 + $0x28] sm:$0xff]   ;;  %v3086_v43 = vld [vmem:[%s3773_s9 + $0x110] sm:$0xff]   ;;  %s1118_s19 = scalar_lea.vmem %s4005_s2, %s1117_s10  ;;  %s2543_s25 = scalar_lea.vmem (%p3313_p6), %s4006_s3, %s2838_s12 }
  0xb4   : > { %2859 = vmatpush3.bf16.msra.mxu1 %v3070_v29  ;;  %v3083_v44 = vld [vmem:[%s3773_s9 + $0x70] sm:$0xff]   ;;  %v3089_v46 = vld [vmem:[%s3773_s9 + $0x158] sm:$0xff]   ;;  %v3096_v50 = vld [vmem:[%s3773_s9 + $0x160] sm:$0xff]  }
  0xb5   : > { %2860 = vmatprep.subr.bf16.mxu1 %v3071_v30  ;;  %v3084_v45 = vld [vmem:[%s3773_s9 + $0x30] sm:$0xff]   ;;  %v3093_v47 = vld [vmem:[%s3773_s9 + $0x118] sm:$0xff]   ;;  %v3097_v51 = vld [vmem:[%s3773_s9 + $0x120] sm:$0xff]  }
  0xb6   : > { %2915 = vmatpush3.bf16.msra.mxu0 %v3082_v39  ;;  %v3087_v48 = vld [vmem:[%s3773_s9 + $0x78] sm:$0xff]   ;;  %v3094_v53 = vld [vmem:[%s3773_s9 + $0xc0] sm:$0xff]   ;;  %v3100_v56 = vld [vmem:[%s3773_s9 + $0x168] sm:$0xff]  }
  0xb7   : > { %2916 = vmatprep.subr.bf16.mxu0 %v3085_v42  ;;  %v3088_v49 = vld [vmem:[%s3773_s9 + $0x38] sm:$0xff]   ;;  %v3095_v54 = vld [vmem:[%s3773_s9 + $0x80] sm:$0xff]   ;;  %v3101_v57 = vld [vmem:[%s3773_s9 + $0x128] sm:$0xff]  }
  0xb8   : > { %2861 = vmatpush3.bf16.msra.mxu1 %v3072_v31  ;;  %v3098_v58 = vld [vmem:[%s3773_s9 + $0xc8] sm:$0xff]   ;;  %v3104_v60 = vld [vmem:[%s3773_s9 + $0x170] sm:$0xff]   ;;  %v3108_v1 = vld [vmem:[%s3773_s9 + $0x178] sm:$0xff]  }
  0xb9   : > { %2862 = vmatprep.subr.bf16.mxu1 %v3073_v32  ;;  %v3099_v59 = vld [vmem:[%s3773_s9 + $0x88] sm:$0xff]   ;;  %v3105_v61 = vld [vmem:[%s3773_s9 + $0x130] sm:$0xff]   ;;  %v3109_v2 = vld [vmem:[%s3773_s9 + $0x138] sm:$0xff]  }
  0xba   : > { %2917 = vmatpush3.bf16.msra.mxu0 %v3086_v43  ;;  %v3102_v62 = vld [vmem:[%s3773_s9 + $0xd0] sm:$0xff]   ;;  %v3106_v4 = vld [vmem:[%s3773_s9 + $0xd8] sm:$0xff]   ;;  %v3115_v6 = vld [vmem:[%s3773_s9 + $0x240] sm:$0xff]  }
  0xbb   : > { %2918 = vmatprep.subr.bf16.mxu0 %v3089_v46  ;;  %v3103_v0 = vld [vmem:[%s3773_s9 + $0x90] sm:$0xff]   ;;  %v3107_v5 = vld [vmem:[%s3773_s9 + $0x98] sm:$0xff]   ;;  %v3116_v7 = vld [vmem:[%s3773_s9 + $0x200] sm:$0xff]  }
  0xbc   : > { %2863 = vmatpush3.bf16.msra.mxu1 %v3074_v33  ;;  %v3110_v8 = vld [vmem:[%s3773_s9 + $0xe0] sm:$0xff]   ;;  %v3122_v10 = vld [vmem:[%s3773_s9 + $0x248] sm:$0xff]   ;;  %v3126_v14 = vld [vmem:[%s3773_s9 + $0x250] sm:$0xff]  }
  0xbd   : > { %2864 = vmatprep.subr.bf16.mxu1 %v3075_v36  ;;  %v3111_v9 = vld [vmem:[%s3773_s9 + $0xa0] sm:$0xff]   ;;  %v3123_v11 = vld [vmem:[%s3773_s9 + $0x208] sm:$0xff]   ;;  %v3127_v15 = vld [vmem:[%s3773_s9 + $0x210] sm:$0xff]  }
  0xbe   : > { %2919 = vmatpush3.bf16.msra.mxu0 %v3093_v47  ;;  %v3117_v12 = vld [vmem:[%s3773_s9 + $0xe8] sm:$0xff]   ;;  %v3124_v16 = vld [vmem:[%s3773_s9 + $0xf0] sm:$0xff]   ;;  %v3130_v18 = vld [vmem:[%s3773_s9 + $0x258] sm:$0xff]   ;;  %v3257_v47 = vmov 0  }
  0xbf   : > { %2920 = vmatprep.subr.bf16.mxu0 %v3096_v50  ;;  %v3120_v13 = vld [vmem:[%s3773_s9 + $0xa8] sm:$0xff]   ;;  %v3125_v17 = vld [vmem:[%s3773_s9 + $0xb0] sm:$0xff]   ;;  %v3128_v19 = vld [vmem:[%s3773_s9 + $0xf8] sm:$0xff]  }
  0xc0   : > { %2865 = vmatpush3.bf16.msra.mxu1 %v3076_v37  ;;  %v3134_v21 = vld [vmem:[%s3773_s9 + $0x218] sm:$0xff]   ;;  %v3135_v23 = vld [vmem:[%s3773_s9 + $0x1c0] sm:$0xff]   ;;  %v3139_v28 = vld [vmem:[%s3773_s9 + $0x1c8] sm:$0xff]  }
  0xc1   : > { %2866 = vmatprep.subr.bf16.mxu1 %v3079_v40  ;;  %v3129_v22 = vld [vmem:[%s3773_s9 + $0xb8] sm:$0xff]   ;;  %v3137_v25 = vld [vmem:[%s3773_s9 + $0x260] sm:$0xff]   ;;  %v3141_v29 = vld [vmem:[%s3773_s9 + $0x268] sm:$0xff]  }
  0xc2   : > { %2921 = vmatpush3.bf16.msra.mxu0 %v3097_v51  ;;  %v3138_v26 = vld [vmem:[%s3773_s9 + $0x220] sm:$0xff]   ;;  %v3142_v30 = vld [vmem:[%s4003_s0 + $0x7c] ss:$56 sps:$4 sm:$0xff]   ;;  %v3140_v31 = vld [vmem:[%s3773_s9 + $0x188] sm:$0xff]  }
  0xc3   : > { %2922 = vmatprep.subr.bf16.mxu0 %v3100_v56  ;;  %v3136_v27 = vld [vmem:[%s3773_s9 + $0x180] sm:$0xff]   ;;  %v3144_v32 = vld [vmem:[%s3773_s9 + $0x228] sm:$0xff]   ;;  %v3146_v33 = vld [vmem:[%s3773_s9 + $0x1d0] sm:$0xff]  }
  0xc4   : > { %2867 = vmatpush3.bf16.msra.mxu1 %v3080_v41  ;;  %v3145_v34 = vld [vmem:[%s4003_s0 + $0x78] ss:$56 sps:$4 sm:$0xff]   ;;  %v3147_v35 = vld [vmem:[%s4003_s0 + $0x84] ss:$56 sps:$4 sm:$0xff]   ;;  %v3163_v50 = vld [vmem:[%s3773_s9 + $0x1e8] sm:$0xff]  }
  0xc5   : > { %2868 = vmatprep.subr.bf16.mxu1 %v3083_v44  ;;  %v3149_v36 = vld [vmem:[%s3773_s9 + $0x190] sm:$0xff]   ;;  %v3150_v37 = vld [vmem:[%s4003_s0 + $0x80] ss:$56 sps:$4 sm:$0xff]   ;;  %v3164_v51 = vld [vmem:[%s3773_s9 + $0x1a8] sm:$0xff]  }
  0xc6   : > { %2923 = vmatpush3.bf16.msra.mxu0 %v3101_v57  ;;  %v3151_v38 = vld [vmem:[%s3773_s9 + $0x270] sm:$0xff]   ;;  %v3153_v40 = vld [vmem:[%s3773_s9 + $0x1d8] sm:$0xff]   ;;  %v3157_v44 = vld [vmem:[%s3773_s9 + $0x1e0] sm:$0xff]  }
  0xc7   : > { %2924 = vmatprep.subr.bf16.mxu0 %v3104_v60  ;;  %v3152_v39 = vld [vmem:[%s3773_s9 + $0x230] sm:$0xff]   ;;  %v3154_v41 = vld [vmem:[%s3773_s9 + $0x198] sm:$0xff]   ;;  %v3175_v60 = vld [vmem:[%s3773_s9 + $0x2c0] sm:$0xff]  }
  0xc8   : > { %2869 = vmatpush3.bf16.msra.mxu1 %v3084_v45  ;;  %v3155_v42 = vld [vmem:[%s3773_s9 + $0x278] sm:$0xff]   ;;  %v3158_v45 = vld [vmem:[%s3773_s9 + $0x1a0] sm:$0xff]  }
  0xc9   : > { %2870 = vmatprep.subr.bf16.mxu1 %v3087_v48  ;;  %v3156_v43 = vld [vmem:[%s3773_s9 + $0x238] sm:$0xff]  }
  0xca   : > { %2925 = vmatpush3.bf16.msra.mxu0 %v3105_v61  ;;  %v3159_v46 = vld [vmem:[%s4003_s0 + $0x20] ss:$56 sps:$4 sm:$0xff]   ;;  %v3161_v48 = vld [vmem:[%s4003_s0 + $0x24] ss:$56 sps:$4 sm:$0xff]  }
  0xcb   : > { %2926 = vmatprep.subr.bf16.mxu0 %v3108_v1  ;;  %v3169_v56 = vld [vmem:[%s3773_s9 + $0x1f8] sm:$0xff]   ;;  %v3179_v1 = vld [vmem:[%s3773_s9 + $0x288] sm:$0xff]  }
  0xcc   : > { %2871 = vmatpush3.bf16.msra.mxu1 %v3088_v49  ;;  %v3162_v49 = vld [vmem:[%s3773_s9 + $0x300] sm:$0xff]   ;;  %v3173_v57 = vld [vmem:[%s4003_s0 + $0x1c] ss:$56 sps:$4 sm:$0xff]   ;;  %v3171_v61 = vld [vmem:[%s4003_s0 + $0x18] ss:$56 sps:$4 sm:$0xff]  }
  0xcd   : > { %2884 = vmatprep.subr.bf16.mxu1 %v3094_v53  ;;  %v3166_v53 = vld [vmem:[%s3773_s9 + $0x1f0] sm:$0xff]  }
  0xce   : > { %2927 = vmatpush3.bf16.msra.mxu0 %v3109_v2  ;;  %v3180_v2 = vld [vmem:[%s4003_s0 + $0x8c] ss:$56 sps:$4 sm:$0xff]  }
  0xcf   : > { %2198 = vmatmul.mubr.bf16.vlgmr.msra.gmra.mrb[0].mxu1 %v3090_v52  ;;  %2968 = vmatprep.subr.bf16.mxu0 %v3115_v6  ;;  %v3165_v52 = vld [vmem:[%s3773_s9 + $0x308] sm:$0xff]   ;;  %v3184_v6 = vld [vmem:[%s3773_s9 + $0x2d0] sm:$0xff]  }
  0xd0   : > { %2885 = vmatpush3.bf16.msra.mxu1 %v3095_v54  ;;  %2205 = vmatprep.mubr.bf16.mxu1 %v3118_v55  ;;  %v3167_v54 = vld [vmem:[%s3773_s9 + $0x1b0] sm:$0xff]  }
  0xd1   : > { %2886 = vmatprep.subr.bf16.mxu1 %v3098_v58  ;;  %2296 = vmatmul.mubr.bf16.vlgmr.msra.gmra.mrb[0].mxu0 %v3112_v3  ;;  %v3168_v55 = vld [vmem:[%s3773_s9 + $0x310] sm:$0xff]   ;;  %v3170_v58 = vld [vmem:[%s3773_s9 + $0x1b8] sm:$0xff]   ;;  %v3182_v3 = vld [vmem:[%s3773_s9 + $0x328] sm:$0xff]  }
  0xd2   : > { %2969 = vmatpush3.bf16.msra.mxu0 %v3116_v7  ;;  %2303 = vmatprep.mubr.bf16.mxu0 %v3147_v35  ;;  %v3188_v7 = vld [vmem:[%s4003_s0 + $0x90] ss:$56 sps:$4 sm:$0xff]  }
  0xd3   : > { %2970 = vmatprep.subr.bf16.mxu0 %v3122_v10  ;;  %v3190_v10 = vld [vmem:[%s3773_s9 + $0x2d8] sm:$0xff]  }
  0xd4   : > { %2887 = vmatpush3.bf16.msra.mxu1 %v3099_v59  ;;  %v3174_v59 = vld [vmem:[%s3773_s9 + $0x318] sm:$0xff]  }
  0xd5   : > { %2888 = vmatprep.subr.bf16.mxu1 %v3102_v62  ;;  %v3176_v62 = vld [vmem:[%s3773_s9 + $0x280] sm:$0xff]  }
  0xd6   : > { %2971 = vmatpush3.bf16.msra.mxu0 %v3123_v11  ;;  %v3191_v11 = vld [vmem:[%s3773_s9 + $0x298] sm:$0xff]  }
  0xd7   : > { %2206 = vmatmul.mubr.bf16.gmra.mrb[4].mxu1 %v3121_v63  ;;  %2972 = vmatprep.subr.bf16.mxu0 %v3126_v14  ;;  %v3177_v63 = vld [vmem:[%s3773_s9 + $0x320] sm:$0xff]  }
  0xd8   : > { %2889 = vmatpush3.bf16.msra.mxu1 %v3103_v0  ;;  %2246 = vmatprep.mubr.bf16.mxu1 %v3133_v20  ;;  %v3178_v0 = vld [vmem:[%s3773_s9 + $0x2c8] sm:$0xff]   ;;  %v3194_v14 = vld [vmem:[%s3773_s9 + $0x2a0] sm:$0xff]  }
  0xd9   : > { %2890 = vmatprep.subr.bf16.mxu1 %v3106_v4  ;;  %2304 = vmatmul.mubr.bf16.gmra.mrb[4].mxu0 %v3150_v37  ;;  %v3185_v4 = vld [vmem:[%s4003_s0 + $0x94] ss:$56 sps:$4 sm:$0xff]  }
  0xda   : > { %2973 = vmatpush3.bf16.msra.mxu0 %v3127_v15  ;;  %2393 = vmatprep.mubr.bf16.mxu0 %v3161_v48  ;;  %v3195_v15 = vld [vmem:[%s3773_s9 + $0x340] sm:$0xff]  }
  0xdb   : > { %2974 = vmatprep.subr.bf16.mxu0 %v3130_v18  ;;  %v3198_v18 = vld [vmem:[%s3773_s9 + $0x348] sm:$0xff]  }
  0xdc   : > { %2891 = vmatpush3.bf16.msra.mxu1 %v3107_v5  ;;  %v3183_v5 = vld [vmem:[%s4003_s0 + $0x88] ss:$56 sps:$4 sm:$0xff]   ;;  %v3206_v20 = vld [vmem:[%s4003_s0 + $0x2c] ss:$56 sps:$4 sm:$0xff]  }
  0xdd   : > { %2892 = vmatprep.subr.bf16.mxu1 %v3110_v8  ;;  %v3187_v8 = vld [vmem:[%s3773_s9 + $0x290] sm:$0xff]  }
  0xde   : > { %2975 = vmatpush3.bf16.msra.mxu0 %v3134_v21  ;;  %v3200_v21 = vld [vmem:[%s3773_s9 + $0x2b0] sm:$0xff]  }
  0xdf   : > { %2976 = vmatprep.subr.bf16.mxu0 %v3137_v25  ;;  %v3203_v25 = vld [vmem:[%s3773_s9 + $0x2b8] sm:$0xff]  }
  0xe0   : > { %2893 = vmatpush3.bf16.msra.mxu1 %v3111_v9  ;;  %v3189_v9 = vld [vmem:[%s3773_s9 + $0x330] sm:$0xff]  }
  0xe1   : > { %2894 = vmatprep.subr.bf16.mxu1 %v3117_v12  ;;  %v3192_v12 = vld [vmem:[%s3773_s9 + $0x338] sm:$0xff]  }
  0xe2   : > { %2977 = vmatpush3.bf16.msra.mxu0 %v3138_v26  ;;  %v3207_v26 = vld [vmem:[%s3773_s9 + $0x358] sm:$0xff]  }
  0xe3   : > { %2978 = vmatprep.subr.bf16.mxu0 %v3141_v29  ;;  %v3211_v29 = vld [vmem:[%s4003_s0 + $0x9c] ss:$56 sps:$4 sm:$0xff]  }
  0xe4   : > { %2895 = vmatpush3.bf16.msra.mxu1 %v3120_v13  ;;  %v3193_v13 = vld [vmem:[%s3773_s9 + $0x2e0] sm:$0xff]  }
  0xe5   : > { %2896 = vmatprep.subr.bf16.mxu1 %v3124_v16  ;;  %v3196_v16 = vld [vmem:[%s3773_s9 + $0x2e8] sm:$0xff]  }
  0xe6   : > { %2979 = vmatpush3.bf16.msra.mxu0 %v3144_v32  ;;  %v3216_v32 = vld [vmem:[%s4003_s0 + $0xa0] ss:$56 sps:$4 sm:$0xff]  }
  0xe7   : > { %2980 = vmatprep.subr.bf16.mxu0 %v3151_v38 }
  0xe8   : > { %2897 = vmatpush3.bf16.msra.mxu1 %v3125_v17  ;;  %v3197_v17 = vld [vmem:[%s3773_s9 + $0x2a8] sm:$0xff]  }
  0xe9   : > { %2898 = vmatprep.subr.bf16.mxu1 %v3128_v19  ;;  %v3199_v19 = vld [vmem:[%s3773_s9 + $0x2f0] sm:$0xff]  }
  0xea   : > { %2981 = vmatpush3.bf16.msra.mxu0 %v3152_v39 }
  0xeb   : > { %2982 = vmatprep.subr.bf16.mxu0 %v3155_v42 }
  0xec   : > { %2899 = vmatpush3.bf16.msra.mxu1 %v3129_v22  ;;  %v3201_v22 = vld [vmem:[%s3773_s9 + $0x350] sm:$0xff]  }
  0xed   : > { %2940 = vmatprep.subr.bf16.mxu1 %v3135_v23  ;;  %v3210_v23 = vld [vmem:[%s4003_s0 + $0x34] ss:$56 sps:$4 sm:$0xff]  }
  0xee   : > { %2983 = vmatpush3.bf16.msra.mxu0 %v3156_v43 }
  0xef   : > { %2247 = vmatmul.mubr.bf16.vlgmr.msra.gmra.mrb[8].mxu1 %v3131_v24  ;;  %2459 = vmatprep.subr.bf16.mxu0 %v3257_v47  ;;  %v3202_v24 = vld [vmem:[%s3773_s9 + $0x2f8] sm:$0xff]  }
  0xf0   : > { %2941 = vmatpush3.bf16.msra.mxu1 %v3136_v27  ;;  %2254 = vmatprep.mubr.bf16.mxu1 %v3142_v30  ;;  %v3204_v27 = vld [vmem:[%s4003_s0 + $0x28] ss:$56 sps:$4 sm:$0xff]   ;;  %v3214_v30 = vld [vmem:[%s4003_s0 + $0xa4] ss:$56 sps:$4 sm:$0xff]  }
  0xf1   : > { %2942 = vmatprep.subr.bf16.mxu1 %v3139_v28  ;;  %2394 = vmatmul.mubr.bf16.vlgmr.msra.gmra.mrb[8].mxu0 %v3159_v46  ;;  %v3208_v28 = vld [vmem:[%s4003_s0 + $0x30] ss:$56 sps:$4 sm:$0xff]  }
  0xf2   : > { %2460 = vmatpush1.bf16.msra.mxu0 %v3162_v49  ;;  %2401 = vmatprep.mubr.bf16.mxu0 %v3185_v4 }
  0xf3   : > { %2461 = vmatprep.subr.bf16.mxu0 %v3257_v47 }
  0xf4   : > { %2943 = vmatpush3.bf16.msra.mxu1 %v3140_v31  ;;  %v3213_v31 = vld [vmem:[%s4003_s0 + $0x98] ss:$56 sps:$4 sm:$0xff]  }
  0xf5   : > { %2944 = vmatprep.subr.bf16.mxu1 %v3146_v33 }
  0xf6   : > { %2462 = vmatpush1.bf16.msra.mxu0 %v3165_v52 }
  0xf7   : > { %2255 = vmatmul.mubr.bf16.gmra.mrb[12].mxu1 %v3145_v34  ;;  %2463 = vmatprep.subr.bf16.mxu0 %v3257_v47 }
  0xf8   : > { %2945 = vmatpush3.bf16.msra.mxu1 %v3149_v36  ;;  %2344 = vmatprep.mubr.bf16.mxu1 %v3173_v57 }
  0xf9   : > { %2946 = vmatprep.subr.bf16.mxu1 %v3153_v40  ;;  %2402 = vmatmul.mubr.bf16.gmra.mrb[12].mxu0 %v3188_v7 }
  0xfa   : > { %2464 = vmatpush1.bf16.msra.mxu0 %v3168_v55  ;;  %2831 = vmatprep.mubr.msk.bf16.mxu0 %vm2158_vm0, %v3210_v23 }
  0xfb   : > { %2465 = vmatprep.subr.bf16.mxu0 %v3257_v47 }
  0xfc   : > { %2947 = vmatpush3.bf16.msra.mxu1 %v3154_v41 }
  0xfd   : > { %2948 = vmatprep.subr.bf16.mxu1 %v3157_v44 }
  0xfe   : > { %2466 = vmatpush1.bf16.msra.mxu0 %v3174_v59 }
  0xff   : > { %2467 = vmatprep.subr.bf16.mxu0 %v3257_v47 }
 0x100   : > { %2949 = vmatpush3.bf16.msra.mxu1 %v3158_v45 }
 0x101   : > { %2950 = vmatprep.subr.bf16.mxu1 %v3163_v50 }
 0x102   : > { %2468 = vmatpush1.bf16.msra.mxu0 %v3177_v63 }
 0x103   : > { %2469 = vmatprep.subr.bf16.mxu0 %v3257_v47 }
 0x104   : > { %2951 = vmatpush3.bf16.msra.mxu1 %v3164_v51  ;;  %v2694_v51 = vld [vmem:[%s1118_s19] ss:$0 sm:$0xff] }
 0x105   : > { %2952 = vmatprep.subr.bf16.mxu1 %v3166_v53 }
 0x106   : > { %2470 = vmatpush1.bf16.msra.mxu0 %v3182_v3 }
 0x107   : > { %2471 = vmatprep.subr.bf16.mxu0 %v3257_v47 }
 0x108   : > { %2953 = vmatpush3.bf16.msra.mxu1 %v3167_v54 }
 0x109   : > { %2954 = vmatprep.subr.bf16.mxu1 %v3169_v56 }
 0x10a   : > { %2472 = vmatpush1.bf16.msra.mxu0 %v3189_v9 }
 0x10b   : > { %2473 = vmatprep.subr.bf16.mxu0 %v3257_v47 }
 0x10c   : > { %2955 = vmatpush3.bf16.msra.mxu1 %v3170_v58 }
 0x10d   : > { %2996 = vmatprep.subr.bf16.mxu1 %v3175_v60 }
 0x10e   : > { %2474 = vmatpush1.bf16.msra.mxu0 %v3192_v12 }
 0x10f   : > { %2345 = vmatmul.mubr.bf16.vlgmr.msra.gmra.mrb[16].mxu1 %v3171_v61  ;;  %2475 = vmatprep.subr.bf16.mxu0 %v3257_v47 }
 0x110   : > { %2997 = vmatpush3.bf16.msra.mxu1 %v3176_v62  ;;  %2352 = vmatprep.mubr.bf16.mxu1 %v3180_v2 }
 0x111   : > { %2998 = vmatprep.subr.bf16.mxu1 %v3178_v0 }
 0x112   : > { %2476 = vmatpush1.bf16.msra.mxu0 %v3195_v15 }
 0x113   : > { %2477 = vmatprep.subr.bf16.mxu0 %v3257_v47 }
 0x114   : > { %2999 = vmatpush3.bf16.msra.mxu1 %v3179_v1 }
 0x115   : > { %3000 = vmatprep.subr.bf16.mxu1 %v3184_v6 }
 0x116   : > { %2478 = vmatpush1.bf16.msra.mxu0 %v3198_v18 }
 0x117   : > { %2353 = vmatmul.mubr.bf16.gmra.mrb[20].mxu1 %v3183_v5  ;;  %2479 = vmatprep.subr.bf16.mxu0 %v3257_v47 }
 0x118   : > { %3001 = vmatpush3.bf16.msra.mxu1 %v3187_v8  ;;  %2442 = vmatprep.mubr.bf16.mxu1 %v3206_v20 }
 0x119   : > { %3002 = vmatprep.subr.bf16.mxu1 %v3190_v10 }
 0x11a   : > { %2480 = vmatpush1.bf16.msra.mxu0 %v3201_v22 }
 0x11b   : > { %2481 = vmatprep.subr.bf16.mxu0 %v3257_v47 }
 0x11c   : > { %3003 = vmatpush3.bf16.msra.mxu1 %v3191_v11 }
 0x11d   : > { %3004 = vmatprep.subr.bf16.mxu1 %v3193_v13 }
 0x11e   : > { %2482 = vmatpush1.bf16.msra.mxu0 %v3207_v26 }
 0x120   : > { %3005 = vmatpush3.bf16.msra.mxu1 %v3194_v14 }
 0x121   : > { %3006 = vmatprep.subr.bf16.mxu1 %v3196_v16  ;;  %2492 = vmatmul.mubr.bf16.vlgmr.msra.gmra.mrb[16].mxu0 %v3208_v28 }
 0x122   : > { %2832 = vmatprep.mubr.msk.bf16.mxu0 %vm2158_vm0, %v3214_v30 }
 0x124   : > { %3007 = vmatpush3.bf16.msra.mxu1 %v3197_v17 }
 0x125   : > { %3008 = vmatprep.subr.bf16.mxu1 %v3199_v19 }
 0x128   : > { %3009 = vmatpush3.bf16.msra.mxu1 %v3200_v21 }
 0x129   : > { %3010 = vmatprep.subr.bf16.mxu1 %v3202_v24  ;;  %2500 = vmatmul.mubr.bf16.gmra.mrb[20].mxu0 %v3216_v32 }
 0x12c   : > { %3011 = vmatpush3.bf16.msra.mxu1 %v3203_v25 }
 0x12f   : > { %2443 = vmatmul.mubr.bf16.vlgmr.msra.gmra.mrb[24].mxu1 %v3204_v27 }
 0x130   : > { %2450 = vmatprep.mubr.bf16.mxu1 %v3211_v29 }
 0x137   : > { %2451 = vmatmul.mubr.bf16.gmra.mrb[28].mxu1 %v3213_v31 }
 0x1a2   : > { %v2872_v33 = vpop.f32.mrb[0].mxu1 }
 0x1a3   : > { %v2873_v34 = vpop.f32.mrb[1].mxu1 }
 0x1a4   : > { %v2874_v35 = vadd.f32 %v2873_v34, %v2872_v33  ;;  %v2875_v36 = vpop.f32.mrb[2].mxu1  ;;  %v2928_v43 = vpop.f32.mrb[0].mxu0 }
 0x1a5   : > { %v2876_v37 = vpop.f32.mrb[3].mxu1  ;;  %v2929_v45 = vpop.f32.mrb[1].mxu0 }
 0x1a6   : > { %v2877_v38 = vadd.f32 %v2876_v37, %v2875_v36  ;;  %v2930_v47 = vadd.f32 %v2929_v45, %v2928_v43  ;;  %v2931_v48 = vpop.f32.mrb[2].mxu0  ;;  %v2200_v54 = vadd.f32 %v2874_v35, %v2694_v51 }
 0x1a7   : > { %v2932_v49 = vpop.f32.mrb[3].mxu0 }
 0x1a8   : > { %v2933_v50 = vadd.f32 %v2932_v49, %v2931_v48  ;;  %v2203_v58 = vadd.f32 %v2877_v38, %v2694_v51 }
 0x1aa   : > { %v2878_v39 = vpop.f32.mrb[4].mxu1 }
 0x1ab   : > { %v2879_v40 = vpop.f32.mrb[5].mxu1 }
 0x1ac   : > { %v2880_v41 = vadd.f32 %v2879_v40, %v2878_v39  ;;  %v2881_v42 = vpop.f32.mrb[6].mxu1  ;;  %v2934_v61 = vpop.f32.mrb[4].mxu0 }
 0x1ad   : > { %v2882_v44 = vpop.f32.mrb[7].mxu1  ;;  %v2935_v63 = vpop.f32.mrb[5].mxu0 }
 0x1ae   : > { %v2883_v46 = vadd.f32 %v2882_v44, %v2881_v42  ;;  %v2936_v1 = vadd.f32 %v2935_v63, %v2934_v61  ;;  %v2937_v2 = vpop.f32.mrb[6].mxu0  ;;  %v2208_v8 = vadd.f32 %v2880_v41, %v2694_v51 }
 0x1af   : > { %v2938_v4 = vpop.f32.mrb[7].mxu0 }
 0x1b0   : > { %v2939_v7 = vadd.f32 %v2938_v4, %v2937_v2  ;;  %v2211_v12 = vadd.f32 %v2883_v46, %v2694_v51 }
 0x1c2   : > { %v2900_v52 = vpop.f32.mrb[8].mxu1 }
 0x1c3   : > { %v2901_v53 = vpop.f32.mrb[9].mxu1 }
 0x1c4   : > { %v2902_v55 = vadd.f32 %v2901_v53, %v2900_v52  ;;  %v2903_v56 = vpop.f32.mrb[10].mxu1  ;;  %v2984_v18 = vpop.f32.mrb[8].mxu0 }
 0x1c5   : > { %v2904_v57 = vpop.f32.mrb[11].mxu1  ;;  %v2985_v19 = vpop.f32.mrb[9].mxu0 }
 0x1c6   : > { %v2249_v59 = vadd.f32 %v2902_v55, %v2200_v54  ;;  %v2905_v60 = vadd.f32 %v2904_v57, %v2903_v56  ;;  %v2986_v20 = vadd.f32 %v2985_v19, %v2984_v18  ;;  %v2987_v21 = vpop.f32.mrb[10].mxu0 }
 0x1c7   : > { %v2988_v22 = vpop.f32.mrb[11].mxu0 }
 0x1c8   : > { %v2252_v62 = vadd.f32 %v2905_v60, %v2203_v58  ;;  %v2298_v0 = vadd.f32 %v2930_v47, %v2249_v59  ;;  %v2989_v23 = vadd.f32 %v2988_v22, %v2987_v21 }
 0x1ca   : > { %v2906_v3 = vpop.f32.mrb[12].mxu1  ;;  %v2301_v5 = vadd.f32 %v2933_v50, %v2252_v62 }
 0x1cb   : > { %v2907_v6 = vpop.f32.mrb[13].mxu1 }
 0x1cc   : > { %v2908_v9 = vadd.f32 %v2907_v6, %v2906_v3  ;;  %v2909_v10 = vpop.f32.mrb[14].mxu1  ;;  %v2990_v32 = vpop.f32.mrb[12].mxu0 }
 0x1cd   : > { %v2910_v11 = vpop.f32.mrb[15].mxu1  ;;  %v2991_v34 = vpop.f32.mrb[13].mxu0 }
 0x1ce   : > { %v2257_v13 = vadd.f32 %v2908_v9, %v2208_v8  ;;  %v2911_v14 = vadd.f32 %v2910_v11, %v2909_v10  ;;  %v2992_v36 = vadd.f32 %v2991_v34, %v2990_v32  ;;  %v2993_v37 = vpop.f32.mrb[14].mxu0 }
 0x1cf   : > { %v2994_v40 = vpop.f32.mrb[15].mxu0 }
 0x1d0   : > { %v2260_v15 = vadd.f32 %v2911_v14, %v2211_v12  ;;  %v2306_v16 = vadd.f32 %v2936_v1, %v2257_v13  ;;  %v2995_v43 = vadd.f32 %v2994_v40, %v2993_v37 }
 0x1d2   : > { %v2309_v17 = vadd.f32 %v2939_v7, %v2260_v15 }
 0x1e2   : > { %v2956_v24 = vpop.f32.mrb[16].mxu1 }
 0x1e3   : > { %v2957_v25 = vpop.f32.mrb[17].mxu1 }
 0x1e4   : > { %v2958_v26 = vadd.f32 %v2957_v25, %v2956_v24  ;;  %v2959_v27 = vpop.f32.mrb[18].mxu1 }
 0x1e5   : > { %v2960_v28 = vpop.f32.mrb[19].mxu1 }
 0x1e6   : > { %v2347_v29 = vadd.f32 %v2958_v26, %v2298_v0  ;;  %v2961_v30 = vadd.f32 %v2960_v28, %v2959_v27 }
 0x1e8   : > { %v2350_v31 = vadd.f32 %v2961_v30, %v2301_v5  ;;  %v2396_v33 = vadd.f32 %v2986_v20, %v2347_v29 }
 0x1ea   : > { %v2962_v35 = vpop.f32.mrb[20].mxu1  ;;  %v2399_v38 = vadd.f32 %v2989_v23, %v2350_v31 }
 0x1eb   : > { %v2963_v39 = vpop.f32.mrb[21].mxu1 }
 0x1ec   : > { %v2964_v41 = vadd.f32 %v2963_v39, %v2962_v35  ;;  %v2965_v42 = vpop.f32.mrb[22].mxu1 }
 0x1ed   : > { %v2966_v44 = vpop.f32.mrb[23].mxu1 }
 0x1ee   : > { %v2355_v45 = vadd.f32 %v2964_v41, %v2306_v16  ;;  %v2967_v46 = vadd.f32 %v2966_v44, %v2965_v42 }
 0x1f0   : > { %v2358_v47 = vadd.f32 %v2967_v46, %v2309_v17  ;;  %v2404_v48 = vadd.f32 %v2992_v36, %v2355_v45 }
 0x1f2   : > { %v2407_v49 = vadd.f32 %v2995_v43, %v2358_v47 }
 0x1f4   : > { %v2493_v51 = vpop.f32.mrb[16].mxu0 }
 0x1f5   : > { %v2495_v53 = vpop.f32.mrb[17].mxu0 }
 0x1f6   : > { %v2496_v56 = vpop.f32.mrb[18].mxu0 }
 0x1f7   : > { %v2498_v58 = vpop.f32.mrb[19].mxu0 }
 0x1fc   : > { %v2501_v1 = vpop.f32.mrb[20].mxu0 }
 0x1fd   : > { %v2503_v3 = vpop.f32.mrb[21].mxu0 }
 0x1fe   : > { %v2504_v8 = vpop.f32.mrb[22].mxu0 }
 0x1ff   : > { %v2506_v10 = vpop.f32.mrb[23].mxu0 }
 0x202   : > { %v3012_v50 = vpop.f32.mrb[24].mxu1 }
 0x203   : > { %v3013_v52 = vpop.f32.mrb[25].mxu1 }
 0x204   : > { %v3014_v54 = vadd.f32 %v3013_v52, %v3012_v50  ;;  %v3015_v55 = vpop.f32.mrb[26].mxu1 }
 0x205   : > { %v3016_v57 = vpop.f32.mrb[27].mxu1 }
 0x206   : > { %v2445_v59 = vadd.f32 %v3014_v54, %v2396_v33  ;;  %v3017_v60 = vadd.f32 %v3016_v57, %v3015_v55 }
 0x208   : > { %v2494_v61 = vadd.f32 %v2493_v51, %v2445_v59  ;;  %v2448_v62 = vadd.f32 %v3017_v60, %v2399_v38 }
 0x20a   : > { %v2497_v63 = vadd.f32 %v2496_v56, %v2448_v62  ;;  %v3018_v0 = vpop.f32.mrb[28].mxu1  ;;  %v2508_v4 = vmax.f32 %v2494_v61, 0.0 }
 0x20b   : > { %v3019_v2 = vpop.f32.mrb[29].mxu1 }
 0x20c   : > { %v2509_v5 = vmax.f32 %v2497_v63, 0.0  ;;  %v3020_v6 = vadd.f32 %v3019_v2, %v3018_v0  ;;  %v3021_v7 = vpop.f32.mrb[30].mxu1 }
 0x20d   : > { %v3022_v9 = vpop.f32.mrb[31].mxu1 }
 0x20e   : > { %v2848_v11 = vpack.c.bf16 %v2509_v5, %v2508_v4  ;;  %v2453_v12 = vadd.f32 %v3020_v6, %v2404_v48  ;;  %v3023_v13 = vadd.f32 %v3022_v9, %v3021_v7 }
 0x210   : > { %2849 = vst [vmem:[%s1108_s23] sm:$0xff] %v2848_v11   ;;  %v2502_v14 = vadd.f32 %v2501_v1, %v2453_v12  ;;  %v2456_v15 = vadd.f32 %v3023_v13, %v2407_v49 }
 0x212   : > { %v2505_v16 = vadd.f32 %v2504_v8, %v2456_v15  ;;  %v2510_v17 = vmax.f32 %v2502_v14, 0.0  ;;  %2538 = sbr.rel (!%p3313_p6) target bundleno = 545 (0x221), region = 77 }
 0x214   : > { %v2511_v18 = vmax.f32 %v2505_v16, 0.0 }
 0x216   : > { %v2853_v19 = vpack.c.bf16 %v2511_v18, %v2510_v17 }
 0x217   : > { %v2559_v20 = vld [vmem:[%s1108_s23] sm:$0xf] (%p3313_p6)  ;;  %v2561_v21 = vld [vmem:[%s1108_s23 + $0x4] sm:$0xf] (%p3313_p6) }
 0x218   : > { %2855 = vst [vmem:[%s1108_s23 + $0x8] sm:$0xff] %v2853_v19   ;;  %2560 = vst [vmem:[%s2543_s25] sm:$0xf] (%p3313_p6), %v2559_v20 }
 0x219   : > { %2562 = vst [vmem:[%s2543_s25 + $0xc] sm:$0xf] %v2561_v21 }
 0x21f   : > { %v2563_v22 = vld [vmem:[%s1108_s23 + $0x8] sm:$0xf]  ;;  %v2565_v23 = vld [vmem:[%s1108_s23 + $0xc] sm:$0xf] }
 0x220   : > { %2564 = vst [vmem:[%s2543_s25 + $0x18] sm:$0xf] %v2563_v22  ;;  %2566 = vst [vmem:[%s2543_s25 + $0x24] sm:$0xf] %v2565_v23 }
 0x221 PF: > { %s13_s16 = sadd.s32 1, %s3255_s16   ;;  %s4008_s12 = smov %s3243_s13 }
 0x222   : > { %p10_p12 = scmp.ge.s32.totalorder %s13_s16, 5   ;;  %s4009_s13 = smov %s3318_s22 }
 0x223   : > { %s4010_s14 = smov %s3251_s15  ;;  %s4011_s15 = smov %s4013_s17 }
 0x224   :  { %12 = sbr.rel (!%p10_p12) target bundleno = 3 (0x3), region = 155 }

// kernel: alexnet_fmaps.8
= control target key start
LH: loop header
LB: loop body
LE: loop exit
PB: predicated region body
PF: predicated region fallthrough
CT: control target
= control target key end

     0   :  { %s6006_s12 = smov 0   ;;  %s6008_s13 = smov 0   ;;  %s7335_s0 = inlined_call_operand.vmem [shape: bf16[32,3456], index: 0, kind: input, shape index: {}]   ;;  %s7336_s1 = inlined_call_operand.vmem [shape: bf16[3456,256], index: 1, kind: input, shape index: {}]   ;;  %s7337_s2 = inlined_call_operand.vmem [shape: f32[1,256], index: 2, kind: input, shape index: {}]   ;;  %s7338_s3 = inlined_call_operand.vmem [shape: bf16[32,256], index: 3, kind: output, shape index: {}]  }
   0x1   :  { %s6010_s14 = smov 0   ;;  %s6012_s15 = smov 0  }
   0x2   :  { %s6014_s16 = smov 0  }
   0x3 LB: > { %s22_s17 = sadd.s32 1, %s5980_s15  ;;  %s4912_s18 = sadd.s32 4294967295, %s5984_s16   ;;  %s5984_s16 = sphi %s6014_s16, %s13_s16   ;;  %s5980_s15 = sphi %s6012_s15, %s7343_s15   ;;  %s5976_s14 = sphi %s6010_s14, %s7342_s14   ;;  %s5972_s13 = sphi %s6008_s13, %s7341_s13   ;;  %s5968_s12 = sphi %s6006_s12, %s7340_s12  }
   0x4   : > { %p23_p0 = scmp.ge.s32.totalorder %s22_s17, 2  ;;  %p65_p1 = scmp.ne.s32.totalorder %s5972_s13, %s5968_s12 }
   0x5   : > { %p66_p2 = scmp.eq.s32.totalorder %s5984_s16, 0  ;;  %p123_p4 = scmp.eq.s32.totalorder %s4912_s18, 1 }
   0x6   : > { %s7345_s17 = smov (%p23_p0, %s22_s17), 0  ;;  %s58_s20 = sadd.s32 1, %s5972_s13 }
   0x7   : > { %p67_p3 = por %p66_p2, %p65_p1  ;;  %s55_s19 = ssub.s32 %s5980_s15, %s7345_s17 }
   0x8   : > { %p56_p5 = scmp.eq.s32.totalorder %s55_s19, 0  ;;  %p6041_p6 = por %p123_p4, %p65_p1 }
   0x9   : > { %p4916_p7 = scmp.ge.s32.totalorder %s5984_s16, 2 }
   0xa   : > { %s6046_s22 = scalar_select %p56_p5, %s5972_s13, %s58_s20  }
   0xb   : > { %155 = sbr.rel (%p4916_p7) target bundleno = 310 (0x136), region = 20 }
  0x12   : > { %158 = sbr.rel (!%p67_p3) target bundleno = 310 (0x136), region = 24  ;;  %s160_s23 = sand.u32 (%p67_p3), 1, %s5972_s13  }
  0x13   : > { %s4917_s24 = sshll.u32 (%p67_p3), %s5980_s15, 2  ;;  %s5608_s25 = smul.u32 (%p67_p3), 1728, %s160_s23 }
  0x14   : > { %s6054_s28 = scalar_lea.vmem (%p67_p3), %s7336_s1, %s4917_s24 }
  0x15   : > { %v180_v0 = vld [vmem:[%s6054_s28] sm:$0xf] (%p67_p3)  ;;  %v182_v1 = vld [vmem:[%s6054_s28 + $0x8] sm:$0xf] (%p67_p3)  ;;  %v184_v2 = vld [vmem:[%s6054_s28 + $0x10] sm:$0xf] (%p67_p3) }
  0x16   : > { %v186_v3 = vld [vmem:[%s6054_s28 + $0x18] sm:$0xf] (%p67_p3)  ;;  %v188_v4 = vld [vmem:[%s6054_s28 + $0x20] sm:$0xf] (%p67_p3)  ;;  %s6061_s29 = scalar_lea.vmem (%p67_p3), [#allocation2], %s5608_s25 }
  0x17   : > { %181 = vst [vmem:[%s6061_s29] sm:$0xf] (%p67_p3), %v180_v0  ;;  %183 = vst [vmem:[%s6061_s29 + $0x4] sm:$0xf] (%p67_p3), %v182_v1  ;;  %v190_v5 = vld [vmem:[%s6054_s28 + $0x28] sm:$0xf] (%p67_p3) }
  0x18   : > { %185 = vst [vmem:[%s6061_s29 + $0x8] sm:$0xf] (%p67_p3), %v184_v2  ;;  %187 = vst [vmem:[%s6061_s29 + $0xc] sm:$0xf] (%p67_p3), %v186_v3  ;;  %v192_v6 = vld [vmem:[%s6054_s28 + $0x30] sm:$0xf] (%p67_p3) }
  0x19   : > { %189 = vst [vmem:[%s6061_s29 + $0x10] sm:$0xf] %v188_v4  ;;  %v194_v7 = vld [vmem:[%s6054_s28 + $0x38] sm:$0xf]  ;;  %191 = vst [vmem:[%s6061_s29 + $0x14] sm:$0xf] %v190_v5 }
  0x1a   : > { %193 = vst [vmem:[%s6061_s29 + $0x18] sm:$0xf] %v192_v6  ;;  %195 = vst [vmem:[%s6061_s29 + $0x1c] sm:$0xf] %v194_v7  ;;  %v196_v8 = vld [vmem:[%s6054_s28 + $0x40] sm:$0xf] }
  0x1b   : > { %v198_v9 = vld [vmem:[%s6054_s28 + $0x48] sm:$0xf]  ;;  %v200_v10 = vld [vmem:[%s6054_s28 + $0x50] sm:$0xf]  ;;  %197 = vst [vmem:[%s6061_s29 + $0x20] sm:$0xf] %v196_v8 }
  0x1c   : > { %199 = vst [vmem:[%s6061_s29 + $0x24] sm:$0xf] %v198_v9  ;;  %201 = vst [vmem:[%s6061_s29 + $0x28] sm:$0xf] %v200_v10  ;;  %v202_v11 = vld [vmem:[%s6054_s28 + $0x58] sm:$0xf] }
  0x1d   : > { %v204_v12 = vld [vmem:[%s6054_s28 + $0x60] sm:$0xf]  ;;  %v206_v13 = vld [vmem:[%s6054_s28 + $0x68] sm:$0xf]  ;;  %203 = vst [vmem:[%s6061_s29 + $0x2c] sm:$0xf] %v202_v11 }
  0x1e   : > { %205 = vst [vmem:[%s6061_s29 + $0x30] sm:$0xf] %v204_v12  ;;  %207 = vst [vmem:[%s6061_s29 + $0x34] sm:$0xf] %v206_v13  ;;  %v208_v14 = vld [vmem:[%s6054_s28 + $0x70] sm:$0xf] }
  0x1f   : > { %v210_v15 = vld [vmem:[%s6054_s28 + $0x78] sm:$0xf]  ;;  %v212_v16 = vld [vmem:[%s6054_s28 + $0x80] sm:$0xf]  ;;  %209 = vst [vmem:[%s6061_s29 + $0x38] sm:$0xf] %v208_v14 }
  0x20   : > { %211 = vst [vmem:[%s6061_s29 + $0x3c] sm:$0xf] %v210_v15  ;;  %213 = vst [vmem:[%s6061_s29 + $0x40] sm:$0xf] %v212_v16  ;;  %v214_v17 = vld [vmem:[%s6054_s28 + $0x88] sm:$0xf] }
  0x21   : > { %v216_v18 = vld [vmem:[%s6054_s28 + $0x90] sm:$0xf]  ;;  %v218_v19 = vld [vmem:[%s6054_s28 + $0x98] sm:$0xf]  ;;  %215 = vst [vmem:[%s6061_s29 + $0x44] sm:$0xf] %v214_v17 }
  0x22   : > { %217 = vst [vmem:[%s6061_s29 + $0x48] sm:$0xf] %v216_v18  ;;  %219 = vst [vmem:[%s6061_s29 + $0x4c] sm:$0xf] %v218_v19  ;;  %v220_v20 = vld [vmem:[%s6054_s28 + $0xa0] sm:$0xf] }
  0x23   : > { %v222_v21 = vld [vmem:[%s6054_s28 + $0xa8] sm:$0xf]  ;;  %v224_v22 = vld [vmem:[%s6054_s28 + $0xb0] sm:$0xf]  ;;  %221 = vst [vmem:[%s6061_s29 + $0x50] sm:$0xf] %v220_v20 }
  0x24   : > { %223 = vst [vmem:[%s6061_s29 + $0x54] sm:$0xf] %v222_v21  ;;  %225 = vst [vmem:[%s6061_s29 + $0x58] sm:$0xf] %v224_v22  ;;  %v226_v23 = vld [vmem:[%s6054_s28 + $0xb8] sm:$0xf] }
  0x25   : > { %v228_v24 = vld [vmem:[%s6054_s28 + $0xc0] sm:$0xf]  ;;  %v230_v25 = vld [vmem:[%s6054_s28 + $0xc8] sm:$0xf]  ;;  %227 = vst [vmem:[%s6061_s29 + $0x5c] sm:$0xf] %v226_v23 }
  0x26   : > { %229 = vst [vmem:[%s6061_s29 + $0x60] sm:$0xf] %v228_v24  ;;  %231 = vst [vmem:[%s6061_s29 + $0x64] sm:$0xf] %v230_v25  ;;  %v232_v26 = vld [vmem:[%s6054_s28 + $0xd0] sm:$0xf] }
  0x27   : > { %v234_v27 = vld [vmem:[%s6054_s28 + $0xd8] sm:$0xf]  ;;  %v236_v28 = vld [vmem:[%s6054_s28 + $0xe0] sm:$0xf]  ;;  %233 = vst [vmem:[%s6061_s29 + $0x68] sm:$0xf] %v232_v26 }
  0x28   : > { %235 = vst [vmem:[%s6061_s29 + $0x6c] sm:$0xf] %v234_v27  ;;  %237 = vst [vmem:[%s6061_s29 + $0x70] sm:$0xf] %v236_v28  ;;  %v238_v29 = vld [vmem:[%s6054_s28 + $0xe8] sm:$0xf] }
  0x29   : > { %v240_v30 = vld [vmem:[%s6054_s28 + $0xf0] sm:$0xf]  ;;  %v242_v31 = vld [vmem:[%s6054_s28 + $0xf8] sm:$0xf]  ;;  %239 = vst [vmem:[%s6061_s29 + $0x74] sm:$0xf] %v238_v29 }
  0x2a   : > { %241 = vst [vmem:[%s6061_s29 + $0x78] sm:$0xf] %v240_v30  ;;  %243 = vst [vmem:[%s6061_s29 + $0x7c] sm:$0xf] %v242_v31  ;;  %v244_v32 = vld [vmem:[%s6054_s28 + $0x100] sm:$0xf] }
  0x2b   : > { %v246_v33 = vld [vmem:[%s6054_s28 + $0x108] sm:$0xf]  ;;  %v248_v34 = vld [vmem:[%s6054_s28 + $0x110] sm:$0xf]  ;;  %245 = vst [vmem:[%s6061_s29 + $0x80] sm:$0xf] %v244_v32 }
  0x2c   : > { %247 = vst [vmem:[%s6061_s29 + $0x84] sm:$0xf] %v246_v33  ;;  %249 = vst [vmem:[%s6061_s29 + $0x88] sm:$0xf] %v248_v34  ;;  %v250_v35 = vld [vmem:[%s6054_s28 + $0x118] sm:$0xf] }
  0x2d   : > { %v252_v36 = vld [vmem:[%s6054_s28 + $0x120] sm:$0xf]  ;;  %v254_v37 = vld [vmem:[%s6054_s28 + $0x128] sm:$0xf]  ;;  %251 = vst [vmem:[%s6061_s29 + $0x8c] sm:$0xf] %v250_v35 }
  0x2e   : > { %253 = vst [vmem:[%s6061_s29 + $0x90] sm:$0xf] %v252_v36  ;;  %255 = vst [vmem:[%s6061_s29 + $0x94] sm:$0xf] %v254_v37  ;;  %v256_v38 = vld [vmem:[%s6054_s28 + $0x130] sm:$0xf] }
  0x2f   : > { %v258_v39 = vld [vmem:[%s6054_s28 + $0x138] sm:$0xf]  ;;  %v260_v40 = vld [vmem:[%s6054_s28 + $0x140] sm:$0xf]  ;;  %257 = vst [vmem:[%s6061_s29 + $0x98] sm:$0xf] %v256_v38 }
  0x30   : > { %259 = vst [vmem:[%s6061_s29 + $0x9c] sm:$0xf] %v258_v39  ;;  %261 = vst [vmem:[%s6061_s29 + $0xa0] sm:$0xf] %v260_v40  ;;  %v262_v41 = vld [vmem:[%s6054_s28 + $0x148] sm:$0xf] }
  0x31   : > { %v264_v42 = vld [vmem:[%s6054_s28 + $0x150] sm:$0xf]  ;;  %v266_v43 = vld [vmem:[%s6054_s28 + $0x158] sm:$0xf]  ;;  %263 = vst [vmem:[%s6061_s29 + $0xa4] sm:$0xf] %v262_v41 }
  0x32   : > { %265 = vst [vmem:[%s6061_s29 + $0xa8] sm:$0xf] %v264_v42  ;;  %267 = vst [vmem:[%s6061_s29 + $0xac] sm:$0xf] %v266_v43  ;;  %v268_v44 = vld [vmem:[%s6054_s28 + $0x160] sm:$0xf] }
  0x33   : > { %v270_v45 = vld [vmem:[%s6054_s28 + $0x168] sm:$0xf]  ;;  %v272_v46 = vld [vmem:[%s6054_s28 + $0x170] sm:$0xf]  ;;  %269 = vst [vmem:[%s6061_s29 + $0xb0] sm:$0xf] %v268_v44 }
  0x34   : > { %271 = vst [vmem:[%s6061_s29 + $0xb4] sm:$0xf] %v270_v45  ;;  %273 = vst [vmem:[%s6061_s29 + $0xb8] sm:$0xf] %v272_v46  ;;  %v274_v47 = vld [vmem:[%s6054_s28 + $0x178] sm:$0xf] }
  0x35   : > { %v276_v48 = vld [vmem:[%s6054_s28 + $0x180] sm:$0xf]  ;;  %v278_v49 = vld [vmem:[%s6054_s28 + $0x188] sm:$0xf]  ;;  %275 = vst [vmem:[%s6061_s29 + $0xbc] sm:$0xf] %v274_v47 }
  0x36   : > { %277 = vst [vmem:[%s6061_s29 + $0xc0] sm:$0xf] %v276_v48  ;;  %279 = vst [vmem:[%s6061_s29 + $0xc4] sm:$0xf] %v278_v49  ;;  %v280_v50 = vld [vmem:[%s6054_s28 + $0x190] sm:$0xf] }
  0x37   : > { %v282_v51 = vld [vmem:[%s6054_s28 + $0x198] sm:$0xf]  ;;  %v284_v52 = vld [vmem:[%s6054_s28 + $0x1a0] sm:$0xf]  ;;  %281 = vst [vmem:[%s6061_s29 + $0xc8] sm:$0xf] %v280_v50 }
  0x38   : > { %283 = vst [vmem:[%s6061_s29 + $0xcc] sm:$0xf] %v282_v51  ;;  %285 = vst [vmem:[%s6061_s29 + $0xd0] sm:$0xf] %v284_v52  ;;  %v286_v53 = vld [vmem:[%s6054_s28 + $0x1a8] sm:$0xf] }
  0x39   : > { %v288_v54 = vld [vmem:[%s6054_s28 + $0x1b0] sm:$0xf]  ;;  %v290_v55 = vld [vmem:[%s6054_s28 + $0x1b8] sm:$0xf]  ;;  %287 = vst [vmem:[%s6061_s29 + $0xd4] sm:$0xf] %v286_v53 }
  0x3a   : > { %289 = vst [vmem:[%s6061_s29 + $0xd8] sm:$0xf] %v288_v54  ;;  %291 = vst [vmem:[%s6061_s29 + $0xdc] sm:$0xf] %v290_v55  ;;  %v292_v56 = vld [vmem:[%s6054_s28 + $0x1c0] sm:$0xf] }
  0x3b   : > { %v294_v57 = vld [vmem:[%s6054_s28 + $0x1c8] sm:$0xf]  ;;  %v296_v58 = vld [vmem:[%s6054_s28 + $0x1d0] sm:$0xf]  ;;  %293 = vst [vmem:[%s6061_s29 + $0xe0] sm:$0xf] %v292_v56 }
  0x3c   : > { %295 = vst [vmem:[%s6061_s29 + $0xe4] sm:$0xf] %v294_v57  ;;  %297 = vst [vmem:[%s6061_s29 + $0xe8] sm:$0xf] %v296_v58  ;;  %v298_v59 = vld [vmem:[%s6054_s28 + $0x1d8] sm:$0xf] }
  0x3d   : > { %v300_v60 = vld [vmem:[%s6054_s28 + $0x1e0] sm:$0xf]  ;;  %v302_v61 = vld [vmem:[%s6054_s28 + $0x1e8] sm:$0xf]  ;;  %299 = vst [vmem:[%s6061_s29 + $0xec] sm:$0xf] %v298_v59 }
  0x3e   : > { %301 = vst [vmem:[%s6061_s29 + $0xf0] sm:$0xf] %v300_v60  ;;  %303 = vst [vmem:[%s6061_s29 + $0xf4] sm:$0xf] %v302_v61  ;;  %v304_v62 = vld [vmem:[%s6054_s28 + $0x1f0] sm:$0xf] }
  0x3f   : > { %v306_v63 = vld [vmem:[%s6054_s28 + $0x1f8] sm:$0xf]  ;;  %v308_v0 = vld [vmem:[%s6054_s28 + $0x200] sm:$0xf]  ;;  %305 = vst [vmem:[%s6061_s29 + $0xf8] sm:$0xf] %v304_v62 }
  0x40   : > { %307 = vst [vmem:[%s6061_s29 + $0xfc] sm:$0xf] %v306_v63  ;;  %309 = vst [vmem:[%s6061_s29 + $0x100] sm:$0xf] %v308_v0  ;;  %v310_v1 = vld [vmem:[%s6054_s28 + $0x208] sm:$0xf] }
  0x41   : > { %v312_v2 = vld [vmem:[%s6054_s28 + $0x210] sm:$0xf]  ;;  %v314_v3 = vld [vmem:[%s6054_s28 + $0x218] sm:$0xf]  ;;  %311 = vst [vmem:[%s6061_s29 + $0x104] sm:$0xf] %v310_v1 }
  0x42   : > { %313 = vst [vmem:[%s6061_s29 + $0x108] sm:$0xf] %v312_v2  ;;  %315 = vst [vmem:[%s6061_s29 + $0x10c] sm:$0xf] %v314_v3  ;;  %v316_v4 = vld [vmem:[%s6054_s28 + $0x220] sm:$0xf] }
  0x43   : > { %v318_v5 = vld [vmem:[%s6054_s28 + $0x228] sm:$0xf]  ;;  %v320_v6 = vld [vmem:[%s6054_s28 + $0x230] sm:$0xf]  ;;  %317 = vst [vmem:[%s6061_s29 + $0x110] sm:$0xf] %v316_v4 }
  0x44   : > { %319 = vst [vmem:[%s6061_s29 + $0x114] sm:$0xf] %v318_v5  ;;  %321 = vst [vmem:[%s6061_s29 + $0x118] sm:$0xf] %v320_v6  ;;  %v322_v7 = vld [vmem:[%s6054_s28 + $0x238] sm:$0xf] }
  0x45   : > { %v324_v8 = vld [vmem:[%s6054_s28 + $0x240] sm:$0xf]  ;;  %v326_v9 = vld [vmem:[%s6054_s28 + $0x248] sm:$0xf]  ;;  %323 = vst [vmem:[%s6061_s29 + $0x11c] sm:$0xf] %v322_v7 }
  0x46   : > { %325 = vst [vmem:[%s6061_s29 + $0x120] sm:$0xf] %v324_v8  ;;  %327 = vst [vmem:[%s6061_s29 + $0x124] sm:$0xf] %v326_v9  ;;  %v328_v10 = vld [vmem:[%s6054_s28 + $0x250] sm:$0xf] }
  0x47   : > { %v330_v11 = vld [vmem:[%s6054_s28 + $0x258] sm:$0xf]  ;;  %v332_v12 = vld [vmem:[%s6054_s28 + $0x260] sm:$0xf]  ;;  %329 = vst [vmem:[%s6061_s29 + $0x128] sm:$0xf] %v328_v10 }
  0x48   : > { %331 = vst [vmem:[%s6061_s29 + $0x12c] sm:$0xf] %v330_v11  ;;  %333 = vst [vmem:[%s6061_s29 + $0x130] sm:$0xf] %v332_v12  ;;  %v334_v13 = vld [vmem:[%s6054_s28 + $0x268] sm:$0xf] }
  0x49   : > { %v336_v14 = vld [vmem:[%s6054_s28 + $0x270] sm:$0xf]  ;;  %v338_v15 = vld [vmem:[%s6054_s28 + $0x278] sm:$0xf]  ;;  %335 = vst [vmem:[%s6061_s29 + $0x134] sm:$0xf] %v334_v13 }
  0x4a   : > { %337 = vst [vmem:[%s6061_s29 + $0x138] sm:$0xf] %v336_v14  ;;  %339 = vst [vmem:[%s6061_s29 + $0x13c] sm:$0xf] %v338_v15  ;;  %v340_v16 = vld [vmem:[%s6054_s28 + $0x280] sm:$0xf] }
  0x4b   : > { %v342_v17 = vld [vmem:[%s6054_s28 + $0x288] sm:$0xf]  ;;  %v344_v18 = vld [vmem:[%s6054_s28 + $0x290] sm:$0xf]  ;;  %341 = vst [vmem:[%s6061_s29 + $0x140] sm:$0xf] %v340_v16 }
  0x4c   : > { %343 = vst [vmem:[%s6061_s29 + $0x144] sm:$0xf] %v342_v17  ;;  %345 = vst [vmem:[%s6061_s29 + $0x148] sm:$0xf] %v344_v18  ;;  %v346_v19 = vld [vmem:[%s6054_s28 + $0x298] sm:$0xf] }
  0x4d   : > { %v348_v20 = vld [vmem:[%s6054_s28 + $0x2a0] sm:$0xf]  ;;  %v350_v21 = vld [vmem:[%s6054_s28 + $0x2a8] sm:$0xf]  ;;  %347 = vst [vmem:[%s6061_s29 + $0x14c] sm:$0xf] %v346_v19 }
  0x4e   : > { %349 = vst [vmem:[%s6061_s29 + $0x150] sm:$0xf] %v348_v20  ;;  %351 = vst [vmem:[%s6061_s29 + $0x154] sm:$0xf] %v350_v21  ;;  %v352_v22 = vld [vmem:[%s6054_s28 + $0x2b0] sm:$0xf] }
  0x4f   : > { %v354_v23 = vld [vmem:[%s6054_s28 + $0x2b8] sm:$0xf]  ;;  %v356_v24 = vld [vmem:[%s6054_s28 + $0x2c0] sm:$0xf]  ;;  %353 = vst [vmem:[%s6061_s29 + $0x158] sm:$0xf] %v352_v22 }
  0x50   : > { %355 = vst [vmem:[%s6061_s29 + $0x15c] sm:$0xf] %v354_v23  ;;  %357 = vst [vmem:[%s6061_s29 + $0x160] sm:$0xf] %v356_v24  ;;  %v358_v25 = vld [vmem:[%s6054_s28 + $0x2c8] sm:$0xf] }
  0x51   : > { %v360_v26 = vld [vmem:[%s6054_s28 + $0x2d0] sm:$0xf]  ;;  %v362_v27 = vld [vmem:[%s6054_s28 + $0x2d8] sm:$0xf]  ;;  %359 = vst [vmem:[%s6061_s29 + $0x164] sm:$0xf] %v358_v25 }
  0x52   : > { %361 = vst [vmem:[%s6061_s29 + $0x168] sm:$0xf] %v360_v26  ;;  %363 = vst [vmem:[%s6061_s29 + $0x16c] sm:$0xf] %v362_v27  ;;  %v364_v28 = vld [vmem:[%s6054_s28 + $0x2e0] sm:$0xf] }
  0x53   : > { %v366_v29 = vld [vmem:[%s6054_s28 + $0x2e8] sm:$0xf]  ;;  %v368_v30 = vld [vmem:[%s6054_s28 + $0x2f0] sm:$0xf]  ;;  %365 = vst [vmem:[%s6061_s29 + $0x170] sm:$0xf] %v364_v28 }
  0x54   : > { %367 = vst [vmem:[%s6061_s29 + $0x174] sm:$0xf] %v366_v29  ;;  %369 = vst [vmem:[%s6061_s29 + $0x178] sm:$0xf] %v368_v30  ;;  %v370_v31 = vld [vmem:[%s6054_s28 + $0x2f8] sm:$0xf] }
  0x55   : > { %v372_v32 = vld [vmem:[%s6054_s28 + $0x300] sm:$0xf]  ;;  %v374_v33 = vld [vmem:[%s6054_s28 + $0x308] sm:$0xf]  ;;  %371 = vst [vmem:[%s6061_s29 + $0x17c] sm:$0xf] %v370_v31 }
  0x56   : > { %373 = vst [vmem:[%s6061_s29 + $0x180] sm:$0xf] %v372_v32  ;;  %375 = vst [vmem:[%s6061_s29 + $0x184] sm:$0xf] %v374_v33  ;;  %v376_v34 = vld [vmem:[%s6054_s28 + $0x310] sm:$0xf] }
  0x57   : > { %v378_v35 = vld [vmem:[%s6054_s28 + $0x318] sm:$0xf]  ;;  %v380_v36 = vld [vmem:[%s6054_s28 + $0x320] sm:$0xf]  ;;  %377 = vst [vmem:[%s6061_s29 + $0x188] sm:$0xf] %v376_v34 }
  0x58   : > { %379 = vst [vmem:[%s6061_s29 + $0x18c] sm:$0xf] %v378_v35  ;;  %381 = vst [vmem:[%s6061_s29 + $0x190] sm:$0xf] %v380_v36  ;;  %v382_v37 = vld [vmem:[%s6054_s28 + $0x328] sm:$0xf] }
  0x59   : > { %v384_v38 = vld [vmem:[%s6054_s28 + $0x330] sm:$0xf]  ;;  %v386_v39 = vld [vmem:[%s6054_s28 + $0x338] sm:$0xf]  ;;  %383 = vst [vmem:[%s6061_s29 + $0x194] sm:$0xf] %v382_v37 }
  0x5a   : > { %385 = vst [vmem:[%s6061_s29 + $0x198] sm:$0xf] %v384_v38  ;;  %387 = vst [vmem:[%s6061_s29 + $0x19c] sm:$0xf] %v386_v39  ;;  %v388_v40 = vld [vmem:[%s6054_s28 + $0x340] sm:$0xf] }
  0x5b   : > { %v390_v41 = vld [vmem:[%s6054_s28 + $0x348] sm:$0xf]  ;;  %v392_v42 = vld [vmem:[%s6054_s28 + $0x350] sm:$0xf]  ;;  %389 = vst [vmem:[%s6061_s29 + $0x1a0] sm:$0xf] %v388_v40 }
  0x5c   : > { %391 = vst [vmem:[%s6061_s29 + $0x1a4] sm:$0xf] %v390_v41  ;;  %393 = vst [vmem:[%s6061_s29 + $0x1a8] sm:$0xf] %v392_v42  ;;  %v394_v43 = vld [vmem:[%s6054_s28 + $0x358] sm:$0xf] }
  0x5d   : > { %v396_v44 = vld [vmem:[%s6054_s28 + $0x360] sm:$0xf]  ;;  %v398_v45 = vld [vmem:[%s6054_s28 + $0x368] sm:$0xf]  ;;  %395 = vst [vmem:[%s6061_s29 + $0x1ac] sm:$0xf] %v394_v43 }
  0x5e   : > { %397 = vst [vmem:[%s6061_s29 + $0x1b0] sm:$0xf] %v396_v44  ;;  %399 = vst [vmem:[%s6061_s29 + $0x1b4] sm:$0xf] %v398_v45  ;;  %v400_v46 = vld [vmem:[%s6054_s28 + $0x370] sm:$0xf] }
  0x5f   : > { %v402_v47 = vld [vmem:[%s6054_s28 + $0x378] sm:$0xf]  ;;  %v404_v48 = vld [vmem:[%s6054_s28 + $0x380] sm:$0xf]  ;;  %401 = vst [vmem:[%s6061_s29 + $0x1b8] sm:$0xf] %v400_v46 }
  0x60   : > { %403 = vst [vmem:[%s6061_s29 + $0x1bc] sm:$0xf] %v402_v47  ;;  %405 = vst [vmem:[%s6061_s29 + $0x1c0] sm:$0xf] %v404_v48  ;;  %v406_v49 = vld [vmem:[%s6054_s28 + $0x388] sm:$0xf] }
  0x61   : > { %v408_v50 = vld [vmem:[%s6054_s28 + $0x390] sm:$0xf]  ;;  %v410_v51 = vld [vmem:[%s6054_s28 + $0x398] sm:$0xf]  ;;  %407 = vst [vmem:[%s6061_s29 + $0x1c4] sm:$0xf] %v406_v49 }
  0x62   : > { %409 = vst [vmem:[%s6061_s29 + $0x1c8] sm:$0xf] %v408_v50  ;;  %411 = vst [vmem:[%s6061_s29 + $0x1cc] sm:$0xf] %v410_v51  ;;  %v412_v52 = vld [vmem:[%s6054_s28 + $0x3a0] sm:$0xf] }
  0x63   : > { %v414_v53 = vld [vmem:[%s6054_s28 + $0x3a8] sm:$0xf]  ;;  %v416_v54 = vld [vmem:[%s6054_s28 + $0x3b0] sm:$0xf]  ;;  %413 = vst [vmem:[%s6061_s29 + $0x1d0] sm:$0xf] %v412_v52 }
  0x64   : > { %415 = vst [vmem:[%s6061_s29 + $0x1d4] sm:$0xf] %v414_v53  ;;  %417 = vst [vmem:[%s6061_s29 + $0x1d8] sm:$0xf] %v416_v54  ;;  %v418_v55 = vld [vmem:[%s6054_s28 + $0x3b8] sm:$0xf] }
  0x65   : > { %v420_v56 = vld [vmem:[%s6054_s28 + $0x3c0] sm:$0xf]  ;;  %v422_v57 = vld [vmem:[%s6054_s28 + $0x3c8] sm:$0xf]  ;;  %419 = vst [vmem:[%s6061_s29 + $0x1dc] sm:$0xf] %v418_v55 }
  0x66   : > { %421 = vst [vmem:[%s6061_s29 + $0x1e0] sm:$0xf] %v420_v56  ;;  %423 = vst [vmem:[%s6061_s29 + $0x1e4] sm:$0xf] %v422_v57  ;;  %v424_v58 = vld [vmem:[%s6054_s28 + $0x3d0] sm:$0xf] }
  0x67   : > { %v426_v59 = vld [vmem:[%s6054_s28 + $0x3d8] sm:$0xf]  ;;  %v428_v60 = vld [vmem:[%s6054_s28 + $0x3e0] sm:$0xf]  ;;  %425 = vst [vmem:[%s6061_s29 + $0x1e8] sm:$0xf] %v424_v58 }
  0x68   : > { %427 = vst [vmem:[%s6061_s29 + $0x1ec] sm:$0xf] %v426_v59  ;;  %429 = vst [vmem:[%s6061_s29 + $0x1f0] sm:$0xf] %v428_v60  ;;  %v430_v61 = vld [vmem:[%s6054_s28 + $0x3e8] sm:$0xf] }
  0x69   : > { %v432_v62 = vld [vmem:[%s6054_s28 + $0x3f0] sm:$0xf]  ;;  %v434_v63 = vld [vmem:[%s6054_s28 + $0x3f8] sm:$0xf]  ;;  %431 = vst [vmem:[%s6061_s29 + $0x1f4] sm:$0xf] %v430_v61 }
  0x6a   : > { %433 = vst [vmem:[%s6061_s29 + $0x1f8] sm:$0xf] %v432_v62  ;;  %435 = vst [vmem:[%s6061_s29 + $0x1fc] sm:$0xf] %v434_v63  ;;  %v436_v0 = vld [vmem:[%s6054_s28 + $0x400] sm:$0xf] }
  0x6b   : > { %v438_v1 = vld [vmem:[%s6054_s28 + $0x408] sm:$0xf]  ;;  %v440_v2 = vld [vmem:[%s6054_s28 + $0x410] sm:$0xf]  ;;  %437 = vst [vmem:[%s6061_s29 + $0x200] sm:$0xf] %v436_v0 }
  0x6c   : > { %439 = vst [vmem:[%s6061_s29 + $0x204] sm:$0xf] %v438_v1  ;;  %441 = vst [vmem:[%s6061_s29 + $0x208] sm:$0xf] %v440_v2  ;;  %v442_v3 = vld [vmem:[%s6054_s28 + $0x418] sm:$0xf] }
  0x6d   : > { %v444_v4 = vld [vmem:[%s6054_s28 + $0x420] sm:$0xf]  ;;  %v446_v5 = vld [vmem:[%s6054_s28 + $0x428] sm:$0xf]  ;;  %443 = vst [vmem:[%s6061_s29 + $0x20c] sm:$0xf] %v442_v3 }
  0x6e   : > { %445 = vst [vmem:[%s6061_s29 + $0x210] sm:$0xf] %v444_v4  ;;  %447 = vst [vmem:[%s6061_s29 + $0x214] sm:$0xf] %v446_v5  ;;  %v448_v6 = vld [vmem:[%s6054_s28 + $0x430] sm:$0xf] }
  0x6f   : > { %v450_v7 = vld [vmem:[%s6054_s28 + $0x438] sm:$0xf]  ;;  %v452_v8 = vld [vmem:[%s6054_s28 + $0x440] sm:$0xf]  ;;  %449 = vst [vmem:[%s6061_s29 + $0x218] sm:$0xf] %v448_v6 }
  0x70   : > { %451 = vst [vmem:[%s6061_s29 + $0x21c] sm:$0xf] %v450_v7  ;;  %453 = vst [vmem:[%s6061_s29 + $0x220] sm:$0xf] %v452_v8  ;;  %v454_v9 = vld [vmem:[%s6054_s28 + $0x448] sm:$0xf] }
  0x71   : > { %v456_v10 = vld [vmem:[%s6054_s28 + $0x450] sm:$0xf]  ;;  %v458_v11 = vld [vmem:[%s6054_s28 + $0x458] sm:$0xf]  ;;  %455 = vst [vmem:[%s6061_s29 + $0x224] sm:$0xf] %v454_v9 }
  0x72   : > { %457 = vst [vmem:[%s6061_s29 + $0x228] sm:$0xf] %v456_v10  ;;  %459 = vst [vmem:[%s6061_s29 + $0x22c] sm:$0xf] %v458_v11  ;;  %v460_v12 = vld [vmem:[%s6054_s28 + $0x460] sm:$0xf] }
  0x73   : > { %v462_v13 = vld [vmem:[%s6054_s28 + $0x468] sm:$0xf]  ;;  %v464_v14 = vld [vmem:[%s6054_s28 + $0x470] sm:$0xf]  ;;  %461 = vst [vmem:[%s6061_s29 + $0x230] sm:$0xf] %v460_v12 }
  0x74   : > { %463 = vst [vmem:[%s6061_s29 + $0x234] sm:$0xf] %v462_v13  ;;  %465 = vst [vmem:[%s6061_s29 + $0x238] sm:$0xf] %v464_v14  ;;  %v466_v15 = vld [vmem:[%s6054_s28 + $0x478] sm:$0xf] }
  0x75   : > { %v468_v16 = vld [vmem:[%s6054_s28 + $0x480] sm:$0xf]  ;;  %v470_v17 = vld [vmem:[%s6054_s28 + $0x488] sm:$0xf]  ;;  %467 = vst [vmem:[%s6061_s29 + $0x23c] sm:$0xf] %v466_v15 }
  0x76   : > { %469 = vst [vmem:[%s6061_s29 + $0x240] sm:$0xf] %v468_v16  ;;  %471 = vst [vmem:[%s6061_s29 + $0x244] sm:$0xf] %v470_v17  ;;  %v472_v18 = vld [vmem:[%s6054_s28 + $0x490] sm:$0xf] }
  0x77   : > { %v474_v19 = vld [vmem:[%s6054_s28 + $0x498] sm:$0xf]  ;;  %v476_v20 = vld [vmem:[%s6054_s28 + $0x4a0] sm:$0xf]  ;;  %473 = vst [vmem:[%s6061_s29 + $0x248] sm:$0xf] %v472_v18 }
  0x78   : > { %475 = vst [vmem:[%s6061_s29 + $0x24c] sm:$0xf] %v474_v19  ;;  %477 = vst [vmem:[%s6061_s29 + $0x250] sm:$0xf] %v476_v20  ;;  %v478_v21 = vld [vmem:[%s6054_s28 + $0x4a8] sm:$0xf] }
  0x79   : > { %v480_v22 = vld [vmem:[%s6054_s28 + $0x4b0] sm:$0xf]  ;;  %v482_v23 = vld [vmem:[%s6054_s28 + $0x4b8] sm:$0xf]  ;;  %479 = vst [vmem:[%s6061_s29 + $0x254] sm:$0xf] %v478_v21 }
  0x7a   : > { %481 = vst [vmem:[%s6061_s29 + $0x258] sm:$0xf] %v480_v22  ;;  %483 = vst [vmem:[%s6061_s29 + $0x25c] sm:$0xf] %v482_v23  ;;  %v484_v24 = vld [vmem:[%s6054_s28 + $0x4c0] sm:$0xf] }
  0x7b   : > { %v486_v25 = vld [vmem:[%s6054_s28 + $0x4c8] sm:$0xf]  ;;  %v488_v26 = vld [vmem:[%s6054_s28 + $0x4d0] sm:$0xf]  ;;  %485 = vst [vmem:[%s6061_s29 + $0x260] sm:$0xf] %v484_v24 }
  0x7c   : > { %487 = vst [vmem:[%s6061_s29 + $0x264] sm:$0xf] %v486_v25  ;;  %489 = vst [vmem:[%s6061_s29 + $0x268] sm:$0xf] %v488_v26  ;;  %v490_v27 = vld [vmem:[%s6054_s28 + $0x4d8] sm:$0xf] }
  0x7d   : > { %v492_v28 = vld [vmem:[%s6054_s28 + $0x4e0] sm:$0xf]  ;;  %v494_v29 = vld [vmem:[%s6054_s28 + $0x4e8] sm:$0xf]  ;;  %491 = vst [vmem:[%s6061_s29 + $0x26c] sm:$0xf] %v490_v27 }
  0x7e   : > { %493 = vst [vmem:[%s6061_s29 + $0x270] sm:$0xf] %v492_v28  ;;  %495 = vst [vmem:[%s6061_s29 + $0x274] sm:$0xf] %v494_v29  ;;  %v496_v30 = vld [vmem:[%s6054_s28 + $0x4f0] sm:$0xf] }
  0x7f   : > { %v498_v31 = vld [vmem:[%s6054_s28 + $0x4f8] sm:$0xf]  ;;  %v500_v32 = vld [vmem:[%s6054_s28 + $0x500] sm:$0xf]  ;;  %497 = vst [vmem:[%s6061_s29 + $0x278] sm:$0xf] %v496_v30 }
  0x80   : > { %499 = vst [vmem:[%s6061_s29 + $0x27c] sm:$0xf] %v498_v31  ;;  %501 = vst [vmem:[%s6061_s29 + $0x280] sm:$0xf] %v500_v32  ;;  %v502_v33 = vld [vmem:[%s6054_s28 + $0x508] sm:$0xf] }
  0x81   : > { %v504_v34 = vld [vmem:[%s6054_s28 + $0x510] sm:$0xf]  ;;  %v506_v35 = vld [vmem:[%s6054_s28 + $0x518] sm:$0xf]  ;;  %503 = vst [vmem:[%s6061_s29 + $0x284] sm:$0xf] %v502_v33 }
  0x82   : > { %505 = vst [vmem:[%s6061_s29 + $0x288] sm:$0xf] %v504_v34  ;;  %507 = vst [vmem:[%s6061_s29 + $0x28c] sm:$0xf] %v506_v35  ;;  %v508_v36 = vld [vmem:[%s6054_s28 + $0x520] sm:$0xf] }
  0x83   : > { %v510_v37 = vld [vmem:[%s6054_s28 + $0x528] sm:$0xf]  ;;  %v512_v38 = vld [vmem:[%s6054_s28 + $0x530] sm:$0xf]  ;;  %509 = vst [vmem:[%s6061_s29 + $0x290] sm:$0xf] %v508_v36 }
  0x84   : > { %511 = vst [vmem:[%s6061_s29 + $0x294] sm:$0xf] %v510_v37  ;;  %513 = vst [vmem:[%s6061_s29 + $0x298] sm:$0xf] %v512_v38  ;;  %v514_v39 = vld [vmem:[%s6054_s28 + $0x538] sm:$0xf] }
  0x85   : > { %v516_v40 = vld [vmem:[%s6054_s28 + $0x540] sm:$0xf]  ;;  %v518_v41 = vld [vmem:[%s6054_s28 + $0x548] sm:$0xf]  ;;  %515 = vst [vmem:[%s6061_s29 + $0x29c] sm:$0xf] %v514_v39 }
  0x86   : > { %517 = vst [vmem:[%s6061_s29 + $0x2a0] sm:$0xf] %v516_v40  ;;  %519 = vst [vmem:[%s6061_s29 + $0x2a4] sm:$0xf] %v518_v41  ;;  %v520_v42 = vld [vmem:[%s6054_s28 + $0x550] sm:$0xf] }
  0x87   : > { %v522_v43 = vld [vmem:[%s6054_s28 + $0x558] sm:$0xf]  ;;  %v524_v44 = vld [vmem:[%s6054_s28 + $0x560] sm:$0xf]  ;;  %521 = vst [vmem:[%s6061_s29 + $0x2a8] sm:$0xf] %v520_v42 }
  0x88   : > { %523 = vst [vmem:[%s6061_s29 + $0x2ac] sm:$0xf] %v522_v43  ;;  %525 = vst [vmem:[%s6061_s29 + $0x2b0] sm:$0xf] %v524_v44  ;;  %v526_v45 = vld [vmem:[%s6054_s28 + $0x568] sm:$0xf] }
  0x89   : > { %v528_v46 = vld [vmem:[%s6054_s28 + $0x570] sm:$0xf]  ;;  %v530_v47 = vld [vmem:[%s6054_s28 + $0x578] sm:$0xf]  ;;  %527 = vst [vmem:[%s6061_s29 + $0x2b4] sm:$0xf] %v526_v45 }
  0x8a   : > { %529 = vst [vmem:[%s6061_s29 + $0x2b8] sm:$0xf] %v528_v46  ;;  %531 = vst [vmem:[%s6061_s29 + $0x2bc] sm:$0xf] %v530_v47  ;;  %v532_v48 = vld [vmem:[%s6054_s28 + $0x580] sm:$0xf] }
  0x8b   : > { %v534_v49 = vld [vmem:[%s6054_s28 + $0x588] sm:$0xf]  ;;  %v536_v50 = vld [vmem:[%s6054_s28 + $0x590] sm:$0xf]  ;;  %533 = vst [vmem:[%s6061_s29 + $0x2c0] sm:$0xf] %v532_v48 }
  0x8c   : > { %535 = vst [vmem:[%s6061_s29 + $0x2c4] sm:$0xf] %v534_v49  ;;  %537 = vst [vmem:[%s6061_s29 + $0x2c8] sm:$0xf] %v536_v50  ;;  %v538_v51 = vld [vmem:[%s6054_s28 + $0x598] sm:$0xf] }
  0x8d   : > { %v540_v52 = vld [vmem:[%s6054_s28 + $0x5a0] sm:$0xf]  ;;  %v542_v53 = vld [vmem:[%s6054_s28 + $0x5a8] sm:$0xf]  ;;  %539 = vst [vmem:[%s6061_s29 + $0x2cc] sm:$0xf] %v538_v51 }
  0x8e   : > { %541 = vst [vmem:[%s6061_s29 + $0x2d0] sm:$0xf] %v540_v52  ;;  %543 = vst [vmem:[%s6061_s29 + $0x2d4] sm:$0xf] %v542_v53  ;;  %v544_v54 = vld [vmem:[%s6054_s28 + $0x5b0] sm:$0xf] }
  0x8f   : > { %v546_v55 = vld [vmem:[%s6054_s28 + $0x5b8] sm:$0xf]  ;;  %v548_v56 = vld [vmem:[%s6054_s28 + $0x5c0] sm:$0xf]  ;;  %545 = vst [vmem:[%s6061_s29 + $0x2d8] sm:$0xf] %v544_v54 }
  0x90   : > { %547 = vst [vmem:[%s6061_s29 + $0x2dc] sm:$0xf] %v546_v55  ;;  %549 = vst [vmem:[%s6061_s29 + $0x2e0] sm:$0xf] %v548_v56  ;;  %v550_v57 = vld [vmem:[%s6054_s28 + $0x5c8] sm:$0xf] }
  0x91   : > { %v552_v58 = vld [vmem:[%s6054_s28 + $0x5d0] sm:$0xf]  ;;  %v554_v59 = vld [vmem:[%s6054_s28 + $0x5d8] sm:$0xf]  ;;  %551 = vst [vmem:[%s6061_s29 + $0x2e4] sm:$0xf] %v550_v57 }
  0x92   : > { %553 = vst [vmem:[%s6061_s29 + $0x2e8] sm:$0xf] %v552_v58  ;;  %555 = vst [vmem:[%s6061_s29 + $0x2ec] sm:$0xf] %v554_v59  ;;  %v556_v60 = vld [vmem:[%s6054_s28 + $0x5e0] sm:$0xf] }
  0x93   : > { %v558_v61 = vld [vmem:[%s6054_s28 + $0x5e8] sm:$0xf]  ;;  %v560_v62 = vld [vmem:[%s6054_s28 + $0x5f0] sm:$0xf]  ;;  %557 = vst [vmem:[%s6061_s29 + $0x2f0] sm:$0xf] %v556_v60 }
  0x94   : > { %559 = vst [vmem:[%s6061_s29 + $0x2f4] sm:$0xf] %v558_v61  ;;  %561 = vst [vmem:[%s6061_s29 + $0x2f8] sm:$0xf] %v560_v62  ;;  %v562_v63 = vld [vmem:[%s6054_s28 + $0x5f8] sm:$0xf] }
  0x95   : > { %v564_v0 = vld [vmem:[%s6054_s28 + $0x600] sm:$0xf]  ;;  %v566_v1 = vld [vmem:[%s6054_s28 + $0x608] sm:$0xf]  ;;  %563 = vst [vmem:[%s6061_s29 + $0x2fc] sm:$0xf] %v562_v63 }
  0x96   : > { %565 = vst [vmem:[%s6061_s29 + $0x300] sm:$0xf] %v564_v0  ;;  %567 = vst [vmem:[%s6061_s29 + $0x304] sm:$0xf] %v566_v1  ;;  %v568_v2 = vld [vmem:[%s6054_s28 + $0x610] sm:$0xf] }
  0x97   : > { %v570_v3 = vld [vmem:[%s6054_s28 + $0x618] sm:$0xf]  ;;  %v572_v4 = vld [vmem:[%s6054_s28 + $0x620] sm:$0xf]  ;;  %569 = vst [vmem:[%s6061_s29 + $0x308] sm:$0xf] %v568_v2 }
  0x98   : > { %571 = vst [vmem:[%s6061_s29 + $0x30c] sm:$0xf] %v570_v3  ;;  %573 = vst [vmem:[%s6061_s29 + $0x310] sm:$0xf] %v572_v4  ;;  %v574_v5 = vld [vmem:[%s6054_s28 + $0x628] sm:$0xf] }
  0x99   : > { %v576_v6 = vld [vmem:[%s6054_s28 + $0x630] sm:$0xf]  ;;  %v578_v7 = vld [vmem:[%s6054_s28 + $0x638] sm:$0xf]  ;;  %575 = vst [vmem:[%s6061_s29 + $0x314] sm:$0xf] %v574_v5 }
  0x9a   : > { %577 = vst [vmem:[%s6061_s29 + $0x318] sm:$0xf] %v576_v6  ;;  %579 = vst [vmem:[%s6061_s29 + $0x31c] sm:$0xf] %v578_v7  ;;  %v580_v8 = vld [vmem:[%s6054_s28 + $0x640] sm:$0xf] }
  0x9b   : > { %v582_v9 = vld [vmem:[%s6054_s28 + $0x648] sm:$0xf]  ;;  %v584_v10 = vld [vmem:[%s6054_s28 + $0x650] sm:$0xf]  ;;  %581 = vst [vmem:[%s6061_s29 + $0x320] sm:$0xf] %v580_v8 }
  0x9c   : > { %583 = vst [vmem:[%s6061_s29 + $0x324] sm:$0xf] %v582_v9  ;;  %585 = vst [vmem:[%s6061_s29 + $0x328] sm:$0xf] %v584_v10  ;;  %v586_v11 = vld [vmem:[%s6054_s28 + $0x658] sm:$0xf] }
  0x9d   : > { %v588_v12 = vld [vmem:[%s6054_s28 + $0x660] sm:$0xf]  ;;  %v590_v13 = vld [vmem:[%s6054_s28 + $0x668] sm:$0xf]  ;;  %587 = vst [vmem:[%s6061_s29 + $0x32c] sm:$0xf] %v586_v11 }
  0x9e   : > { %589 = vst [vmem:[%s6061_s29 + $0x330] sm:$0xf] %v588_v12  ;;  %591 = vst [vmem:[%s6061_s29 + $0x334] sm:$0xf] %v590_v13  ;;  %v592_v14 = vld [vmem:[%s6054_s28 + $0x670] sm:$0xf] }
  0x9f   : > { %v594_v15 = vld [vmem:[%s6054_s28 + $0x678] sm:$0xf]  ;;  %v596_v16 = vld [vmem:[%s6054_s28 + $0x680] sm:$0xf]  ;;  %593 = vst [vmem:[%s6061_s29 + $0x338] sm:$0xf] %v592_v14 }
  0xa0   : > { %595 = vst [vmem:[%s6061_s29 + $0x33c] sm:$0xf] %v594_v15  ;;  %597 = vst [vmem:[%s6061_s29 + $0x340] sm:$0xf] %v596_v16  ;;  %v598_v17 = vld [vmem:[%s6054_s28 + $0x688] sm:$0xf] }
  0xa1   : > { %v600_v18 = vld [vmem:[%s6054_s28 + $0x690] sm:$0xf]  ;;  %v602_v19 = vld [vmem:[%s6054_s28 + $0x698] sm:$0xf]  ;;  %599 = vst [vmem:[%s6061_s29 + $0x344] sm:$0xf] %v598_v17 }
  0xa2   : > { %601 = vst [vmem:[%s6061_s29 + $0x348] sm:$0xf] %v600_v18  ;;  %603 = vst [vmem:[%s6061_s29 + $0x34c] sm:$0xf] %v602_v19  ;;  %v604_v20 = vld [vmem:[%s6054_s28 + $0x6a0] sm:$0xf] }
  0xa3   : > { %v606_v21 = vld [vmem:[%s6054_s28 + $0x6a8] sm:$0xf]  ;;  %v608_v22 = vld [vmem:[%s6054_s28 + $0x6b0] sm:$0xf]  ;;  %605 = vst [vmem:[%s6061_s29 + $0x350] sm:$0xf] %v604_v20 }
  0xa4   : > { %607 = vst [vmem:[%s6061_s29 + $0x354] sm:$0xf] %v606_v21  ;;  %609 = vst [vmem:[%s6061_s29 + $0x358] sm:$0xf] %v608_v22  ;;  %v610_v23 = vld [vmem:[%s6054_s28 + $0x6b8] sm:$0xf] }
  0xa5   : > { %v612_v24 = vld [vmem:[%s6054_s28 + $0x6c0] sm:$0xf]  ;;  %v614_v25 = vld [vmem:[%s6054_s28 + $0x6c8] sm:$0xf]  ;;  %611 = vst [vmem:[%s6061_s29 + $0x35c] sm:$0xf] %v610_v23 }
  0xa6   : > { %613 = vst [vmem:[%s6061_s29 + $0x360] sm:$0xf] %v612_v24  ;;  %615 = vst [vmem:[%s6061_s29 + $0x364] sm:$0xf] %v614_v25  ;;  %v616_v26 = vld [vmem:[%s6054_s28 + $0x6d0] sm:$0xf] }
  0xa7   : > { %v618_v27 = vld [vmem:[%s6054_s28 + $0x6d8] sm:$0xf]  ;;  %v620_v28 = vld [vmem:[%s6054_s28 + $0x6e0] sm:$0xf]  ;;  %617 = vst [vmem:[%s6061_s29 + $0x368] sm:$0xf] %v616_v26 }
  0xa8   : > { %619 = vst [vmem:[%s6061_s29 + $0x36c] sm:$0xf] %v618_v27  ;;  %621 = vst [vmem:[%s6061_s29 + $0x370] sm:$0xf] %v620_v28  ;;  %v622_v29 = vld [vmem:[%s6054_s28 + $0x6e8] sm:$0xf] }
  0xa9   : > { %v624_v30 = vld [vmem:[%s6054_s28 + $0x6f0] sm:$0xf]  ;;  %v626_v31 = vld [vmem:[%s6054_s28 + $0x6f8] sm:$0xf]  ;;  %623 = vst [vmem:[%s6061_s29 + $0x374] sm:$0xf] %v622_v29 }
  0xaa   : > { %625 = vst [vmem:[%s6061_s29 + $0x378] sm:$0xf] %v624_v30  ;;  %627 = vst [vmem:[%s6061_s29 + $0x37c] sm:$0xf] %v626_v31  ;;  %v628_v32 = vld [vmem:[%s6054_s28 + $0x700] sm:$0xf] }
  0xab   : > { %v630_v33 = vld [vmem:[%s6054_s28 + $0x708] sm:$0xf]  ;;  %v632_v34 = vld [vmem:[%s6054_s28 + $0x710] sm:$0xf]  ;;  %629 = vst [vmem:[%s6061_s29 + $0x380] sm:$0xf] %v628_v32 }
  0xac   : > { %631 = vst [vmem:[%s6061_s29 + $0x384] sm:$0xf] %v630_v33  ;;  %633 = vst [vmem:[%s6061_s29 + $0x388] sm:$0xf] %v632_v34  ;;  %v634_v35 = vld [vmem:[%s6054_s28 + $0x718] sm:$0xf] }
  0xad   : > { %v636_v36 = vld [vmem:[%s6054_s28 + $0x720] sm:$0xf]  ;;  %v638_v37 = vld [vmem:[%s6054_s28 + $0x728] sm:$0xf]  ;;  %635 = vst [vmem:[%s6061_s29 + $0x38c] sm:$0xf] %v634_v35 }
  0xae   : > { %637 = vst [vmem:[%s6061_s29 + $0x390] sm:$0xf] %v636_v36  ;;  %639 = vst [vmem:[%s6061_s29 + $0x394] sm:$0xf] %v638_v37  ;;  %v640_v38 = vld [vmem:[%s6054_s28 + $0x730] sm:$0xf] }
  0xaf   : > { %v642_v39 = vld [vmem:[%s6054_s28 + $0x738] sm:$0xf]  ;;  %v644_v40 = vld [vmem:[%s6054_s28 + $0x740] sm:$0xf]  ;;  %641 = vst [vmem:[%s6061_s29 + $0x398] sm:$0xf] %v640_v38 }
  0xb0   : > { %643 = vst [vmem:[%s6061_s29 + $0x39c] sm:$0xf] %v642_v39  ;;  %645 = vst [vmem:[%s6061_s29 + $0x3a0] sm:$0xf] %v644_v40  ;;  %v646_v41 = vld [vmem:[%s6054_s28 + $0x748] sm:$0xf] }
  0xb1   : > { %v648_v42 = vld [vmem:[%s6054_s28 + $0x750] sm:$0xf]  ;;  %v650_v43 = vld [vmem:[%s6054_s28 + $0x758] sm:$0xf]  ;;  %647 = vst [vmem:[%s6061_s29 + $0x3a4] sm:$0xf] %v646_v41 }
  0xb2   : > { %649 = vst [vmem:[%s6061_s29 + $0x3a8] sm:$0xf] %v648_v42  ;;  %651 = vst [vmem:[%s6061_s29 + $0x3ac] sm:$0xf] %v650_v43  ;;  %v652_v44 = vld [vmem:[%s6054_s28 + $0x760] sm:$0xf] }
  0xb3   : > { %v654_v45 = vld [vmem:[%s6054_s28 + $0x768] sm:$0xf]  ;;  %v656_v46 = vld [vmem:[%s6054_s28 + $0x770] sm:$0xf]  ;;  %653 = vst [vmem:[%s6061_s29 + $0x3b0] sm:$0xf] %v652_v44 }
  0xb4   : > { %655 = vst [vmem:[%s6061_s29 + $0x3b4] sm:$0xf] %v654_v45  ;;  %657 = vst [vmem:[%s6061_s29 + $0x3b8] sm:$0xf] %v656_v46  ;;  %v658_v47 = vld [vmem:[%s6054_s28 + $0x778] sm:$0xf] }
  0xb5   : > { %v660_v48 = vld [vmem:[%s6054_s28 + $0x780] sm:$0xf]  ;;  %v662_v49 = vld [vmem:[%s6054_s28 + $0x788] sm:$0xf]  ;;  %659 = vst [vmem:[%s6061_s29 + $0x3bc] sm:$0xf] %v658_v47 }
  0xb6   : > { %661 = vst [vmem:[%s6061_s29 + $0x3c0] sm:$0xf] %v660_v48  ;;  %663 = vst [vmem:[%s6061_s29 + $0x3c4] sm:$0xf] %v662_v49  ;;  %v664_v50 = vld [vmem:[%s6054_s28 + $0x790] sm:$0xf] }
  0xb7   : > { %v666_v51 = vld [vmem:[%s6054_s28 + $0x798] sm:$0xf]  ;;  %v668_v52 = vld [vmem:[%s6054_s28 + $0x7a0] sm:$0xf]  ;;  %665 = vst [vmem:[%s6061_s29 + $0x3c8] sm:$0xf] %v664_v50 }
  0xb8   : > { %667 = vst [vmem:[%s6061_s29 + $0x3cc] sm:$0xf] %v666_v51  ;;  %669 = vst [vmem:[%s6061_s29 + $0x3d0] sm:$0xf] %v668_v52  ;;  %v670_v53 = vld [vmem:[%s6054_s28 + $0x7a8] sm:$0xf] }
  0xb9   : > { %v672_v54 = vld [vmem:[%s6054_s28 + $0x7b0] sm:$0xf]  ;;  %v674_v55 = vld [vmem:[%s6054_s28 + $0x7b8] sm:$0xf]  ;;  %671 = vst [vmem:[%s6061_s29 + $0x3d4] sm:$0xf] %v670_v53 }
  0xba   : > { %673 = vst [vmem:[%s6061_s29 + $0x3d8] sm:$0xf] %v672_v54  ;;  %675 = vst [vmem:[%s6061_s29 + $0x3dc] sm:$0xf] %v674_v55  ;;  %v676_v56 = vld [vmem:[%s6054_s28 + $0x7c0] sm:$0xf] }
  0xbb   : > { %v678_v57 = vld [vmem:[%s6054_s28 + $0x7c8] sm:$0xf]  ;;  %v680_v58 = vld [vmem:[%s6054_s28 + $0x7d0] sm:$0xf]  ;;  %677 = vst [vmem:[%s6061_s29 + $0x3e0] sm:$0xf] %v676_v56 }
  0xbc   : > { %679 = vst [vmem:[%s6061_s29 + $0x3e4] sm:$0xf] %v678_v57  ;;  %681 = vst [vmem:[%s6061_s29 + $0x3e8] sm:$0xf] %v680_v58  ;;  %v682_v59 = vld [vmem:[%s6054_s28 + $0x7d8] sm:$0xf] }
  0xbd   : > { %v684_v60 = vld [vmem:[%s6054_s28 + $0x7e0] sm:$0xf]  ;;  %v686_v61 = vld [vmem:[%s6054_s28 + $0x7e8] sm:$0xf]  ;;  %683 = vst [vmem:[%s6061_s29 + $0x3ec] sm:$0xf] %v682_v59 }
  0xbe   : > { %685 = vst [vmem:[%s6061_s29 + $0x3f0] sm:$0xf] %v684_v60  ;;  %687 = vst [vmem:[%s6061_s29 + $0x3f4] sm:$0xf] %v686_v61  ;;  %v688_v62 = vld [vmem:[%s6054_s28 + $0x7f0] sm:$0xf] }
  0xbf   : > { %v690_v63 = vld [vmem:[%s6054_s28 + $0x7f8] sm:$0xf]  ;;  %v692_v0 = vld [vmem:[%s6054_s28 + $0x800] sm:$0xf]  ;;  %689 = vst [vmem:[%s6061_s29 + $0x3f8] sm:$0xf] %v688_v62 }
  0xc0   : > { %691 = vst [vmem:[%s6061_s29 + $0x3fc] sm:$0xf] %v690_v63  ;;  %693 = vst [vmem:[%s6061_s29 + $0x400] sm:$0xf] %v692_v0  ;;  %v694_v1 = vld [vmem:[%s6054_s28 + $0x808] sm:$0xf] }
  0xc1   : > { %v696_v2 = vld [vmem:[%s6054_s28 + $0x810] sm:$0xf]  ;;  %v698_v3 = vld [vmem:[%s6054_s28 + $0x818] sm:$0xf]  ;;  %695 = vst [vmem:[%s6061_s29 + $0x404] sm:$0xf] %v694_v1 }
  0xc2   : > { %697 = vst [vmem:[%s6061_s29 + $0x408] sm:$0xf] %v696_v2  ;;  %699 = vst [vmem:[%s6061_s29 + $0x40c] sm:$0xf] %v698_v3  ;;  %v700_v4 = vld [vmem:[%s6054_s28 + $0x820] sm:$0xf] }
  0xc3   : > { %v702_v5 = vld [vmem:[%s6054_s28 + $0x828] sm:$0xf]  ;;  %v704_v6 = vld [vmem:[%s6054_s28 + $0x830] sm:$0xf]  ;;  %701 = vst [vmem:[%s6061_s29 + $0x410] sm:$0xf] %v700_v4 }
  0xc4   : > { %703 = vst [vmem:[%s6061_s29 + $0x414] sm:$0xf] %v702_v5  ;;  %705 = vst [vmem:[%s6061_s29 + $0x418] sm:$0xf] %v704_v6  ;;  %v706_v7 = vld [vmem:[%s6054_s28 + $0x838] sm:$0xf] }
  0xc5   : > { %v708_v8 = vld [vmem:[%s6054_s28 + $0x840] sm:$0xf]  ;;  %v710_v9 = vld [vmem:[%s6054_s28 + $0x848] sm:$0xf]  ;;  %707 = vst [vmem:[%s6061_s29 + $0x41c] sm:$0xf] %v706_v7 }
  0xc6   : > { %709 = vst [vmem:[%s6061_s29 + $0x420] sm:$0xf] %v708_v8  ;;  %711 = vst [vmem:[%s6061_s29 + $0x424] sm:$0xf] %v710_v9  ;;  %v712_v10 = vld [vmem:[%s6054_s28 + $0x850] sm:$0xf] }
  0xc7   : > { %v714_v11 = vld [vmem:[%s6054_s28 + $0x858] sm:$0xf]  ;;  %v716_v12 = vld [vmem:[%s6054_s28 + $0x860] sm:$0xf]  ;;  %713 = vst [vmem:[%s6061_s29 + $0x428] sm:$0xf] %v712_v10 }
  0xc8   : > { %715 = vst [vmem:[%s6061_s29 + $0x42c] sm:$0xf] %v714_v11  ;;  %717 = vst [vmem:[%s6061_s29 + $0x430] sm:$0xf] %v716_v12  ;;  %v718_v13 = vld [vmem:[%s6054_s28 + $0x868] sm:$0xf] }
  0xc9   : > { %v720_v14 = vld [vmem:[%s6054_s28 + $0x870] sm:$0xf]  ;;  %v722_v15 = vld [vmem:[%s6054_s28 + $0x878] sm:$0xf]  ;;  %719 = vst [vmem:[%s6061_s29 + $0x434] sm:$0xf] %v718_v13 }
  0xca   : > { %721 = vst [vmem:[%s6061_s29 + $0x438] sm:$0xf] %v720_v14  ;;  %723 = vst [vmem:[%s6061_s29 + $0x43c] sm:$0xf] %v722_v15  ;;  %v724_v16 = vld [vmem:[%s6054_s28 + $0x880] sm:$0xf] }
  0xcb   : > { %v726_v17 = vld [vmem:[%s6054_s28 + $0x888] sm:$0xf]  ;;  %v728_v18 = vld [vmem:[%s6054_s28 + $0x890] sm:$0xf]  ;;  %725 = vst [vmem:[%s6061_s29 + $0x440] sm:$0xf] %v724_v16 }
  0xcc   : > { %727 = vst [vmem:[%s6061_s29 + $0x444] sm:$0xf] %v726_v17  ;;  %729 = vst [vmem:[%s6061_s29 + $0x448] sm:$0xf] %v728_v18  ;;  %v730_v19 = vld [vmem:[%s6054_s28 + $0x898] sm:$0xf] }
  0xcd   : > { %v732_v20 = vld [vmem:[%s6054_s28 + $0x8a0] sm:$0xf]  ;;  %v734_v21 = vld [vmem:[%s6054_s28 + $0x8a8] sm:$0xf]  ;;  %731 = vst [vmem:[%s6061_s29 + $0x44c] sm:$0xf] %v730_v19 }
  0xce   : > { %733 = vst [vmem:[%s6061_s29 + $0x450] sm:$0xf] %v732_v20  ;;  %735 = vst [vmem:[%s6061_s29 + $0x454] sm:$0xf] %v734_v21  ;;  %v736_v22 = vld [vmem:[%s6054_s28 + $0x8b0] sm:$0xf] }
  0xcf   : > { %v738_v23 = vld [vmem:[%s6054_s28 + $0x8b8] sm:$0xf]  ;;  %v740_v24 = vld [vmem:[%s6054_s28 + $0x8c0] sm:$0xf]  ;;  %737 = vst [vmem:[%s6061_s29 + $0x458] sm:$0xf] %v736_v22 }
  0xd0   : > { %739 = vst [vmem:[%s6061_s29 + $0x45c] sm:$0xf] %v738_v23  ;;  %741 = vst [vmem:[%s6061_s29 + $0x460] sm:$0xf] %v740_v24  ;;  %v742_v25 = vld [vmem:[%s6054_s28 + $0x8c8] sm:$0xf] }
  0xd1   : > { %v744_v26 = vld [vmem:[%s6054_s28 + $0x8d0] sm:$0xf]  ;;  %v746_v27 = vld [vmem:[%s6054_s28 + $0x8d8] sm:$0xf]  ;;  %743 = vst [vmem:[%s6061_s29 + $0x464] sm:$0xf] %v742_v25 }
  0xd2   : > { %745 = vst [vmem:[%s6061_s29 + $0x468] sm:$0xf] %v744_v26  ;;  %747 = vst [vmem:[%s6061_s29 + $0x46c] sm:$0xf] %v746_v27  ;;  %v748_v28 = vld [vmem:[%s6054_s28 + $0x8e0] sm:$0xf] }
  0xd3   : > { %v750_v29 = vld [vmem:[%s6054_s28 + $0x8e8] sm:$0xf]  ;;  %v752_v30 = vld [vmem:[%s6054_s28 + $0x8f0] sm:$0xf]  ;;  %749 = vst [vmem:[%s6061_s29 + $0x470] sm:$0xf] %v748_v28 }
  0xd4   : > { %751 = vst [vmem:[%s6061_s29 + $0x474] sm:$0xf] %v750_v29  ;;  %753 = vst [vmem:[%s6061_s29 + $0x478] sm:$0xf] %v752_v30  ;;  %v754_v31 = vld [vmem:[%s6054_s28 + $0x8f8] sm:$0xf] }
  0xd5   : > { %v756_v32 = vld [vmem:[%s6054_s28 + $0x900] sm:$0xf]  ;;  %v758_v33 = vld [vmem:[%s6054_s28 + $0x908] sm:$0xf]  ;;  %755 = vst [vmem:[%s6061_s29 + $0x47c] sm:$0xf] %v754_v31 }
  0xd6   : > { %757 = vst [vmem:[%s6061_s29 + $0x480] sm:$0xf] %v756_v32  ;;  %759 = vst [vmem:[%s6061_s29 + $0x484] sm:$0xf] %v758_v33  ;;  %v760_v34 = vld [vmem:[%s6054_s28 + $0x910] sm:$0xf] }
  0xd7   : > { %v762_v35 = vld [vmem:[%s6054_s28 + $0x918] sm:$0xf]  ;;  %v764_v36 = vld [vmem:[%s6054_s28 + $0x920] sm:$0xf]  ;;  %761 = vst [vmem:[%s6061_s29 + $0x488] sm:$0xf] %v760_v34 }
  0xd8   : > { %763 = vst [vmem:[%s6061_s29 + $0x48c] sm:$0xf] %v762_v35  ;;  %765 = vst [vmem:[%s6061_s29 + $0x490] sm:$0xf] %v764_v36  ;;  %v766_v37 = vld [vmem:[%s6054_s28 + $0x928] sm:$0xf] }
  0xd9   : > { %v768_v38 = vld [vmem:[%s6054_s28 + $0x930] sm:$0xf]  ;;  %v770_v39 = vld [vmem:[%s6054_s28 + $0x938] sm:$0xf]  ;;  %767 = vst [vmem:[%s6061_s29 + $0x494] sm:$0xf] %v766_v37 }
  0xda   : > { %769 = vst [vmem:[%s6061_s29 + $0x498] sm:$0xf] %v768_v38  ;;  %771 = vst [vmem:[%s6061_s29 + $0x49c] sm:$0xf] %v770_v39  ;;  %v772_v40 = vld [vmem:[%s6054_s28 + $0x940] sm:$0xf] }
  0xdb   : > { %v774_v41 = vld [vmem:[%s6054_s28 + $0x948] sm:$0xf]  ;;  %v776_v42 = vld [vmem:[%s6054_s28 + $0x950] sm:$0xf]  ;;  %773 = vst [vmem:[%s6061_s29 + $0x4a0] sm:$0xf] %v772_v40 }
  0xdc   : > { %775 = vst [vmem:[%s6061_s29 + $0x4a4] sm:$0xf] %v774_v41  ;;  %777 = vst [vmem:[%s6061_s29 + $0x4a8] sm:$0xf] %v776_v42  ;;  %v778_v43 = vld [vmem:[%s6054_s28 + $0x958] sm:$0xf] }
  0xdd   : > { %v780_v44 = vld [vmem:[%s6054_s28 + $0x960] sm:$0xf]  ;;  %v782_v45 = vld [vmem:[%s6054_s28 + $0x968] sm:$0xf]  ;;  %779 = vst [vmem:[%s6061_s29 + $0x4ac] sm:$0xf] %v778_v43 }
  0xde   : > { %781 = vst [vmem:[%s6061_s29 + $0x4b0] sm:$0xf] %v780_v44  ;;  %783 = vst [vmem:[%s6061_s29 + $0x4b4] sm:$0xf] %v782_v45  ;;  %v784_v46 = vld [vmem:[%s6054_s28 + $0x970] sm:$0xf] }
  0xdf   : > { %v786_v47 = vld [vmem:[%s6054_s28 + $0x978] sm:$0xf]  ;;  %v788_v48 = vld [vmem:[%s6054_s28 + $0x980] sm:$0xf]  ;;  %785 = vst [vmem:[%s6061_s29 + $0x4b8] sm:$0xf] %v784_v46 }
  0xe0   : > { %787 = vst [vmem:[%s6061_s29 + $0x4bc] sm:$0xf] %v786_v47  ;;  %789 = vst [vmem:[%s6061_s29 + $0x4c0] sm:$0xf] %v788_v48  ;;  %v790_v49 = vld [vmem:[%s6054_s28 + $0x988] sm:$0xf] }
  0xe1   : > { %v792_v50 = vld [vmem:[%s6054_s28 + $0x990] sm:$0xf]  ;;  %v794_v51 = vld [vmem:[%s6054_s28 + $0x998] sm:$0xf]  ;;  %791 = vst [vmem:[%s6061_s29 + $0x4c4] sm:$0xf] %v790_v49 }
  0xe2   : > { %793 = vst [vmem:[%s6061_s29 + $0x4c8] sm:$0xf] %v792_v50  ;;  %795 = vst [vmem:[%s6061_s29 + $0x4cc] sm:$0xf] %v794_v51  ;;  %v796_v52 = vld [vmem:[%s6054_s28 + $0x9a0] sm:$0xf] }
  0xe3   : > { %v798_v53 = vld [vmem:[%s6054_s28 + $0x9a8] sm:$0xf]  ;;  %v800_v54 = vld [vmem:[%s6054_s28 + $0x9b0] sm:$0xf]  ;;  %797 = vst [vmem:[%s6061_s29 + $0x4d0] sm:$0xf] %v796_v52 }
  0xe4   : > { %799 = vst [vmem:[%s6061_s29 + $0x4d4] sm:$0xf] %v798_v53  ;;  %801 = vst [vmem:[%s6061_s29 + $0x4d8] sm:$0xf] %v800_v54  ;;  %v802_v55 = vld [vmem:[%s6054_s28 + $0x9b8] sm:$0xf] }
  0xe5   : > { %v804_v56 = vld [vmem:[%s6054_s28 + $0x9c0] sm:$0xf]  ;;  %v806_v57 = vld [vmem:[%s6054_s28 + $0x9c8] sm:$0xf]  ;;  %803 = vst [vmem:[%s6061_s29 + $0x4dc] sm:$0xf] %v802_v55 }
  0xe6   : > { %805 = vst [vmem:[%s6061_s29 + $0x4e0] sm:$0xf] %v804_v56  ;;  %807 = vst [vmem:[%s6061_s29 + $0x4e4] sm:$0xf] %v806_v57  ;;  %v808_v58 = vld [vmem:[%s6054_s28 + $0x9d0] sm:$0xf] }
  0xe7   : > { %v810_v59 = vld [vmem:[%s6054_s28 + $0x9d8] sm:$0xf]  ;;  %v812_v60 = vld [vmem:[%s6054_s28 + $0x9e0] sm:$0xf]  ;;  %809 = vst [vmem:[%s6061_s29 + $0x4e8] sm:$0xf] %v808_v58 }
  0xe8   : > { %811 = vst [vmem:[%s6061_s29 + $0x4ec] sm:$0xf] %v810_v59  ;;  %813 = vst [vmem:[%s6061_s29 + $0x4f0] sm:$0xf] %v812_v60  ;;  %v814_v61 = vld [vmem:[%s6054_s28 + $0x9e8] sm:$0xf] }
  0xe9   : > { %v816_v62 = vld [vmem:[%s6054_s28 + $0x9f0] sm:$0xf]  ;;  %v818_v63 = vld [vmem:[%s6054_s28 + $0x9f8] sm:$0xf]  ;;  %815 = vst [vmem:[%s6061_s29 + $0x4f4] sm:$0xf] %v814_v61 }
  0xea   : > { %817 = vst [vmem:[%s6061_s29 + $0x4f8] sm:$0xf] %v816_v62  ;;  %819 = vst [vmem:[%s6061_s29 + $0x4fc] sm:$0xf] %v818_v63  ;;  %v820_v0 = vld [vmem:[%s6054_s28 + $0xa00] sm:$0xf] }
  0xeb   : > { %v822_v1 = vld [vmem:[%s6054_s28 + $0xa08] sm:$0xf]  ;;  %v824_v2 = vld [vmem:[%s6054_s28 + $0xa10] sm:$0xf]  ;;  %821 = vst [vmem:[%s6061_s29 + $0x500] sm:$0xf] %v820_v0 }
  0xec   : > { %823 = vst [vmem:[%s6061_s29 + $0x504] sm:$0xf] %v822_v1  ;;  %825 = vst [vmem:[%s6061_s29 + $0x508] sm:$0xf] %v824_v2  ;;  %v826_v3 = vld [vmem:[%s6054_s28 + $0xa18] sm:$0xf] }
  0xed   : > { %v828_v4 = vld [vmem:[%s6054_s28 + $0xa20] sm:$0xf]  ;;  %v830_v5 = vld [vmem:[%s6054_s28 + $0xa28] sm:$0xf]  ;;  %827 = vst [vmem:[%s6061_s29 + $0x50c] sm:$0xf] %v826_v3 }
  0xee   : > { %829 = vst [vmem:[%s6061_s29 + $0x510] sm:$0xf] %v828_v4  ;;  %831 = vst [vmem:[%s6061_s29 + $0x514] sm:$0xf] %v830_v5  ;;  %v832_v6 = vld [vmem:[%s6054_s28 + $0xa30] sm:$0xf] }
  0xef   : > { %v834_v7 = vld [vmem:[%s6054_s28 + $0xa38] sm:$0xf]  ;;  %v836_v8 = vld [vmem:[%s6054_s28 + $0xa40] sm:$0xf]  ;;  %833 = vst [vmem:[%s6061_s29 + $0x518] sm:$0xf] %v832_v6 }
  0xf0   : > { %835 = vst [vmem:[%s6061_s29 + $0x51c] sm:$0xf] %v834_v7  ;;  %837 = vst [vmem:[%s6061_s29 + $0x520] sm:$0xf] %v836_v8  ;;  %v838_v9 = vld [vmem:[%s6054_s28 + $0xa48] sm:$0xf] }
  0xf1   : > { %v840_v10 = vld [vmem:[%s6054_s28 + $0xa50] sm:$0xf]  ;;  %v842_v11 = vld [vmem:[%s6054_s28 + $0xa58] sm:$0xf]  ;;  %839 = vst [vmem:[%s6061_s29 + $0x524] sm:$0xf] %v838_v9 }
  0xf2   : > { %841 = vst [vmem:[%s6061_s29 + $0x528] sm:$0xf] %v840_v10  ;;  %843 = vst [vmem:[%s6061_s29 + $0x52c] sm:$0xf] %v842_v11  ;;  %v844_v12 = vld [vmem:[%s6054_s28 + $0xa60] sm:$0xf] }
  0xf3   : > { %v846_v13 = vld [vmem:[%s6054_s28 + $0xa68] sm:$0xf]  ;;  %v848_v14 = vld [vmem:[%s6054_s28 + $0xa70] sm:$0xf]  ;;  %845 = vst [vmem:[%s6061_s29 + $0x530] sm:$0xf] %v844_v12 }
  0xf4   : > { %847 = vst [vmem:[%s6061_s29 + $0x534] sm:$0xf] %v846_v13  ;;  %849 = vst [vmem:[%s6061_s29 + $0x538] sm:$0xf] %v848_v14  ;;  %v850_v15 = vld [vmem:[%s6054_s28 + $0xa78] sm:$0xf] }
  0xf5   : > { %v852_v16 = vld [vmem:[%s6054_s28 + $0xa80] sm:$0xf]  ;;  %v854_v17 = vld [vmem:[%s6054_s28 + $0xa88] sm:$0xf]  ;;  %851 = vst [vmem:[%s6061_s29 + $0x53c] sm:$0xf] %v850_v15 }
  0xf6   : > { %853 = vst [vmem:[%s6061_s29 + $0x540] sm:$0xf] %v852_v16  ;;  %855 = vst [vmem:[%s6061_s29 + $0x544] sm:$0xf] %v854_v17  ;;  %v856_v18 = vld [vmem:[%s6054_s28 + $0xa90] sm:$0xf] }
  0xf7   : > { %v858_v19 = vld [vmem:[%s6054_s28 + $0xa98] sm:$0xf]  ;;  %v860_v20 = vld [vmem:[%s6054_s28 + $0xaa0] sm:$0xf]  ;;  %857 = vst [vmem:[%s6061_s29 + $0x548] sm:$0xf] %v856_v18 }
  0xf8   : > { %859 = vst [vmem:[%s6061_s29 + $0x54c] sm:$0xf] %v858_v19  ;;  %861 = vst [vmem:[%s6061_s29 + $0x550] sm:$0xf] %v860_v20  ;;  %v862_v21 = vld [vmem:[%s6054_s28 + $0xaa8] sm:$0xf] }
  0xf9   : > { %v864_v22 = vld [vmem:[%s6054_s28 + $0xab0] sm:$0xf]  ;;  %v866_v23 = vld [vmem:[%s6054_s28 + $0xab8] sm:$0xf]  ;;  %863 = vst [vmem:[%s6061_s29 + $0x554] sm:$0xf] %v862_v21 }
  0xfa   : > { %865 = vst [vmem:[%s6061_s29 + $0x558] sm:$0xf] %v864_v22  ;;  %867 = vst [vmem:[%s6061_s29 + $0x55c] sm:$0xf] %v866_v23  ;;  %v868_v24 = vld [vmem:[%s6054_s28 + $0xac0] sm:$0xf] }
  0xfb   : > { %v870_v25 = vld [vmem:[%s6054_s28 + $0xac8] sm:$0xf]  ;;  %v872_v26 = vld [vmem:[%s6054_s28 + $0xad0] sm:$0xf]  ;;  %869 = vst [vmem:[%s6061_s29 + $0x560] sm:$0xf] %v868_v24 }
  0xfc   : > { %871 = vst [vmem:[%s6061_s29 + $0x564] sm:$0xf] %v870_v25  ;;  %873 = vst [vmem:[%s6061_s29 + $0x568] sm:$0xf] %v872_v26  ;;  %v874_v27 = vld [vmem:[%s6054_s28 + $0xad8] sm:$0xf] }
  0xfd   : > { %v876_v28 = vld [vmem:[%s6054_s28 + $0xae0] sm:$0xf]  ;;  %v878_v29 = vld [vmem:[%s6054_s28 + $0xae8] sm:$0xf]  ;;  %875 = vst [vmem:[%s6061_s29 + $0x56c] sm:$0xf] %v874_v27 }
  0xfe   : > { %877 = vst [vmem:[%s6061_s29 + $0x570] sm:$0xf] %v876_v28  ;;  %879 = vst [vmem:[%s6061_s29 + $0x574] sm:$0xf] %v878_v29  ;;  %v880_v30 = vld [vmem:[%s6054_s28 + $0xaf0] sm:$0xf] }
  0xff   : > { %v882_v31 = vld [vmem:[%s6054_s28 + $0xaf8] sm:$0xf]  ;;  %v884_v32 = vld [vmem:[%s6054_s28 + $0xb00] sm:$0xf]  ;;  %881 = vst [vmem:[%s6061_s29 + $0x578] sm:$0xf] %v880_v30 }
 0x100   : > { %883 = vst [vmem:[%s6061_s29 + $0x57c] sm:$0xf] %v882_v31  ;;  %885 = vst [vmem:[%s6061_s29 + $0x580] sm:$0xf] %v884_v32  ;;  %v886_v33 = vld [vmem:[%s6054_s28 + $0xb08] sm:$0xf] }
 0x101   : > { %v888_v34 = vld [vmem:[%s6054_s28 + $0xb10] sm:$0xf]  ;;  %v890_v35 = vld [vmem:[%s6054_s28 + $0xb18] sm:$0xf]  ;;  %887 = vst [vmem:[%s6061_s29 + $0x584] sm:$0xf] %v886_v33 }
 0x102   : > { %889 = vst [vmem:[%s6061_s29 + $0x588] sm:$0xf] %v888_v34  ;;  %891 = vst [vmem:[%s6061_s29 + $0x58c] sm:$0xf] %v890_v35  ;;  %v892_v36 = vld [vmem:[%s6054_s28 + $0xb20] sm:$0xf] }
 0x103   : > { %v894_v37 = vld [vmem:[%s6054_s28 + $0xb28] sm:$0xf]  ;;  %v896_v38 = vld [vmem:[%s6054_s28 + $0xb30] sm:$0xf]  ;;  %893 = vst [vmem:[%s6061_s29 + $0x590] sm:$0xf] %v892_v36 }
 0x104   : > { %895 = vst [vmem:[%s6061_s29 + $0x594] sm:$0xf] %v894_v37  ;;  %897 = vst [vmem:[%s6061_s29 + $0x598] sm:$0xf] %v896_v38  ;;  %v898_v39 = vld [vmem:[%s6054_s28 + $0xb38] sm:$0xf] }
 0x105   : > { %v900_v40 = vld [vmem:[%s6054_s28 + $0xb40] sm:$0xf]  ;;  %v902_v41 = vld [vmem:[%s6054_s28 + $0xb48] sm:$0xf]  ;;  %899 = vst [vmem:[%s6061_s29 + $0x59c] sm:$0xf] %v898_v39 }
 0x106   : > { %901 = vst [vmem:[%s6061_s29 + $0x5a0] sm:$0xf] %v900_v40  ;;  %903 = vst [vmem:[%s6061_s29 + $0x5a4] sm:$0xf] %v902_v41  ;;  %v904_v42 = vld [vmem:[%s6054_s28 + $0xb50] sm:$0xf] }
 0x107   : > { %v906_v43 = vld [vmem:[%s6054_s28 + $0xb58] sm:$0xf]  ;;  %v908_v44 = vld [vmem:[%s6054_s28 + $0xb60] sm:$0xf]  ;;  %905 = vst [vmem:[%s6061_s29 + $0x5a8] sm:$0xf] %v904_v42 }
 0x108   : > { %907 = vst [vmem:[%s6061_s29 + $0x5ac] sm:$0xf] %v906_v43  ;;  %909 = vst [vmem:[%s6061_s29 + $0x5b0] sm:$0xf] %v908_v44  ;;  %v910_v45 = vld [vmem:[%s6054_s28 + $0xb68] sm:$0xf] }
 0x109   : > { %v912_v46 = vld [vmem:[%s6054_s28 + $0xb70] sm:$0xf]  ;;  %v914_v47 = vld [vmem:[%s6054_s28 + $0xb78] sm:$0xf]  ;;  %911 = vst [vmem:[%s6061_s29 + $0x5b4] sm:$0xf] %v910_v45 }
 0x10a   : > { %913 = vst [vmem:[%s6061_s29 + $0x5b8] sm:$0xf] %v912_v46  ;;  %915 = vst [vmem:[%s6061_s29 + $0x5bc] sm:$0xf] %v914_v47  ;;  %v916_v48 = vld [vmem:[%s6054_s28 + $0xb80] sm:$0xf] }
 0x10b   : > { %v918_v49 = vld [vmem:[%s6054_s28 + $0xb88] sm:$0xf]  ;;  %v920_v50 = vld [vmem:[%s6054_s28 + $0xb90] sm:$0xf]  ;;  %917 = vst [vmem:[%s6061_s29 + $0x5c0] sm:$0xf] %v916_v48 }
 0x10c   : > { %919 = vst [vmem:[%s6061_s29 + $0x5c4] sm:$0xf] %v918_v49  ;;  %921 = vst [vmem:[%s6061_s29 + $0x5c8] sm:$0xf] %v920_v50  ;;  %v922_v51 = vld [vmem:[%s6054_s28 + $0xb98] sm:$0xf] }
 0x10d   : > { %v924_v52 = vld [vmem:[%s6054_s28 + $0xba0] sm:$0xf]  ;;  %v926_v53 = vld [vmem:[%s6054_s28 + $0xba8] sm:$0xf]  ;;  %923 = vst [vmem:[%s6061_s29 + $0x5cc] sm:$0xf] %v922_v51 }
 0x10e   : > { %925 = vst [vmem:[%s6061_s29 + $0x5d0] sm:$0xf] %v924_v52  ;;  %927 = vst [vmem:[%s6061_s29 + $0x5d4] sm:$0xf] %v926_v53  ;;  %v928_v54 = vld [vmem:[%s6054_s28 + $0xbb0] sm:$0xf] }
 0x10f   : > { %v930_v55 = vld [vmem:[%s6054_s28 + $0xbb8] sm:$0xf]  ;;  %v932_v56 = vld [vmem:[%s6054_s28 + $0xbc0] sm:$0xf]  ;;  %929 = vst [vmem:[%s6061_s29 + $0x5d8] sm:$0xf] %v928_v54 }
 0x110   : > { %931 = vst [vmem:[%s6061_s29 + $0x5dc] sm:$0xf] %v930_v55  ;;  %933 = vst [vmem:[%s6061_s29 + $0x5e0] sm:$0xf] %v932_v56  ;;  %v934_v57 = vld [vmem:[%s6054_s28 + $0xbc8] sm:$0xf] }
 0x111   : > { %v936_v58 = vld [vmem:[%s6054_s28 + $0xbd0] sm:$0xf]  ;;  %v938_v59 = vld [vmem:[%s6054_s28 + $0xbd8] sm:$0xf]  ;;  %935 = vst [vmem:[%s6061_s29 + $0x5e4] sm:$0xf] %v934_v57 }
 0x112   : > { %937 = vst [vmem:[%s6061_s29 + $0x5e8] sm:$0xf] %v936_v58  ;;  %939 = vst [vmem:[%s6061_s29 + $0x5ec] sm:$0xf] %v938_v59  ;;  %v940_v60 = vld [vmem:[%s6054_s28 + $0xbe0] sm:$0xf] }
 0x113   : > { %v942_v61 = vld [vmem:[%s6054_s28 + $0xbe8] sm:$0xf]  ;;  %v944_v62 = vld [vmem:[%s6054_s28 + $0xbf0] sm:$0xf]  ;;  %941 = vst [vmem:[%s6061_s29 + $0x5f0] sm:$0xf] %v940_v60 }
 0x114   : > { %943 = vst [vmem:[%s6061_s29 + $0x5f4] sm:$0xf] %v942_v61  ;;  %945 = vst [vmem:[%s6061_s29 + $0x5f8] sm:$0xf] %v944_v62  ;;  %v946_v63 = vld [vmem:[%s6054_s28 + $0xbf8] sm:$0xf] }
 0x115   : > { %v948_v0 = vld [vmem:[%s6054_s28 + $0xc00] sm:$0xf]  ;;  %v950_v1 = vld [vmem:[%s6054_s28 + $0xc08] sm:$0xf]  ;;  %947 = vst [vmem:[%s6061_s29 + $0x5fc] sm:$0xf] %v946_v63 }
 0x116   : > { %949 = vst [vmem:[%s6061_s29 + $0x600] sm:$0xf] %v948_v0  ;;  %951 = vst [vmem:[%s6061_s29 + $0x604] sm:$0xf] %v950_v1  ;;  %v952_v2 = vld [vmem:[%s6054_s28 + $0xc10] sm:$0xf] }
 0x117   : > { %v954_v3 = vld [vmem:[%s6054_s28 + $0xc18] sm:$0xf]  ;;  %v956_v4 = vld [vmem:[%s6054_s28 + $0xc20] sm:$0xf]  ;;  %953 = vst [vmem:[%s6061_s29 + $0x608] sm:$0xf] %v952_v2 }
 0x118   : > { %955 = vst [vmem:[%s6061_s29 + $0x60c] sm:$0xf] %v954_v3  ;;  %957 = vst [vmem:[%s6061_s29 + $0x610] sm:$0xf] %v956_v4  ;;  %v958_v5 = vld [vmem:[%s6054_s28 + $0xc28] sm:$0xf] }
 0x119   : > { %v960_v6 = vld [vmem:[%s6054_s28 + $0xc30] sm:$0xf]  ;;  %v962_v7 = vld [vmem:[%s6054_s28 + $0xc38] sm:$0xf]  ;;  %959 = vst [vmem:[%s6061_s29 + $0x614] sm:$0xf] %v958_v5 }
 0x11a   : > { %961 = vst [vmem:[%s6061_s29 + $0x618] sm:$0xf] %v960_v6  ;;  %963 = vst [vmem:[%s6061_s29 + $0x61c] sm:$0xf] %v962_v7  ;;  %v964_v8 = vld [vmem:[%s6054_s28 + $0xc40] sm:$0xf] }
 0x11b   : > { %v966_v9 = vld [vmem:[%s6054_s28 + $0xc48] sm:$0xf]  ;;  %v968_v10 = vld [vmem:[%s6054_s28 + $0xc50] sm:$0xf]  ;;  %965 = vst [vmem:[%s6061_s29 + $0x620] sm:$0xf] %v964_v8 }
 0x11c   : > { %967 = vst [vmem:[%s6061_s29 + $0x624] sm:$0xf] %v966_v9  ;;  %969 = vst [vmem:[%s6061_s29 + $0x628] sm:$0xf] %v968_v10  ;;  %v970_v11 = vld [vmem:[%s6054_s28 + $0xc58] sm:$0xf] }
 0x11d   : > { %v972_v12 = vld [vmem:[%s6054_s28 + $0xc60] sm:$0xf]  ;;  %v974_v13 = vld [vmem:[%s6054_s28 + $0xc68] sm:$0xf]  ;;  %971 = vst [vmem:[%s6061_s29 + $0x62c] sm:$0xf] %v970_v11 }
 0x11e   : > { %973 = vst [vmem:[%s6061_s29 + $0x630] sm:$0xf] %v972_v12  ;;  %975 = vst [vmem:[%s6061_s29 + $0x634] sm:$0xf] %v974_v13  ;;  %v976_v14 = vld [vmem:[%s6054_s28 + $0xc70] sm:$0xf] }
 0x11f   : > { %v978_v15 = vld [vmem:[%s6054_s28 + $0xc78] sm:$0xf]  ;;  %v980_v16 = vld [vmem:[%s6054_s28 + $0xc80] sm:$0xf]  ;;  %977 = vst [vmem:[%s6061_s29 + $0x638] sm:$0xf] %v976_v14 }
 0x120   : > { %979 = vst [vmem:[%s6061_s29 + $0x63c] sm:$0xf] %v978_v15  ;;  %981 = vst [vmem:[%s6061_s29 + $0x640] sm:$0xf] %v980_v16  ;;  %v982_v17 = vld [vmem:[%s6054_s28 + $0xc88] sm:$0xf] }
 0x121   : > { %v984_v18 = vld [vmem:[%s6054_s28 + $0xc90] sm:$0xf]  ;;  %v986_v19 = vld [vmem:[%s6054_s28 + $0xc98] sm:$0xf]  ;;  %983 = vst [vmem:[%s6061_s29 + $0x644] sm:$0xf] %v982_v17 }
 0x122   : > { %985 = vst [vmem:[%s6061_s29 + $0x648] sm:$0xf] %v984_v18  ;;  %987 = vst [vmem:[%s6061_s29 + $0x64c] sm:$0xf] %v986_v19  ;;  %v988_v20 = vld [vmem:[%s6054_s28 + $0xca0] sm:$0xf] }
 0x123   : > { %v990_v21 = vld [vmem:[%s6054_s28 + $0xca8] sm:$0xf]  ;;  %v992_v22 = vld [vmem:[%s6054_s28 + $0xcb0] sm:$0xf]  ;;  %989 = vst [vmem:[%s6061_s29 + $0x650] sm:$0xf] %v988_v20 }
 0x124   : > { %991 = vst [vmem:[%s6061_s29 + $0x654] sm:$0xf] %v990_v21  ;;  %993 = vst [vmem:[%s6061_s29 + $0x658] sm:$0xf] %v992_v22  ;;  %v994_v23 = vld [vmem:[%s6054_s28 + $0xcb8] sm:$0xf] }
 0x125   : > { %v996_v24 = vld [vmem:[%s6054_s28 + $0xcc0] sm:$0xf]  ;;  %v998_v25 = vld [vmem:[%s6054_s28 + $0xcc8] sm:$0xf]  ;;  %995 = vst [vmem:[%s6061_s29 + $0x65c] sm:$0xf] %v994_v23 }
 0x126   : > { %997 = vst [vmem:[%s6061_s29 + $0x660] sm:$0xf] %v996_v24  ;;  %999 = vst [vmem:[%s6061_s29 + $0x664] sm:$0xf] %v998_v25  ;;  %v1000_v26 = vld [vmem:[%s6054_s28 + $0xcd0] sm:$0xf] }
 0x127   : > { %v1002_v27 = vld [vmem:[%s6054_s28 + $0xcd8] sm:$0xf]  ;;  %v1004_v28 = vld [vmem:[%s6054_s28 + $0xce0] sm:$0xf]  ;;  %1001 = vst [vmem:[%s6061_s29 + $0x668] sm:$0xf] %v1000_v26 }
 0x128   : > { %1003 = vst [vmem:[%s6061_s29 + $0x66c] sm:$0xf] %v1002_v27  ;;  %1005 = vst [vmem:[%s6061_s29 + $0x670] sm:$0xf] %v1004_v28  ;;  %v1006_v29 = vld [vmem:[%s6054_s28 + $0xce8] sm:$0xf] }
 0x129   : > { %v1008_v30 = vld [vmem:[%s6054_s28 + $0xcf0] sm:$0xf]  ;;  %v1010_v31 = vld [vmem:[%s6054_s28 + $0xcf8] sm:$0xf]  ;;  %1007 = vst [vmem:[%s6061_s29 + $0x674] sm:$0xf] %v1006_v29 }
 0x12a   : > { %1009 = vst [vmem:[%s6061_s29 + $0x678] sm:$0xf] %v1008_v30  ;;  %1011 = vst [vmem:[%s6061_s29 + $0x67c] sm:$0xf] %v1010_v31  ;;  %v1012_v32 = vld [vmem:[%s6054_s28 + $0xd00] sm:$0xf] }
 0x12b   : > { %v1014_v33 = vld [vmem:[%s6054_s28 + $0xd08] sm:$0xf]  ;;  %v1016_v34 = vld [vmem:[%s6054_s28 + $0xd10] sm:$0xf]  ;;  %1013 = vst [vmem:[%s6061_s29 + $0x680] sm:$0xf] %v1012_v32 }
 0x12c   : > { %1015 = vst [vmem:[%s6061_s29 + $0x684] sm:$0xf] %v1014_v33  ;;  %1017 = vst [vmem:[%s6061_s29 + $0x688] sm:$0xf] %v1016_v34  ;;  %v1018_v35 = vld [vmem:[%s6054_s28 + $0xd18] sm:$0xf] }
 0x12d   : > { %v1020_v36 = vld [vmem:[%s6054_s28 + $0xd20] sm:$0xf]  ;;  %v1022_v37 = vld [vmem:[%s6054_s28 + $0xd28] sm:$0xf]  ;;  %1019 = vst [vmem:[%s6061_s29 + $0x68c] sm:$0xf] %v1018_v35 }
 0x12e   : > { %1021 = vst [vmem:[%s6061_s29 + $0x690] sm:$0xf] %v1020_v36  ;;  %1023 = vst [vmem:[%s6061_s29 + $0x694] sm:$0xf] %v1022_v37  ;;  %v1024_v38 = vld [vmem:[%s6054_s28 + $0xd30] sm:$0xf] }
 0x12f   : > { %v1026_v39 = vld [vmem:[%s6054_s28 + $0xd38] sm:$0xf]  ;;  %v1028_v40 = vld [vmem:[%s6054_s28 + $0xd40] sm:$0xf]  ;;  %1025 = vst [vmem:[%s6061_s29 + $0x698] sm:$0xf] %v1024_v38 }
 0x130   : > { %1027 = vst [vmem:[%s6061_s29 + $0x69c] sm:$0xf] %v1026_v39  ;;  %1029 = vst [vmem:[%s6061_s29 + $0x6a0] sm:$0xf] %v1028_v40  ;;  %v1030_v41 = vld [vmem:[%s6054_s28 + $0xd48] sm:$0xf] }
 0x131   : > { %v1032_v42 = vld [vmem:[%s6054_s28 + $0xd50] sm:$0xf]  ;;  %v1034_v43 = vld [vmem:[%s6054_s28 + $0xd58] sm:$0xf]  ;;  %1031 = vst [vmem:[%s6061_s29 + $0x6a4] sm:$0xf] %v1030_v41 }
 0x132   : > { %1033 = vst [vmem:[%s6061_s29 + $0x6a8] sm:$0xf] %v1032_v42  ;;  %1035 = vst [vmem:[%s6061_s29 + $0x6ac] sm:$0xf] %v1034_v43  ;;  %v1036_v44 = vld [vmem:[%s6054_s28 + $0xd60] sm:$0xf] }
 0x133   : > { %v1038_v45 = vld [vmem:[%s6054_s28 + $0xd68] sm:$0xf]  ;;  %v1040_v46 = vld [vmem:[%s6054_s28 + $0xd70] sm:$0xf]  ;;  %1037 = vst [vmem:[%s6061_s29 + $0x6b0] sm:$0xf] %v1036_v44 }
 0x134   : > { %1039 = vst [vmem:[%s6061_s29 + $0x6b4] sm:$0xf] %v1038_v45  ;;  %1041 = vst [vmem:[%s6061_s29 + $0x6b8] sm:$0xf] %v1040_v46  ;;  %v1042_v47 = vld [vmem:[%s6054_s28 + $0xd78] sm:$0xf] }
 0x135   : > { %1043 = vst [vmem:[%s6061_s29 + $0x6bc] sm:$0xf] %v1042_v47 }
 0x136 PF: > { %p4918_p8 = scmp.ge.s32.totalorder %s5984_s16, 1  ;;  %p1935_p9 = scmp.lt.s32.totalorder %s5984_s16, 3 }
 0x138   : > { %p1936_p10 = pnand %p4918_p8, %p1935_p9 }
 0x139   : > { %s1942_s30 = sand.u32 (!%p1936_p10), 1, %s5968_s12   ;;  %v5683_v48 = vld [vmem:[%s7335_s0 + $0x4] ss:$108 sps:$4 sm:$0xff] (!%p1936_p10)   ;;  %v5688_v49 = vld [vmem:[%s7335_s0 + $0xc] ss:$108 sps:$4 sm:$0xff] (!%p1936_p10)   ;;  %p1980_p11 = scmp.lt.s32.totalorder (!%p1936_p10), %s5976_s14, 1 }
 0x13a   : > { %1939 = sbr.rel (%p1936_p10) target bundleno = 785 (0x311), region = 69  ;;  %4080 = vmatprep.mubr.bf16.mxu0 (!%p1936_p10), %v5683_v48  ;;  %4129 = vmatprep.mubr.bf16.mxu1 (!%p1936_p10), %v5688_v49  ;;  %v5681_v15 = vld [vmem:[%s7335_s0] ss:$108 sps:$4 sm:$0xff] (!%p1936_p10)   ;;  %v5709_v17 = vld [vmem:[%s7335_s0 + $0xdc] ss:$108 sps:$4 sm:$0xff] (!%p1936_p10)   ;;  %s4919_s23 = sshll.u32 (!%p1936_p10), %s1942_s30, 4 }
 0x13b   : > { %s5609_s4 = smul.u32 (!%p1936_p10), 1728, %s1942_s30  ;;  %v5686_v19 = vld [vmem:[%s7335_s0 + $0x8] ss:$108 sps:$4 sm:$0xff] (!%p1936_p10)   ;;  %v5712_v26 = vld [vmem:[%s7335_s0 + $0xd8] ss:$108 sps:$4 sm:$0xff] (!%p1936_p10)   ;;  %s1972_s24 = scalar_lea.vmem (!%p1936_p10), [#allocation3], %s4919_s23 }
 0x13c   : > { %v5714_v45 = vld [vmem:[%s7335_s0 + $0xe4] ss:$108 sps:$4 sm:$0xff] (!%p1936_p10)   ;;  %v5717_v47 = vld [vmem:[%s7335_s0 + $0xe0] ss:$108 sps:$4 sm:$0xff] (!%p1936_p10)  }
 0x13d   : > { %s6933_s9 = scalar_lea.vmem (!%p1936_p10), [#allocation2], %s5609_s4 }
 0x13e   : > { %v5650_v50 = vld [vmem:[%s6933_s9 + $0x40] sm:$0xff] (!%p1936_p10)   ;;  %v5654_v54 = vld [vmem:[%s6933_s9 + $0x48] sm:$0xff] (!%p1936_p10)   ;;  %v5658_v58 = vld [vmem:[%s6933_s9 + $0x50] sm:$0xff] (!%p1936_p10)  }
 0x13f   : > { %v5651_v51 = vld [vmem:[%s6933_s9] sm:$0xff] (!%p1936_p10)   ;;  %5214 = vmatprep.subr.bf16.mxu0 (!%p1936_p10), %v5650_v50  ;;  %v5655_v55 = vld [vmem:[%s6933_s9 + $0x8] sm:$0xff] (!%p1936_p10)   ;;  %v5659_v59 = vld [vmem:[%s6933_s9 + $0x10] sm:$0xff] (!%p1936_p10)  }
 0x140   : > { %v5652_v52 = vld [vmem:[%s6933_s9 + $0xc0] sm:$0xff] (!%p1936_p10)   ;;  %5215 = vmatpush3.bf16.msra.mxu0 (!%p1936_p10), %v5651_v51  ;;  %v5656_v56 = vld [vmem:[%s6933_s9 + $0xc8] sm:$0xff] (!%p1936_p10)   ;;  %v5660_v60 = vld [vmem:[%s6933_s9 + $0xd0] sm:$0xff] (!%p1936_p10)  }
 0x141   : > { %v5653_v53 = vld [vmem:[%s6933_s9 + $0x80] sm:$0xff]   ;;  %5242 = vmatprep.subr.bf16.mxu1 %v5652_v52  ;;  %5216 = vmatprep.subr.bf16.mxu0 %v5654_v54  ;;  %v5657_v57 = vld [vmem:[%s6933_s9 + $0x88] sm:$0xff]   ;;  %v5661_v61 = vld [vmem:[%s6933_s9 + $0x90] sm:$0xff]   ;;  %s1981_s25 = scalar_select %p1980_p11, %s5976_s14, 1 }
 0x142   : > { %5243 = vmatpush3.bf16.msra.mxu1 %v5653_v53  ;;  %v5662_v62 = vld [vmem:[%s6933_s9 + $0x58] sm:$0xff]   ;;  %v5666_v2 = vld [vmem:[%s6933_s9 + $0x60] sm:$0xff]   ;;  %v5670_v6 = vld [vmem:[%s6933_s9 + $0x68] sm:$0xff]   ;;  %s5196_s12 = sshll.u32 (%p6041_p6), %s5976_s14, 2 }
 0x143   : > { %5244 = vmatprep.subr.bf16.mxu1 %v5656_v56  ;;  %v5663_v63 = vld [vmem:[%s6933_s9 + $0x18] sm:$0xff]   ;;  %v5667_v3 = vld [vmem:[%s6933_s9 + $0x20] sm:$0xff]   ;;  %v5671_v7 = vld [vmem:[%s6933_s9 + $0x28] sm:$0xff]   ;;  %s1982_s4 = scalar_lea.vmem %s7337_s2, %s1981_s25  ;;  %s4769_s26 = scalar_lea.vmem (%p6041_p6), %s7338_s3, %s5196_s12 }
 0x144   : > { %5217 = vmatpush3.bf16.msra.mxu0 %v5655_v55  ;;  %v5664_v0 = vld [vmem:[%s6933_s9 + $0xd8] sm:$0xff]   ;;  %v5668_v4 = vld [vmem:[%s6933_s9 + $0xe0] sm:$0xff]   ;;  %v5672_v8 = vld [vmem:[%s6933_s9 + $0xe8] sm:$0xff]  }
 0x145   : > { %5218 = vmatprep.subr.bf16.mxu0 %v5658_v58  ;;  %v5665_v1 = vld [vmem:[%s6933_s9 + $0x98] sm:$0xff]   ;;  %v5669_v5 = vld [vmem:[%s6933_s9 + $0xa0] sm:$0xff]   ;;  %v5673_v9 = vld [vmem:[%s6933_s9 + $0xa8] sm:$0xff]  }
 0x146   : > { %5245 = vmatpush3.bf16.msra.mxu1 %v5657_v57  ;;  %v5674_v10 = vld [vmem:[%s6933_s9 + $0x70] sm:$0xff]   ;;  %v5678_v14 = vld [vmem:[%s6933_s9 + $0x78] sm:$0xff]   ;;  %v5685_v21 = vld [vmem:[%s6933_s9 + $0x140] sm:$0xff]  }
 0x147   : > { %5246 = vmatprep.subr.bf16.mxu1 %v5660_v60  ;;  %v5675_v11 = vld [vmem:[%s6933_s9 + $0x30] sm:$0xff]   ;;  %v5679_v16 = vld [vmem:[%s6933_s9 + $0x38] sm:$0xff]   ;;  %v5689_v22 = vld [vmem:[%s6933_s9 + $0x100] sm:$0xff]  }
 0x148   : > { %5219 = vmatpush3.bf16.msra.mxu0 %v5659_v59  ;;  %v5676_v12 = vld [vmem:[%s6933_s9 + $0xf0] sm:$0xff]   ;;  %v5680_v18 = vld [vmem:[%s6933_s9 + $0xf8] sm:$0xff]   ;;  %v5690_v23 = vld [vmem:[%s6933_s9 + $0x1c0] sm:$0xff]  }
 0x149   : > { %5220 = vmatprep.subr.bf16.mxu0 %v5662_v62  ;;  %v5677_v13 = vld [vmem:[%s6933_s9 + $0xb0] sm:$0xff]   ;;  %v5684_v20 = vld [vmem:[%s6933_s9 + $0xb8] sm:$0xff]   ;;  %v5691_v24 = vld [vmem:[%s6933_s9 + $0x180] sm:$0xff]  }
 0x14a   : > { %5247 = vmatpush3.bf16.msra.mxu1 %v5661_v61  ;;  %v5692_v25 = vld [vmem:[%s6933_s9 + $0x148] sm:$0xff]   ;;  %v5696_v30 = vld [vmem:[%s6933_s9 + $0x150] sm:$0xff]   ;;  %v5700_v34 = vld [vmem:[%s6933_s9 + $0x158] sm:$0xff]  }
 0x14b   : > { %5248 = vmatprep.subr.bf16.mxu1 %v5664_v0  ;;  %v5693_v27 = vld [vmem:[%s6933_s9 + $0x108] sm:$0xff]   ;;  %v5697_v31 = vld [vmem:[%s6933_s9 + $0x110] sm:$0xff]   ;;  %v5701_v35 = vld [vmem:[%s6933_s9 + $0x118] sm:$0xff]  }
 0x14c   : > { %5221 = vmatpush3.bf16.msra.mxu0 %v5663_v63  ;;  %v5694_v28 = vld [vmem:[%s6933_s9 + $0x1c8] sm:$0xff]   ;;  %v5698_v32 = vld [vmem:[%s6933_s9 + $0x1d0] sm:$0xff]   ;;  %v5702_v36 = vld [vmem:[%s6933_s9 + $0x1d8] sm:$0xff]  }
 0x14d   : > { %5222 = vmatprep.subr.bf16.mxu0 %v5666_v2  ;;  %v5695_v29 = vld [vmem:[%s6933_s9 + $0x188] sm:$0xff]   ;;  %v5699_v33 = vld [vmem:[%s6933_s9 + $0x190] sm:$0xff]   ;;  %v5703_v37 = vld [vmem:[%s6933_s9 + $0x198] sm:$0xff]  }
 0x14e   : > { %5249 = vmatpush3.bf16.msra.mxu1 %v5665_v1  ;;  %v5704_v38 = vld [vmem:[%s6933_s9 + $0x160] sm:$0xff]   ;;  %v5708_v42 = vld [vmem:[%s6933_s9 + $0x168] sm:$0xff]   ;;  %v5718_v48 = vld [vmem:[%s6933_s9 + $0x170] sm:$0xff]  }
 0x14f   : > { %5250 = vmatprep.subr.bf16.mxu1 %v5668_v4  ;;  %v5705_v39 = vld [vmem:[%s6933_s9 + $0x120] sm:$0xff]   ;;  %v5711_v43 = vld [vmem:[%s6933_s9 + $0x128] sm:$0xff]   ;;  %v5719_v49 = vld [vmem:[%s6933_s9 + $0x130] sm:$0xff]  }
 0x150   : > { %5223 = vmatpush3.bf16.msra.mxu0 %v5667_v3  ;;  %v5706_v40 = vld [vmem:[%s6933_s9 + $0x1e0] sm:$0xff]   ;;  %v5713_v44 = vld [vmem:[%s6933_s9 + $0x1e8] sm:$0xff]   ;;  %v5720_v50 = vld [vmem:[%s6933_s9 + $0x1f0] sm:$0xff]  }
 0x151   : > { %5224 = vmatprep.subr.bf16.mxu0 %v5670_v6  ;;  %v5707_v41 = vld [vmem:[%s6933_s9 + $0x1a0] sm:$0xff]   ;;  %v5716_v46 = vld [vmem:[%s6933_s9 + $0x1a8] sm:$0xff]   ;;  %v5721_v51 = vld [vmem:[%s6933_s9 + $0x1b0] sm:$0xff]  }
 0x152   : > { %5251 = vmatpush3.bf16.msra.mxu1 %v5669_v5  ;;  %v5722_v52 = vld [vmem:[%s6933_s9 + $0x178] sm:$0xff]   ;;  %v5727_v56 = vld [vmem:[%s7335_s0 + $0x14] ss:$108 sps:$4 sm:$0xff]   ;;  %v5736_v0 = vld [vmem:[%s6933_s9 + $0x248] sm:$0xff]  }
 0x153   : > { %5252 = vmatprep.subr.bf16.mxu1 %v5672_v8  ;;  %v5723_v53 = vld [vmem:[%s6933_s9 + $0x138] sm:$0xff]   ;;  %v5729_v58 = vld [vmem:[%s6933_s9 + $0x240] sm:$0xff]   ;;  %v5737_v1 = vld [vmem:[%s6933_s9 + $0x208] sm:$0xff]  }
 0x154   : > { %5225 = vmatpush3.bf16.msra.mxu0 %v5671_v7  ;;  %v5724_v54 = vld [vmem:[%s6933_s9 + $0x1f8] sm:$0xff]   ;;  %v5733_v61 = vld [vmem:[%s6933_s9 + $0x200] sm:$0xff]   ;;  %v5738_v2 = vld [vmem:[%s6933_s9 + $0x2c8] sm:$0xff]  }
 0x155   : > { %5226 = vmatprep.subr.bf16.mxu0 %v5674_v10  ;;  %v5725_v55 = vld [vmem:[%s7335_s0 + $0x10] ss:$108 sps:$4 sm:$0xff]   ;;  %v5730_v59 = vld [vmem:[%s7335_s0 + $0x18] ss:$108 sps:$4 sm:$0xff]   ;;  %v5741_v4 = vld [vmem:[%s6933_s9 + $0x288] sm:$0xff]  }
 0x156   : > { %5253 = vmatpush3.bf16.msra.mxu1 %v5673_v9  ;;  %v5728_v57 = vld [vmem:[%s6933_s9 + $0x1b8] sm:$0xff]   ;;  %v5734_v62 = vld [vmem:[%s6933_s9 + $0x2c0] sm:$0xff]   ;;  %v5742_v5 = vld [vmem:[%s7335_s0 + $0xe8] ss:$108 sps:$4 sm:$0xff]  }
 0x157   : > { %5254 = vmatprep.subr.bf16.mxu1 %v5676_v12  ;;  %v5732_v60 = vld [vmem:[%s7335_s0 + $0x1c] ss:$108 sps:$4 sm:$0xff]   ;;  %v5735_v63 = vld [vmem:[%s6933_s9 + $0x280] sm:$0xff]   ;;  %v5739_v3 = vld [vmem:[%s7335_s0 + $0xec] ss:$108 sps:$4 sm:$0xff]  }
 0x158   : > { %5227 = vmatpush3.bf16.msra.mxu0 %v5675_v11  ;;  %v5743_v6 = vld [vmem:[%s6933_s9 + $0x250] sm:$0xff]   ;;  %v5750_v12 = vld [vmem:[%s6933_s9 + $0x258] sm:$0xff]  }
 0x159   : > { %5228 = vmatprep.subr.bf16.mxu0 %v5678_v14  ;;  %v5744_v7 = vld [vmem:[%s7335_s0 + $0xf4] ss:$108 sps:$4 sm:$0xff]   ;;  %v5747_v9 = vld [vmem:[%s7335_s0 + $0xf0] ss:$108 sps:$4 sm:$0xff]  }
 0x15a   : > { %5255 = vmatpush3.bf16.msra.mxu1 %v5677_v13  ;;  %v5746_v8 = vld [vmem:[%s6933_s9 + $0x210] sm:$0xff]   ;;  %v5751_v13 = vld [vmem:[%s6933_s9 + $0x218] sm:$0xff]  }
 0x15b   : > { %5256 = vmatprep.subr.bf16.mxu1 %v5680_v18  ;;  %v5748_v10 = vld [vmem:[%s6933_s9 + $0x2d0] sm:$0xff]   ;;  %v5752_v14 = vld [vmem:[%s6933_s9 + $0x2d8] sm:$0xff]   ;;  %v5756_v18 = vld [vmem:[%s6933_s9 + $0x2e0] sm:$0xff]  }
 0x15c   : > { %5229 = vmatpush3.bf16.msra.mxu0 %v5679_v16  ;;  %v5749_v11 = vld [vmem:[%s6933_s9 + $0x290] sm:$0xff]   ;;  %v5754_v16 = vld [vmem:[%s6933_s9 + $0x260] sm:$0xff]  }
 0x15d   : > { %5270 = vmatprep.subr.bf16.mxu0 %v5685_v21  ;;  %v5759_v21 = vld [vmem:[%s6933_s9 + $0x228] sm:$0xff]  }
 0x15e   : > { %5257 = vmatpush3.bf16.msra.mxu1 %v5684_v20  ;;  %v5758_v20 = vld [vmem:[%s6933_s9 + $0x268] sm:$0xff]  }
 0x15f   : > { %4081 = vmatmul.mubr.bf16.vlgmr.msra.gmra.mrb[0].mxu0 %v5681_v15  ;;  %5298 = vmatprep.subr.bf16.mxu1 %v5690_v23  ;;  %v5753_v15 = vld [vmem:[%s6933_s9 + $0x298] sm:$0xff]   ;;  %v5761_v23 = vld [vmem:[%s6933_s9 + $0x2a8] sm:$0xff]  }
 0x160   : > { %5271 = vmatpush3.bf16.msra.mxu0 %v5689_v22  ;;  %4088 = vmatprep.mubr.bf16.mxu0 %v5709_v17  ;;  %v5755_v17 = vld [vmem:[%s6933_s9 + $0x220] sm:$0xff]   ;;  %v5760_v22 = vld [vmem:[%s6933_s9 + $0x2e8] sm:$0xff]  }
 0x161   : > { %4130 = vmatmul.mubr.bf16.vlgmr.msra.gmra.mrb[0].mxu1 %v5686_v19  ;;  %5272 = vmatprep.subr.bf16.mxu0 %v5692_v25  ;;  %v5757_v19 = vld [vmem:[%s6933_s9 + $0x2a0] sm:$0xff]   ;;  %v5763_v25 = vld [vmem:[%s6933_s9 + $0x230] sm:$0xff]  }
 0x162   : > { %5299 = vmatpush3.bf16.msra.mxu1 %v5691_v24  ;;  %4137 = vmatprep.mubr.bf16.mxu1 %v5714_v45  ;;  %v5762_v24 = vld [vmem:[%s6933_s9 + $0x270] sm:$0xff]   ;;  %v5786_v45 = vld [vmem:[%s7335_s0 + $0xf8] ss:$108 sps:$4 sm:$0xff]  }
 0x163   : > { %5300 = vmatprep.subr.bf16.mxu1 %v5694_v28  ;;  %v5766_v28 = vld [vmem:[%s6933_s9 + $0x278] sm:$0xff]  }
 0x164   : > { %5273 = vmatpush3.bf16.msra.mxu0 %v5693_v27  ;;  %v5765_v27 = vld [vmem:[%s6933_s9 + $0x2b0] sm:$0xff]  }
 0x165   : > { %5274 = vmatprep.subr.bf16.mxu0 %v5696_v30  ;;  %v5768_v30 = vld [vmem:[%s6933_s9 + $0x2f8] sm:$0xff]  }
 0x166   : > { %5301 = vmatpush3.bf16.msra.mxu1 %v5695_v29  ;;  %v5767_v29 = vld [vmem:[%s6933_s9 + $0x238] sm:$0xff]  }
 0x167   : > { %4089 = vmatmul.mubr.bf16.gmra.mrb[4].mxu0 %v5712_v26  ;;  %5302 = vmatprep.subr.bf16.mxu1 %v5698_v32  ;;  %v5764_v26 = vld [vmem:[%s6933_s9 + $0x2f0] sm:$0xff]  }
 0x168   : > { %5275 = vmatpush3.bf16.msra.mxu0 %v5697_v31  ;;  %4178 = vmatprep.mubr.bf16.mxu0 %v5727_v56  ;;  %v5769_v31 = vld [vmem:[%s7335_s0 + $0x20] ss:$108 sps:$4 sm:$0xff]   ;;  %v5771_v32 = vld [vmem:[%s7335_s0 + $0x24] ss:$108 sps:$4 sm:$0xff]  }
 0x169   : > { %5276 = vmatprep.subr.bf16.mxu0 %v5700_v34  ;;  %4138 = vmatmul.mubr.bf16.gmra.mrb[4].mxu1 %v5717_v47  ;;  %v5773_v34 = vld [vmem:[%s6933_s9 + $0x340] sm:$0xff]  }
 0x16a   : > { %5303 = vmatpush3.bf16.msra.mxu1 %v5699_v33  ;;  %4227 = vmatprep.mubr.bf16.mxu1 %v5732_v60  ;;  %v5772_v33 = vld [vmem:[%s6933_s9 + $0x2b8] sm:$0xff]   ;;  %v5788_v47 = vld [vmem:[%s7335_s0 + $0x104] ss:$108 sps:$4 sm:$0xff]   ;;  %v5802_v60 = vld [vmem:[%s6933_s9 + $0x368] sm:$0xff]  }
 0x16b   : > { %5304 = vmatprep.subr.bf16.mxu1 %v5702_v36  ;;  %v5776_v36 = vld [vmem:[%s7335_s0 + $0x2c] ss:$108 sps:$4 sm:$0xff]   ;;  %v5798_v56 = vld [vmem:[%s6933_s9 + $0x360] sm:$0xff]  }
 0x16c   : > { %5277 = vmatpush3.bf16.msra.mxu0 %v5701_v35  ;;  %v5774_v35 = vld [vmem:[%s7335_s0 + $0x28] ss:$108 sps:$4 sm:$0xff]  }
 0x16d   : > { %5278 = vmatprep.subr.bf16.mxu0 %v5704_v38  ;;  %v5778_v38 = vld [vmem:[%s6933_s9 + $0x3c0] sm:$0xff]  }
 0x16e   : > { %5305 = vmatpush3.bf16.msra.mxu1 %v5703_v37  ;;  %v5777_v37 = vld [vmem:[%s6933_s9 + $0x300] sm:$0xff]  }
 0x16f   : > { %5306 = vmatprep.subr.bf16.mxu1 %v5706_v40  ;;  %v5780_v40 = vld [vmem:[%s6933_s9 + $0x348] sm:$0xff]  }
 0x170   : > { %5279 = vmatpush3.bf16.msra.mxu0 %v5705_v39  ;;  %v5779_v39 = vld [vmem:[%s6933_s9 + $0x380] sm:$0xff]  }
 0x171   : > { %5280 = vmatprep.subr.bf16.mxu0 %v5708_v42  ;;  %v5782_v42 = vld [vmem:[%s6933_s9 + $0x3c8] sm:$0xff]  }
 0x172   : > { %5307 = vmatpush3.bf16.msra.mxu1 %v5707_v41  ;;  %v5781_v41 = vld [vmem:[%s6933_s9 + $0x308] sm:$0xff]  }
 0x173   : > { %5308 = vmatprep.subr.bf16.mxu1 %v5713_v44  ;;  %v5785_v44 = vld [vmem:[%s6933_s9 + $0x388] sm:$0xff]  }
 0x174   : > { %5281 = vmatpush3.bf16.msra.mxu0 %v5711_v43  ;;  %v5783_v43 = vld [vmem:[%s7335_s0 + $0xfc] ss:$108 sps:$4 sm:$0xff]  }
 0x175   : > { %5282 = vmatprep.subr.bf16.mxu0 %v5718_v48  ;;  %v5790_v48 = vld [vmem:[%s6933_s9 + $0x310] sm:$0xff]  }
 0x176   : > { %5309 = vmatpush3.bf16.msra.mxu1 %v5716_v46  ;;  %v5787_v46 = vld [vmem:[%s6933_s9 + $0x350] sm:$0xff]  }
 0x177   : > { %5310 = vmatprep.subr.bf16.mxu1 %v5720_v50  ;;  %v5792_v50 = vld [vmem:[%s6933_s9 + $0x3d0] sm:$0xff]  }
 0x178   : > { %5283 = vmatpush3.bf16.msra.mxu0 %v5719_v49  ;;  %v5791_v49 = vld [vmem:[%s7335_s0 + $0x100] ss:$108 sps:$4 sm:$0xff]  }
 0x179   : > { %5284 = vmatprep.subr.bf16.mxu0 %v5722_v52  ;;  %v5794_v52 = vld [vmem:[%s6933_s9 + $0x358] sm:$0xff]  }
 0x17a   : > { %5311 = vmatpush3.bf16.msra.mxu1 %v5721_v51  ;;  %v5793_v51 = vld [vmem:[%s6933_s9 + $0x390] sm:$0xff]  }
 0x17b   : > { %5312 = vmatprep.subr.bf16.mxu1 %v5724_v54  ;;  %v5796_v54 = vld [vmem:[%s6933_s9 + $0x3d8] sm:$0xff]  }
 0x17c   : > { %5285 = vmatpush3.bf16.msra.mxu0 %v5723_v53  ;;  %v5795_v53 = vld [vmem:[%s6933_s9 + $0x318] sm:$0xff]  }
 0x17d   : > { %5326 = vmatprep.subr.bf16.mxu0 %v5729_v58  ;;  %v5800_v58 = vld [vmem:[%s6933_s9 + $0x3e0] sm:$0xff]  }
 0x17e   : > { %5313 = vmatpush3.bf16.msra.mxu1 %v5728_v57  ;;  %v5799_v57 = vld [vmem:[%s6933_s9 + $0x320] sm:$0xff]  }
 0x17f   : > { %4179 = vmatmul.mubr.bf16.vlgmr.msra.gmra.mrb[8].mxu0 %v5725_v55  ;;  %5354 = vmatprep.subr.bf16.mxu1 %v5734_v62  ;;  %v5797_v55 = vld [vmem:[%s6933_s9 + $0x398] sm:$0xff]   ;;  %v5804_v62 = vld [vmem:[%s6933_s9 + $0x3e8] sm:$0xff]  }
 0x180   : > { %5327 = vmatpush3.bf16.msra.mxu0 %v5733_v61  ;;  %4186 = vmatprep.mubr.bf16.mxu0 %v5739_v3  ;;  %v5803_v61 = vld [vmem:[%s6933_s9 + $0x328] sm:$0xff]   ;;  %v5809_v3 = vld [vmem:[%s6933_s9 + $0x3b0] sm:$0xff]  }
 0x181   : > { %4228 = vmatmul.mubr.bf16.vlgmr.msra.gmra.mrb[8].mxu1 %v5730_v59  ;;  %5328 = vmatprep.subr.bf16.mxu0 %v5736_v0  ;;  %v5801_v59 = vld [vmem:[%s6933_s9 + $0x3a0] sm:$0xff]   ;;  %v5806_v0 = vld [vmem:[%s6933_s9 + $0x370] sm:$0xff]  }
 0x182   : > { %5355 = vmatpush3.bf16.msra.mxu1 %v5735_v63  ;;  %4235 = vmatprep.mubr.bf16.mxu1 %v5744_v7  ;;  %v5805_v63 = vld [vmem:[%s6933_s9 + $0x3a8] sm:$0xff]   ;;  %v5813_v7 = vld [vmem:[%s7335_s0 + $0x30] ss:$108 sps:$4 sm:$0xff]  }
 0x183   : > { %5356 = vmatprep.subr.bf16.mxu1 %v5738_v2  ;;  %v5808_v2 = vld [vmem:[%s6933_s9 + $0x3f0] sm:$0xff]  }
 0x184   : > { %5329 = vmatpush3.bf16.msra.mxu0 %v5737_v1  ;;  %v5807_v1 = vld [vmem:[%s6933_s9 + $0x330] sm:$0xff]  }
 0x185   : > { %5330 = vmatprep.subr.bf16.mxu0 %v5743_v6  ;;  %v5812_v6 = vld [vmem:[%s6933_s9 + $0x3f8] sm:$0xff]  }
 0x186   : > { %5357 = vmatpush3.bf16.msra.mxu1 %v5741_v4  ;;  %v5810_v4 = vld [vmem:[%s6933_s9 + $0x378] sm:$0xff]  }
 0x187   : > { %4187 = vmatmul.mubr.bf16.gmra.mrb[12].mxu0 %v5742_v5  ;;  %5358 = vmatprep.subr.bf16.mxu1 %v5748_v10  ;;  %v5811_v5 = vld [vmem:[%s6933_s9 + $0x338] sm:$0xff]   ;;  %v5817_v10 = vld [vmem:[%s6933_s9 + $0x440] sm:$0xff]  }
 0x188   : > { %5331 = vmatpush3.bf16.msra.mxu0 %v5746_v8  ;;  %4276 = vmatprep.mubr.bf16.mxu0 %v5771_v32  ;;  %v5815_v8 = vld [vmem:[%s7335_s0 + $0x34] ss:$108 sps:$4 sm:$0xff]  }
 0x189   : > { %4236 = vmatmul.mubr.bf16.gmra.mrb[12].mxu1 %v5747_v9  ;;  %5332 = vmatprep.subr.bf16.mxu0 %v5750_v12  ;;  %v5816_v9 = vld [vmem:[%s6933_s9 + $0x3b8] sm:$0xff]   ;;  %v5842_v32 = vld [vmem:[%s6933_s9 + $0x460] sm:$0xff]  }
 0x18a   : > { %5359 = vmatpush3.bf16.msra.mxu1 %v5749_v11  ;;  %4325 = vmatprep.mubr.bf16.mxu1 %v5776_v36  ;;  %v5818_v11 = vld [vmem:[%s7335_s0 + $0x38] ss:$108 sps:$4 sm:$0xff]   ;;  %v5820_v12 = vld [vmem:[%s7335_s0 + $0x3c] ss:$108 sps:$4 sm:$0xff]  }
 0x18b   : > { %5360 = vmatprep.subr.bf16.mxu1 %v5752_v14  ;;  %v5822_v14 = vld [vmem:[%s6933_s9 + $0x4c0] sm:$0xff]   ;;  %v5846_v36 = vld [vmem:[%s6933_s9 + $0x468] sm:$0xff]  }
 0x18c   : > { %5333 = vmatpush3.bf16.msra.mxu0 %v5751_v13  ;;  %v5821_v13 = vld [vmem:[%s6933_s9 + $0x400] sm:$0xff]  }
 0x18d   : > { %5334 = vmatprep.subr.bf16.mxu0 %v5754_v16  ;;  %v5824_v16 = vld [vmem:[%s6933_s9 + $0x448] sm:$0xff]  }
 0x18e   : > { %5361 = vmatpush3.bf16.msra.mxu1 %v5753_v15  ;;  %v5823_v15 = vld [vmem:[%s6933_s9 + $0x480] sm:$0xff]  }
 0x18f   : > { %5362 = vmatprep.subr.bf16.mxu1 %v5756_v18  ;;  %v5826_v18 = vld [vmem:[%s6933_s9 + $0x4c8] sm:$0xff]  }
 0x190   : > { %5335 = vmatpush3.bf16.msra.mxu0 %v5755_v17  ;;  %v5825_v17 = vld [vmem:[%s6933_s9 + $0x408] sm:$0xff]  }
 0x191   : > { %5336 = vmatprep.subr.bf16.mxu0 %v5758_v20  ;;  %v5829_v20 = vld [vmem:[%s6933_s9 + $0x488] sm:$0xff]  }
 0x192   : > { %5363 = vmatpush3.bf16.msra.mxu1 %v5757_v19  ;;  %v5827_v19 = vld [vmem:[%s7335_s0 + $0x10c] ss:$108 sps:$4 sm:$0xff]  }
 0x193   : > { %5364 = vmatprep.subr.bf16.mxu1 %v5760_v22  ;;  %v5831_v22 = vld [vmem:[%s6933_s9 + $0x450] sm:$0xff]  }
 0x194   : > { %5337 = vmatpush3.bf16.msra.mxu0 %v5759_v21  ;;  %v5830_v21 = vld [vmem:[%s7335_s0 + $0x108] ss:$108 sps:$4 sm:$0xff]  }
 0x195   : > { %5338 = vmatprep.subr.bf16.mxu0 %v5762_v24  ;;  %v5834_v24 = vld [vmem:[%s6933_s9 + $0x410] sm:$0xff]  }
 0x196   : > { %5365 = vmatpush3.bf16.msra.mxu1 %v5761_v23  ;;  %v5832_v23 = vld [vmem:[%s7335_s0 + $0x114] ss:$108 sps:$4 sm:$0xff]  }
 0x197   : > { %5366 = vmatprep.subr.bf16.mxu1 %v5764_v26  ;;  %v5836_v26 = vld [vmem:[%s6933_s9 + $0x4d0] sm:$0xff]  }
 0x198   : > { %5339 = vmatpush3.bf16.msra.mxu0 %v5763_v25  ;;  %v5835_v25 = vld [vmem:[%s7335_s0 + $0x110] ss:$108 sps:$4 sm:$0xff]  }
 0x199   : > { %5340 = vmatprep.subr.bf16.mxu0 %v5766_v28  ;;  %v5838_v28 = vld [vmem:[%s6933_s9 + $0x458] sm:$0xff]  }
 0x19a   : > { %5367 = vmatpush3.bf16.msra.mxu1 %v5765_v27  ;;  %v5837_v27 = vld [vmem:[%s6933_s9 + $0x490] sm:$0xff]  }
 0x19b   : > { %5368 = vmatprep.subr.bf16.mxu1 %v5768_v30  ;;  %v5840_v30 = vld [vmem:[%s6933_s9 + $0x4d8] sm:$0xff]  }
 0x19c   : > { %5341 = vmatpush3.bf16.msra.mxu0 %v5767_v29  ;;  %v5839_v29 = vld [vmem:[%s6933_s9 + $0x418] sm:$0xff]  }
 0x19d   : > { %5382 = vmatprep.subr.bf16.mxu0 %v5773_v34  ;;  %v5844_v34 = vld [vmem:[%s6933_s9 + $0x4e0] sm:$0xff]  }
 0x19e   : > { %5369 = vmatpush3.bf16.msra.mxu1 %v5772_v33  ;;  %v5843_v33 = vld [vmem:[%s6933_s9 + $0x420] sm:$0xff]  }
 0x19f   : > { %4277 = vmatmul.mubr.bf16.vlgmr.msra.gmra.mrb[16].mxu0 %v5769_v31  ;;  %5410 = vmatprep.subr.bf16.mxu1 %v5778_v38  ;;  %v5841_v31 = vld [vmem:[%s6933_s9 + $0x498] sm:$0xff]   ;;  %v5848_v38 = vld [vmem:[%s6933_s9 + $0x4e8] sm:$0xff]  }
 0x1a0   : > { %5383 = vmatpush3.bf16.msra.mxu0 %v5777_v37  ;;  %4284 = vmatprep.mubr.bf16.mxu0 %v5783_v43  ;;  %v5847_v37 = vld [vmem:[%s6933_s9 + $0x428] sm:$0xff]   ;;  %v5853_v43 = vld [vmem:[%s6933_s9 + $0x4b0] sm:$0xff]  }
 0x1a1   : > { %4326 = vmatmul.mubr.bf16.vlgmr.msra.gmra.mrb[16].mxu1 %v5774_v35  ;;  %5384 = vmatprep.subr.bf16.mxu0 %v5780_v40  ;;  %v5845_v35 = vld [vmem:[%s6933_s9 + $0x4a0] sm:$0xff]   ;;  %v5850_v40 = vld [vmem:[%s6933_s9 + $0x470] sm:$0xff]  }
 0x1a2   : > { %5411 = vmatpush3.bf16.msra.mxu1 %v5779_v39  ;;  %4333 = vmatprep.mubr.bf16.mxu1 %v5788_v47  ;;  %v5849_v39 = vld [vmem:[%s6933_s9 + $0x4a8] sm:$0xff]  }
 0x1a3   : > { %5412 = vmatprep.subr.bf16.mxu1 %v5782_v42  ;;  %v5852_v42 = vld [vmem:[%s6933_s9 + $0x4f0] sm:$0xff]   ;;  %v5857_v47 = vld [vmem:[%s7335_s0 + $0x40] ss:$108 sps:$4 sm:$0xff]  }
 0x1a4   : > { %5385 = vmatpush3.bf16.msra.mxu0 %v5781_v41  ;;  %v5851_v41 = vld [vmem:[%s6933_s9 + $0x430] sm:$0xff]  }
 0x1a5   : > { %5386 = vmatprep.subr.bf16.mxu0 %v5787_v46  ;;  %v5856_v46 = vld [vmem:[%s6933_s9 + $0x4f8] sm:$0xff]  }
 0x1a6   : > { %5413 = vmatpush3.bf16.msra.mxu1 %v5785_v44  ;;  %v5854_v44 = vld [vmem:[%s6933_s9 + $0x478] sm:$0xff]  }
 0x1a7   : > { %4285 = vmatmul.mubr.bf16.gmra.mrb[20].mxu0 %v5786_v45  ;;  %5414 = vmatprep.subr.bf16.mxu1 %v5792_v50  ;;  %v5855_v45 = vld [vmem:[%s6933_s9 + $0x438] sm:$0xff]   ;;  %v5861_v50 = vld [vmem:[%s6933_s9 + $0x540] sm:$0xff]  }
 0x1a8   : > { %5387 = vmatpush3.bf16.msra.mxu0 %v5790_v48  ;;  %4374 = vmatprep.mubr.bf16.mxu0 %v5815_v8  ;;  %v5859_v48 = vld [vmem:[%s7335_s0 + $0x44] ss:$108 sps:$4 sm:$0xff]  }
 0x1a9   : > { %4334 = vmatmul.mubr.bf16.gmra.mrb[20].mxu1 %v5791_v49  ;;  %5388 = vmatprep.subr.bf16.mxu0 %v5794_v52  ;;  %v5860_v49 = vld [vmem:[%s6933_s9 + $0x4b8] sm:$0xff]   ;;  %v5886_v8 = vld [vmem:[%s6933_s9 + $0x560] sm:$0xff]  }
 0x1aa   : > { %5415 = vmatpush3.bf16.msra.mxu1 %v5793_v51  ;;  %4423 = vmatprep.mubr.bf16.mxu1 %v5820_v12  ;;  %v5862_v51 = vld [vmem:[%s7335_s0 + $0x48] ss:$108 sps:$4 sm:$0xff]   ;;  %v5864_v52 = vld [vmem:[%s7335_s0 + $0x4c] ss:$108 sps:$4 sm:$0xff]  }
 0x1ab   : > { %5416 = vmatprep.subr.bf16.mxu1 %v5796_v54  ;;  %v5866_v54 = vld [vmem:[%s6933_s9 + $0x5c0] sm:$0xff]   ;;  %v5890_v12 = vld [vmem:[%s6933_s9 + $0x568] sm:$0xff]  }
 0x1ac   : > { %5389 = vmatpush3.bf16.msra.mxu0 %v5795_v53  ;;  %v5865_v53 = vld [vmem:[%s6933_s9 + $0x500] sm:$0xff]  }
 0x1ad   : > { %5390 = vmatprep.subr.bf16.mxu0 %v5798_v56  ;;  %v5868_v56 = vld [vmem:[%s6933_s9 + $0x548] sm:$0xff]  }
 0x1ae   : > { %5417 = vmatpush3.bf16.msra.mxu1 %v5797_v55  ;;  %v5867_v55 = vld [vmem:[%s6933_s9 + $0x580] sm:$0xff]  }
 0x1af   : > { %5418 = vmatprep.subr.bf16.mxu1 %v5800_v58  ;;  %v5870_v58 = vld [vmem:[%s6933_s9 + $0x5c8] sm:$0xff]  }
 0x1b0   : > { %5391 = vmatpush3.bf16.msra.mxu0 %v5799_v57  ;;  %v5869_v57 = vld [vmem:[%s6933_s9 + $0x508] sm:$0xff]  }
 0x1b1   : > { %5392 = vmatprep.subr.bf16.mxu0 %v5802_v60  ;;  %v5873_v60 = vld [vmem:[%s6933_s9 + $0x588] sm:$0xff]  }
 0x1b2   : > { %5419 = vmatpush3.bf16.msra.mxu1 %v5801_v59  ;;  %v5871_v59 = vld [vmem:[%s7335_s0 + $0x11c] ss:$108 sps:$4 sm:$0xff]  }
 0x1b3   : > { %5420 = vmatprep.subr.bf16.mxu1 %v5804_v62  ;;  %v5875_v62 = vld [vmem:[%s6933_s9 + $0x550] sm:$0xff]  }
 0x1b4   : > { %5393 = vmatpush3.bf16.msra.mxu0 %v5803_v61  ;;  %v5874_v61 = vld [vmem:[%s7335_s0 + $0x118] ss:$108 sps:$4 sm:$0xff]  }
 0x1b5   : > { %5394 = vmatprep.subr.bf16.mxu0 %v5806_v0  ;;  %v5878_v0 = vld [vmem:[%s6933_s9 + $0x510] sm:$0xff]  }
 0x1b6   : > { %5421 = vmatpush3.bf16.msra.mxu1 %v5805_v63  ;;  %v5876_v63 = vld [vmem:[%s7335_s0 + $0x124] ss:$108 sps:$4 sm:$0xff]  }
 0x1b7   : > { %5422 = vmatprep.subr.bf16.mxu1 %v5808_v2  ;;  %v5880_v2 = vld [vmem:[%s6933_s9 + $0x5d0] sm:$0xff]  }
 0x1b8   : > { %5395 = vmatpush3.bf16.msra.mxu0 %v5807_v1  ;;  %v5879_v1 = vld [vmem:[%s7335_s0 + $0x120] ss:$108 sps:$4 sm:$0xff]  }
 0x1b9   : > { %5396 = vmatprep.subr.bf16.mxu0 %v5810_v4  ;;  %v5882_v4 = vld [vmem:[%s6933_s9 + $0x558] sm:$0xff]  }
 0x1ba   : > { %5423 = vmatpush3.bf16.msra.mxu1 %v5809_v3  ;;  %v5881_v3 = vld [vmem:[%s6933_s9 + $0x590] sm:$0xff]  }
 0x1bb   : > { %5424 = vmatprep.subr.bf16.mxu1 %v5812_v6  ;;  %v5884_v6 = vld [vmem:[%s6933_s9 + $0x5d8] sm:$0xff]  }
 0x1bc   : > { %5397 = vmatpush3.bf16.msra.mxu0 %v5811_v5  ;;  %v5883_v5 = vld [vmem:[%s6933_s9 + $0x518] sm:$0xff]  }
 0x1bd   : > { %5438 = vmatprep.subr.bf16.mxu0 %v5817_v10  ;;  %v5888_v10 = vld [vmem:[%s6933_s9 + $0x5e0] sm:$0xff]  }
 0x1be   : > { %5425 = vmatpush3.bf16.msra.mxu1 %v5816_v9  ;;  %v5887_v9 = vld [vmem:[%s6933_s9 + $0x520] sm:$0xff]  }
 0x1bf   : > { %4375 = vmatmul.mubr.bf16.vlgmr.msra.gmra.mrb[24].mxu0 %v5813_v7  ;;  %5466 = vmatprep.subr.bf16.mxu1 %v5822_v14  ;;  %v5885_v7 = vld [vmem:[%s6933_s9 + $0x598] sm:$0xff]   ;;  %v5892_v14 = vld [vmem:[%s6933_s9 + $0x5e8] sm:$0xff]  }
 0x1c0   : > { %5439 = vmatpush3.bf16.msra.mxu0 %v5821_v13  ;;  %4382 = vmatprep.mubr.bf16.mxu0 %v5827_v19  ;;  %v5891_v13 = vld [vmem:[%s6933_s9 + $0x528] sm:$0xff]   ;;  %v5897_v19 = vld [vmem:[%s6933_s9 + $0x5b0] sm:$0xff]  }
 0x1c1   : > { %4424 = vmatmul.mubr.bf16.vlgmr.msra.gmra.mrb[24].mxu1 %v5818_v11  ;;  %5440 = vmatprep.subr.bf16.mxu0 %v5824_v16  ;;  %v5889_v11 = vld [vmem:[%s6933_s9 + $0x5a0] sm:$0xff]   ;;  %v5894_v16 = vld [vmem:[%s6933_s9 + $0x570] sm:$0xff]  }
 0x1c2   : > { %5467 = vmatpush3.bf16.msra.mxu1 %v5823_v15  ;;  %4431 = vmatprep.mubr.bf16.mxu1 %v5832_v23  ;;  %v5893_v15 = vld [vmem:[%s6933_s9 + $0x5a8] sm:$0xff]   ;;  %v5901_v23 = vld [vmem:[%s7335_s0 + $0x50] ss:$108 sps:$4 sm:$0xff]  }
 0x1c3   : > { %5468 = vmatprep.subr.bf16.mxu1 %v5826_v18  ;;  %v5896_v18 = vld [vmem:[%s6933_s9 + $0x5f0] sm:$0xff]  }
 0x1c4   : > { %5441 = vmatpush3.bf16.msra.mxu0 %v5825_v17  ;;  %v5895_v17 = vld [vmem:[%s6933_s9 + $0x530] sm:$0xff]  }
 0x1c5   : > { %5442 = vmatprep.subr.bf16.mxu0 %v5831_v22  ;;  %v5900_v22 = vld [vmem:[%s6933_s9 + $0x5f8] sm:$0xff]  }
 0x1c6   : > { %5469 = vmatpush3.bf16.msra.mxu1 %v5829_v20  ;;  %v5898_v20 = vld [vmem:[%s6933_s9 + $0x578] sm:$0xff]  }
 0x1c7   : > { %4383 = vmatmul.mubr.bf16.gmra.mrb[28].mxu0 %v5830_v21  ;;  %5470 = vmatprep.subr.bf16.mxu1 %v5836_v26  ;;  %v5899_v21 = vld [vmem:[%s6933_s9 + $0x538] sm:$0xff]   ;;  %v5905_v26 = vld [vmem:[%s6933_s9 + $0x640] sm:$0xff]  }
 0x1c8   : > { %5443 = vmatpush3.bf16.msra.mxu0 %v5834_v24  ;;  %4472 = vmatprep.mubr.bf16.mxu0 %v5859_v48  ;;  %v5903_v24 = vld [vmem:[%s7335_s0 + $0x54] ss:$108 sps:$4 sm:$0xff]   ;;  %v5930_v48 = vld [vmem:[%s6933_s9 + $0x628] sm:$0xff]  }
 0x1c9   : > { %4432 = vmatmul.mubr.bf16.gmra.mrb[28].mxu1 %v5835_v25  ;;  %5444 = vmatprep.subr.bf16.mxu0 %v5838_v28  ;;  %v5904_v25 = vld [vmem:[%s6933_s9 + $0x5b8] sm:$0xff]  }
 0x1ca   : > { %5471 = vmatpush3.bf16.msra.mxu1 %v5837_v27  ;;  %4521 = vmatprep.mubr.bf16.mxu1 %v5864_v52  ;;  %v5906_v27 = vld [vmem:[%s7335_s0 + $0x58] ss:$108 sps:$4 sm:$0xff]   ;;  %v5908_v28 = vld [vmem:[%s7335_s0 + $0x5c] ss:$108 sps:$4 sm:$0xff]   ;;  %v5935_v52 = vld [vmem:[%s6933_s9 + $0x6b0] sm:$0xff]  }
 0x1cb   : > { %5472 = vmatprep.subr.bf16.mxu1 %v5840_v30  ;;  %v5910_v30 = vld [vmem:[%s6933_s9 + $0x648] sm:$0xff]  }
 0x1cc   : > { %5445 = vmatpush3.bf16.msra.mxu0 %v5839_v29  ;;  %v5909_v29 = vld [vmem:[%s6933_s9 + $0x600] sm:$0xff]  }
 0x1cd   : > { %5446 = vmatprep.subr.bf16.mxu0 %v5842_v32  ;;  %v5912_v32 = vld [vmem:[%s6933_s9 + $0x608] sm:$0xff]  }
 0x1ce   : > { %5473 = vmatpush3.bf16.msra.mxu1 %v5841_v31  ;;  %v5911_v31 = vld [vmem:[%s6933_s9 + $0x680] sm:$0xff]  }
 0x1cf   : > { %5474 = vmatprep.subr.bf16.mxu1 %v5844_v34  ;;  %v5915_v34 = vld [vmem:[%s7335_s0 + $0x128] ss:$108 sps:$4 sm:$0xff]  }
 0x1d0   : > { %5447 = vmatpush3.bf16.msra.mxu0 %v5843_v33  ;;  %v5913_v33 = vld [vmem:[%s7335_s0 + $0x12c] ss:$108 sps:$4 sm:$0xff]  }
 0x1d1   : > { %5448 = vmatprep.subr.bf16.mxu0 %v5846_v36  ;;  %v5917_v36 = vld [vmem:[%s6933_s9 + $0x688] sm:$0xff]  }
 0x1d2   : > { %5475 = vmatpush3.bf16.msra.mxu1 %v5845_v35  ;;  %v5916_v35 = vld [vmem:[%s6933_s9 + $0x650] sm:$0xff]  }
 0x1d3   : > { %5476 = vmatprep.subr.bf16.mxu1 %v5848_v38  ;;  %v5920_v38 = vld [vmem:[%s6933_s9 + $0x610] sm:$0xff]  }
 0x1d4   : > { %5449 = vmatpush3.bf16.msra.mxu0 %v5847_v37  ;;  %v5918_v37 = vld [vmem:[%s7335_s0 + $0x134] ss:$108 sps:$4 sm:$0xff]  }
 0x1d5   : > { %5450 = vmatprep.subr.bf16.mxu0 %v5850_v40  ;;  %v5922_v40 = vld [vmem:[%s6933_s9 + $0x658] sm:$0xff]  }
 0x1d6   : > { %5477 = vmatpush3.bf16.msra.mxu1 %v5849_v39  ;;  %v5921_v39 = vld [vmem:[%s7335_s0 + $0x130] ss:$108 sps:$4 sm:$0xff]  }
 0x1d7   : > { %5478 = vmatprep.subr.bf16.mxu1 %v5852_v42  ;;  %v5924_v42 = vld [vmem:[%s6933_s9 + $0x618] sm:$0xff]  }
 0x1d8   : > { %5451 = vmatpush3.bf16.msra.mxu0 %v5851_v41  ;;  %v5923_v41 = vld [vmem:[%s6933_s9 + $0x690] sm:$0xff]  }
 0x1d9   : > { %5452 = vmatprep.subr.bf16.mxu0 %v5854_v44  ;;  %v5926_v44 = vld [vmem:[%s6933_s9 + $0x698] sm:$0xff]  }
 0x1da   : > { %5479 = vmatpush3.bf16.msra.mxu1 %v5853_v43  ;;  %v5925_v43 = vld [vmem:[%s6933_s9 + $0x660] sm:$0xff]  }
 0x1db   : > { %5480 = vmatprep.subr.bf16.mxu1 %v5856_v46  ;;  %v5928_v46 = vld [vmem:[%s6933_s9 + $0x668] sm:$0xff]  }
 0x1dc   : > { %5453 = vmatpush3.bf16.msra.mxu0 %v5855_v45  ;;  %v5927_v45 = vld [vmem:[%s6933_s9 + $0x620] sm:$0xff]  }
 0x1dd   : > { %5494 = vmatprep.subr.bf16.mxu0 %v5861_v50  ;;  %v5932_v50 = vld [vmem:[%s6933_s9 + $0x6a8] sm:$0xff]  }
 0x1de   : > { %5481 = vmatpush3.bf16.msra.mxu1 %v5860_v49  ;;  %v5931_v49 = vld [vmem:[%s6933_s9 + $0x670] sm:$0xff]  }
 0x1df   : > { %4473 = vmatmul.mubr.bf16.vlgmr.msra.gmra.mrb[32].mxu0 %v5857_v47  ;;  %5522 = vmatprep.subr.bf16.mxu1 %v5866_v54  ;;  %v5929_v47 = vld [vmem:[%s6933_s9 + $0x6a0] sm:$0xff]   ;;  %v5936_v54 = vld [vmem:[%s6933_s9 + $0x638] sm:$0xff]  }
 0x1e0   : > { %5495 = vmatpush3.bf16.msra.mxu0 %v5865_v53  ;;  %4480 = vmatprep.mubr.bf16.mxu0 %v5871_v59  ;;  %v5934_v53 = vld [vmem:[%s6933_s9 + $0x678] sm:$0xff]  }
 0x1e1   : > { %4522 = vmatmul.mubr.bf16.vlgmr.msra.gmra.mrb[32].mxu1 %v5862_v51  ;;  %5496 = vmatprep.subr.bf16.mxu0 %v5868_v56  ;;  %v5933_v51 = vld [vmem:[%s6933_s9 + $0x630] sm:$0xff]   ;;  %v5940_v56 = vld [vmem:[%s6933_s9 + $0x6b8] sm:$0xff]  }
 0x1e2   : > { %5523 = vmatpush3.bf16.msra.mxu1 %v5867_v55  ;;  %4529 = vmatprep.mubr.bf16.mxu1 %v5876_v63  ;;  %v5939_v55 = vld [vmem:[%s7335_s0 + $0x64] ss:$108 sps:$4 sm:$0xff]  }
 0x1e3   : > { %5524 = vmatprep.subr.bf16.mxu1 %v5870_v58  ;;  %v5941_v58 = vld [vmem:[%s7335_s0 + $0x68] ss:$108 sps:$4 sm:$0xff]  }
 0x1e4   : > { %5497 = vmatpush3.bf16.msra.mxu0 %v5869_v57 }
 0x1e5   : > { %5498 = vmatprep.subr.bf16.mxu0 %v5875_v62  ;;  %v4920_v62 = vld [vmem:[%s1982_s4] ss:$0 sm:$0xff] }
 0x1e6   : > { %5525 = vmatpush3.bf16.msra.mxu1 %v5873_v60 }
 0x1e7   : > { %4481 = vmatmul.mubr.bf16.gmra.mrb[36].mxu0 %v5874_v61  ;;  %5526 = vmatprep.subr.bf16.mxu1 %v5880_v2  ;;  %v5937_v61 = vld [vmem:[%s7335_s0 + $0x60] ss:$108 sps:$4 sm:$0xff]  }
 0x1e8   : > { %5499 = vmatpush3.bf16.msra.mxu0 %v5878_v0  ;;  %4570 = vmatprep.mubr.bf16.mxu0 %v5903_v24  ;;  %v5943_v0 = vld [vmem:[%s7335_s0 + $0x13c] ss:$108 sps:$4 sm:$0xff]  }
 0x1e9   : > { %4530 = vmatmul.mubr.bf16.gmra.mrb[36].mxu1 %v5879_v1  ;;  %5500 = vmatprep.subr.bf16.mxu0 %v5882_v4 }
 0x1ea   : > { %5527 = vmatpush3.bf16.msra.mxu1 %v5881_v3  ;;  %4619 = vmatprep.mubr.bf16.mxu1 %v5908_v28 }
 0x1eb   : > { %5528 = vmatprep.subr.bf16.mxu1 %v5884_v6 }
 0x1ec   : > { %5501 = vmatpush3.bf16.msra.mxu0 %v5883_v5 }
 0x1ed   : > { %5502 = vmatprep.subr.bf16.mxu0 %v5886_v8 }
 0x1ee   : > { %5529 = vmatpush3.bf16.msra.mxu1 %v5885_v7  ;;  %v5942_v7 = vld [vmem:[%s7335_s0 + $0x140] ss:$108 sps:$4 sm:$0xff]  }
 0x1ef   : > { %5530 = vmatprep.subr.bf16.mxu1 %v5888_v10 }
 0x1f0   : > { %5503 = vmatpush3.bf16.msra.mxu0 %v5887_v9 }
 0x1f1   : > { %5504 = vmatprep.subr.bf16.mxu0 %v5890_v12 }
 0x1f2   : > { %5531 = vmatpush3.bf16.msra.mxu1 %v5889_v11 }
 0x1f3   : > { %5532 = vmatprep.subr.bf16.mxu1 %v5892_v14 }
 0x1f4   : > { %5505 = vmatpush3.bf16.msra.mxu0 %v5891_v13 }
 0x1f5   : > { %5506 = vmatprep.subr.bf16.mxu0 %v5894_v16 }
 0x1f6   : > { %5533 = vmatpush3.bf16.msra.mxu1 %v5893_v15 }
 0x1f7   : > { %5534 = vmatprep.subr.bf16.mxu1 %v5896_v18  ;;  %v5945_v18 = vld [vmem:[%s7335_s0 + $0x138] ss:$108 sps:$4 sm:$0xff]  }
 0x1f8   : > { %5507 = vmatpush3.bf16.msra.mxu0 %v5895_v17 }
 0x1f9   : > { %5508 = vmatprep.subr.bf16.mxu0 %v5898_v20 }
 0x1fa   : > { %5535 = vmatpush3.bf16.msra.mxu1 %v5897_v19 }
 0x1fb   : > { %5536 = vmatprep.subr.bf16.mxu1 %v5900_v22 }
 0x1fc   : > { %5509 = vmatpush3.bf16.msra.mxu0 %v5899_v21 }
 0x1fd   : > { %5550 = vmatprep.subr.bf16.mxu0 %v5905_v26 }
 0x1fe   : > { %5537 = vmatpush3.bf16.msra.mxu1 %v5904_v25 }
 0x1ff   : > { %4571 = vmatmul.mubr.bf16.vlgmr.msra.gmra.mrb[40].mxu0 %v5901_v23  ;;  %5588 = vmatprep.subr.bf16.mxu1 %v5911_v31 }
 0x200   : > { %5551 = vmatpush3.bf16.msra.mxu0 %v5909_v29  ;;  %4578 = vmatprep.mubr.bf16.mxu0 %v5913_v33 }
 0x201   : > { %4620 = vmatmul.mubr.bf16.vlgmr.msra.gmra.mrb[40].mxu1 %v5906_v27  ;;  %5552 = vmatprep.subr.bf16.mxu0 %v5910_v30 }
 0x202   : > { %5589 = vmatpush3.bf16.msra.mxu1 %v5911_v31  ;;  %4627 = vmatprep.mubr.bf16.mxu1 %v5918_v37 }
 0x203   : > { %5590 = vmatprep.subr.bf16.mxu1 %v5917_v36 }
 0x204   : > { %5553 = vmatpush3.bf16.msra.mxu0 %v5912_v32 }
 0x205   : > { %5554 = vmatprep.subr.bf16.mxu0 %v5916_v35 }
 0x206   : > { %5591 = vmatpush3.bf16.msra.mxu1 %v5917_v36 }
 0x207   : > { %4579 = vmatmul.mubr.bf16.gmra.mrb[44].mxu0 %v5915_v34  ;;  %5592 = vmatprep.subr.bf16.mxu1 %v5923_v41 }
 0x208   : > { %5555 = vmatpush3.bf16.msra.mxu0 %v5920_v38  ;;  %4668 = vmatprep.mubr.bf16.mxu0 %v5939_v55 }
 0x209   : > { %4628 = vmatmul.mubr.bf16.gmra.mrb[44].mxu1 %v5921_v39  ;;  %5556 = vmatprep.subr.bf16.mxu0 %v5922_v40 }
 0x20a   : > { %5593 = vmatpush3.bf16.msra.mxu1 %v5923_v41  ;;  %5604 = vmatprep.mubr.bf16.mxu1 %v5941_v58 }
 0x20b   : > { %5594 = vmatprep.subr.bf16.mxu1 %v5926_v44 }
 0x20c   : > { %5557 = vmatpush3.bf16.msra.mxu0 %v5924_v42 }
 0x20d   : > { %5558 = vmatprep.subr.bf16.mxu0 %v5925_v43 }
 0x20e   : > { %5595 = vmatpush3.bf16.msra.mxu1 %v5926_v44 }
 0x20f   : > { %5596 = vmatprep.subr.bf16.mxu1 %v5929_v47 }
 0x210   : > { %5559 = vmatpush3.bf16.msra.mxu0 %v5927_v45 }
 0x211   : > { %5560 = vmatprep.subr.bf16.mxu0 %v5928_v46 }
 0x212   : > { %5597 = vmatpush3.bf16.msra.mxu1 %v5929_v47 }
 0x213   : > { %5598 = vmatprep.subr.bf16.mxu1 %v5932_v50 }
 0x214   : > { %5561 = vmatpush3.bf16.msra.mxu0 %v5930_v48 }
 0x215   : > { %5562 = vmatprep.subr.bf16.mxu0 %v5931_v49 }
 0x216   : > { %5599 = vmatpush3.bf16.msra.mxu1 %v5932_v50 }
 0x217   : > { %5600 = vmatprep.subr.bf16.mxu1 %v5935_v52 }
 0x218   : > { %5563 = vmatpush3.bf16.msra.mxu0 %v5933_v51 }
 0x219   : > { %5564 = vmatprep.subr.bf16.mxu0 %v5934_v53 }
 0x21a   : > { %5601 = vmatpush3.bf16.msra.mxu1 %v5935_v52 }
 0x21b   : > { %5602 = vmatprep.subr.bf16.mxu1 %v5940_v56 }
 0x21c   : > { %5565 = vmatpush3.bf16.msra.mxu0 %v5936_v54 }
 0x21e   : > { %5603 = vmatpush3.bf16.msra.mxu1 %v5940_v56 }
 0x21f   : > { %4669 = vmatmul.mubr.bf16.vlgmr.msra.gmra.mrb[48].mxu0 %v5937_v61 }
 0x220   : > { %4676 = vmatprep.mubr.bf16.mxu0 %v5943_v0 }
 0x221   : > { %5605 = vmatmul.mubr.bf16.vlgmr.msra.gmra.mrb[48].mxu1 %v5942_v7 }
 0x227   : > { %4677 = vmatmul.mubr.bf16.gmra.mrb[52].mxu0 %v5945_v18 }
 0x232   : > { %v5230_v57 = vpop.f32.mrb[0].mxu0 }
 0x233   : > { %v5231_v59 = vpop.f32.mrb[1].mxu0 }
 0x234   : > { %v5258_v60 = vpop.f32.mrb[0].mxu1  ;;  %v5232_v63 = vadd.f32 %v5231_v59, %v5230_v57  ;;  %v5233_v1 = vpop.f32.mrb[2].mxu0 }
 0x235   : > { %v5259_v2 = vpop.f32.mrb[1].mxu1  ;;  %v5234_v4 = vpop.f32.mrb[3].mxu0 }
 0x236   : > { %v4083_v3 = vadd.f32 %v5232_v63, %v4920_v62  ;;  %v5260_v5 = vadd.f32 %v5259_v2, %v5258_v60  ;;  %v5261_v6 = vpop.f32.mrb[2].mxu1  ;;  %v5235_v8 = vadd.f32 %v5234_v4, %v5233_v1 }
 0x237   : > { %v5262_v9 = vpop.f32.mrb[3].mxu1 }
 0x238   : > { %v4132_v10 = vadd.f32 %v5260_v5, %v4083_v3  ;;  %v5263_v11 = vadd.f32 %v5262_v9, %v5261_v6  ;;  %v4086_v12 = vadd.f32 %v5235_v8, %v4920_v62 }
 0x23a   : > { %v5236_v13 = vpop.f32.mrb[4].mxu0  ;;  %v4135_v15 = vadd.f32 %v5263_v11, %v4086_v12 }
 0x23b   : > { %v5237_v14 = vpop.f32.mrb[5].mxu0 }
 0x23c   : > { %v5238_v16 = vadd.f32 %v5237_v14, %v5236_v13  ;;  %v5239_v17 = vpop.f32.mrb[6].mxu0  ;;  %v5264_v22 = vpop.f32.mrb[4].mxu1 }
 0x23d   : > { %v5240_v19 = vpop.f32.mrb[7].mxu0  ;;  %v5265_v23 = vpop.f32.mrb[5].mxu1 }
 0x23e   : > { %v5241_v20 = vadd.f32 %v5240_v19, %v5239_v17  ;;  %v4091_v21 = vadd.f32 %v5238_v16, %v4920_v62  ;;  %v5266_v25 = vadd.f32 %v5265_v23, %v5264_v22  ;;  %v5267_v26 = vpop.f32.mrb[6].mxu1 }
 0x23f   : > { %v5268_v27 = vpop.f32.mrb[7].mxu1 }
 0x240   : > { %v4094_v24 = vadd.f32 %v5241_v20, %v4920_v62  ;;  %v4140_v28 = vadd.f32 %v5266_v25, %v4091_v21  ;;  %v5269_v29 = vadd.f32 %v5268_v27, %v5267_v26 }
 0x242   : > { %v4143_v30 = vadd.f32 %v5269_v29, %v4094_v24 }
 0x252   : > { %v5286_v31 = vpop.f32.mrb[8].mxu0 }
 0x253   : > { %v5287_v32 = vpop.f32.mrb[9].mxu0 }
 0x254   : > { %v5288_v33 = vadd.f32 %v5287_v32, %v5286_v31  ;;  %v5289_v34 = vpop.f32.mrb[10].mxu0  ;;  %v5314_v35 = vpop.f32.mrb[8].mxu1 }
 0x255   : > { %v5290_v36 = vpop.f32.mrb[11].mxu0  ;;  %v5315_v39 = vpop.f32.mrb[9].mxu1 }
 0x256   : > { %v4181_v37 = vadd.f32 %v5288_v33, %v4132_v10  ;;  %v5291_v38 = vadd.f32 %v5290_v36, %v5289_v34  ;;  %v5316_v40 = vadd.f32 %v5315_v39, %v5314_v35  ;;  %v5317_v41 = vpop.f32.mrb[10].mxu1 }
 0x257   : > { %v5318_v43 = vpop.f32.mrb[11].mxu1 }
 0x258   : > { %v4184_v42 = vadd.f32 %v5291_v38, %v4135_v15  ;;  %v4230_v44 = vadd.f32 %v5316_v40, %v4181_v37  ;;  %v5319_v45 = vadd.f32 %v5318_v43, %v5317_v41 }
 0x25a   : > { %v4233_v46 = vadd.f32 %v5319_v45, %v4184_v42  ;;  %v5292_v47 = vpop.f32.mrb[12].mxu0 }
 0x25b   : > { %v5293_v48 = vpop.f32.mrb[13].mxu0 }
 0x25c   : > { %v5294_v49 = vadd.f32 %v5293_v48, %v5292_v47  ;;  %v5295_v50 = vpop.f32.mrb[14].mxu0  ;;  %v5320_v51 = vpop.f32.mrb[12].mxu1 }
 0x25d   : > { %v5296_v52 = vpop.f32.mrb[15].mxu0  ;;  %v5321_v55 = vpop.f32.mrb[13].mxu1 }
 0x25e   : > { %v4189_v53 = vadd.f32 %v5294_v49, %v4140_v28  ;;  %v5297_v54 = vadd.f32 %v5296_v52, %v5295_v50  ;;  %v5322_v56 = vadd.f32 %v5321_v55, %v5320_v51  ;;  %v5323_v57 = vpop.f32.mrb[14].mxu1 }
 0x25f   : > { %v5324_v59 = vpop.f32.mrb[15].mxu1 }
 0x260   : > { %v4192_v58 = vadd.f32 %v5297_v54, %v4143_v30  ;;  %v4238_v60 = vadd.f32 %v5322_v56, %v4189_v53  ;;  %v5325_v61 = vadd.f32 %v5324_v59, %v5323_v57 }
 0x262   : > { %v4241_v62 = vadd.f32 %v5325_v61, %v4192_v58 }
 0x272   : > { %v5342_v63 = vpop.f32.mrb[16].mxu0 }
 0x273   : > { %v5343_v0 = vpop.f32.mrb[17].mxu0 }
 0x274   : > { %v5344_v1 = vadd.f32 %v5343_v0, %v5342_v63  ;;  %v5345_v2 = vpop.f32.mrb[18].mxu0  ;;  %v5370_v5 = vpop.f32.mrb[16].mxu1 }
 0x275   : > { %v5346_v3 = vpop.f32.mrb[19].mxu0  ;;  %v5371_v7 = vpop.f32.mrb[17].mxu1 }
 0x276   : > { %v4279_v4 = vadd.f32 %v5344_v1, %v4230_v44  ;;  %v5347_v6 = vadd.f32 %v5346_v3, %v5345_v2  ;;  %v5372_v9 = vadd.f32 %v5371_v7, %v5370_v5  ;;  %v5373_v10 = vpop.f32.mrb[18].mxu1 }
 0x277   : > { %v5374_v11 = vpop.f32.mrb[19].mxu1 }
 0x278   : > { %v4282_v8 = vadd.f32 %v5347_v6, %v4233_v46  ;;  %v4328_v12 = vadd.f32 %v5372_v9, %v4279_v4  ;;  %v5375_v13 = vadd.f32 %v5374_v11, %v5373_v10 }
 0x27a   : > { %v4331_v14 = vadd.f32 %v5375_v13, %v4282_v8  ;;  %v5348_v15 = vpop.f32.mrb[20].mxu0 }
 0x27b   : > { %v5349_v16 = vpop.f32.mrb[21].mxu0 }
 0x27c   : > { %v5350_v17 = vadd.f32 %v5349_v16, %v5348_v15  ;;  %v5351_v18 = vpop.f32.mrb[22].mxu0  ;;  %v5376_v19 = vpop.f32.mrb[20].mxu1 }
 0x27d   : > { %v5352_v20 = vpop.f32.mrb[23].mxu0  ;;  %v5377_v23 = vpop.f32.mrb[21].mxu1 }
 0x27e   : > { %v4287_v21 = vadd.f32 %v5350_v17, %v4238_v60  ;;  %v5353_v22 = vadd.f32 %v5352_v20, %v5351_v18  ;;  %v5378_v24 = vadd.f32 %v5377_v23, %v5376_v19  ;;  %v5379_v25 = vpop.f32.mrb[22].mxu1 }
 0x27f   : > { %v5380_v27 = vpop.f32.mrb[23].mxu1 }
 0x280   : > { %v4290_v26 = vadd.f32 %v5353_v22, %v4241_v62  ;;  %v4336_v28 = vadd.f32 %v5378_v24, %v4287_v21  ;;  %v5381_v29 = vadd.f32 %v5380_v27, %v5379_v25 }
 0x282   : > { %v4339_v30 = vadd.f32 %v5381_v29, %v4290_v26 }
 0x292   : > { %v5398_v31 = vpop.f32.mrb[24].mxu0 }
 0x293   : > { %v5399_v32 = vpop.f32.mrb[25].mxu0 }
 0x294   : > { %v5400_v33 = vadd.f32 %v5399_v32, %v5398_v31  ;;  %v5401_v34 = vpop.f32.mrb[26].mxu0  ;;  %v5426_v35 = vpop.f32.mrb[24].mxu1 }
 0x295   : > { %v5402_v36 = vpop.f32.mrb[27].mxu0  ;;  %v5427_v39 = vpop.f32.mrb[25].mxu1 }
 0x296   : > { %v4377_v37 = vadd.f32 %v5400_v33, %v4328_v12  ;;  %v5403_v38 = vadd.f32 %v5402_v36, %v5401_v34  ;;  %v5428_v40 = vadd.f32 %v5427_v39, %v5426_v35  ;;  %v5429_v41 = vpop.f32.mrb[26].mxu1 }
 0x297   : > { %v5430_v43 = vpop.f32.mrb[27].mxu1 }
 0x298   : > { %v4380_v42 = vadd.f32 %v5403_v38, %v4331_v14  ;;  %v4426_v44 = vadd.f32 %v5428_v40, %v4377_v37  ;;  %v5431_v45 = vadd.f32 %v5430_v43, %v5429_v41 }
 0x29a   : > { %v4429_v46 = vadd.f32 %v5431_v45, %v4380_v42  ;;  %v5404_v47 = vpop.f32.mrb[28].mxu0 }
 0x29b   : > { %v5405_v48 = vpop.f32.mrb[29].mxu0 }
 0x29c   : > { %v5406_v49 = vadd.f32 %v5405_v48, %v5404_v47  ;;  %v5407_v50 = vpop.f32.mrb[30].mxu0  ;;  %v5432_v53 = vpop.f32.mrb[28].mxu1 }
 0x29d   : > { %v5408_v51 = vpop.f32.mrb[31].mxu0  ;;  %v5433_v55 = vpop.f32.mrb[29].mxu1 }
 0x29e   : > { %v4385_v52 = vadd.f32 %v5406_v49, %v4336_v28  ;;  %v5409_v54 = vadd.f32 %v5408_v51, %v5407_v50  ;;  %v5434_v57 = vadd.f32 %v5433_v55, %v5432_v53  ;;  %v5435_v58 = vpop.f32.mrb[30].mxu1 }
 0x29f   : > { %v5436_v59 = vpop.f32.mrb[31].mxu1 }
 0x2a0   : > { %v4388_v56 = vadd.f32 %v5409_v54, %v4339_v30  ;;  %v4434_v60 = vadd.f32 %v5434_v57, %v4385_v52  ;;  %v5437_v61 = vadd.f32 %v5436_v59, %v5435_v58 }
 0x2a2   : > { %v4437_v62 = vadd.f32 %v5437_v61, %v4388_v56 }
 0x2b2   : > { %v5454_v63 = vpop.f32.mrb[32].mxu0 }
 0x2b3   : > { %v5455_v0 = vpop.f32.mrb[33].mxu0 }
 0x2b4   : > { %v5456_v1 = vadd.f32 %v5455_v0, %v5454_v63  ;;  %v5457_v2 = vpop.f32.mrb[34].mxu0  ;;  %v5482_v3 = vpop.f32.mrb[32].mxu1 }
 0x2b5   : > { %v5458_v4 = vpop.f32.mrb[35].mxu0  ;;  %v5483_v7 = vpop.f32.mrb[33].mxu1 }
 0x2b6   : > { %v4475_v5 = vadd.f32 %v5456_v1, %v4426_v44  ;;  %v5459_v6 = vadd.f32 %v5458_v4, %v5457_v2  ;;  %v5484_v8 = vadd.f32 %v5483_v7, %v5482_v3  ;;  %v5485_v9 = vpop.f32.mrb[34].mxu1 }
 0x2b7   : > { %v5486_v11 = vpop.f32.mrb[35].mxu1 }
 0x2b8   : > { %v4478_v10 = vadd.f32 %v5459_v6, %v4429_v46  ;;  %v4524_v12 = vadd.f32 %v5484_v8, %v4475_v5  ;;  %v5487_v13 = vadd.f32 %v5486_v11, %v5485_v9 }
 0x2ba   : > { %v4527_v14 = vadd.f32 %v5487_v13, %v4478_v10  ;;  %v5460_v15 = vpop.f32.mrb[36].mxu0 }
 0x2bb   : > { %v5461_v16 = vpop.f32.mrb[37].mxu0 }
 0x2bc   : > { %v5462_v17 = vadd.f32 %v5461_v16, %v5460_v15  ;;  %v5463_v18 = vpop.f32.mrb[38].mxu0  ;;  %v5488_v19 = vpop.f32.mrb[36].mxu1 }
 0x2bd   : > { %v5464_v20 = vpop.f32.mrb[39].mxu0  ;;  %v5489_v23 = vpop.f32.mrb[37].mxu1 }
 0x2be   : > { %v4483_v21 = vadd.f32 %v5462_v17, %v4434_v60  ;;  %v5465_v22 = vadd.f32 %v5464_v20, %v5463_v18  ;;  %v5490_v24 = vadd.f32 %v5489_v23, %v5488_v19  ;;  %v5491_v25 = vpop.f32.mrb[38].mxu1 }
 0x2bf   : > { %v5492_v27 = vpop.f32.mrb[39].mxu1 }
 0x2c0   : > { %v4486_v26 = vadd.f32 %v5465_v22, %v4437_v62  ;;  %v4532_v28 = vadd.f32 %v5490_v24, %v4483_v21  ;;  %v5493_v29 = vadd.f32 %v5492_v27, %v5491_v25 }
 0x2c2   : > { %v4535_v30 = vadd.f32 %v5493_v29, %v4486_v26 }
 0x2d2   : > { %v5510_v31 = vpop.f32.mrb[40].mxu0 }
 0x2d3   : > { %v5511_v32 = vpop.f32.mrb[41].mxu0 }
 0x2d4   : > { %v5512_v33 = vadd.f32 %v5511_v32, %v5510_v31  ;;  %v5513_v34 = vpop.f32.mrb[42].mxu0  ;;  %v5538_v37 = vpop.f32.mrb[40].mxu1 }
 0x2d5   : > { %v5514_v35 = vpop.f32.mrb[43].mxu0  ;;  %v5539_v39 = vpop.f32.mrb[41].mxu1 }
 0x2d6   : > { %v4573_v36 = vadd.f32 %v5512_v33, %v4524_v12  ;;  %v5515_v38 = vadd.f32 %v5514_v35, %v5513_v34  ;;  %v5540_v41 = vadd.f32 %v5539_v39, %v5538_v37  ;;  %v5541_v42 = vpop.f32.mrb[42].mxu1 }
 0x2d7   : > { %v5542_v43 = vpop.f32.mrb[43].mxu1 }
 0x2d8   : > { %v4576_v40 = vadd.f32 %v5515_v38, %v4527_v14  ;;  %v4622_v44 = vadd.f32 %v5540_v41, %v4573_v36  ;;  %v5543_v45 = vadd.f32 %v5542_v43, %v5541_v42 }
 0x2da   : > { %v5516_v46 = vpop.f32.mrb[44].mxu0  ;;  %v4625_v47 = vadd.f32 %v5543_v45, %v4576_v40 }
 0x2db   : > { %v5517_v48 = vpop.f32.mrb[45].mxu0 }
 0x2dc   : > { %v5518_v49 = vadd.f32 %v5517_v48, %v5516_v46  ;;  %v5519_v50 = vpop.f32.mrb[46].mxu0  ;;  %v5544_v51 = vpop.f32.mrb[44].mxu1 }
 0x2dd   : > { %v5520_v52 = vpop.f32.mrb[47].mxu0  ;;  %v5545_v55 = vpop.f32.mrb[45].mxu1 }
 0x2de   : > { %v4581_v53 = vadd.f32 %v5518_v49, %v4532_v28  ;;  %v5521_v54 = vadd.f32 %v5520_v52, %v5519_v50  ;;  %v5546_v56 = vadd.f32 %v5545_v55, %v5544_v51  ;;  %v5547_v57 = vpop.f32.mrb[46].mxu1 }
 0x2df   : > { %v5548_v59 = vpop.f32.mrb[47].mxu1 }
 0x2e0   : > { %v4584_v58 = vadd.f32 %v5521_v54, %v4535_v30  ;;  %v4630_v60 = vadd.f32 %v5546_v56, %v4581_v53  ;;  %v5549_v61 = vadd.f32 %v5548_v59, %v5547_v57 }
 0x2e2   : > { %v4633_v62 = vadd.f32 %v5549_v61, %v4584_v58 }
 0x2f2   : > { %v5566_v63 = vpop.f32.mrb[48].mxu0 }
 0x2f3   : > { %v5567_v0 = vpop.f32.mrb[49].mxu0 }
 0x2f4   : > { %v5568_v1 = vadd.f32 %v5567_v0, %v5566_v63  ;;  %v5569_v2 = vpop.f32.mrb[50].mxu0  ;;  %v5606_v4 = vpop.f32.mrb[48].mxu1 }
 0x2f5   : > { %v5570_v3 = vpop.f32.mrb[51].mxu0  ;;  %v4719_v7 = vpop.f32.mrb[49].mxu1 }
 0x2f6   : > { %v5571_v5 = vadd.f32 %v5570_v3, %v5569_v2  ;;  %v4671_v6 = vadd.f32 %v5568_v1, %v4622_v44  ;;  %v5607_v8 = vpop.f32.mrb[50].mxu1 }
 0x2f7   : > { %v4722_v11 = vpop.f32.mrb[51].mxu1 }
 0x2f8   : > { %v4720_v9 = vadd.f32 %v4719_v7, %v4671_v6  ;;  %v4674_v10 = vadd.f32 %v5571_v5, %v4625_v47 }
 0x2fa   : > { %v4723_v12 = vadd.f32 %v4722_v11, %v4674_v10  ;;  %v5572_v13 = vpop.f32.mrb[52].mxu0  ;;  %v4734_v15 = vmax.f32 %v4720_v9, 0.0 }
 0x2fb   : > { %v5573_v14 = vpop.f32.mrb[53].mxu0 }
 0x2fc   : > { %v4735_v16 = vmax.f32 %v4723_v12, 0.0  ;;  %v5574_v17 = vadd.f32 %v5573_v14, %v5572_v13  ;;  %v5575_v18 = vpop.f32.mrb[54].mxu0 }
 0x2fd   : > { %v5576_v19 = vpop.f32.mrb[55].mxu0 }
 0x2fe   : > { %v5206_v20 = vpack.c.bf16 %v4735_v16, %v4734_v15  ;;  %v4679_v21 = vadd.f32 %v5574_v17, %v4630_v60  ;;  %v5577_v22 = vadd.f32 %v5576_v19, %v5575_v18 }
 0x300   : > { %5207 = vst [vmem:[%s1972_s24] sm:$0xff] %v5206_v20   ;;  %v4728_v23 = vadd.f32 %v5606_v4, %v4679_v21  ;;  %v4682_v24 = vadd.f32 %v5577_v22, %v4633_v62 }
 0x302   : > { %v4731_v25 = vadd.f32 %v5607_v8, %v4682_v24  ;;  %v4736_v26 = vmax.f32 %v4728_v23, 0.0  ;;  %4764 = sbr.rel (!%p6041_p6) target bundleno = 785 (0x311), region = 77 }
 0x304   : > { %v4737_v27 = vmax.f32 %v4731_v25, 0.0 }
 0x306   : > { %v5211_v28 = vpack.c.bf16 %v4737_v27, %v4736_v26 }
 0x307   : > { %v4785_v29 = vld [vmem:[%s1972_s24] sm:$0xf] (%p6041_p6)  ;;  %v4787_v30 = vld [vmem:[%s1972_s24 + $0x4] sm:$0xf] (%p6041_p6) }
 0x308   : > { %5213 = vst [vmem:[%s1972_s24 + $0x8] sm:$0xff] %v5211_v28   ;;  %4786 = vst [vmem:[%s4769_s26] sm:$0xf] (%p6041_p6), %v4785_v29 }
 0x309   : > { %4788 = vst [vmem:[%s4769_s26 + $0x8] sm:$0xf] %v4787_v30 }
 0x30f   : > { %v4789_v31 = vld [vmem:[%s1972_s24 + $0x8] sm:$0xf]  ;;  %v4791_v32 = vld [vmem:[%s1972_s24 + $0xc] sm:$0xf] }
 0x310   : > { %4790 = vst [vmem:[%s4769_s26 + $0x10] sm:$0xf] %v4789_v31  ;;  %4792 = vst [vmem:[%s4769_s26 + $0x18] sm:$0xf] %v4791_v32 }
 0x311 PF: > { %s13_s16 = sadd.s32 1, %s5984_s16   ;;  %s7340_s12 = smov %s5972_s13 }
 0x312   : > { %p10_p12 = scmp.ge.s32.totalorder %s13_s16, 4   ;;  %s7341_s13 = smov %s6046_s22 }
 0x313   : > { %s7342_s14 = smov %s5980_s15  ;;  %s7343_s15 = smov %s7345_s17 }
 0x314   :  { %12 = sbr.rel (!%p10_p12) target bundleno = 3 (0x3), region = 155 }

// kernel: alexnet_fmaps.9
= control target key start
LH: loop header
LB: loop body
LE: loop exit
PB: predicated region body
PF: predicated region fallthrough
CT: control target
= control target key end

     0   :  { %s4183_s12 = smov 0   ;;  %s4185_s13 = smov 0   ;;  %s5098_s0 = inlined_call_operand.vmem [shape: bf16[32,2304], index: 0, kind: input, shape index: {}]   ;;  %s5099_s1 = inlined_call_operand.vmem [shape: bf16[2304,256], index: 1, kind: input, shape index: {}]   ;;  %s5100_s2 = inlined_call_operand.vmem [shape: f32[1,256], index: 2, kind: input, shape index: {}]   ;;  %s5101_s3 = inlined_call_operand.vmem [shape: bf16[32,256], index: 3, kind: output, shape index: {}]  }
   0x1   :  { %s4187_s14 = smov 0   ;;  %s4189_s15 = smov 0  }
   0x2   :  { %s4191_s16 = smov 0  }
   0x3 LB: > { %s22_s17 = sadd.s32 1, %s4157_s15  ;;  %s3403_s18 = sadd.s32 4294967295, %s4161_s16   ;;  %s4161_s16 = sphi %s4191_s16, %s13_s16   ;;  %s4157_s15 = sphi %s4189_s15, %s5106_s15   ;;  %s4153_s14 = sphi %s4187_s14, %s5105_s14   ;;  %s4149_s13 = sphi %s4185_s13, %s5104_s13   ;;  %s4145_s12 = sphi %s4183_s12, %s5103_s12  }
   0x4   : > { %p23_p0 = scmp.ge.s32.totalorder %s22_s17, 2  ;;  %p65_p1 = scmp.ne.s32.totalorder %s4149_s13, %s4145_s12 }
   0x5   : > { %p66_p2 = scmp.eq.s32.totalorder %s4161_s16, 0  ;;  %p123_p4 = scmp.eq.s32.totalorder %s3403_s18, 1 }
   0x6   : > { %s5108_s17 = smov (%p23_p0, %s22_s17), 0  ;;  %s58_s20 = sadd.s32 1, %s4149_s13 }
   0x7   : > { %p67_p3 = por %p66_p2, %p65_p1  ;;  %s55_s19 = ssub.s32 %s4157_s15, %s5108_s17 }
   0x8   : > { %p56_p5 = scmp.eq.s32.totalorder %s55_s19, 0  ;;  %p4218_p6 = por %p123_p4, %p65_p1 }
   0x9   : > { %p3407_p7 = scmp.ge.s32.totalorder %s4161_s16, 2 }
   0xa   : > { %s4223_s22 = scalar_select %p56_p5, %s4149_s13, %s58_s20  }
   0xb   : > { %155 = sbr.rel (%p3407_p7) target bundleno = 214 (0xd6), region = 20 }
  0x12   : > { %158 = sbr.rel (!%p67_p3) target bundleno = 214 (0xd6), region = 24  ;;  %s160_s23 = sand.u32 (%p67_p3), 1, %s4149_s13  }
  0x13   : > { %s3408_s24 = sshll.u32 (%p67_p3), %s4157_s15, 2  ;;  %s3883_s25 = smul.u32 (%p67_p3), 1152, %s160_s23 }
  0x14   : > { %s4231_s28 = scalar_lea.vmem (%p67_p3), %s5099_s1, %s3408_s24 }
  0x15   : > { %v180_v0 = vld [vmem:[%s4231_s28] sm:$0xf] (%p67_p3)  ;;  %v182_v1 = vld [vmem:[%s4231_s28 + $0x8] sm:$0xf] (%p67_p3)  ;;  %v184_v2 = vld [vmem:[%s4231_s28 + $0x10] sm:$0xf] (%p67_p3) }
  0x16   : > { %v186_v3 = vld [vmem:[%s4231_s28 + $0x18] sm:$0xf] (%p67_p3)  ;;  %v188_v4 = vld [vmem:[%s4231_s28 + $0x20] sm:$0xf] (%p67_p3)  ;;  %s4238_s29 = scalar_lea.vmem (%p67_p3), [#allocation2], %s3883_s25 }
  0x17   : > { %181 = vst [vmem:[%s4238_s29] sm:$0xf] (%p67_p3), %v180_v0  ;;  %183 = vst [vmem:[%s4238_s29 + $0x4] sm:$0xf] (%p67_p3), %v182_v1  ;;  %v190_v5 = vld [vmem:[%s4231_s28 + $0x28] sm:$0xf] (%p67_p3) }
  0x18   : > { %185 = vst [vmem:[%s4238_s29 + $0x8] sm:$0xf] (%p67_p3), %v184_v2  ;;  %187 = vst [vmem:[%s4238_s29 + $0xc] sm:$0xf] (%p67_p3), %v186_v3  ;;  %v192_v6 = vld [vmem:[%s4231_s28 + $0x30] sm:$0xf] (%p67_p3) }
  0x19   : > { %189 = vst [vmem:[%s4238_s29 + $0x10] sm:$0xf] %v188_v4  ;;  %v194_v7 = vld [vmem:[%s4231_s28 + $0x38] sm:$0xf]  ;;  %191 = vst [vmem:[%s4238_s29 + $0x14] sm:$0xf] %v190_v5 }
  0x1a   : > { %193 = vst [vmem:[%s4238_s29 + $0x18] sm:$0xf] %v192_v6  ;;  %195 = vst [vmem:[%s4238_s29 + $0x1c] sm:$0xf] %v194_v7  ;;  %v196_v8 = vld [vmem:[%s4231_s28 + $0x40] sm:$0xf] }
  0x1b   : > { %v198_v9 = vld [vmem:[%s4231_s28 + $0x48] sm:$0xf]  ;;  %v200_v10 = vld [vmem:[%s4231_s28 + $0x50] sm:$0xf]  ;;  %197 = vst [vmem:[%s4238_s29 + $0x20] sm:$0xf] %v196_v8 }
  0x1c   : > { %199 = vst [vmem:[%s4238_s29 + $0x24] sm:$0xf] %v198_v9  ;;  %201 = vst [vmem:[%s4238_s29 + $0x28] sm:$0xf] %v200_v10  ;;  %v202_v11 = vld [vmem:[%s4231_s28 + $0x58] sm:$0xf] }
  0x1d   : > { %v204_v12 = vld [vmem:[%s4231_s28 + $0x60] sm:$0xf]  ;;  %v206_v13 = vld [vmem:[%s4231_s28 + $0x68] sm:$0xf]  ;;  %203 = vst [vmem:[%s4238_s29 + $0x2c] sm:$0xf] %v202_v11 }
  0x1e   : > { %205 = vst [vmem:[%s4238_s29 + $0x30] sm:$0xf] %v204_v12  ;;  %207 = vst [vmem:[%s4238_s29 + $0x34] sm:$0xf] %v206_v13  ;;  %v208_v14 = vld [vmem:[%s4231_s28 + $0x70] sm:$0xf] }
  0x1f   : > { %v210_v15 = vld [vmem:[%s4231_s28 + $0x78] sm:$0xf]  ;;  %v212_v16 = vld [vmem:[%s4231_s28 + $0x80] sm:$0xf]  ;;  %209 = vst [vmem:[%s4238_s29 + $0x38] sm:$0xf] %v208_v14 }
  0x20   : > { %211 = vst [vmem:[%s4238_s29 + $0x3c] sm:$0xf] %v210_v15  ;;  %213 = vst [vmem:[%s4238_s29 + $0x40] sm:$0xf] %v212_v16  ;;  %v214_v17 = vld [vmem:[%s4231_s28 + $0x88] sm:$0xf] }
  0x21   : > { %v216_v18 = vld [vmem:[%s4231_s28 + $0x90] sm:$0xf]  ;;  %v218_v19 = vld [vmem:[%s4231_s28 + $0x98] sm:$0xf]  ;;  %215 = vst [vmem:[%s4238_s29 + $0x44] sm:$0xf] %v214_v17 }
  0x22   : > { %217 = vst [vmem:[%s4238_s29 + $0x48] sm:$0xf] %v216_v18  ;;  %219 = vst [vmem:[%s4238_s29 + $0x4c] sm:$0xf] %v218_v19  ;;  %v220_v20 = vld [vmem:[%s4231_s28 + $0xa0] sm:$0xf] }
  0x23   : > { %v222_v21 = vld [vmem:[%s4231_s28 + $0xa8] sm:$0xf]  ;;  %v224_v22 = vld [vmem:[%s4231_s28 + $0xb0] sm:$0xf]  ;;  %221 = vst [vmem:[%s4238_s29 + $0x50] sm:$0xf] %v220_v20 }
  0x24   : > { %223 = vst [vmem:[%s4238_s29 + $0x54] sm:$0xf] %v222_v21  ;;  %225 = vst [vmem:[%s4238_s29 + $0x58] sm:$0xf] %v224_v22  ;;  %v226_v23 = vld [vmem:[%s4231_s28 + $0xb8] sm:$0xf] }
  0x25   : > { %v228_v24 = vld [vmem:[%s4231_s28 + $0xc0] sm:$0xf]  ;;  %v230_v25 = vld [vmem:[%s4231_s28 + $0xc8] sm:$0xf]  ;;  %227 = vst [vmem:[%s4238_s29 + $0x5c] sm:$0xf] %v226_v23 }
  0x26   : > { %229 = vst [vmem:[%s4238_s29 + $0x60] sm:$0xf] %v228_v24  ;;  %231 = vst [vmem:[%s4238_s29 + $0x64] sm:$0xf] %v230_v25  ;;  %v232_v26 = vld [vmem:[%s4231_s28 + $0xd0] sm:$0xf] }
  0x27   : > { %v234_v27 = vld [vmem:[%s4231_s28 + $0xd8] sm:$0xf]  ;;  %v236_v28 = vld [vmem:[%s4231_s28 + $0xe0] sm:$0xf]  ;;  %233 = vst [vmem:[%s4238_s29 + $0x68] sm:$0xf] %v232_v26 }
  0x28   : > { %235 = vst [vmem:[%s4238_s29 + $0x6c] sm:$0xf] %v234_v27  ;;  %237 = vst [vmem:[%s4238_s29 + $0x70] sm:$0xf] %v236_v28  ;;  %v238_v29 = vld [vmem:[%s4231_s28 + $0xe8] sm:$0xf] }
  0x29   : > { %v240_v30 = vld [vmem:[%s4231_s28 + $0xf0] sm:$0xf]  ;;  %v242_v31 = vld [vmem:[%s4231_s28 + $0xf8] sm:$0xf]  ;;  %239 = vst [vmem:[%s4238_s29 + $0x74] sm:$0xf] %v238_v29 }
  0x2a   : > { %241 = vst [vmem:[%s4238_s29 + $0x78] sm:$0xf] %v240_v30  ;;  %243 = vst [vmem:[%s4238_s29 + $0x7c] sm:$0xf] %v242_v31  ;;  %v244_v32 = vld [vmem:[%s4231_s28 + $0x100] sm:$0xf] }
  0x2b   : > { %v246_v33 = vld [vmem:[%s4231_s28 + $0x108] sm:$0xf]  ;;  %v248_v34 = vld [vmem:[%s4231_s28 + $0x110] sm:$0xf]  ;;  %245 = vst [vmem:[%s4238_s29 + $0x80] sm:$0xf] %v244_v32 }
  0x2c   : > { %247 = vst [vmem:[%s4238_s29 + $0x84] sm:$0xf] %v246_v33  ;;  %249 = vst [vmem:[%s4238_s29 + $0x88] sm:$0xf] %v248_v34  ;;  %v250_v35 = vld [vmem:[%s4231_s28 + $0x118] sm:$0xf] }
  0x2d   : > { %v252_v36 = vld [vmem:[%s4231_s28 + $0x120] sm:$0xf]  ;;  %v254_v37 = vld [vmem:[%s4231_s28 + $0x128] sm:$0xf]  ;;  %251 = vst [vmem:[%s4238_s29 + $0x8c] sm:$0xf] %v250_v35 }
  0x2e   : > { %253 = vst [vmem:[%s4238_s29 + $0x90] sm:$0xf] %v252_v36  ;;  %255 = vst [vmem:[%s4238_s29 + $0x94] sm:$0xf] %v254_v37  ;;  %v256_v38 = vld [vmem:[%s4231_s28 + $0x130] sm:$0xf] }
  0x2f   : > { %v258_v39 = vld [vmem:[%s4231_s28 + $0x138] sm:$0xf]  ;;  %v260_v40 = vld [vmem:[%s4231_s28 + $0x140] sm:$0xf]  ;;  %257 = vst [vmem:[%s4238_s29 + $0x98] sm:$0xf] %v256_v38 }
  0x30   : > { %259 = vst [vmem:[%s4238_s29 + $0x9c] sm:$0xf] %v258_v39  ;;  %261 = vst [vmem:[%s4238_s29 + $0xa0] sm:$0xf] %v260_v40  ;;  %v262_v41 = vld [vmem:[%s4231_s28 + $0x148] sm:$0xf] }
  0x31   : > { %v264_v42 = vld [vmem:[%s4231_s28 + $0x150] sm:$0xf]  ;;  %v266_v43 = vld [vmem:[%s4231_s28 + $0x158] sm:$0xf]  ;;  %263 = vst [vmem:[%s4238_s29 + $0xa4] sm:$0xf] %v262_v41 }
  0x32   : > { %265 = vst [vmem:[%s4238_s29 + $0xa8] sm:$0xf] %v264_v42  ;;  %267 = vst [vmem:[%s4238_s29 + $0xac] sm:$0xf] %v266_v43  ;;  %v268_v44 = vld [vmem:[%s4231_s28 + $0x160] sm:$0xf] }
  0x33   : > { %v270_v45 = vld [vmem:[%s4231_s28 + $0x168] sm:$0xf]  ;;  %v272_v46 = vld [vmem:[%s4231_s28 + $0x170] sm:$0xf]  ;;  %269 = vst [vmem:[%s4238_s29 + $0xb0] sm:$0xf] %v268_v44 }
  0x34   : > { %271 = vst [vmem:[%s4238_s29 + $0xb4] sm:$0xf] %v270_v45  ;;  %273 = vst [vmem:[%s4238_s29 + $0xb8] sm:$0xf] %v272_v46  ;;  %v274_v47 = vld [vmem:[%s4231_s28 + $0x178] sm:$0xf] }
  0x35   : > { %v276_v48 = vld [vmem:[%s4231_s28 + $0x180] sm:$0xf]  ;;  %v278_v49 = vld [vmem:[%s4231_s28 + $0x188] sm:$0xf]  ;;  %275 = vst [vmem:[%s4238_s29 + $0xbc] sm:$0xf] %v274_v47 }
  0x36   : > { %277 = vst [vmem:[%s4238_s29 + $0xc0] sm:$0xf] %v276_v48  ;;  %279 = vst [vmem:[%s4238_s29 + $0xc4] sm:$0xf] %v278_v49  ;;  %v280_v50 = vld [vmem:[%s4231_s28 + $0x190] sm:$0xf] }
  0x37   : > { %v282_v51 = vld [vmem:[%s4231_s28 + $0x198] sm:$0xf]  ;;  %v284_v52 = vld [vmem:[%s4231_s28 + $0x1a0] sm:$0xf]  ;;  %281 = vst [vmem:[%s4238_s29 + $0xc8] sm:$0xf] %v280_v50 }
  0x38   : > { %283 = vst [vmem:[%s4238_s29 + $0xcc] sm:$0xf] %v282_v51  ;;  %285 = vst [vmem:[%s4238_s29 + $0xd0] sm:$0xf] %v284_v52  ;;  %v286_v53 = vld [vmem:[%s4231_s28 + $0x1a8] sm:$0xf] }
  0x39   : > { %v288_v54 = vld [vmem:[%s4231_s28 + $0x1b0] sm:$0xf]  ;;  %v290_v55 = vld [vmem:[%s4231_s28 + $0x1b8] sm:$0xf]  ;;  %287 = vst [vmem:[%s4238_s29 + $0xd4] sm:$0xf] %v286_v53 }
  0x3a   : > { %289 = vst [vmem:[%s4238_s29 + $0xd8] sm:$0xf] %v288_v54  ;;  %291 = vst [vmem:[%s4238_s29 + $0xdc] sm:$0xf] %v290_v55  ;;  %v292_v56 = vld [vmem:[%s4231_s28 + $0x1c0] sm:$0xf] }
  0x3b   : > { %v294_v57 = vld [vmem:[%s4231_s28 + $0x1c8] sm:$0xf]  ;;  %v296_v58 = vld [vmem:[%s4231_s28 + $0x1d0] sm:$0xf]  ;;  %293 = vst [vmem:[%s4238_s29 + $0xe0] sm:$0xf] %v292_v56 }
  0x3c   : > { %295 = vst [vmem:[%s4238_s29 + $0xe4] sm:$0xf] %v294_v57  ;;  %297 = vst [vmem:[%s4238_s29 + $0xe8] sm:$0xf] %v296_v58  ;;  %v298_v59 = vld [vmem:[%s4231_s28 + $0x1d8] sm:$0xf] }
  0x3d   : > { %v300_v60 = vld [vmem:[%s4231_s28 + $0x1e0] sm:$0xf]  ;;  %v302_v61 = vld [vmem:[%s4231_s28 + $0x1e8] sm:$0xf]  ;;  %299 = vst [vmem:[%s4238_s29 + $0xec] sm:$0xf] %v298_v59 }
  0x3e   : > { %301 = vst [vmem:[%s4238_s29 + $0xf0] sm:$0xf] %v300_v60  ;;  %303 = vst [vmem:[%s4238_s29 + $0xf4] sm:$0xf] %v302_v61  ;;  %v304_v62 = vld [vmem:[%s4231_s28 + $0x1f0] sm:$0xf] }
  0x3f   : > { %v306_v63 = vld [vmem:[%s4231_s28 + $0x1f8] sm:$0xf]  ;;  %v308_v0 = vld [vmem:[%s4231_s28 + $0x200] sm:$0xf]  ;;  %305 = vst [vmem:[%s4238_s29 + $0xf8] sm:$0xf] %v304_v62 }
  0x40   : > { %307 = vst [vmem:[%s4238_s29 + $0xfc] sm:$0xf] %v306_v63  ;;  %309 = vst [vmem:[%s4238_s29 + $0x100] sm:$0xf] %v308_v0  ;;  %v310_v1 = vld [vmem:[%s4231_s28 + $0x208] sm:$0xf] }
  0x41   : > { %v312_v2 = vld [vmem:[%s4231_s28 + $0x210] sm:$0xf]  ;;  %v314_v3 = vld [vmem:[%s4231_s28 + $0x218] sm:$0xf]  ;;  %311 = vst [vmem:[%s4238_s29 + $0x104] sm:$0xf] %v310_v1 }
  0x42   : > { %313 = vst [vmem:[%s4238_s29 + $0x108] sm:$0xf] %v312_v2  ;;  %315 = vst [vmem:[%s4238_s29 + $0x10c] sm:$0xf] %v314_v3  ;;  %v316_v4 = vld [vmem:[%s4231_s28 + $0x220] sm:$0xf] }
  0x43   : > { %v318_v5 = vld [vmem:[%s4231_s28 + $0x228] sm:$0xf]  ;;  %v320_v6 = vld [vmem:[%s4231_s28 + $0x230] sm:$0xf]  ;;  %317 = vst [vmem:[%s4238_s29 + $0x110] sm:$0xf] %v316_v4 }
  0x44   : > { %319 = vst [vmem:[%s4238_s29 + $0x114] sm:$0xf] %v318_v5  ;;  %321 = vst [vmem:[%s4238_s29 + $0x118] sm:$0xf] %v320_v6  ;;  %v322_v7 = vld [vmem:[%s4231_s28 + $0x238] sm:$0xf] }
  0x45   : > { %v324_v8 = vld [vmem:[%s4231_s28 + $0x240] sm:$0xf]  ;;  %v326_v9 = vld [vmem:[%s4231_s28 + $0x248] sm:$0xf]  ;;  %323 = vst [vmem:[%s4238_s29 + $0x11c] sm:$0xf] %v322_v7 }
  0x46   : > { %325 = vst [vmem:[%s4238_s29 + $0x120] sm:$0xf] %v324_v8  ;;  %327 = vst [vmem:[%s4238_s29 + $0x124] sm:$0xf] %v326_v9  ;;  %v328_v10 = vld [vmem:[%s4231_s28 + $0x250] sm:$0xf] }
  0x47   : > { %v330_v11 = vld [vmem:[%s4231_s28 + $0x258] sm:$0xf]  ;;  %v332_v12 = vld [vmem:[%s4231_s28 + $0x260] sm:$0xf]  ;;  %329 = vst [vmem:[%s4238_s29 + $0x128] sm:$0xf] %v328_v10 }
  0x48   : > { %331 = vst [vmem:[%s4238_s29 + $0x12c] sm:$0xf] %v330_v11  ;;  %333 = vst [vmem:[%s4238_s29 + $0x130] sm:$0xf] %v332_v12  ;;  %v334_v13 = vld [vmem:[%s4231_s28 + $0x268] sm:$0xf] }
  0x49   : > { %v336_v14 = vld [vmem:[%s4231_s28 + $0x270] sm:$0xf]  ;;  %v338_v15 = vld [vmem:[%s4231_s28 + $0x278] sm:$0xf]  ;;  %335 = vst [vmem:[%s4238_s29 + $0x134] sm:$0xf] %v334_v13 }
  0x4a   : > { %337 = vst [vmem:[%s4238_s29 + $0x138] sm:$0xf] %v336_v14  ;;  %339 = vst [vmem:[%s4238_s29 + $0x13c] sm:$0xf] %v338_v15  ;;  %v340_v16 = vld [vmem:[%s4231_s28 + $0x280] sm:$0xf] }
  0x4b   : > { %v342_v17 = vld [vmem:[%s4231_s28 + $0x288] sm:$0xf]  ;;  %v344_v18 = vld [vmem:[%s4231_s28 + $0x290] sm:$0xf]  ;;  %341 = vst [vmem:[%s4238_s29 + $0x140] sm:$0xf] %v340_v16 }
  0x4c   : > { %343 = vst [vmem:[%s4238_s29 + $0x144] sm:$0xf] %v342_v17  ;;  %345 = vst [vmem:[%s4238_s29 + $0x148] sm:$0xf] %v344_v18  ;;  %v346_v19 = vld [vmem:[%s4231_s28 + $0x298] sm:$0xf] }
  0x4d   : > { %v348_v20 = vld [vmem:[%s4231_s28 + $0x2a0] sm:$0xf]  ;;  %v350_v21 = vld [vmem:[%s4231_s28 + $0x2a8] sm:$0xf]  ;;  %347 = vst [vmem:[%s4238_s29 + $0x14c] sm:$0xf] %v346_v19 }
  0x4e   : > { %349 = vst [vmem:[%s4238_s29 + $0x150] sm:$0xf] %v348_v20  ;;  %351 = vst [vmem:[%s4238_s29 + $0x154] sm:$0xf] %v350_v21  ;;  %v352_v22 = vld [vmem:[%s4231_s28 + $0x2b0] sm:$0xf] }
  0x4f   : > { %v354_v23 = vld [vmem:[%s4231_s28 + $0x2b8] sm:$0xf]  ;;  %v356_v24 = vld [vmem:[%s4231_s28 + $0x2c0] sm:$0xf]  ;;  %353 = vst [vmem:[%s4238_s29 + $0x158] sm:$0xf] %v352_v22 }
  0x50   : > { %355 = vst [vmem:[%s4238_s29 + $0x15c] sm:$0xf] %v354_v23  ;;  %357 = vst [vmem:[%s4238_s29 + $0x160] sm:$0xf] %v356_v24  ;;  %v358_v25 = vld [vmem:[%s4231_s28 + $0x2c8] sm:$0xf] }
  0x51   : > { %v360_v26 = vld [vmem:[%s4231_s28 + $0x2d0] sm:$0xf]  ;;  %v362_v27 = vld [vmem:[%s4231_s28 + $0x2d8] sm:$0xf]  ;;  %359 = vst [vmem:[%s4238_s29 + $0x164] sm:$0xf] %v358_v25 }
  0x52   : > { %361 = vst [vmem:[%s4238_s29 + $0x168] sm:$0xf] %v360_v26  ;;  %363 = vst [vmem:[%s4238_s29 + $0x16c] sm:$0xf] %v362_v27  ;;  %v364_v28 = vld [vmem:[%s4231_s28 + $0x2e0] sm:$0xf] }
  0x53   : > { %v366_v29 = vld [vmem:[%s4231_s28 + $0x2e8] sm:$0xf]  ;;  %v368_v30 = vld [vmem:[%s4231_s28 + $0x2f0] sm:$0xf]  ;;  %365 = vst [vmem:[%s4238_s29 + $0x170] sm:$0xf] %v364_v28 }
  0x54   : > { %367 = vst [vmem:[%s4238_s29 + $0x174] sm:$0xf] %v366_v29  ;;  %369 = vst [vmem:[%s4238_s29 + $0x178] sm:$0xf] %v368_v30  ;;  %v370_v31 = vld [vmem:[%s4231_s28 + $0x2f8] sm:$0xf] }
  0x55   : > { %v372_v32 = vld [vmem:[%s4231_s28 + $0x300] sm:$0xf]  ;;  %v374_v33 = vld [vmem:[%s4231_s28 + $0x308] sm:$0xf]  ;;  %371 = vst [vmem:[%s4238_s29 + $0x17c] sm:$0xf] %v370_v31 }
  0x56   : > { %373 = vst [vmem:[%s4238_s29 + $0x180] sm:$0xf] %v372_v32  ;;  %375 = vst [vmem:[%s4238_s29 + $0x184] sm:$0xf] %v374_v33  ;;  %v376_v34 = vld [vmem:[%s4231_s28 + $0x310] sm:$0xf] }
  0x57   : > { %v378_v35 = vld [vmem:[%s4231_s28 + $0x318] sm:$0xf]  ;;  %v380_v36 = vld [vmem:[%s4231_s28 + $0x320] sm:$0xf]  ;;  %377 = vst [vmem:[%s4238_s29 + $0x188] sm:$0xf] %v376_v34 }
  0x58   : > { %379 = vst [vmem:[%s4238_s29 + $0x18c] sm:$0xf] %v378_v35  ;;  %381 = vst [vmem:[%s4238_s29 + $0x190] sm:$0xf] %v380_v36  ;;  %v382_v37 = vld [vmem:[%s4231_s28 + $0x328] sm:$0xf] }
  0x59   : > { %v384_v38 = vld [vmem:[%s4231_s28 + $0x330] sm:$0xf]  ;;  %v386_v39 = vld [vmem:[%s4231_s28 + $0x338] sm:$0xf]  ;;  %383 = vst [vmem:[%s4238_s29 + $0x194] sm:$0xf] %v382_v37 }
  0x5a   : > { %385 = vst [vmem:[%s4238_s29 + $0x198] sm:$0xf] %v384_v38  ;;  %387 = vst [vmem:[%s4238_s29 + $0x19c] sm:$0xf] %v386_v39  ;;  %v388_v40 = vld [vmem:[%s4231_s28 + $0x340] sm:$0xf] }
  0x5b   : > { %v390_v41 = vld [vmem:[%s4231_s28 + $0x348] sm:$0xf]  ;;  %v392_v42 = vld [vmem:[%s4231_s28 + $0x350] sm:$0xf]  ;;  %389 = vst [vmem:[%s4238_s29 + $0x1a0] sm:$0xf] %v388_v40 }
  0x5c   : > { %391 = vst [vmem:[%s4238_s29 + $0x1a4] sm:$0xf] %v390_v41  ;;  %393 = vst [vmem:[%s4238_s29 + $0x1a8] sm:$0xf] %v392_v42  ;;  %v394_v43 = vld [vmem:[%s4231_s28 + $0x358] sm:$0xf] }
  0x5d   : > { %v396_v44 = vld [vmem:[%s4231_s28 + $0x360] sm:$0xf]  ;;  %v398_v45 = vld [vmem:[%s4231_s28 + $0x368] sm:$0xf]  ;;  %395 = vst [vmem:[%s4238_s29 + $0x1ac] sm:$0xf] %v394_v43 }
  0x5e   : > { %397 = vst [vmem:[%s4238_s29 + $0x1b0] sm:$0xf] %v396_v44  ;;  %399 = vst [vmem:[%s4238_s29 + $0x1b4] sm:$0xf] %v398_v45  ;;  %v400_v46 = vld [vmem:[%s4231_s28 + $0x370] sm:$0xf] }
  0x5f   : > { %v402_v47 = vld [vmem:[%s4231_s28 + $0x378] sm:$0xf]  ;;  %v404_v48 = vld [vmem:[%s4231_s28 + $0x380] sm:$0xf]  ;;  %401 = vst [vmem:[%s4238_s29 + $0x1b8] sm:$0xf] %v400_v46 }
  0x60   : > { %403 = vst [vmem:[%s4238_s29 + $0x1bc] sm:$0xf] %v402_v47  ;;  %405 = vst [vmem:[%s4238_s29 + $0x1c0] sm:$0xf] %v404_v48  ;;  %v406_v49 = vld [vmem:[%s4231_s28 + $0x388] sm:$0xf] }
  0x61   : > { %v408_v50 = vld [vmem:[%s4231_s28 + $0x390] sm:$0xf]  ;;  %v410_v51 = vld [vmem:[%s4231_s28 + $0x398] sm:$0xf]  ;;  %407 = vst [vmem:[%s4238_s29 + $0x1c4] sm:$0xf] %v406_v49 }
  0x62   : > { %409 = vst [vmem:[%s4238_s29 + $0x1c8] sm:$0xf] %v408_v50  ;;  %411 = vst [vmem:[%s4238_s29 + $0x1cc] sm:$0xf] %v410_v51  ;;  %v412_v52 = vld [vmem:[%s4231_s28 + $0x3a0] sm:$0xf] }
  0x63   : > { %v414_v53 = vld [vmem:[%s4231_s28 + $0x3a8] sm:$0xf]  ;;  %v416_v54 = vld [vmem:[%s4231_s28 + $0x3b0] sm:$0xf]  ;;  %413 = vst [vmem:[%s4238_s29 + $0x1d0] sm:$0xf] %v412_v52 }
  0x64   : > { %415 = vst [vmem:[%s4238_s29 + $0x1d4] sm:$0xf] %v414_v53  ;;  %417 = vst [vmem:[%s4238_s29 + $0x1d8] sm:$0xf] %v416_v54  ;;  %v418_v55 = vld [vmem:[%s4231_s28 + $0x3b8] sm:$0xf] }
  0x65   : > { %v420_v56 = vld [vmem:[%s4231_s28 + $0x3c0] sm:$0xf]  ;;  %v422_v57 = vld [vmem:[%s4231_s28 + $0x3c8] sm:$0xf]  ;;  %419 = vst [vmem:[%s4238_s29 + $0x1dc] sm:$0xf] %v418_v55 }
  0x66   : > { %421 = vst [vmem:[%s4238_s29 + $0x1e0] sm:$0xf] %v420_v56  ;;  %423 = vst [vmem:[%s4238_s29 + $0x1e4] sm:$0xf] %v422_v57  ;;  %v424_v58 = vld [vmem:[%s4231_s28 + $0x3d0] sm:$0xf] }
  0x67   : > { %v426_v59 = vld [vmem:[%s4231_s28 + $0x3d8] sm:$0xf]  ;;  %v428_v60 = vld [vmem:[%s4231_s28 + $0x3e0] sm:$0xf]  ;;  %425 = vst [vmem:[%s4238_s29 + $0x1e8] sm:$0xf] %v424_v58 }
  0x68   : > { %427 = vst [vmem:[%s4238_s29 + $0x1ec] sm:$0xf] %v426_v59  ;;  %429 = vst [vmem:[%s4238_s29 + $0x1f0] sm:$0xf] %v428_v60  ;;  %v430_v61 = vld [vmem:[%s4231_s28 + $0x3e8] sm:$0xf] }
  0x69   : > { %v432_v62 = vld [vmem:[%s4231_s28 + $0x3f0] sm:$0xf]  ;;  %v434_v63 = vld [vmem:[%s4231_s28 + $0x3f8] sm:$0xf]  ;;  %431 = vst [vmem:[%s4238_s29 + $0x1f4] sm:$0xf] %v430_v61 }
  0x6a   : > { %433 = vst [vmem:[%s4238_s29 + $0x1f8] sm:$0xf] %v432_v62  ;;  %435 = vst [vmem:[%s4238_s29 + $0x1fc] sm:$0xf] %v434_v63  ;;  %v436_v0 = vld [vmem:[%s4231_s28 + $0x400] sm:$0xf] }
  0x6b   : > { %v438_v1 = vld [vmem:[%s4231_s28 + $0x408] sm:$0xf]  ;;  %v440_v2 = vld [vmem:[%s4231_s28 + $0x410] sm:$0xf]  ;;  %437 = vst [vmem:[%s4238_s29 + $0x200] sm:$0xf] %v436_v0 }
  0x6c   : > { %439 = vst [vmem:[%s4238_s29 + $0x204] sm:$0xf] %v438_v1  ;;  %441 = vst [vmem:[%s4238_s29 + $0x208] sm:$0xf] %v440_v2  ;;  %v442_v3 = vld [vmem:[%s4231_s28 + $0x418] sm:$0xf] }
  0x6d   : > { %v444_v4 = vld [vmem:[%s4231_s28 + $0x420] sm:$0xf]  ;;  %v446_v5 = vld [vmem:[%s4231_s28 + $0x428] sm:$0xf]  ;;  %443 = vst [vmem:[%s4238_s29 + $0x20c] sm:$0xf] %v442_v3 }
  0x6e   : > { %445 = vst [vmem:[%s4238_s29 + $0x210] sm:$0xf] %v444_v4  ;;  %447 = vst [vmem:[%s4238_s29 + $0x214] sm:$0xf] %v446_v5  ;;  %v448_v6 = vld [vmem:[%s4231_s28 + $0x430] sm:$0xf] }
  0x6f   : > { %v450_v7 = vld [vmem:[%s4231_s28 + $0x438] sm:$0xf]  ;;  %v452_v8 = vld [vmem:[%s4231_s28 + $0x440] sm:$0xf]  ;;  %449 = vst [vmem:[%s4238_s29 + $0x218] sm:$0xf] %v448_v6 }
  0x70   : > { %451 = vst [vmem:[%s4238_s29 + $0x21c] sm:$0xf] %v450_v7  ;;  %453 = vst [vmem:[%s4238_s29 + $0x220] sm:$0xf] %v452_v8  ;;  %v454_v9 = vld [vmem:[%s4231_s28 + $0x448] sm:$0xf] }
  0x71   : > { %v456_v10 = vld [vmem:[%s4231_s28 + $0x450] sm:$0xf]  ;;  %v458_v11 = vld [vmem:[%s4231_s28 + $0x458] sm:$0xf]  ;;  %455 = vst [vmem:[%s4238_s29 + $0x224] sm:$0xf] %v454_v9 }
  0x72   : > { %457 = vst [vmem:[%s4238_s29 + $0x228] sm:$0xf] %v456_v10  ;;  %459 = vst [vmem:[%s4238_s29 + $0x22c] sm:$0xf] %v458_v11  ;;  %v460_v12 = vld [vmem:[%s4231_s28 + $0x460] sm:$0xf] }
  0x73   : > { %v462_v13 = vld [vmem:[%s4231_s28 + $0x468] sm:$0xf]  ;;  %v464_v14 = vld [vmem:[%s4231_s28 + $0x470] sm:$0xf]  ;;  %461 = vst [vmem:[%s4238_s29 + $0x230] sm:$0xf] %v460_v12 }
  0x74   : > { %463 = vst [vmem:[%s4238_s29 + $0x234] sm:$0xf] %v462_v13  ;;  %465 = vst [vmem:[%s4238_s29 + $0x238] sm:$0xf] %v464_v14  ;;  %v466_v15 = vld [vmem:[%s4231_s28 + $0x478] sm:$0xf] }
  0x75   : > { %v468_v16 = vld [vmem:[%s4231_s28 + $0x480] sm:$0xf]  ;;  %v470_v17 = vld [vmem:[%s4231_s28 + $0x488] sm:$0xf]  ;;  %467 = vst [vmem:[%s4238_s29 + $0x23c] sm:$0xf] %v466_v15 }
  0x76   : > { %469 = vst [vmem:[%s4238_s29 + $0x240] sm:$0xf] %v468_v16  ;;  %471 = vst [vmem:[%s4238_s29 + $0x244] sm:$0xf] %v470_v17  ;;  %v472_v18 = vld [vmem:[%s4231_s28 + $0x490] sm:$0xf] }
  0x77   : > { %v474_v19 = vld [vmem:[%s4231_s28 + $0x498] sm:$0xf]  ;;  %v476_v20 = vld [vmem:[%s4231_s28 + $0x4a0] sm:$0xf]  ;;  %473 = vst [vmem:[%s4238_s29 + $0x248] sm:$0xf] %v472_v18 }
  0x78   : > { %475 = vst [vmem:[%s4238_s29 + $0x24c] sm:$0xf] %v474_v19  ;;  %477 = vst [vmem:[%s4238_s29 + $0x250] sm:$0xf] %v476_v20  ;;  %v478_v21 = vld [vmem:[%s4231_s28 + $0x4a8] sm:$0xf] }
  0x79   : > { %v480_v22 = vld [vmem:[%s4231_s28 + $0x4b0] sm:$0xf]  ;;  %v482_v23 = vld [vmem:[%s4231_s28 + $0x4b8] sm:$0xf]  ;;  %479 = vst [vmem:[%s4238_s29 + $0x254] sm:$0xf] %v478_v21 }
  0x7a   : > { %481 = vst [vmem:[%s4238_s29 + $0x258] sm:$0xf] %v480_v22  ;;  %483 = vst [vmem:[%s4238_s29 + $0x25c] sm:$0xf] %v482_v23  ;;  %v484_v24 = vld [vmem:[%s4231_s28 + $0x4c0] sm:$0xf] }
  0x7b   : > { %v486_v25 = vld [vmem:[%s4231_s28 + $0x4c8] sm:$0xf]  ;;  %v488_v26 = vld [vmem:[%s4231_s28 + $0x4d0] sm:$0xf]  ;;  %485 = vst [vmem:[%s4238_s29 + $0x260] sm:$0xf] %v484_v24 }
  0x7c   : > { %487 = vst [vmem:[%s4238_s29 + $0x264] sm:$0xf] %v486_v25  ;;  %489 = vst [vmem:[%s4238_s29 + $0x268] sm:$0xf] %v488_v26  ;;  %v490_v27 = vld [vmem:[%s4231_s28 + $0x4d8] sm:$0xf] }
  0x7d   : > { %v492_v28 = vld [vmem:[%s4231_s28 + $0x4e0] sm:$0xf]  ;;  %v494_v29 = vld [vmem:[%s4231_s28 + $0x4e8] sm:$0xf]  ;;  %491 = vst [vmem:[%s4238_s29 + $0x26c] sm:$0xf] %v490_v27 }
  0x7e   : > { %493 = vst [vmem:[%s4238_s29 + $0x270] sm:$0xf] %v492_v28  ;;  %495 = vst [vmem:[%s4238_s29 + $0x274] sm:$0xf] %v494_v29  ;;  %v496_v30 = vld [vmem:[%s4231_s28 + $0x4f0] sm:$0xf] }
  0x7f   : > { %v498_v31 = vld [vmem:[%s4231_s28 + $0x4f8] sm:$0xf]  ;;  %v500_v32 = vld [vmem:[%s4231_s28 + $0x500] sm:$0xf]  ;;  %497 = vst [vmem:[%s4238_s29 + $0x278] sm:$0xf] %v496_v30 }
  0x80   : > { %499 = vst [vmem:[%s4238_s29 + $0x27c] sm:$0xf] %v498_v31  ;;  %501 = vst [vmem:[%s4238_s29 + $0x280] sm:$0xf] %v500_v32  ;;  %v502_v33 = vld [vmem:[%s4231_s28 + $0x508] sm:$0xf] }
  0x81   : > { %v504_v34 = vld [vmem:[%s4231_s28 + $0x510] sm:$0xf]  ;;  %v506_v35 = vld [vmem:[%s4231_s28 + $0x518] sm:$0xf]  ;;  %503 = vst [vmem:[%s4238_s29 + $0x284] sm:$0xf] %v502_v33 }
  0x82   : > { %505 = vst [vmem:[%s4238_s29 + $0x288] sm:$0xf] %v504_v34  ;;  %507 = vst [vmem:[%s4238_s29 + $0x28c] sm:$0xf] %v506_v35  ;;  %v508_v36 = vld [vmem:[%s4231_s28 + $0x520] sm:$0xf] }
  0x83   : > { %v510_v37 = vld [vmem:[%s4231_s28 + $0x528] sm:$0xf]  ;;  %v512_v38 = vld [vmem:[%s4231_s28 + $0x530] sm:$0xf]  ;;  %509 = vst [vmem:[%s4238_s29 + $0x290] sm:$0xf] %v508_v36 }
  0x84   : > { %511 = vst [vmem:[%s4238_s29 + $0x294] sm:$0xf] %v510_v37  ;;  %513 = vst [vmem:[%s4238_s29 + $0x298] sm:$0xf] %v512_v38  ;;  %v514_v39 = vld [vmem:[%s4231_s28 + $0x538] sm:$0xf] }
  0x85   : > { %v516_v40 = vld [vmem:[%s4231_s28 + $0x540] sm:$0xf]  ;;  %v518_v41 = vld [vmem:[%s4231_s28 + $0x548] sm:$0xf]  ;;  %515 = vst [vmem:[%s4238_s29 + $0x29c] sm:$0xf] %v514_v39 }
  0x86   : > { %517 = vst [vmem:[%s4238_s29 + $0x2a0] sm:$0xf] %v516_v40  ;;  %519 = vst [vmem:[%s4238_s29 + $0x2a4] sm:$0xf] %v518_v41  ;;  %v520_v42 = vld [vmem:[%s4231_s28 + $0x550] sm:$0xf] }
  0x87   : > { %v522_v43 = vld [vmem:[%s4231_s28 + $0x558] sm:$0xf]  ;;  %v524_v44 = vld [vmem:[%s4231_s28 + $0x560] sm:$0xf]  ;;  %521 = vst [vmem:[%s4238_s29 + $0x2a8] sm:$0xf] %v520_v42 }
  0x88   : > { %523 = vst [vmem:[%s4238_s29 + $0x2ac] sm:$0xf] %v522_v43  ;;  %525 = vst [vmem:[%s4238_s29 + $0x2b0] sm:$0xf] %v524_v44  ;;  %v526_v45 = vld [vmem:[%s4231_s28 + $0x568] sm:$0xf] }
  0x89   : > { %v528_v46 = vld [vmem:[%s4231_s28 + $0x570] sm:$0xf]  ;;  %v530_v47 = vld [vmem:[%s4231_s28 + $0x578] sm:$0xf]  ;;  %527 = vst [vmem:[%s4238_s29 + $0x2b4] sm:$0xf] %v526_v45 }
  0x8a   : > { %529 = vst [vmem:[%s4238_s29 + $0x2b8] sm:$0xf] %v528_v46  ;;  %531 = vst [vmem:[%s4238_s29 + $0x2bc] sm:$0xf] %v530_v47  ;;  %v532_v48 = vld [vmem:[%s4231_s28 + $0x580] sm:$0xf] }
  0x8b   : > { %v534_v49 = vld [vmem:[%s4231_s28 + $0x588] sm:$0xf]  ;;  %v536_v50 = vld [vmem:[%s4231_s28 + $0x590] sm:$0xf]  ;;  %533 = vst [vmem:[%s4238_s29 + $0x2c0] sm:$0xf] %v532_v48 }
  0x8c   : > { %535 = vst [vmem:[%s4238_s29 + $0x2c4] sm:$0xf] %v534_v49  ;;  %537 = vst [vmem:[%s4238_s29 + $0x2c8] sm:$0xf] %v536_v50  ;;  %v538_v51 = vld [vmem:[%s4231_s28 + $0x598] sm:$0xf] }
  0x8d   : > { %v540_v52 = vld [vmem:[%s4231_s28 + $0x5a0] sm:$0xf]  ;;  %v542_v53 = vld [vmem:[%s4231_s28 + $0x5a8] sm:$0xf]  ;;  %539 = vst [vmem:[%s4238_s29 + $0x2cc] sm:$0xf] %v538_v51 }
  0x8e   : > { %541 = vst [vmem:[%s4238_s29 + $0x2d0] sm:$0xf] %v540_v52  ;;  %543 = vst [vmem:[%s4238_s29 + $0x2d4] sm:$0xf] %v542_v53  ;;  %v544_v54 = vld [vmem:[%s4231_s28 + $0x5b0] sm:$0xf] }
  0x8f   : > { %v546_v55 = vld [vmem:[%s4231_s28 + $0x5b8] sm:$0xf]  ;;  %v548_v56 = vld [vmem:[%s4231_s28 + $0x5c0] sm:$0xf]  ;;  %545 = vst [vmem:[%s4238_s29 + $0x2d8] sm:$0xf] %v544_v54 }
  0x90   : > { %547 = vst [vmem:[%s4238_s29 + $0x2dc] sm:$0xf] %v546_v55  ;;  %549 = vst [vmem:[%s4238_s29 + $0x2e0] sm:$0xf] %v548_v56  ;;  %v550_v57 = vld [vmem:[%s4231_s28 + $0x5c8] sm:$0xf] }
  0x91   : > { %v552_v58 = vld [vmem:[%s4231_s28 + $0x5d0] sm:$0xf]  ;;  %v554_v59 = vld [vmem:[%s4231_s28 + $0x5d8] sm:$0xf]  ;;  %551 = vst [vmem:[%s4238_s29 + $0x2e4] sm:$0xf] %v550_v57 }
  0x92   : > { %553 = vst [vmem:[%s4238_s29 + $0x2e8] sm:$0xf] %v552_v58  ;;  %555 = vst [vmem:[%s4238_s29 + $0x2ec] sm:$0xf] %v554_v59  ;;  %v556_v60 = vld [vmem:[%s4231_s28 + $0x5e0] sm:$0xf] }
  0x93   : > { %v558_v61 = vld [vmem:[%s4231_s28 + $0x5e8] sm:$0xf]  ;;  %v560_v62 = vld [vmem:[%s4231_s28 + $0x5f0] sm:$0xf]  ;;  %557 = vst [vmem:[%s4238_s29 + $0x2f0] sm:$0xf] %v556_v60 }
  0x94   : > { %559 = vst [vmem:[%s4238_s29 + $0x2f4] sm:$0xf] %v558_v61  ;;  %561 = vst [vmem:[%s4238_s29 + $0x2f8] sm:$0xf] %v560_v62  ;;  %v562_v63 = vld [vmem:[%s4231_s28 + $0x5f8] sm:$0xf] }
  0x95   : > { %v564_v0 = vld [vmem:[%s4231_s28 + $0x600] sm:$0xf]  ;;  %v566_v1 = vld [vmem:[%s4231_s28 + $0x608] sm:$0xf]  ;;  %563 = vst [vmem:[%s4238_s29 + $0x2fc] sm:$0xf] %v562_v63 }
  0x96   : > { %565 = vst [vmem:[%s4238_s29 + $0x300] sm:$0xf] %v564_v0  ;;  %567 = vst [vmem:[%s4238_s29 + $0x304] sm:$0xf] %v566_v1  ;;  %v568_v2 = vld [vmem:[%s4231_s28 + $0x610] sm:$0xf] }
  0x97   : > { %v570_v3 = vld [vmem:[%s4231_s28 + $0x618] sm:$0xf]  ;;  %v572_v4 = vld [vmem:[%s4231_s28 + $0x620] sm:$0xf]  ;;  %569 = vst [vmem:[%s4238_s29 + $0x308] sm:$0xf] %v568_v2 }
  0x98   : > { %571 = vst [vmem:[%s4238_s29 + $0x30c] sm:$0xf] %v570_v3  ;;  %573 = vst [vmem:[%s4238_s29 + $0x310] sm:$0xf] %v572_v4  ;;  %v574_v5 = vld [vmem:[%s4231_s28 + $0x628] sm:$0xf] }
  0x99   : > { %v576_v6 = vld [vmem:[%s4231_s28 + $0x630] sm:$0xf]  ;;  %v578_v7 = vld [vmem:[%s4231_s28 + $0x638] sm:$0xf]  ;;  %575 = vst [vmem:[%s4238_s29 + $0x314] sm:$0xf] %v574_v5 }
  0x9a   : > { %577 = vst [vmem:[%s4238_s29 + $0x318] sm:$0xf] %v576_v6  ;;  %579 = vst [vmem:[%s4238_s29 + $0x31c] sm:$0xf] %v578_v7  ;;  %v580_v8 = vld [vmem:[%s4231_s28 + $0x640] sm:$0xf] }
  0x9b   : > { %v582_v9 = vld [vmem:[%s4231_s28 + $0x648] sm:$0xf]  ;;  %v584_v10 = vld [vmem:[%s4231_s28 + $0x650] sm:$0xf]  ;;  %581 = vst [vmem:[%s4238_s29 + $0x320] sm:$0xf] %v580_v8 }
  0x9c   : > { %583 = vst [vmem:[%s4238_s29 + $0x324] sm:$0xf] %v582_v9  ;;  %585 = vst [vmem:[%s4238_s29 + $0x328] sm:$0xf] %v584_v10  ;;  %v586_v11 = vld [vmem:[%s4231_s28 + $0x658] sm:$0xf] }
  0x9d   : > { %v588_v12 = vld [vmem:[%s4231_s28 + $0x660] sm:$0xf]  ;;  %v590_v13 = vld [vmem:[%s4231_s28 + $0x668] sm:$0xf]  ;;  %587 = vst [vmem:[%s4238_s29 + $0x32c] sm:$0xf] %v586_v11 }
  0x9e   : > { %589 = vst [vmem:[%s4238_s29 + $0x330] sm:$0xf] %v588_v12  ;;  %591 = vst [vmem:[%s4238_s29 + $0x334] sm:$0xf] %v590_v13  ;;  %v592_v14 = vld [vmem:[%s4231_s28 + $0x670] sm:$0xf] }
  0x9f   : > { %v594_v15 = vld [vmem:[%s4231_s28 + $0x678] sm:$0xf]  ;;  %v596_v16 = vld [vmem:[%s4231_s28 + $0x680] sm:$0xf]  ;;  %593 = vst [vmem:[%s4238_s29 + $0x338] sm:$0xf] %v592_v14 }
  0xa0   : > { %595 = vst [vmem:[%s4238_s29 + $0x33c] sm:$0xf] %v594_v15  ;;  %597 = vst [vmem:[%s4238_s29 + $0x340] sm:$0xf] %v596_v16  ;;  %v598_v17 = vld [vmem:[%s4231_s28 + $0x688] sm:$0xf] }
  0xa1   : > { %v600_v18 = vld [vmem:[%s4231_s28 + $0x690] sm:$0xf]  ;;  %v602_v19 = vld [vmem:[%s4231_s28 + $0x698] sm:$0xf]  ;;  %599 = vst [vmem:[%s4238_s29 + $0x344] sm:$0xf] %v598_v17 }
  0xa2   : > { %601 = vst [vmem:[%s4238_s29 + $0x348] sm:$0xf] %v600_v18  ;;  %603 = vst [vmem:[%s4238_s29 + $0x34c] sm:$0xf] %v602_v19  ;;  %v604_v20 = vld [vmem:[%s4231_s28 + $0x6a0] sm:$0xf] }
  0xa3   : > { %v606_v21 = vld [vmem:[%s4231_s28 + $0x6a8] sm:$0xf]  ;;  %v608_v22 = vld [vmem:[%s4231_s28 + $0x6b0] sm:$0xf]  ;;  %605 = vst [vmem:[%s4238_s29 + $0x350] sm:$0xf] %v604_v20 }
  0xa4   : > { %607 = vst [vmem:[%s4238_s29 + $0x354] sm:$0xf] %v606_v21  ;;  %609 = vst [vmem:[%s4238_s29 + $0x358] sm:$0xf] %v608_v22  ;;  %v610_v23 = vld [vmem:[%s4231_s28 + $0x6b8] sm:$0xf] }
  0xa5   : > { %v612_v24 = vld [vmem:[%s4231_s28 + $0x6c0] sm:$0xf]  ;;  %v614_v25 = vld [vmem:[%s4231_s28 + $0x6c8] sm:$0xf]  ;;  %611 = vst [vmem:[%s4238_s29 + $0x35c] sm:$0xf] %v610_v23 }
  0xa6   : > { %613 = vst [vmem:[%s4238_s29 + $0x360] sm:$0xf] %v612_v24  ;;  %615 = vst [vmem:[%s4238_s29 + $0x364] sm:$0xf] %v614_v25  ;;  %v616_v26 = vld [vmem:[%s4231_s28 + $0x6d0] sm:$0xf] }
  0xa7   : > { %v618_v27 = vld [vmem:[%s4231_s28 + $0x6d8] sm:$0xf]  ;;  %v620_v28 = vld [vmem:[%s4231_s28 + $0x6e0] sm:$0xf]  ;;  %617 = vst [vmem:[%s4238_s29 + $0x368] sm:$0xf] %v616_v26 }
  0xa8   : > { %619 = vst [vmem:[%s4238_s29 + $0x36c] sm:$0xf] %v618_v27  ;;  %621 = vst [vmem:[%s4238_s29 + $0x370] sm:$0xf] %v620_v28  ;;  %v622_v29 = vld [vmem:[%s4231_s28 + $0x6e8] sm:$0xf] }
  0xa9   : > { %v624_v30 = vld [vmem:[%s4231_s28 + $0x6f0] sm:$0xf]  ;;  %v626_v31 = vld [vmem:[%s4231_s28 + $0x6f8] sm:$0xf]  ;;  %623 = vst [vmem:[%s4238_s29 + $0x374] sm:$0xf] %v622_v29 }
  0xaa   : > { %625 = vst [vmem:[%s4238_s29 + $0x378] sm:$0xf] %v624_v30  ;;  %627 = vst [vmem:[%s4238_s29 + $0x37c] sm:$0xf] %v626_v31  ;;  %v628_v32 = vld [vmem:[%s4231_s28 + $0x700] sm:$0xf] }
  0xab   : > { %v630_v33 = vld [vmem:[%s4231_s28 + $0x708] sm:$0xf]  ;;  %v632_v34 = vld [vmem:[%s4231_s28 + $0x710] sm:$0xf]  ;;  %629 = vst [vmem:[%s4238_s29 + $0x380] sm:$0xf] %v628_v32 }
  0xac   : > { %631 = vst [vmem:[%s4238_s29 + $0x384] sm:$0xf] %v630_v33  ;;  %633 = vst [vmem:[%s4238_s29 + $0x388] sm:$0xf] %v632_v34  ;;  %v634_v35 = vld [vmem:[%s4231_s28 + $0x718] sm:$0xf] }
  0xad   : > { %v636_v36 = vld [vmem:[%s4231_s28 + $0x720] sm:$0xf]  ;;  %v638_v37 = vld [vmem:[%s4231_s28 + $0x728] sm:$0xf]  ;;  %635 = vst [vmem:[%s4238_s29 + $0x38c] sm:$0xf] %v634_v35 }
  0xae   : > { %637 = vst [vmem:[%s4238_s29 + $0x390] sm:$0xf] %v636_v36  ;;  %639 = vst [vmem:[%s4238_s29 + $0x394] sm:$0xf] %v638_v37  ;;  %v640_v38 = vld [vmem:[%s4231_s28 + $0x730] sm:$0xf] }
  0xaf   : > { %v642_v39 = vld [vmem:[%s4231_s28 + $0x738] sm:$0xf]  ;;  %v644_v40 = vld [vmem:[%s4231_s28 + $0x740] sm:$0xf]  ;;  %641 = vst [vmem:[%s4238_s29 + $0x398] sm:$0xf] %v640_v38 }
  0xb0   : > { %643 = vst [vmem:[%s4238_s29 + $0x39c] sm:$0xf] %v642_v39  ;;  %645 = vst [vmem:[%s4238_s29 + $0x3a0] sm:$0xf] %v644_v40  ;;  %v646_v41 = vld [vmem:[%s4231_s28 + $0x748] sm:$0xf] }
  0xb1   : > { %v648_v42 = vld [vmem:[%s4231_s28 + $0x750] sm:$0xf]  ;;  %v650_v43 = vld [vmem:[%s4231_s28 + $0x758] sm:$0xf]  ;;  %647 = vst [vmem:[%s4238_s29 + $0x3a4] sm:$0xf] %v646_v41 }
  0xb2   : > { %649 = vst [vmem:[%s4238_s29 + $0x3a8] sm:$0xf] %v648_v42  ;;  %651 = vst [vmem:[%s4238_s29 + $0x3ac] sm:$0xf] %v650_v43  ;;  %v652_v44 = vld [vmem:[%s4231_s28 + $0x760] sm:$0xf] }
  0xb3   : > { %v654_v45 = vld [vmem:[%s4231_s28 + $0x768] sm:$0xf]  ;;  %v656_v46 = vld [vmem:[%s4231_s28 + $0x770] sm:$0xf]  ;;  %653 = vst [vmem:[%s4238_s29 + $0x3b0] sm:$0xf] %v652_v44 }
  0xb4   : > { %655 = vst [vmem:[%s4238_s29 + $0x3b4] sm:$0xf] %v654_v45  ;;  %657 = vst [vmem:[%s4238_s29 + $0x3b8] sm:$0xf] %v656_v46  ;;  %v658_v47 = vld [vmem:[%s4231_s28 + $0x778] sm:$0xf] }
  0xb5   : > { %v660_v48 = vld [vmem:[%s4231_s28 + $0x780] sm:$0xf]  ;;  %v662_v49 = vld [vmem:[%s4231_s28 + $0x788] sm:$0xf]  ;;  %659 = vst [vmem:[%s4238_s29 + $0x3bc] sm:$0xf] %v658_v47 }
  0xb6   : > { %661 = vst [vmem:[%s4238_s29 + $0x3c0] sm:$0xf] %v660_v48  ;;  %663 = vst [vmem:[%s4238_s29 + $0x3c4] sm:$0xf] %v662_v49  ;;  %v664_v50 = vld [vmem:[%s4231_s28 + $0x790] sm:$0xf] }
  0xb7   : > { %v666_v51 = vld [vmem:[%s4231_s28 + $0x798] sm:$0xf]  ;;  %v668_v52 = vld [vmem:[%s4231_s28 + $0x7a0] sm:$0xf]  ;;  %665 = vst [vmem:[%s4238_s29 + $0x3c8] sm:$0xf] %v664_v50 }
  0xb8   : > { %667 = vst [vmem:[%s4238_s29 + $0x3cc] sm:$0xf] %v666_v51  ;;  %669 = vst [vmem:[%s4238_s29 + $0x3d0] sm:$0xf] %v668_v52  ;;  %v670_v53 = vld [vmem:[%s4231_s28 + $0x7a8] sm:$0xf] }
  0xb9   : > { %v672_v54 = vld [vmem:[%s4231_s28 + $0x7b0] sm:$0xf]  ;;  %v674_v55 = vld [vmem:[%s4231_s28 + $0x7b8] sm:$0xf]  ;;  %671 = vst [vmem:[%s4238_s29 + $0x3d4] sm:$0xf] %v670_v53 }
  0xba   : > { %673 = vst [vmem:[%s4238_s29 + $0x3d8] sm:$0xf] %v672_v54  ;;  %675 = vst [vmem:[%s4238_s29 + $0x3dc] sm:$0xf] %v674_v55  ;;  %v676_v56 = vld [vmem:[%s4231_s28 + $0x7c0] sm:$0xf] }
  0xbb   : > { %v678_v57 = vld [vmem:[%s4231_s28 + $0x7c8] sm:$0xf]  ;;  %v680_v58 = vld [vmem:[%s4231_s28 + $0x7d0] sm:$0xf]  ;;  %677 = vst [vmem:[%s4238_s29 + $0x3e0] sm:$0xf] %v676_v56 }
  0xbc   : > { %679 = vst [vmem:[%s4238_s29 + $0x3e4] sm:$0xf] %v678_v57  ;;  %681 = vst [vmem:[%s4238_s29 + $0x3e8] sm:$0xf] %v680_v58  ;;  %v682_v59 = vld [vmem:[%s4231_s28 + $0x7d8] sm:$0xf] }
  0xbd   : > { %v684_v60 = vld [vmem:[%s4231_s28 + $0x7e0] sm:$0xf]  ;;  %v686_v61 = vld [vmem:[%s4231_s28 + $0x7e8] sm:$0xf]  ;;  %683 = vst [vmem:[%s4238_s29 + $0x3ec] sm:$0xf] %v682_v59 }
  0xbe   : > { %685 = vst [vmem:[%s4238_s29 + $0x3f0] sm:$0xf] %v684_v60  ;;  %687 = vst [vmem:[%s4238_s29 + $0x3f4] sm:$0xf] %v686_v61  ;;  %v688_v62 = vld [vmem:[%s4231_s28 + $0x7f0] sm:$0xf] }
  0xbf   : > { %v690_v63 = vld [vmem:[%s4231_s28 + $0x7f8] sm:$0xf]  ;;  %v692_v0 = vld [vmem:[%s4231_s28 + $0x800] sm:$0xf]  ;;  %689 = vst [vmem:[%s4238_s29 + $0x3f8] sm:$0xf] %v688_v62 }
  0xc0   : > { %691 = vst [vmem:[%s4238_s29 + $0x3fc] sm:$0xf] %v690_v63  ;;  %693 = vst [vmem:[%s4238_s29 + $0x400] sm:$0xf] %v692_v0  ;;  %v694_v1 = vld [vmem:[%s4231_s28 + $0x808] sm:$0xf] }
  0xc1   : > { %v696_v2 = vld [vmem:[%s4231_s28 + $0x810] sm:$0xf]  ;;  %v698_v3 = vld [vmem:[%s4231_s28 + $0x818] sm:$0xf]  ;;  %695 = vst [vmem:[%s4238_s29 + $0x404] sm:$0xf] %v694_v1 }
  0xc2   : > { %697 = vst [vmem:[%s4238_s29 + $0x408] sm:$0xf] %v696_v2  ;;  %699 = vst [vmem:[%s4238_s29 + $0x40c] sm:$0xf] %v698_v3  ;;  %v700_v4 = vld [vmem:[%s4231_s28 + $0x820] sm:$0xf] }
  0xc3   : > { %v702_v5 = vld [vmem:[%s4231_s28 + $0x828] sm:$0xf]  ;;  %v704_v6 = vld [vmem:[%s4231_s28 + $0x830] sm:$0xf]  ;;  %701 = vst [vmem:[%s4238_s29 + $0x410] sm:$0xf] %v700_v4 }
  0xc4   : > { %703 = vst [vmem:[%s4238_s29 + $0x414] sm:$0xf] %v702_v5  ;;  %705 = vst [vmem:[%s4238_s29 + $0x418] sm:$0xf] %v704_v6  ;;  %v706_v7 = vld [vmem:[%s4231_s28 + $0x838] sm:$0xf] }
  0xc5   : > { %v708_v8 = vld [vmem:[%s4231_s28 + $0x840] sm:$0xf]  ;;  %v710_v9 = vld [vmem:[%s4231_s28 + $0x848] sm:$0xf]  ;;  %707 = vst [vmem:[%s4238_s29 + $0x41c] sm:$0xf] %v706_v7 }
  0xc6   : > { %709 = vst [vmem:[%s4238_s29 + $0x420] sm:$0xf] %v708_v8  ;;  %711 = vst [vmem:[%s4238_s29 + $0x424] sm:$0xf] %v710_v9  ;;  %v712_v10 = vld [vmem:[%s4231_s28 + $0x850] sm:$0xf] }
  0xc7   : > { %v714_v11 = vld [vmem:[%s4231_s28 + $0x858] sm:$0xf]  ;;  %v716_v12 = vld [vmem:[%s4231_s28 + $0x860] sm:$0xf]  ;;  %713 = vst [vmem:[%s4238_s29 + $0x428] sm:$0xf] %v712_v10 }
  0xc8   : > { %715 = vst [vmem:[%s4238_s29 + $0x42c] sm:$0xf] %v714_v11  ;;  %717 = vst [vmem:[%s4238_s29 + $0x430] sm:$0xf] %v716_v12  ;;  %v718_v13 = vld [vmem:[%s4231_s28 + $0x868] sm:$0xf] }
  0xc9   : > { %v720_v14 = vld [vmem:[%s4231_s28 + $0x870] sm:$0xf]  ;;  %v722_v15 = vld [vmem:[%s4231_s28 + $0x878] sm:$0xf]  ;;  %719 = vst [vmem:[%s4238_s29 + $0x434] sm:$0xf] %v718_v13 }
  0xca   : > { %721 = vst [vmem:[%s4238_s29 + $0x438] sm:$0xf] %v720_v14  ;;  %723 = vst [vmem:[%s4238_s29 + $0x43c] sm:$0xf] %v722_v15  ;;  %v724_v16 = vld [vmem:[%s4231_s28 + $0x880] sm:$0xf] }
  0xcb   : > { %v726_v17 = vld [vmem:[%s4231_s28 + $0x888] sm:$0xf]  ;;  %v728_v18 = vld [vmem:[%s4231_s28 + $0x890] sm:$0xf]  ;;  %725 = vst [vmem:[%s4238_s29 + $0x440] sm:$0xf] %v724_v16 }
  0xcc   : > { %727 = vst [vmem:[%s4238_s29 + $0x444] sm:$0xf] %v726_v17  ;;  %729 = vst [vmem:[%s4238_s29 + $0x448] sm:$0xf] %v728_v18  ;;  %v730_v19 = vld [vmem:[%s4231_s28 + $0x898] sm:$0xf] }
  0xcd   : > { %v732_v20 = vld [vmem:[%s4231_s28 + $0x8a0] sm:$0xf]  ;;  %v734_v21 = vld [vmem:[%s4231_s28 + $0x8a8] sm:$0xf]  ;;  %731 = vst [vmem:[%s4238_s29 + $0x44c] sm:$0xf] %v730_v19 }
  0xce   : > { %733 = vst [vmem:[%s4238_s29 + $0x450] sm:$0xf] %v732_v20  ;;  %735 = vst [vmem:[%s4238_s29 + $0x454] sm:$0xf] %v734_v21  ;;  %v736_v22 = vld [vmem:[%s4231_s28 + $0x8b0] sm:$0xf] }
  0xcf   : > { %v738_v23 = vld [vmem:[%s4231_s28 + $0x8b8] sm:$0xf]  ;;  %v740_v24 = vld [vmem:[%s4231_s28 + $0x8c0] sm:$0xf]  ;;  %737 = vst [vmem:[%s4238_s29 + $0x458] sm:$0xf] %v736_v22 }
  0xd0   : > { %739 = vst [vmem:[%s4238_s29 + $0x45c] sm:$0xf] %v738_v23  ;;  %741 = vst [vmem:[%s4238_s29 + $0x460] sm:$0xf] %v740_v24  ;;  %v742_v25 = vld [vmem:[%s4231_s28 + $0x8c8] sm:$0xf] }
  0xd1   : > { %v744_v26 = vld [vmem:[%s4231_s28 + $0x8d0] sm:$0xf]  ;;  %v746_v27 = vld [vmem:[%s4231_s28 + $0x8d8] sm:$0xf]  ;;  %743 = vst [vmem:[%s4238_s29 + $0x464] sm:$0xf] %v742_v25 }
  0xd2   : > { %745 = vst [vmem:[%s4238_s29 + $0x468] sm:$0xf] %v744_v26  ;;  %747 = vst [vmem:[%s4238_s29 + $0x46c] sm:$0xf] %v746_v27  ;;  %v748_v28 = vld [vmem:[%s4231_s28 + $0x8e0] sm:$0xf] }
  0xd3   : > { %v750_v29 = vld [vmem:[%s4231_s28 + $0x8e8] sm:$0xf]  ;;  %v752_v30 = vld [vmem:[%s4231_s28 + $0x8f0] sm:$0xf]  ;;  %749 = vst [vmem:[%s4238_s29 + $0x470] sm:$0xf] %v748_v28 }
  0xd4   : > { %751 = vst [vmem:[%s4238_s29 + $0x474] sm:$0xf] %v750_v29  ;;  %753 = vst [vmem:[%s4238_s29 + $0x478] sm:$0xf] %v752_v30  ;;  %v754_v31 = vld [vmem:[%s4231_s28 + $0x8f8] sm:$0xf] }
  0xd5   : > { %755 = vst [vmem:[%s4238_s29 + $0x47c] sm:$0xf] %v754_v31 }
  0xd6 PF: > { %p3409_p8 = scmp.ge.s32.totalorder %s4161_s16, 1  ;;  %p1359_p9 = scmp.lt.s32.totalorder %s4161_s16, 3 }
  0xd8   : > { %p1360_p10 = pnand %p3409_p8, %p1359_p9 }
  0xd9   : > { %s1366_s30 = sand.u32 (!%p1360_p10), 1, %s4145_s12   ;;  %v3959_v32 = vld [vmem:[%s5098_s0 + $0x4] ss:$72 sps:$4 sm:$0xff] (!%p1360_p10)   ;;  %v3957_v0 = vld [vmem:[%s5098_s0] ss:$72 sps:$4 sm:$0xff] (!%p1360_p10)   ;;  %p1404_p11 = scmp.lt.s32.totalorder (!%p1360_p10), %s4153_s14, 1 }
  0xda   : > { %1363 = sbr.rel (%p1360_p10) target bundleno = 618 (0x26a), region = 69  ;;  %v3962_v33 = vld [vmem:[%s5098_s0 + $0xc] ss:$72 sps:$4 sm:$0xff] (!%p1360_p10)   ;;  %2816 = vmatprep.mubr.bf16.mxu0 (!%p1360_p10), %v3959_v32  ;;  %v3960_v2 = vld [vmem:[%s5098_s0 + $0x8] ss:$72 sps:$4 sm:$0xff] (!%p1360_p10)   ;;  %s3410_s19 = sshll.u32 (!%p1360_p10), %s1366_s30, 4 }
  0xdb   : > { %s3884_s4 = smul.u32 (!%p1360_p10), 1152, %s1366_s30  ;;  %2865 = vmatprep.mubr.bf16.mxu1 (!%p1360_p10), %v3962_v33  ;;  %v3983_v4 = vld [vmem:[%s5098_s0 + $0x94] ss:$72 sps:$4 sm:$0xff] (!%p1360_p10)   ;;  %v3985_v11 = vld [vmem:[%s5098_s0 + $0x90] ss:$72 sps:$4 sm:$0xff] (!%p1360_p10)   ;;  %s1396_s20 = scalar_lea.vmem (!%p1360_p10), [#allocation3], %s3410_s19 }
  0xdc   : > { %v3988_v28 = vld [vmem:[%s5098_s0 + $0x9c] ss:$72 sps:$4 sm:$0xff] (!%p1360_p10)   ;;  %v3992_v31 = vld [vmem:[%s5098_s0 + $0x98] ss:$72 sps:$4 sm:$0xff] (!%p1360_p10)  }
  0xdd   : > { %s4822_s9 = scalar_lea.vmem (!%p1360_p10), [#allocation2], %s3884_s4 }
  0xde   : > { %v3925_v34 = vld [vmem:[%s4822_s9 + $0x40] sm:$0xff] (!%p1360_p10)   ;;  %v3929_v38 = vld [vmem:[%s4822_s9 + $0x48] sm:$0xff] (!%p1360_p10)   ;;  %v3933_v42 = vld [vmem:[%s4822_s9 + $0x50] sm:$0xff] (!%p1360_p10)  }
  0xdf   : > { %v3926_v35 = vld [vmem:[%s4822_s9 + $0xc0] sm:$0xff] (!%p1360_p10)   ;;  %3615 = vmatprep.subr.bf16.mxu0 (!%p1360_p10), %v3925_v34  ;;  %v3930_v39 = vld [vmem:[%s4822_s9 + $0xc8] sm:$0xff] (!%p1360_p10)   ;;  %v3934_v43 = vld [vmem:[%s4822_s9 + $0xd0] sm:$0xff] (!%p1360_p10)  }
  0xe0   : > { %v3927_v36 = vld [vmem:[%s4822_s9] sm:$0xff] (!%p1360_p10)   ;;  %3643 = vmatprep.subr.bf16.mxu1 (!%p1360_p10), %v3926_v35  ;;  %v3931_v40 = vld [vmem:[%s4822_s9 + $0x8] sm:$0xff] (!%p1360_p10)   ;;  %v3935_v44 = vld [vmem:[%s4822_s9 + $0x10] sm:$0xff] (!%p1360_p10)  }
  0xe1   : > { %v3928_v37 = vld [vmem:[%s4822_s9 + $0x80] sm:$0xff]   ;;  %3616 = vmatpush3.bf16.msra.mxu0 %v3927_v36  ;;  %v3932_v41 = vld [vmem:[%s4822_s9 + $0x88] sm:$0xff]   ;;  %v3936_v45 = vld [vmem:[%s4822_s9 + $0x90] sm:$0xff]   ;;  %s1405_s10 = scalar_select %p1404_p11, %s4153_s14, 1 }
  0xe2   : > { %3644 = vmatpush3.bf16.msra.mxu1 %v3928_v37  ;;  %3617 = vmatprep.subr.bf16.mxu0 %v3929_v38  ;;  %v3937_v46 = vld [vmem:[%s4822_s9 + $0x58] sm:$0xff]   ;;  %v3941_v50 = vld [vmem:[%s4822_s9 + $0x60] sm:$0xff]   ;;  %v3945_v54 = vld [vmem:[%s4822_s9 + $0x68] sm:$0xff]   ;;  %s3597_s23 = sshll.u32 (%p4218_p6), %s4153_s14, 2 }
  0xe3   : > { %3645 = vmatprep.subr.bf16.mxu1 %v3930_v39  ;;  %v3938_v47 = vld [vmem:[%s4822_s9 + $0xd8] sm:$0xff]   ;;  %v3942_v51 = vld [vmem:[%s4822_s9 + $0xe0] sm:$0xff]   ;;  %v3946_v55 = vld [vmem:[%s4822_s9 + $0xe8] sm:$0xff]   ;;  %s3260_s24 = scalar_lea.vmem (%p4218_p6), %s5101_s3, %s3597_s23 }
  0xe4   : > { %v3939_v48 = vld [vmem:[%s4822_s9 + $0x18] sm:$0xff]   ;;  %v3943_v52 = vld [vmem:[%s4822_s9 + $0x20] sm:$0xff]   ;;  %v3947_v56 = vld [vmem:[%s4822_s9 + $0x28] sm:$0xff]  }
  0xe5   : > { %3618 = vmatpush3.bf16.msra.mxu0 %v3931_v40  ;;  %v3940_v49 = vld [vmem:[%s4822_s9 + $0x98] sm:$0xff]   ;;  %v3944_v53 = vld [vmem:[%s4822_s9 + $0xa0] sm:$0xff]   ;;  %v3948_v57 = vld [vmem:[%s4822_s9 + $0xa8] sm:$0xff]  }
  0xe6   : > { %3646 = vmatpush3.bf16.msra.mxu1 %v3932_v41  ;;  %3619 = vmatprep.subr.bf16.mxu0 %v3933_v42  ;;  %v3949_v58 = vld [vmem:[%s4822_s9 + $0x70] sm:$0xff]   ;;  %v3953_v62 = vld [vmem:[%s4822_s9 + $0x78] sm:$0xff]   ;;  %v3963_v5 = vld [vmem:[%s4822_s9 + $0x140] sm:$0xff]  }
  0xe7   : > { %3647 = vmatprep.subr.bf16.mxu1 %v3934_v43  ;;  %v3950_v59 = vld [vmem:[%s4822_s9 + $0xf0] sm:$0xff]   ;;  %v3954_v63 = vld [vmem:[%s4822_s9 + $0xf8] sm:$0xff]   ;;  %v3964_v6 = vld [vmem:[%s4822_s9 + $0x1c0] sm:$0xff]  }
  0xe8   : > { %v3951_v60 = vld [vmem:[%s4822_s9 + $0x30] sm:$0xff]   ;;  %v3955_v1 = vld [vmem:[%s4822_s9 + $0x38] sm:$0xff]   ;;  %v3965_v7 = vld [vmem:[%s4822_s9 + $0x100] sm:$0xff]  }
  0xe9   : > { %3620 = vmatpush3.bf16.msra.mxu0 %v3935_v44  ;;  %v3952_v61 = vld [vmem:[%s4822_s9 + $0xb0] sm:$0xff]   ;;  %v3956_v3 = vld [vmem:[%s4822_s9 + $0xb8] sm:$0xff]   ;;  %v3966_v8 = vld [vmem:[%s4822_s9 + $0x180] sm:$0xff]  }
  0xea   : > { %3648 = vmatpush3.bf16.msra.mxu1 %v3936_v45  ;;  %3621 = vmatprep.subr.bf16.mxu0 %v3937_v46  ;;  %v3967_v9 = vld [vmem:[%s4822_s9 + $0x148] sm:$0xff]   ;;  %v3971_v14 = vld [vmem:[%s4822_s9 + $0x150] sm:$0xff]   ;;  %v3975_v18 = vld [vmem:[%s4822_s9 + $0x158] sm:$0xff]  }
  0xeb   : > { %3649 = vmatprep.subr.bf16.mxu1 %v3938_v47  ;;  %v3968_v10 = vld [vmem:[%s4822_s9 + $0x1c8] sm:$0xff]   ;;  %v3972_v15 = vld [vmem:[%s4822_s9 + $0x1d0] sm:$0xff]   ;;  %v3976_v19 = vld [vmem:[%s4822_s9 + $0x1d8] sm:$0xff]  }
  0xec   : > { %v3969_v12 = vld [vmem:[%s4822_s9 + $0x108] sm:$0xff]   ;;  %v3973_v16 = vld [vmem:[%s4822_s9 + $0x110] sm:$0xff]   ;;  %v3977_v20 = vld [vmem:[%s4822_s9 + $0x118] sm:$0xff]  }
  0xed   : > { %3622 = vmatpush3.bf16.msra.mxu0 %v3939_v48  ;;  %v3970_v13 = vld [vmem:[%s4822_s9 + $0x188] sm:$0xff]   ;;  %v3974_v17 = vld [vmem:[%s4822_s9 + $0x190] sm:$0xff]   ;;  %v3978_v21 = vld [vmem:[%s4822_s9 + $0x198] sm:$0xff]  }
  0xee   : > { %3650 = vmatpush3.bf16.msra.mxu1 %v3940_v49  ;;  %3623 = vmatprep.subr.bf16.mxu0 %v3941_v50  ;;  %v3979_v22 = vld [vmem:[%s4822_s9 + $0x160] sm:$0xff]   ;;  %v3986_v26 = vld [vmem:[%s4822_s9 + $0x168] sm:$0xff]   ;;  %v3993_v32 = vld [vmem:[%s4822_s9 + $0x170] sm:$0xff]  }
  0xef   : > { %3651 = vmatprep.subr.bf16.mxu1 %v3942_v51  ;;  %v3980_v23 = vld [vmem:[%s4822_s9 + $0x1e0] sm:$0xff]   ;;  %v3987_v27 = vld [vmem:[%s4822_s9 + $0x1e8] sm:$0xff]   ;;  %v3994_v33 = vld [vmem:[%s4822_s9 + $0x1f0] sm:$0xff]  }
  0xf0   : > { %v3981_v24 = vld [vmem:[%s4822_s9 + $0x120] sm:$0xff]   ;;  %v3990_v29 = vld [vmem:[%s4822_s9 + $0x128] sm:$0xff]   ;;  %v3995_v34 = vld [vmem:[%s4822_s9 + $0x130] sm:$0xff]  }
  0xf1   : > { %3624 = vmatpush3.bf16.msra.mxu0 %v3943_v52  ;;  %v3982_v25 = vld [vmem:[%s4822_s9 + $0x1a0] sm:$0xff]   ;;  %v3991_v30 = vld [vmem:[%s4822_s9 + $0x1a8] sm:$0xff]   ;;  %v3996_v35 = vld [vmem:[%s4822_s9 + $0x1b0] sm:$0xff]  }
  0xf2   : > { %3652 = vmatpush3.bf16.msra.mxu1 %v3944_v53  ;;  %3625 = vmatprep.subr.bf16.mxu0 %v3945_v54  ;;  %v3997_v36 = vld [vmem:[%s4822_s9 + $0x178] sm:$0xff]   ;;  %v4007_v44 = vld [vmem:[%s4822_s9 + $0x240] sm:$0xff]   ;;  %v4011_v48 = vld [vmem:[%s4822_s9 + $0x248] sm:$0xff]  }
  0xf3   : > { %3653 = vmatprep.subr.bf16.mxu1 %v3946_v55  ;;  %v3998_v37 = vld [vmem:[%s4822_s9 + $0x1f8] sm:$0xff]   ;;  %v4008_v45 = vld [vmem:[%s4822_s9 + $0x2c0] sm:$0xff]   ;;  %v4012_v49 = vld [vmem:[%s4822_s9 + $0x2c8] sm:$0xff]  }
  0xf4   : > { %v3999_v38 = vld [vmem:[%s4822_s9 + $0x138] sm:$0xff]   ;;  %v4009_v46 = vld [vmem:[%s4822_s9 + $0x200] sm:$0xff]   ;;  %v4013_v50 = vld [vmem:[%s4822_s9 + $0x208] sm:$0xff]  }
  0xf5   : > { %3626 = vmatpush3.bf16.msra.mxu0 %v3947_v56  ;;  %v4000_v39 = vld [vmem:[%s4822_s9 + $0x1b8] sm:$0xff]   ;;  %v4010_v47 = vld [vmem:[%s4822_s9 + $0x280] sm:$0xff]   ;;  %v4014_v51 = vld [vmem:[%s4822_s9 + $0x288] sm:$0xff]  }
  0xf6   : > { %3654 = vmatpush3.bf16.msra.mxu1 %v3948_v57  ;;  %3627 = vmatprep.subr.bf16.mxu0 %v3949_v58  ;;  %v4001_v40 = vld [vmem:[%s5098_s0 + $0x10] ss:$72 sps:$4 sm:$0xff]   ;;  %v4003_v41 = vld [vmem:[%s5098_s0 + $0x14] ss:$72 sps:$4 sm:$0xff]   ;;  %v4015_v52 = vld [vmem:[%s5098_s0 + $0xa4] ss:$72 sps:$4 sm:$0xff]  }
  0xf7   : > { %3655 = vmatprep.subr.bf16.mxu1 %v3950_v59  ;;  %v4004_v42 = vld [vmem:[%s5098_s0 + $0x18] ss:$72 sps:$4 sm:$0xff]   ;;  %v4006_v43 = vld [vmem:[%s5098_s0 + $0x1c] ss:$72 sps:$4 sm:$0xff]   ;;  %v4018_v54 = vld [vmem:[%s4822_s9 + $0x250] sm:$0xff]  }
  0xf8   : > { %v4017_v53 = vld [vmem:[%s5098_s0 + $0xa0] ss:$72 sps:$4 sm:$0xff]   ;;  %v4019_v55 = vld [vmem:[%s4822_s9 + $0x2d0] sm:$0xff]  }
  0xf9   : > { %3628 = vmatpush3.bf16.msra.mxu0 %v3951_v60  ;;  %v4020_v56 = vld [vmem:[%s5098_s0 + $0xac] ss:$72 sps:$4 sm:$0xff]   ;;  %v4024_v59 = vld [vmem:[%s5098_s0 + $0xa8] ss:$72 sps:$4 sm:$0xff]   ;;  %v4025_v60 = vld [vmem:[%s4822_s9 + $0x258] sm:$0xff]  }
  0xfa   : > { %3656 = vmatpush3.bf16.msra.mxu1 %v3952_v61  ;;  %3629 = vmatprep.subr.bf16.mxu0 %v3953_v62  ;;  %v4022_v57 = vld [vmem:[%s4822_s9 + $0x210] sm:$0xff]   ;;  %v4026_v61 = vld [vmem:[%s4822_s9 + $0x2d8] sm:$0xff]  }
  0xfb   : > { %3657 = vmatprep.subr.bf16.mxu1 %v3954_v63  ;;  %v4023_v58 = vld [vmem:[%s4822_s9 + $0x290] sm:$0xff]   ;;  %v4027_v62 = vld [vmem:[%s4822_s9 + $0x218] sm:$0xff]  }
  0xfc   : > { %v4028_v63 = vld [vmem:[%s4822_s9 + $0x298] sm:$0xff]  }
  0xfd   : > { %3630 = vmatpush3.bf16.msra.mxu0 %v3955_v1  ;;  %v4030_v1 = vld [vmem:[%s4822_s9 + $0x2e0] sm:$0xff]  }
  0xfe   : > { %3658 = vmatpush3.bf16.msra.mxu1 %v3956_v3  ;;  %3671 = vmatprep.subr.bf16.mxu0 %v3963_v5  ;;  %v4032_v3 = vld [vmem:[%s4822_s9 + $0x2a0] sm:$0xff]   ;;  %v4034_v5 = vld [vmem:[%s4822_s9 + $0x2e8] sm:$0xff]  }
  0xff   : > { %3699 = vmatprep.subr.bf16.mxu1 %v3964_v6  ;;  %v4035_v6 = vld [vmem:[%s4822_s9 + $0x228] sm:$0xff]  }
 0x100   : > { %2817 = vmatmul.mubr.bf16.vlgmr.msra.gmra.mrb[0].mxu0 %v3957_v0  ;;  %v4029_v0 = vld [vmem:[%s4822_s9 + $0x260] sm:$0xff]  }
 0x101   : > { %2866 = vmatmul.mubr.bf16.vlgmr.msra.gmra.mrb[0].mxu1 %v3960_v2  ;;  %3672 = vmatpush3.bf16.msra.mxu0 %v3965_v7  ;;  %v4031_v2 = vld [vmem:[%s4822_s9 + $0x220] sm:$0xff]   ;;  %v4036_v7 = vld [vmem:[%s4822_s9 + $0x2a8] sm:$0xff]  }
 0x102   : > { %3700 = vmatpush3.bf16.msra.mxu1 %v3966_v8  ;;  %2824 = vmatprep.mubr.bf16.mxu0 %v3983_v4  ;;  %v4033_v4 = vld [vmem:[%s4822_s9 + $0x268] sm:$0xff]   ;;  %v4037_v8 = vld [vmem:[%s4822_s9 + $0x270] sm:$0xff]  }
 0x103   : > { %3673 = vmatprep.subr.bf16.mxu0 %v3967_v9  ;;  %3701 = vmatprep.subr.bf16.mxu1 %v3968_v10  ;;  %v4038_v9 = vld [vmem:[%s4822_s9 + $0x2f0] sm:$0xff]  }
 0x104   : > { %2873 = vmatprep.mubr.bf16.mxu1 %v3988_v28  ;;  %v4039_v10 = vld [vmem:[%s4822_s9 + $0x230] sm:$0xff]  }
 0x105   : > { %3674 = vmatpush3.bf16.msra.mxu0 %v3969_v12  ;;  %v4041_v12 = vld [vmem:[%s4822_s9 + $0x278] sm:$0xff]  }
 0x106   : > { %3702 = vmatpush3.bf16.msra.mxu1 %v3970_v13  ;;  %3675 = vmatprep.subr.bf16.mxu0 %v3971_v14  ;;  %v4042_v13 = vld [vmem:[%s4822_s9 + $0x2f8] sm:$0xff]  }
 0x107   : > { %3703 = vmatprep.subr.bf16.mxu1 %v3972_v15  ;;  %v4043_v14 = vld [vmem:[%s4822_s9 + $0x238] sm:$0xff]  }
 0x108   : > { %2825 = vmatmul.mubr.bf16.gmra.mrb[4].mxu0 %v3985_v11  ;;  %v4040_v11 = vld [vmem:[%s4822_s9 + $0x2b0] sm:$0xff]   ;;  %v4044_v15 = vld [vmem:[%s4822_s9 + $0x2b8] sm:$0xff]  }
 0x109   : > { %3676 = vmatpush3.bf16.msra.mxu0 %v3973_v16  ;;  %2874 = vmatmul.mubr.bf16.gmra.mrb[4].mxu1 %v3992_v31  ;;  %v4045_v16 = vld [vmem:[%s5098_s0 + $0x20] ss:$72 sps:$4 sm:$0xff]   ;;  %v4059_v28 = vld [vmem:[%s5098_s0 + $0xb4] ss:$72 sps:$4 sm:$0xff]  }
 0x10a   : > { %3704 = vmatpush3.bf16.msra.mxu1 %v3974_v17  ;;  %3677 = vmatprep.subr.bf16.mxu0 %v3975_v18  ;;  %v4047_v17 = vld [vmem:[%s5098_s0 + $0x24] ss:$72 sps:$4 sm:$0xff]   ;;  %v4048_v18 = vld [vmem:[%s5098_s0 + $0x28] ss:$72 sps:$4 sm:$0xff]  }
 0x10b   : > { %3705 = vmatprep.subr.bf16.mxu1 %v3976_v19  ;;  %2914 = vmatprep.mubr.bf16.mxu0 %v4003_v41  ;;  %v4050_v19 = vld [vmem:[%s5098_s0 + $0x2c] ss:$72 sps:$4 sm:$0xff]   ;;  %v4074_v41 = vld [vmem:[%s4822_s9 + $0x3e0] sm:$0xff]  }
 0x10c   : > { %2963 = vmatprep.mubr.bf16.mxu1 %v4006_v43  ;;  %v4063_v31 = vld [vmem:[%s4822_s9 + $0x3d0] sm:$0xff]   ;;  %v4076_v43 = vld [vmem:[%s4822_s9 + $0x3a0] sm:$0xff]  }
 0x10d   : > { %3678 = vmatpush3.bf16.msra.mxu0 %v3977_v20  ;;  %v4051_v20 = vld [vmem:[%s4822_s9 + $0x340] sm:$0xff]  }
 0x10e   : > { %3706 = vmatpush3.bf16.msra.mxu1 %v3978_v21  ;;  %3679 = vmatprep.subr.bf16.mxu0 %v3979_v22  ;;  %v4052_v21 = vld [vmem:[%s4822_s9 + $0x3c0] sm:$0xff]  }
 0x10f   : > { %3707 = vmatprep.subr.bf16.mxu1 %v3980_v23  ;;  %v4053_v22 = vld [vmem:[%s4822_s9 + $0x300] sm:$0xff]  }
 0x110   : > { %v4054_v23 = vld [vmem:[%s4822_s9 + $0x380] sm:$0xff]  }
 0x111   : > { %3680 = vmatpush3.bf16.msra.mxu0 %v3981_v24  ;;  %v4055_v24 = vld [vmem:[%s4822_s9 + $0x348] sm:$0xff]  }
 0x112   : > { %3708 = vmatpush3.bf16.msra.mxu1 %v3982_v25  ;;  %3681 = vmatprep.subr.bf16.mxu0 %v3986_v26  ;;  %v4056_v25 = vld [vmem:[%s4822_s9 + $0x3c8] sm:$0xff]  }
 0x113   : > { %3709 = vmatprep.subr.bf16.mxu1 %v3987_v27  ;;  %v4057_v26 = vld [vmem:[%s4822_s9 + $0x308] sm:$0xff]  }
 0x114   : > { %v4058_v27 = vld [vmem:[%s4822_s9 + $0x388] sm:$0xff]  }
 0x115   : > { %3682 = vmatpush3.bf16.msra.mxu0 %v3990_v29  ;;  %v4061_v29 = vld [vmem:[%s5098_s0 + $0xb0] ss:$72 sps:$4 sm:$0xff]  }
 0x116   : > { %3710 = vmatpush3.bf16.msra.mxu1 %v3991_v30  ;;  %3683 = vmatprep.subr.bf16.mxu0 %v3993_v32  ;;  %v4062_v30 = vld [vmem:[%s4822_s9 + $0x350] sm:$0xff]   ;;  %v4064_v32 = vld [vmem:[%s5098_s0 + $0xbc] ss:$72 sps:$4 sm:$0xff]  }
 0x117   : > { %3711 = vmatprep.subr.bf16.mxu1 %v3994_v33  ;;  %v4066_v33 = vld [vmem:[%s4822_s9 + $0x310] sm:$0xff]  }
 0x119   : > { %3684 = vmatpush3.bf16.msra.mxu0 %v3995_v34  ;;  %v4067_v34 = vld [vmem:[%s4822_s9 + $0x390] sm:$0xff]  }
 0x11a   : > { %3712 = vmatpush3.bf16.msra.mxu1 %v3996_v35  ;;  %3685 = vmatprep.subr.bf16.mxu0 %v3997_v36  ;;  %v4068_v35 = vld [vmem:[%s5098_s0 + $0xb8] ss:$72 sps:$4 sm:$0xff]  }
 0x11b   : > { %3713 = vmatprep.subr.bf16.mxu1 %v3998_v37  ;;  %v4069_v36 = vld [vmem:[%s4822_s9 + $0x358] sm:$0xff]  }
 0x11c   : > { %v4070_v37 = vld [vmem:[%s4822_s9 + $0x3d8] sm:$0xff]  }
 0x11d   : > { %3686 = vmatpush3.bf16.msra.mxu0 %v3999_v38  ;;  %v4071_v38 = vld [vmem:[%s4822_s9 + $0x318] sm:$0xff]  }
 0x11e   : > { %3714 = vmatpush3.bf16.msra.mxu1 %v4000_v39  ;;  %3727 = vmatprep.subr.bf16.mxu0 %v4007_v44  ;;  %v4072_v39 = vld [vmem:[%s4822_s9 + $0x398] sm:$0xff]   ;;  %v4077_v44 = vld [vmem:[%s4822_s9 + $0x368] sm:$0xff]  }
 0x11f   : > { %3755 = vmatprep.subr.bf16.mxu1 %v4008_v45  ;;  %v4078_v45 = vld [vmem:[%s4822_s9 + $0x3e8] sm:$0xff]  }
 0x120   : > { %2915 = vmatmul.mubr.bf16.vlgmr.msra.gmra.mrb[8].mxu0 %v4001_v40  ;;  %v4073_v40 = vld [vmem:[%s4822_s9 + $0x360] sm:$0xff]  }
 0x121   : > { %2964 = vmatmul.mubr.bf16.vlgmr.msra.gmra.mrb[8].mxu1 %v4004_v42  ;;  %3728 = vmatpush3.bf16.msra.mxu0 %v4009_v46  ;;  %v4075_v42 = vld [vmem:[%s4822_s9 + $0x320] sm:$0xff]   ;;  %v4079_v46 = vld [vmem:[%s4822_s9 + $0x328] sm:$0xff]  }
 0x122   : > { %3756 = vmatpush3.bf16.msra.mxu1 %v4010_v47  ;;  %3729 = vmatprep.subr.bf16.mxu0 %v4011_v48  ;;  %v4080_v47 = vld [vmem:[%s4822_s9 + $0x3a8] sm:$0xff]   ;;  %v4081_v48 = vld [vmem:[%s4822_s9 + $0x370] sm:$0xff]  }
 0x123   : > { %3757 = vmatprep.subr.bf16.mxu1 %v4012_v49  ;;  %2922 = vmatprep.mubr.bf16.mxu0 %v4015_v52  ;;  %v4082_v49 = vld [vmem:[%s4822_s9 + $0x3f0] sm:$0xff]   ;;  %v4085_v52 = vld [vmem:[%s4822_s9 + $0x378] sm:$0xff]  }
 0x124   : > { %2971 = vmatprep.mubr.bf16.mxu1 %v4020_v56  ;;  %v4089_v56 = vld [vmem:[%s5098_s0 + $0x30] ss:$72 sps:$4 sm:$0xff]  }
 0x125   : > { %3730 = vmatpush3.bf16.msra.mxu0 %v4013_v50  ;;  %v4083_v50 = vld [vmem:[%s4822_s9 + $0x330] sm:$0xff]  }
 0x126   : > { %3758 = vmatpush3.bf16.msra.mxu1 %v4014_v51  ;;  %3731 = vmatprep.subr.bf16.mxu0 %v4018_v54  ;;  %v4084_v51 = vld [vmem:[%s4822_s9 + $0x3b0] sm:$0xff]   ;;  %v4087_v54 = vld [vmem:[%s4822_s9 + $0x338] sm:$0xff]  }
 0x127   : > { %3759 = vmatprep.subr.bf16.mxu1 %v4019_v55  ;;  %v4088_v55 = vld [vmem:[%s4822_s9 + $0x3b8] sm:$0xff]  }
 0x128   : > { %2923 = vmatmul.mubr.bf16.gmra.mrb[12].mxu0 %v4017_v53  ;;  %v4086_v53 = vld [vmem:[%s4822_s9 + $0x3f8] sm:$0xff]  }
 0x129   : > { %3732 = vmatpush3.bf16.msra.mxu0 %v4022_v57  ;;  %2972 = vmatmul.mubr.bf16.gmra.mrb[12].mxu1 %v4024_v59  ;;  %v4091_v57 = vld [vmem:[%s5098_s0 + $0x34] ss:$72 sps:$4 sm:$0xff]  }
 0x12a   : > { %3760 = vmatpush3.bf16.msra.mxu1 %v4023_v58  ;;  %3733 = vmatprep.subr.bf16.mxu0 %v4025_v60  ;;  %v4092_v58 = vld [vmem:[%s5098_s0 + $0x38] ss:$72 sps:$4 sm:$0xff]   ;;  %v4094_v59 = vld [vmem:[%s5098_s0 + $0x3c] ss:$72 sps:$4 sm:$0xff]  }
 0x12b   : > { %3761 = vmatprep.subr.bf16.mxu1 %v4026_v61  ;;  %3012 = vmatprep.mubr.bf16.mxu0 %v4047_v17  ;;  %v4095_v60 = vld [vmem:[%s4822_s9 + $0x440] sm:$0xff]   ;;  %v4116_v17 = vld [vmem:[%s4822_s9 + $0x438] sm:$0xff]  }
 0x12c   : > { %3061 = vmatprep.mubr.bf16.mxu1 %v4050_v19  ;;  %v4096_v61 = vld [vmem:[%s4822_s9 + $0x400] sm:$0xff]   ;;  %v4120_v19 = vld [vmem:[%s5098_s0 + $0xd0] ss:$72 sps:$4 sm:$0xff]  }
 0x12d   : > { %3734 = vmatpush3.bf16.msra.mxu0 %v4027_v62  ;;  %v4097_v62 = vld [vmem:[%s4822_s9 + $0x448] sm:$0xff]  }
 0x12e   : > { %3762 = vmatpush3.bf16.msra.mxu1 %v4028_v63  ;;  %3735 = vmatprep.subr.bf16.mxu0 %v4029_v0  ;;  %v4098_v63 = vld [vmem:[%s4822_s9 + $0x408] sm:$0xff]  }
 0x12f   : > { %3763 = vmatprep.subr.bf16.mxu1 %v4030_v1  ;;  %v4099_v0 = vld [vmem:[%s5098_s0 + $0xc4] ss:$72 sps:$4 sm:$0xff]   ;;  %v4101_v1 = vld [vmem:[%s5098_s0 + $0xc0] ss:$72 sps:$4 sm:$0xff]  }
 0x131   : > { %3736 = vmatpush3.bf16.msra.mxu0 %v4031_v2  ;;  %v4102_v2 = vld [vmem:[%s4822_s9 + $0x450] sm:$0xff]  }
 0x132   : > { %3764 = vmatpush3.bf16.msra.mxu1 %v4032_v3  ;;  %3737 = vmatprep.subr.bf16.mxu0 %v4033_v4  ;;  %v4103_v3 = vld [vmem:[%s5098_s0 + $0xcc] ss:$72 sps:$4 sm:$0xff]  }
 0x133   : > { %3765 = vmatprep.subr.bf16.mxu1 %v4034_v5  ;;  %v4105_v4 = vld [vmem:[%s4822_s9 + $0x410] sm:$0xff]  }
 0x134   : > { %v4106_v5 = vld [vmem:[%s5098_s0 + $0xc8] ss:$72 sps:$4 sm:$0xff]  }
 0x135   : > { %3738 = vmatpush3.bf16.msra.mxu0 %v4035_v6  ;;  %v4107_v6 = vld [vmem:[%s4822_s9 + $0x458] sm:$0xff]  }
 0x136   : > { %3766 = vmatpush3.bf16.msra.mxu1 %v4036_v7  ;;  %3739 = vmatprep.subr.bf16.mxu0 %v4037_v8  ;;  %v4108_v7 = vld [vmem:[%s4822_s9 + $0x418] sm:$0xff]   ;;  %v4109_v8 = vld [vmem:[%s4822_s9 + $0x460] sm:$0xff]  }
 0x137   : > { %3767 = vmatprep.subr.bf16.mxu1 %v4038_v9  ;;  %v4110_v9 = vld [vmem:[%s4822_s9 + $0x420] sm:$0xff]  }
 0x139   : > { %3740 = vmatpush3.bf16.msra.mxu0 %v4039_v10  ;;  %v4111_v10 = vld [vmem:[%s4822_s9 + $0x468] sm:$0xff]  }
 0x13a   : > { %3768 = vmatpush3.bf16.msra.mxu1 %v4040_v11  ;;  %3741 = vmatprep.subr.bf16.mxu0 %v4041_v12  ;;  %v4112_v11 = vld [vmem:[%s4822_s9 + $0x428] sm:$0xff]  }
 0x13b   : > { %3769 = vmatprep.subr.bf16.mxu1 %v4042_v13  ;;  %v4119_v12 = vld [vmem:[%s5098_s0 + $0x44] ss:$72 sps:$4 sm:$0xff]   ;;  %v4113_v13 = vld [vmem:[%s4822_s9 + $0x470] sm:$0xff]  }
 0x13d   : > { %3742 = vmatpush3.bf16.msra.mxu0 %v4043_v14  ;;  %v4122_v14 = vld [vmem:[%s5098_s0 + $0xd4] ss:$72 sps:$4 sm:$0xff]  }
 0x13e   : > { %3770 = vmatpush3.bf16.msra.mxu1 %v4044_v15  ;;  %3783 = vmatprep.subr.bf16.mxu0 %v4051_v20  ;;  %v4114_v15 = vld [vmem:[%s4822_s9 + $0x430] sm:$0xff]  }
 0x13f   : > { %3811 = vmatprep.subr.bf16.mxu1 %v4052_v21 }
 0x140   : > { %3013 = vmatmul.mubr.bf16.vlgmr.msra.gmra.mrb[16].mxu0 %v4045_v16  ;;  %v4115_v16 = vld [vmem:[%s4822_s9 + $0x478] sm:$0xff]   ;;  %s1406_s9 = scalar_lea.vmem %s5100_s2, %s1405_s10 }
 0x141   : > { %3062 = vmatmul.mubr.bf16.vlgmr.msra.gmra.mrb[16].mxu1 %v4048_v18  ;;  %3784 = vmatpush3.bf16.msra.mxu0 %v4053_v22  ;;  %v4117_v18 = vld [vmem:[%s5098_s0 + $0x40] ss:$72 sps:$4 sm:$0xff]  }
 0x142   : > { %3812 = vmatpush3.bf16.msra.mxu1 %v4054_v23  ;;  %3785 = vmatprep.subr.bf16.mxu0 %v4055_v24  ;;  %v3411_v22 = vld [vmem:[%s1406_s9] ss:$0 sm:$0xff] }
 0x143   : > { %3813 = vmatprep.subr.bf16.mxu1 %v4056_v25  ;;  %3020 = vmatprep.mubr.bf16.mxu0 %v4059_v28 }
 0x144   : > { %3069 = vmatprep.mubr.bf16.mxu1 %v4064_v32 }
 0x145   : > { %3786 = vmatpush3.bf16.msra.mxu0 %v4057_v26 }
 0x146   : > { %3814 = vmatpush3.bf16.msra.mxu1 %v4058_v27  ;;  %3787 = vmatprep.subr.bf16.mxu0 %v4062_v30 }
 0x147   : > { %3815 = vmatprep.subr.bf16.mxu1 %v4063_v31 }
 0x148   : > { %3021 = vmatmul.mubr.bf16.gmra.mrb[20].mxu0 %v4061_v29 }
 0x149   : > { %3788 = vmatpush3.bf16.msra.mxu0 %v4066_v33  ;;  %3070 = vmatmul.mubr.bf16.gmra.mrb[20].mxu1 %v4068_v35 }
 0x14a   : > { %3816 = vmatpush3.bf16.msra.mxu1 %v4067_v34  ;;  %3789 = vmatprep.subr.bf16.mxu0 %v4069_v36 }
 0x14b   : > { %3817 = vmatprep.subr.bf16.mxu1 %v4070_v37  ;;  %3110 = vmatprep.mubr.bf16.mxu0 %v4091_v57 }
 0x14c   : > { %3159 = vmatprep.mubr.bf16.mxu1 %v4094_v59 }
 0x14d   : > { %3790 = vmatpush3.bf16.msra.mxu0 %v4071_v38 }
 0x14e   : > { %3818 = vmatpush3.bf16.msra.mxu1 %v4072_v39  ;;  %3791 = vmatprep.subr.bf16.mxu0 %v4073_v40 }
 0x14f   : > { %3819 = vmatprep.subr.bf16.mxu1 %v4074_v41 }
 0x151   : > { %3792 = vmatpush3.bf16.msra.mxu0 %v4075_v42 }
 0x152   : > { %3820 = vmatpush3.bf16.msra.mxu1 %v4076_v43  ;;  %3793 = vmatprep.subr.bf16.mxu0 %v4077_v44 }
 0x153   : > { %3821 = vmatprep.subr.bf16.mxu1 %v4078_v45 }
 0x155   : > { %3794 = vmatpush3.bf16.msra.mxu0 %v4079_v46 }
 0x156   : > { %3822 = vmatpush3.bf16.msra.mxu1 %v4080_v47  ;;  %3795 = vmatprep.subr.bf16.mxu0 %v4081_v48 }
 0x157   : > { %3823 = vmatprep.subr.bf16.mxu1 %v4082_v49 }
 0x159   : > { %3796 = vmatpush3.bf16.msra.mxu0 %v4083_v50 }
 0x15a   : > { %3824 = vmatpush3.bf16.msra.mxu1 %v4084_v51  ;;  %3797 = vmatprep.subr.bf16.mxu0 %v4085_v52 }
 0x15b   : > { %3825 = vmatprep.subr.bf16.mxu1 %v4086_v53 }
 0x15d   : > { %3798 = vmatpush3.bf16.msra.mxu0 %v4087_v54 }
 0x15e   : > { %3826 = vmatpush3.bf16.msra.mxu1 %v4088_v55  ;;  %3839 = vmatprep.subr.bf16.mxu0 %v4095_v60 }
 0x15f   : > { %3867 = vmatprep.subr.bf16.mxu1 %v4095_v60 }
 0x160   : > { %3111 = vmatmul.mubr.bf16.vlgmr.msra.gmra.mrb[24].mxu0 %v4089_v56 }
 0x161   : > { %3160 = vmatmul.mubr.bf16.vlgmr.msra.gmra.mrb[24].mxu1 %v4092_v58  ;;  %3840 = vmatpush3.bf16.msra.mxu0 %v4096_v61 }
 0x162   : > { %3875 = vmatpush3.bf16.msra.mxu1 %v4096_v61  ;;  %3841 = vmatprep.subr.bf16.mxu0 %v4097_v62 }
 0x163   : > { %3868 = vmatprep.subr.bf16.mxu1 %v4097_v62  ;;  %3118 = vmatprep.mubr.bf16.mxu0 %v4099_v0 }
 0x164   : > { %3167 = vmatprep.mubr.bf16.mxu1 %v4103_v3 }
 0x165   : > { %3842 = vmatpush3.bf16.msra.mxu0 %v4098_v63 }
 0x166   : > { %3876 = vmatpush3.bf16.msra.mxu1 %v4098_v63  ;;  %3843 = vmatprep.subr.bf16.mxu0 %v4102_v2 }
 0x167   : > { %3869 = vmatprep.subr.bf16.mxu1 %v4102_v2 }
 0x168   : > { %3119 = vmatmul.mubr.bf16.gmra.mrb[28].mxu0 %v4101_v1 }
 0x169   : > { %3844 = vmatpush3.bf16.msra.mxu0 %v4105_v4  ;;  %3168 = vmatmul.mubr.bf16.gmra.mrb[28].mxu1 %v4106_v5 }
 0x16a   : > { %3877 = vmatpush3.bf16.msra.mxu1 %v4105_v4  ;;  %3845 = vmatprep.subr.bf16.mxu0 %v4107_v6 }
 0x16b   : > { %3870 = vmatprep.subr.bf16.mxu1 %v4107_v6  ;;  %3208 = vmatprep.mubr.bf16.mxu0 %v4119_v12 }
 0x16c   : > { %3216 = vmatprep.mubr.bf16.mxu1 %v4122_v14 }
 0x16d   : > { %3846 = vmatpush3.bf16.msra.mxu0 %v4108_v7 }
 0x16e   : > { %3878 = vmatpush3.bf16.msra.mxu1 %v4108_v7  ;;  %3847 = vmatprep.subr.bf16.mxu0 %v4109_v8 }
 0x16f   : > { %3871 = vmatprep.subr.bf16.mxu1 %v4109_v8 }
 0x171   : > { %3848 = vmatpush3.bf16.msra.mxu0 %v4110_v9 }
 0x172   : > { %3879 = vmatpush3.bf16.msra.mxu1 %v4110_v9  ;;  %3849 = vmatprep.subr.bf16.mxu0 %v4111_v10 }
 0x173   : > { %3872 = vmatprep.subr.bf16.mxu1 %v4111_v10 }
 0x175   : > { %3850 = vmatpush3.bf16.msra.mxu0 %v4112_v11 }
 0x176   : > { %3880 = vmatpush3.bf16.msra.mxu1 %v4112_v11  ;;  %3851 = vmatprep.subr.bf16.mxu0 %v4113_v13 }
 0x177   : > { %3873 = vmatprep.subr.bf16.mxu1 %v4113_v13 }
 0x179   : > { %3852 = vmatpush3.bf16.msra.mxu0 %v4114_v15 }
 0x17a   : > { %3881 = vmatpush3.bf16.msra.mxu1 %v4114_v15  ;;  %3853 = vmatprep.subr.bf16.mxu0 %v4115_v16 }
 0x17b   : > { %3874 = vmatprep.subr.bf16.mxu1 %v4115_v16 }
 0x17d   : > { %3854 = vmatpush3.bf16.msra.mxu0 %v4116_v17 }
 0x17e   : > { %3882 = vmatpush3.bf16.msra.mxu1 %v4116_v17 }
 0x180   : > { %3209 = vmatmul.mubr.bf16.vlgmr.msra.gmra.mrb[32].mxu0 %v4117_v18 }
 0x181   : > { %3217 = vmatmul.mubr.bf16.vlgmr.msra.gmra.mrb[32].mxu1 %v4120_v19 }
 0x1d3   : > { %v3631_v20 = vpop.f32.mrb[0].mxu0 }
 0x1d4   : > { %v3659_v21 = vpop.f32.mrb[0].mxu1  ;;  %v3632_v23 = vpop.f32.mrb[1].mxu0 }
 0x1d5   : > { %v3633_v24 = vadd.f32 %v3632_v23, %v3631_v20  ;;  %v3660_v25 = vpop.f32.mrb[1].mxu1  ;;  %v3634_v26 = vpop.f32.mrb[2].mxu0 }
 0x1d6   : > { %v3661_v27 = vadd.f32 %v3660_v25, %v3659_v21  ;;  %v3662_v28 = vpop.f32.mrb[2].mxu1  ;;  %v3635_v29 = vpop.f32.mrb[3].mxu0 }
 0x1d7   : > { %v2819_v30 = vadd.f32 %v3633_v24, %v3411_v22  ;;  %v3636_v31 = vadd.f32 %v3635_v29, %v3634_v26  ;;  %v3663_v32 = vpop.f32.mrb[3].mxu1 }
 0x1d8   : > { %v3664_v33 = vadd.f32 %v3663_v32, %v3662_v28 }
 0x1d9   : > { %v2868_v34 = vadd.f32 %v3661_v27, %v2819_v30  ;;  %v2822_v35 = vadd.f32 %v3636_v31, %v3411_v22 }
 0x1db   : > { %v2871_v36 = vadd.f32 %v3664_v33, %v2822_v35  ;;  %v3637_v37 = vpop.f32.mrb[4].mxu0 }
 0x1dc   : > { %v3638_v38 = vpop.f32.mrb[5].mxu0  ;;  %v3665_v44 = vpop.f32.mrb[4].mxu1 }
 0x1dd   : > { %v3639_v39 = vadd.f32 %v3638_v38, %v3637_v37  ;;  %v3640_v40 = vpop.f32.mrb[6].mxu0  ;;  %v3666_v45 = vpop.f32.mrb[5].mxu1 }
 0x1de   : > { %v3641_v41 = vpop.f32.mrb[7].mxu0  ;;  %v3667_v47 = vadd.f32 %v3666_v45, %v3665_v44  ;;  %v3668_v48 = vpop.f32.mrb[6].mxu1 }
 0x1df   : > { %v3642_v42 = vadd.f32 %v3641_v41, %v3640_v40  ;;  %v2827_v43 = vadd.f32 %v3639_v39, %v3411_v22  ;;  %v3669_v49 = vpop.f32.mrb[7].mxu1 }
 0x1e0   : > { %v3670_v51 = vadd.f32 %v3669_v49, %v3668_v48 }
 0x1e1   : > { %v2830_v46 = vadd.f32 %v3642_v42, %v3411_v22  ;;  %v2876_v50 = vadd.f32 %v3667_v47, %v2827_v43 }
 0x1e3   : > { %v2879_v52 = vadd.f32 %v3670_v51, %v2830_v46 }
 0x1f3   : > { %v3687_v53 = vpop.f32.mrb[8].mxu0 }
 0x1f4   : > { %v3715_v54 = vpop.f32.mrb[8].mxu1  ;;  %v3688_v55 = vpop.f32.mrb[9].mxu0 }
 0x1f5   : > { %v3689_v56 = vadd.f32 %v3688_v55, %v3687_v53  ;;  %v3716_v57 = vpop.f32.mrb[9].mxu1  ;;  %v3690_v58 = vpop.f32.mrb[10].mxu0 }
 0x1f6   : > { %v3717_v59 = vadd.f32 %v3716_v57, %v3715_v54  ;;  %v3718_v60 = vpop.f32.mrb[10].mxu1  ;;  %v3691_v61 = vpop.f32.mrb[11].mxu0 }
 0x1f7   : > { %v2917_v62 = vadd.f32 %v3689_v56, %v2868_v34  ;;  %v3692_v63 = vadd.f32 %v3691_v61, %v3690_v58  ;;  %v3719_v0 = vpop.f32.mrb[11].mxu1 }
 0x1f8   : > { %v3720_v1 = vadd.f32 %v3719_v0, %v3718_v60 }
 0x1f9   : > { %v2966_v2 = vadd.f32 %v3717_v59, %v2917_v62  ;;  %v2920_v3 = vadd.f32 %v3692_v63, %v2871_v36 }
 0x1fb   : > { %v2969_v4 = vadd.f32 %v3720_v1, %v2920_v3  ;;  %v3693_v5 = vpop.f32.mrb[12].mxu0 }
 0x1fc   : > { %v3694_v6 = vpop.f32.mrb[13].mxu0  ;;  %v3721_v12 = vpop.f32.mrb[12].mxu1 }
 0x1fd   : > { %v3695_v7 = vadd.f32 %v3694_v6, %v3693_v5  ;;  %v3696_v8 = vpop.f32.mrb[14].mxu0  ;;  %v3722_v14 = vpop.f32.mrb[13].mxu1 }
 0x1fe   : > { %v3697_v9 = vpop.f32.mrb[15].mxu0  ;;  %v3723_v15 = vadd.f32 %v3722_v14, %v3721_v12  ;;  %v3724_v16 = vpop.f32.mrb[14].mxu1 }
 0x1ff   : > { %v2925_v10 = vadd.f32 %v3695_v7, %v2876_v50  ;;  %v3698_v11 = vadd.f32 %v3697_v9, %v3696_v8  ;;  %v3725_v17 = vpop.f32.mrb[15].mxu1 }
 0x200   : > { %v3726_v19 = vadd.f32 %v3725_v17, %v3724_v16 }
 0x201   : > { %v2928_v13 = vadd.f32 %v3698_v11, %v2879_v52  ;;  %v2974_v18 = vadd.f32 %v3723_v15, %v2925_v10 }
 0x203   : > { %v2977_v20 = vadd.f32 %v3726_v19, %v2928_v13 }
 0x213   : > { %v3743_v21 = vpop.f32.mrb[16].mxu0 }
 0x214   : > { %v3744_v22 = vpop.f32.mrb[17].mxu0  ;;  %v3771_v23 = vpop.f32.mrb[16].mxu1 }
 0x215   : > { %v3745_v24 = vadd.f32 %v3744_v22, %v3743_v21  ;;  %v3746_v25 = vpop.f32.mrb[18].mxu0  ;;  %v3772_v26 = vpop.f32.mrb[17].mxu1 }
 0x216   : > { %v3747_v27 = vpop.f32.mrb[19].mxu0  ;;  %v3773_v29 = vadd.f32 %v3772_v26, %v3771_v23  ;;  %v3774_v30 = vpop.f32.mrb[18].mxu1 }
 0x217   : > { %v3015_v28 = vadd.f32 %v3745_v24, %v2966_v2  ;;  %v3748_v31 = vadd.f32 %v3747_v27, %v3746_v25  ;;  %v3775_v32 = vpop.f32.mrb[19].mxu1 }
 0x218   : > { %v3776_v35 = vadd.f32 %v3775_v32, %v3774_v30 }
 0x219   : > { %v3064_v33 = vadd.f32 %v3773_v29, %v3015_v28  ;;  %v3018_v34 = vadd.f32 %v3748_v31, %v2969_v4 }
 0x21b   : > { %v3067_v36 = vadd.f32 %v3776_v35, %v3018_v34  ;;  %v3749_v37 = vpop.f32.mrb[20].mxu0 }
 0x21c   : > { %v3750_v38 = vpop.f32.mrb[21].mxu0  ;;  %v3777_v44 = vpop.f32.mrb[20].mxu1 }
 0x21d   : > { %v3751_v39 = vadd.f32 %v3750_v38, %v3749_v37  ;;  %v3752_v40 = vpop.f32.mrb[22].mxu0  ;;  %v3778_v46 = vpop.f32.mrb[21].mxu1 }
 0x21e   : > { %v3753_v41 = vpop.f32.mrb[23].mxu0  ;;  %v3779_v47 = vadd.f32 %v3778_v46, %v3777_v44  ;;  %v3780_v48 = vpop.f32.mrb[22].mxu1 }
 0x21f   : > { %v3023_v42 = vadd.f32 %v3751_v39, %v2974_v18  ;;  %v3754_v43 = vadd.f32 %v3753_v41, %v3752_v40  ;;  %v3781_v49 = vpop.f32.mrb[23].mxu1 }
 0x220   : > { %v3782_v51 = vadd.f32 %v3781_v49, %v3780_v48 }
 0x221   : > { %v3026_v45 = vadd.f32 %v3754_v43, %v2977_v20  ;;  %v3072_v50 = vadd.f32 %v3779_v47, %v3023_v42 }
 0x223   : > { %v3075_v52 = vadd.f32 %v3782_v51, %v3026_v45 }
 0x233   : > { %v3799_v53 = vpop.f32.mrb[24].mxu0 }
 0x234   : > { %v3827_v54 = vpop.f32.mrb[24].mxu1  ;;  %v3800_v55 = vpop.f32.mrb[25].mxu0 }
 0x235   : > { %v3801_v56 = vadd.f32 %v3800_v55, %v3799_v53  ;;  %v3828_v57 = vpop.f32.mrb[25].mxu1  ;;  %v3802_v58 = vpop.f32.mrb[26].mxu0 }
 0x236   : > { %v3829_v59 = vadd.f32 %v3828_v57, %v3827_v54  ;;  %v3830_v60 = vpop.f32.mrb[26].mxu1  ;;  %v3803_v61 = vpop.f32.mrb[27].mxu0 }
 0x237   : > { %v3113_v62 = vadd.f32 %v3801_v56, %v3064_v33  ;;  %v3804_v63 = vadd.f32 %v3803_v61, %v3802_v58  ;;  %v3831_v0 = vpop.f32.mrb[27].mxu1 }
 0x238   : > { %v3832_v1 = vadd.f32 %v3831_v0, %v3830_v60 }
 0x239   : > { %v3162_v2 = vadd.f32 %v3829_v59, %v3113_v62  ;;  %v3116_v3 = vadd.f32 %v3804_v63, %v3067_v36 }
 0x23b   : > { %v3165_v4 = vadd.f32 %v3832_v1, %v3116_v3  ;;  %v3805_v5 = vpop.f32.mrb[28].mxu0 }
 0x23c   : > { %v3806_v6 = vpop.f32.mrb[29].mxu0  ;;  %v3833_v9 = vpop.f32.mrb[28].mxu1 }
 0x23d   : > { %v3807_v7 = vadd.f32 %v3806_v6, %v3805_v5  ;;  %v3808_v8 = vpop.f32.mrb[30].mxu0  ;;  %v3834_v11 = vpop.f32.mrb[29].mxu1 }
 0x23e   : > { %v3809_v10 = vpop.f32.mrb[31].mxu0  ;;  %v3835_v14 = vadd.f32 %v3834_v11, %v3833_v9  ;;  %v3836_v15 = vpop.f32.mrb[30].mxu1 }
 0x23f   : > { %v3121_v12 = vadd.f32 %v3807_v7, %v3072_v50  ;;  %v3810_v13 = vadd.f32 %v3809_v10, %v3808_v8  ;;  %v3837_v16 = vpop.f32.mrb[31].mxu1 }
 0x240   : > { %v3838_v19 = vadd.f32 %v3837_v16, %v3836_v15 }
 0x241   : > { %v3124_v17 = vadd.f32 %v3810_v13, %v3075_v52  ;;  %v3170_v18 = vadd.f32 %v3835_v14, %v3121_v12 }
 0x243   : > { %v3173_v20 = vadd.f32 %v3838_v19, %v3124_v17 }
 0x253   : > { %v3855_v21 = vpop.f32.mrb[32].mxu0 }
 0x254   : > { %v3861_v22 = vpop.f32.mrb[32].mxu1  ;;  %v3856_v23 = vpop.f32.mrb[33].mxu0 }
 0x255   : > { %v3857_v24 = vadd.f32 %v3856_v23, %v3855_v21  ;;  %v3862_v25 = vpop.f32.mrb[33].mxu1  ;;  %v3858_v26 = vpop.f32.mrb[34].mxu0 }
 0x256   : > { %v3863_v27 = vadd.f32 %v3862_v25, %v3861_v22  ;;  %v3864_v28 = vpop.f32.mrb[34].mxu1  ;;  %v3859_v29 = vpop.f32.mrb[35].mxu0 }
 0x257   : > { %v3211_v30 = vadd.f32 %v3857_v24, %v3162_v2  ;;  %v3860_v31 = vadd.f32 %v3859_v29, %v3858_v26  ;;  %v3865_v32 = vpop.f32.mrb[35].mxu1 }
 0x258   : > { %v3219_v33 = vadd.f32 %v3863_v27, %v3170_v18  ;;  %v3866_v34 = vadd.f32 %v3865_v32, %v3864_v28 }
 0x259   : > { %v3214_v35 = vadd.f32 %v3860_v31, %v3165_v4  ;;  %v3225_v37 = vmax.f32 %v3211_v30, 0.0 }
 0x25a   : > { %v3222_v36 = vadd.f32 %v3866_v34, %v3173_v20  ;;  %v3227_v39 = vmax.f32 %v3219_v33, 0.0  ;;  %3255 = sbr.rel (!%p4218_p6) target bundleno = 618 (0x26a), region = 77 }
 0x25b   : > { %v3226_v38 = vmax.f32 %v3214_v35, 0.0 }
 0x25c   : > { %v3228_v40 = vmax.f32 %v3222_v36, 0.0 }
 0x25d   : > { %v3607_v41 = vpack.c.bf16 %v3226_v38, %v3225_v37 }
 0x25e   : > { %v3612_v42 = vpack.c.bf16 %v3228_v40, %v3227_v39 }
 0x25f   : > { %3608 = vst [vmem:[%s1396_s20] sm:$0xff] %v3607_v41  }
 0x260   : > { %3614 = vst [vmem:[%s1396_s20 + $0x8] sm:$0xff] %v3612_v42  }
 0x266   : > { %v3276_v43 = vld [vmem:[%s1396_s20] sm:$0xf]  ;;  %v3278_v44 = vld [vmem:[%s1396_s20 + $0x4] sm:$0xf] }
 0x267   : > { %v3280_v45 = vld [vmem:[%s1396_s20 + $0x8] sm:$0xf]  ;;  %v3282_v46 = vld [vmem:[%s1396_s20 + $0xc] sm:$0xf]  ;;  %3277 = vst [vmem:[%s3260_s24] sm:$0xf] %v3276_v43 }
 0x268   : > { %3279 = vst [vmem:[%s3260_s24 + $0x8] sm:$0xf] %v3278_v44  ;;  %3281 = vst [vmem:[%s3260_s24 + $0x10] sm:$0xf] %v3280_v45 }
 0x269   : > { %3283 = vst [vmem:[%s3260_s24 + $0x18] sm:$0xf] %v3282_v46 }
 0x26a PF: > { %s13_s16 = sadd.s32 1, %s4161_s16   ;;  %s5103_s12 = smov %s4149_s13 }
 0x26b   : > { %p10_p12 = scmp.ge.s32.totalorder %s13_s16, 4   ;;  %s5104_s13 = smov %s4223_s22 }
 0x26c   : > { %s5105_s14 = smov %s4157_s15  ;;  %s5106_s15 = smov %s5108_s17 }
 0x26d   :  { %12 = sbr.rel (!%p10_p12) target bundleno = 3 (0x3), region = 155 }

</bundles_post_ra>
